<compile_context>
chip_gen: v6e
topology: v6e:2x2x1
jax: 0.10.0
libtpu: 0.0.40
codegen_flags: <defaults>
</compile_context>

<pallas_src>
import functools

import jax
import jax.numpy as jnp
from jax.experimental import pallas as pl
from jax.experimental.pallas import tpu as pltpu


# ----------------------------- Pallas kernels ------------------------------


def _matmul_leaky_kernel(x_ref, w_ref, o_ref):
    y = jnp.dot(x_ref[...], w_ref[...], preferred_element_type=jnp.float32)
    act = jnp.where(y > 0, y, 0.2 * y)
    o_ref[...] = act.astype(o_ref.dtype)


def _pick_row_tile(m, cap=1024):
    for t in (cap, 512, 256, 128, 64, 32, 16, 8):
        if t <= m and m % t == 0:
            return t
    return m


def pallas_matmul_leaky(x, w):
    """(M,K)bf16 @ (K,N)bf16 -> (M,N)bf16 with fused LeakyReLU(0.2)."""
    M, K = x.shape
    _, N = w.shape
    tm = _pick_row_tile(M)
    return pl.pallas_call(
        _matmul_leaky_kernel,
        out_shape=jax.ShapeDtypeStruct((M, N), jnp.bfloat16),
        grid_spec=pltpu.PrefetchScalarGridSpec(
            num_scalar_prefetch=0,
            grid=(M // tm,),
            in_specs=[
                pl.BlockSpec((tm, K), lambda i: (i, 0)),
                pl.BlockSpec((K, N), lambda i: (0, 0)),
            ],
            out_specs=pl.BlockSpec((tm, N), lambda i: (i, 0)),
        ),
        compiler_params=pltpu.CompilerParams(
            dimension_semantics=("parallel",)),
    )(x, w)


def _pick_k_tile(k, target=512):
    for t in (target, 512, 256, 128):
        if t < k and k % t == 0:
            return t
    return k


def _matmul_bn_leaky_kernel(x_ref, w_ref, o_ref, acc_ref, *, eps):
    k = pl.program_id(0)

    @pl.when(k == 0)
    def _():
        acc_ref[...] = jnp.zeros_like(acc_ref)

    acc_ref[...] += jnp.dot(x_ref[...], w_ref[...],
                            preferred_element_type=jnp.float32)

    @pl.when(k == pl.num_programs(0) - 1)
    def _():
        y = acc_ref[...]
        # Two-pass (mean-centered) batch statistics over N*H*W == axis 0.
        mean = jnp.mean(y, axis=0, keepdims=True)
        d = y - mean
        var = jnp.mean(d * d, axis=0, keepdims=True)
        yn = d * jax.lax.rsqrt(var + eps)
        act = jnp.where(yn > 0, yn, 0.2 * yn)
        o_ref[...] = act.astype(o_ref.dtype)


def pallas_matmul_bn_leaky(x, w, eps=1e-5):
    """Fused conv-matmul + BatchNorm2d(train, gamma=1, beta=0) + LeakyReLU.

    K is tiled across the grid so the dominant activation DMA pipelines under
    the MXU; the epilogue runs once on the resident f32 accumulator.
    """
    M, K = x.shape
    _, N = w.shape
    tk = _pick_k_tile(K, target=512)
    return pl.pallas_call(
        functools.partial(_matmul_bn_leaky_kernel, eps=eps),
        out_shape=jax.ShapeDtypeStruct((M, N), jnp.bfloat16),
        grid_spec=pltpu.PrefetchScalarGridSpec(
            num_scalar_prefetch=0,
            grid=(K // tk,),
            in_specs=[
                pl.BlockSpec((M, tk), lambda k: (0, k)),
                pl.BlockSpec((tk, N), lambda k: (k, 0)),
            ],
            out_specs=pl.BlockSpec((M, N), lambda k: (0, 0)),
            scratch_shapes=[pltpu.VMEM((M, N), jnp.float32)],
        ),
        compiler_params=pltpu.CompilerParams(
            dimension_semantics=("arbitrary",)),
    )(x, w)


def _conv4_head_kernel(x_ref, w4_ref, w5t_ref, p_ref, o_ref, acc_ref, *, eps):
    k = pl.program_id(0)

    @pl.when(k == 0)
    def _():
        acc_ref[...] = jnp.zeros_like(acc_ref)

    acc_ref[...] += jnp.dot(x_ref[...], w4_ref[...],
                            preferred_element_type=jnp.float32)

    @pl.when(k == pl.num_programs(0) - 1)
    def _():
        y = acc_ref[...]                                  # (batch*16, 512) f32
        mean = jnp.mean(y, axis=0, keepdims=True)
        d = y - mean
        var = jnp.mean(d * d, axis=0, keepdims=True)
        yn = d * jax.lax.rsqrt(var + eps)
        yn = jnp.where(yn > 0, yn, 0.2 * yn)
        # conv5 (512->1, 4x4, valid) == full contraction of each batch's
        # resident 16x512 slab: one VPU multiply against the pre-tiled filter,
        # then one tiny group-sum matmul (P is the per-batch indicator).
        prod = yn * w5t_ref[...]                          # (batch*16, 512)
        zb = jnp.dot(p_ref[...], prod,
                     preferred_element_type=jnp.float32)  # (batch, 512)
        z = jnp.sum(zb, axis=1, keepdims=True)            # (batch, 1)
        o_ref[...] = jax.nn.sigmoid(z)


def pallas_conv4_conv5_head(x, w4, w5_tiled, p, *, eps=1e-5):
    """conv4 + BN + LeakyReLU + conv5 + Sigmoid in one kernel -> (batch, 1)."""
    M, K = x.shape
    _, N = w4.shape
    B = p.shape[0]
    tk = _pick_k_tile(K, target=1024)
    return pl.pallas_call(
        functools.partial(_conv4_head_kernel, eps=eps),
        out_shape=jax.ShapeDtypeStruct((B, 1), jnp.float32),
        grid_spec=pltpu.PrefetchScalarGridSpec(
            num_scalar_prefetch=0,
            grid=(K // tk,),
            in_specs=[
                pl.BlockSpec((M, tk), lambda k: (0, k)),
                pl.BlockSpec((tk, N), lambda k: (k, 0)),
                pl.BlockSpec((M, N), lambda k: (0, 0)),
                pl.BlockSpec((B, M), lambda k: (0, 0)),
            ],
            out_specs=pl.BlockSpec((B, 1), lambda k: (0, 0)),
            scratch_shapes=[pltpu.VMEM((M, N), jnp.float32)],
        ),
        compiler_params=pltpu.CompilerParams(
            dimension_semantics=("arbitrary",)),
    )(x, w4, w5_tiled, p)


# ------------------------------ JAX glue code -------------------------------


def im2col(x_nhwc, ksize, stride, pad):
    """Extract conv patches. Returns (N*OH*OW, KH*KW*C) with (kh, kw, ci) order."""
    N, H, W, C = x_nhwc.shape
    OH = (H + 2 * pad - ksize) // stride + 1
    OW = (W + 2 * pad - ksize) // stride + 1
    xp = jnp.pad(x_nhwc, ((0, 0), (pad, pad), (pad, pad), (0, 0)))
    cols = []
    for kh in range(ksize):
        for kw in range(ksize):
            cols.append(
                xp[:, kh:kh + stride * OH:stride, kw:kw + stride * OW:stride, :])
    cols = jnp.stack(cols, axis=3)  # (N, OH, OW, KH*KW, C)
    return cols.reshape(N * OH * OW, ksize * ksize * C), (N, OH, OW)


def _weight_matrix(w_oihw):
    """PyTorch OIHW -> (KH*KW*I, O), matching the im2col (kh, kw, ci) order."""
    o, i, kh, kw = w_oihw.shape
    return jnp.transpose(w_oihw, (2, 3, 1, 0)).reshape(kh * kw * i, o)


def discriminator_forward(params, x_nchw, eps=1e-5):
    """Reproduces Discriminator.forward: NCHW in -> (N, 1, 1, 1) out."""
    x = jnp.transpose(x_nchw, (0, 2, 3, 1)).astype(jnp.float32)  # -> NHWC
    n = x.shape[0]

    # conv1 (3->64, 4, 2, 1) + LeakyReLU. Cin padded 3 -> 8 so a patch is 128
    # wide; two adjacent patches are packed per LHS row against a block-
    # diagonal weight so the kernel output is a lane-dense (M/2, 128) bf16
    # slab (same bytes as the (M, 64) activation, unmasked stores).
    xp = jnp.pad(x, ((0, 0), (0, 0), (0, 0), (0, 5)))
    w1 = jnp.pad(params["w1"], ((0, 0), (0, 5), (0, 0), (0, 0)))
    w1m = _weight_matrix(w1)                                    # (128, 64)
    w1big = jnp.zeros((256, 128), jnp.float32)
    w1big = w1big.at[:128, :64].set(w1m).at[128:, 64:].set(w1m)
    cols, (_, oh, ow) = im2col(xp.astype(jnp.bfloat16), 4, 2, 1)
    m = cols.shape[0]
    y = pallas_matmul_leaky(cols.reshape(m // 2, 256),
                            w1big.astype(jnp.bfloat16))
    x = y.reshape(n, oh, ow, 64)        # activations stay bf16 from here on

    # conv2, conv3: conv + BatchNorm(train) + LeakyReLU, K-tiled single launch.
    for wname in ("w2", "w3"):
        w = params[wname]
        cols, (_, oh, ow) = im2col(x, 4, 2, 1)
        y = pallas_matmul_bn_leaky(cols,
                                   _weight_matrix(w).astype(jnp.bfloat16),
                                   eps=eps)
        x = y.reshape(n, oh, ow, w.shape[0])

    # conv4 + BN + LeakyReLU + conv5 + Sigmoid, all fused into one kernel.
    cols, (_, oh, ow) = im2col(x, 4, 2, 1)
    assert (oh, ow) == (4, 4), "head fusion assumes 64x64 discriminator input"
    w4_mat = _weight_matrix(params["w4"]).astype(jnp.bfloat16)   # (4096, 512)
    w5_mat = _weight_matrix(params["w5"]).reshape(16, 512)       # f32
    w5_tiled = jnp.tile(w5_mat, (n, 1))                          # (n*16, 512)
    p = (jnp.arange(n * 16)[None, :] // 16
         == jnp.arange(n)[:, None]).astype(jnp.float32)          # (n, n*16)
    z = pallas_conv4_conv5_head(cols, w4_mat, w5_tiled, p, eps=eps)
    return z.reshape(n, 1, 1, 1)


def init_params(key):
    """Deterministic DCGAN-style init: N(0, 0.02), bias=False everywhere."""
    shapes = {
        "w1": (64, 3, 4, 4),
        "w2": (128, 64, 4, 4),
        "w3": (256, 128, 4, 4),
        "w4": (512, 256, 4, 4),
        "w5": (1, 512, 4, 4),
    }
    keys = jax.random.split(key, len(shapes))
    return {name: 0.02 * jax.random.normal(k, shp, jnp.float32)
            for k, (name, shp) in zip(keys, shapes.items())}


# --------------------------- pure-JAX reference -----------------------------


def _conv_ref(x, w, stride, pad):
    return jax.lax.conv_general_dilated(
        x, w, (stride, stride), ((pad, pad), (pad, pad)),
        dimension_numbers=("NCHW", "OIHW", "NCHW"))


def ref_forward(params, x):
    y = _conv_ref(x, params["w1"], 2, 1)
    y = jnp.where(y > 0, y, 0.2 * y)
    for wname in ("w2", "w3", "w4"):
        y = _conv_ref(y, params[wname], 2, 1)
        mean = y.mean(axis=(0, 2, 3), keepdims=True)
        var = ((y - mean) ** 2).mean(axis=(0, 2, 3), keepdims=True)
        y = (y - mean) * jax.lax.rsqrt(var + 1e-5)
        y = jnp.where(y > 0, y, 0.2 * y)
    y = _conv_ref(y, params["w5"], 1, 0)
    return jax.nn.sigmoid(y)


# ---------------------------------- main -------------------------------------

if __name__ == "__main__":
    key = jax.random.PRNGKey(0)
    k_params, k_x = jax.random.split(key)
    params = init_params(k_params)

    # DCGAN discriminator geometry requires 64x64 input (64->32->16->8->4->1).
    x = jax.random.normal(k_x, (2, 3, 64, 64), jnp.float32)

    fwd = jax.jit(discriminator_forward)
    out = jax.block_until_ready(fwd(params, x))
    assert out.shape == (2, 1, 1, 1), out.shape

    with jax.default_matmul_precision("highest"):
        ref = jax.block_until_ready(ref_forward(params, x))
    assert jnp.allclose(out, ref, atol=5e-2), (out, ref)

    print("KERNEL_OK")
</pallas_src>

<mosaic_0001>
module attributes {stable_mosaic.version = 11 : i64} {
  func.func @_matmul_leaky_kernel(%arg0: i32, %arg1: memref<1024x256xbf16, #tpu.memory_space<vmem>>, %arg2: memref<256x128xbf16, #tpu.memory_space<vmem>>, %arg3: memref<1024x128xbf16, #tpu.memory_space<vmem>>) attributes {dimension_semantics = [#tpu.dimension_semantics<parallel>], iteration_bounds = array<i64: 1>, scalar_prefetch = 0 : i64, scratch_operands = 0 : i64, tpu.core_type = #tpu.core_type<tc>, window_params = [{transform_indices = @transform_0, window_bounds = array<i64: 1024, 256>}, {pipeline_mode = #tpu.pipeline_mode<synchronous>, transform_indices = @transform_1, window_bounds = array<i64: 256, 128>}, {transform_indices = @transform_2, window_bounds = array<i64: 1024, 128>}]} {
    %c0 = arith.constant 0 : index
    %c0_0 = arith.constant 0 : index
    %0 = vector.load %arg1[%c0, %c0_0] : memref<1024x256xbf16, #tpu.memory_space<vmem>>, vector<1024x256xbf16>
    %c0_1 = arith.constant 0 : index
    %c0_2 = arith.constant 0 : index
    %1 = vector.load %arg2[%c0_1, %c0_2] : memref<256x128xbf16, #tpu.memory_space<vmem>>, vector<256x128xbf16>
    %cst = arith.constant dense<0.000000e+00> : vector<1024x128xf32>
    %2 = tpu.matmul %0, %1, %cst {dimension_numbers = #tpu.dot_dimension_numbers<[1], [0], [0], [1], [0, 0, 1, 1], [], []>} : vector<1024x256xbf16>, vector<256x128xbf16>, vector<1024x128xf32> -> vector<1024x128xf32>
    %cst_3 = arith.constant 0.000000e+00 : f32
    %3 = vector.broadcast %cst_3 : f32 to vector<1024x128xf32>
    %4 = arith.cmpf ogt, %2, %3 : vector<1024x128xf32>
    %cst_4 = arith.constant 2.000000e-01 : f32
    %5 = vector.broadcast %cst_4 : f32 to vector<1024x128xf32>
    %6 = arith.mulf %5, %2 : vector<1024x128xf32>
    %7 = arith.select %4, %2, %6 : vector<1024x128xi1>, vector<1024x128xf32>
    %8 = arith.truncf %7 : vector<1024x128xf32> to vector<1024x128xbf16>
    %c0_5 = arith.constant 0 : index
    %c0_6 = arith.constant 0 : index
    %9 = vector.load %arg3[%c0_5, %c0_6] : memref<1024x128xbf16, #tpu.memory_space<vmem>>, vector<1024x128xbf16>
    tpu.vector_store %arg3[%c0_5, %c0_6], %8 {strides = array<i32>} : memref<1024x128xbf16, #tpu.memory_space<vmem>>, vector<1024x128xbf16>,
    return
  }
  func.func @transform_0(%arg0: i32) -> (i32, i32) {
    %c0_i32 = arith.constant 0 : i32
    %c0_i32_0 = arith.constant 0 : i32
    return %arg0, %c0_i32 : i32, i32
  }
  func.func @transform_1(%arg0: i32) -> (i32, i32) {
    %c0_i32 = arith.constant 0 : i32
    %c0_i32_0 = arith.constant 0 : i32
    %c0_i32_1 = arith.constant 0 : i32
    return %c0_i32, %c0_i32_0 : i32, i32
  }
  func.func @transform_2(%arg0: i32) -> (i32, i32) {
    %c0_i32 = arith.constant 0 : i32
    %c0_i32_0 = arith.constant 0 : i32
    return %arg0, %c0_i32 : i32, i32
  }
}

module attributes {stable_mosaic.version = 11 : i64} {
  func.func @_matmul_bn_leaky_kernel(%arg0: i32, %arg1: memref<512x512xbf16, #tpu.memory_space<vmem>>, %arg2: memref<512x128xbf16, #tpu.memory_space<vmem>>, %arg3: memref<512x128xbf16, #tpu.memory_space<vmem>>, %arg4: memref<512x128xf32, #tpu.memory_space<vmem>>) attributes {dimension_semantics = [#tpu.dimension_semantics<arbitrary>], iteration_bounds = array<i64: 2>, scalar_prefetch = 0 : i64, scratch_operands = 1 : i64, tpu.core_type = #tpu.core_type<tc>, window_params = [{transform_indices = @transform_0, window_bounds = array<i64: 512, 512>}, {transform_indices = @transform_1, window_bounds = array<i64: 512, 128>}, {pipeline_mode = #tpu.pipeline_mode<synchronous>, transform_indices = @transform_2, window_bounds = array<i64: 512, 128>}]} {
    %c0_i32 = arith.constant 0 : i32
    %0 = arith.cmpi eq, %arg0, %c0_i32 : i32
    %1 = arith.extui %0 : i1 to i32
    %c0_i32_0 = arith.constant 0 : i32
    %2 = arith.cmpi ne, %1, %c0_i32_0 : i32
    scf.if %2 {
      %cst_9 = arith.constant 0.000000e+00 : f32
      %12 = vector.broadcast %cst_9 : f32 to vector<512x128xf32>
      %c0_10 = arith.constant 0 : index
      %c0_11 = arith.constant 0 : index
      %13 = vector.load %arg4[%c0_10, %c0_11] : memref<512x128xf32, #tpu.memory_space<vmem>>, vector<512x128xf32>
      tpu.vector_store %arg4[%c0_10, %c0_11], %12 {strides = array<i32>} : memref<512x128xf32, #tpu.memory_space<vmem>>, vector<512x128xf32>,
    } else {
    }
    %c0 = arith.constant 0 : index
    %c0_1 = arith.constant 0 : index
    %3 = vector.load %arg4[%c0, %c0_1] : memref<512x128xf32, #tpu.memory_space<vmem>>, vector<512x128xf32>
    %c0_2 = arith.constant 0 : index
    %c0_3 = arith.constant 0 : index
    %4 = vector.load %arg1[%c0_2, %c0_3] : memref<512x512xbf16, #tpu.memory_space<vmem>>, vector<512x512xbf16>
    %c0_4 = arith.constant 0 : index
    %c0_5 = arith.constant 0 : index
    %5 = vector.load %arg2[%c0_4, %c0_5] : memref<512x128xbf16, #tpu.memory_space<vmem>>, vector<512x128xbf16>
    %cst = arith.constant dense<0.000000e+00> : vector<512x128xf32>
    %6 = tpu.matmul %4, %5, %cst {dimension_numbers = #tpu.dot_dimension_numbers<[1], [0], [0], [1], [0, 0, 1, 1], [], []>} : vector<512x512xbf16>, vector<512x128xbf16>, vector<512x128xf32> -> vector<512x128xf32>
    %7 = arith.addf %3, %6 : vector<512x128xf32>
    %c0_6 = arith.constant 0 : index
    %c0_7 = arith.constant 0 : index
    %8 = vector.load %arg4[%c0_6, %c0_7] : memref<512x128xf32, #tpu.memory_space<vmem>>, vector<512x128xf32>
    tpu.vector_store %arg4[%c0_6, %c0_7], %7 {strides = array<i32>} : memref<512x128xf32, #tpu.memory_space<vmem>>, vector<512x128xf32>,
    %c1_i32 = arith.constant 1 : i32
    %9 = arith.cmpi eq, %arg0, %c1_i32 : i32
    %10 = arith.extui %9 : i1 to i32
    %c0_i32_8 = arith.constant 0 : i32
    %11 = arith.cmpi ne, %10, %c0_i32_8 : i32
    scf.if %11 {
      %c0_9 = arith.constant 0 : index
      %c0_10 = arith.constant 0 : index
      %12 = vector.load %arg4[%c0_9, %c0_10] : memref<512x128xf32, #tpu.memory_space<vmem>>, vector<512x128xf32>
      %cst_11 = arith.constant dense<0.000000e+00> : vector<128xf32>
      %13 = vector.multi_reduction <add>, %12, %cst_11 [0] : vector<512x128xf32> to vector<128xf32>
      %14 = vector.shape_cast %13 : vector<128xf32> to vector<1x128xf32>
      %cst_12 = arith.constant 5.120000e+02 : f32
      %15 = vector.broadcast %cst_12 : f32 to vector<1x128xf32>
      %16 = arith.divf %14, %15 : vector<1x128xf32>
      %17 = vector.broadcast %16 : vector<1x128xf32> to vector<512x128xf32>
      %18 = arith.subf %12, %17 : vector<512x128xf32>
      %19 = arith.mulf %18, %18 : vector<512x128xf32>
      %cst_13 = arith.constant dense<0.000000e+00> : vector<128xf32>
      %20 = vector.multi_reduction <add>, %19, %cst_13 [0] : vector<512x128xf32> to vector<128xf32>
      %21 = vector.shape_cast %20 : vector<128xf32> to vector<1x128xf32>
      %cst_14 = arith.constant 5.120000e+02 : f32
      %22 = vector.broadcast %cst_14 : f32 to vector<1x128xf32>
      %23 = arith.divf %21, %22 : vector<1x128xf32>
      %cst_15 = arith.constant 9.99999974E-6 : f32
      %24 = vector.broadcast %cst_15 : f32 to vector<1x128xf32>
      %25 = arith.addf %23, %24 : vector<1x128xf32>
      %26 = math.rsqrt %25 : vector<1x128xf32>
      %27 = vector.broadcast %26 : vector<1x128xf32> to vector<512x128xf32>
      %28 = arith.mulf %18, %27 : vector<512x128xf32>
      %cst_16 = arith.constant 0.000000e+00 : f32
      %29 = vector.broadcast %cst_16 : f32 to vector<512x128xf32>
      %30 = arith.cmpf ogt, %28, %29 : vector<512x128xf32>
      %cst_17 = arith.constant 2.000000e-01 : f32
      %31 = vector.broadcast %cst_17 : f32 to vector<512x128xf32>
      %32 = arith.mulf %31, %28 : vector<512x128xf32>
      %33 = arith.select %30, %28, %32 : vector<512x128xi1>, vector<512x128xf32>
      %34 = arith.truncf %33 : vector<512x128xf32> to vector<512x128xbf16>
      %c0_18 = arith.constant 0 : index
      %c0_19 = arith.constant 0 : index
      %35 = vector.load %arg3[%c0_18, %c0_19] : memref<512x128xbf16, #tpu.memory_space<vmem>>, vector<512x128xbf16>
      tpu.vector_store %arg3[%c0_18, %c0_19], %34 {strides = array<i32>} : memref<512x128xbf16, #tpu.memory_space<vmem>>, vector<512x128xbf16>,
    } else {
    }
    return
  }
  func.func @transform_0(%arg0: i32) -> (i32, i32) {
    %c0_i32 = arith.constant 0 : i32
    %c0_i32_0 = arith.constant 0 : i32
    return %c0_i32, %arg0 : i32, i32
  }
  func.func @transform_1(%arg0: i32) -> (i32, i32) {
    %c0_i32 = arith.constant 0 : i32
    %c0_i32_0 = arith.constant 0 : i32
    return %arg0, %c0_i32 : i32, i32
  }
  func.func @transform_2(%arg0: i32) -> (i32, i32) {
    %c0_i32 = arith.constant 0 : i32
    %c0_i32_0 = arith.constant 0 : i32
    %c0_i32_1 = arith.constant 0 : i32
    return %c0_i32, %c0_i32_0 : i32, i32
  }
}

module attributes {stable_mosaic.version = 11 : i64} {
  func.func @_matmul_bn_leaky_kernel(%arg0: i32, %arg1: memref<128x512xbf16, #tpu.memory_space<vmem>>, %arg2: memref<512x256xbf16, #tpu.memory_space<vmem>>, %arg3: memref<128x256xbf16, #tpu.memory_space<vmem>>, %arg4: memref<128x256xf32, #tpu.memory_space<vmem>>) attributes {dimension_semantics = [#tpu.dimension_semantics<arbitrary>], iteration_bounds = array<i64: 4>, scalar_prefetch = 0 : i64, scratch_operands = 1 : i64, tpu.core_type = #tpu.core_type<tc>, window_params = [{transform_indices = @transform_0, window_bounds = array<i64: 128, 512>}, {transform_indices = @transform_1, window_bounds = array<i64: 512, 256>}, {pipeline_mode = #tpu.pipeline_mode<synchronous>, transform_indices = @transform_2, window_bounds = array<i64: 128, 256>}]} {
    %c0_i32 = arith.constant 0 : i32
    %0 = arith.cmpi eq, %arg0, %c0_i32 : i32
    %1 = arith.extui %0 : i1 to i32
    %c0_i32_0 = arith.constant 0 : i32
    %2 = arith.cmpi ne, %1, %c0_i32_0 : i32
    scf.if %2 {
      %cst_9 = arith.constant 0.000000e+00 : f32
      %12 = vector.broadcast %cst_9 : f32 to vector<128x256xf32>
      %c0_10 = arith.constant 0 : index
      %c0_11 = arith.constant 0 : index
      %13 = vector.load %arg4[%c0_10, %c0_11] : memref<128x256xf32, #tpu.memory_space<vmem>>, vector<128x256xf32>
      tpu.vector_store %arg4[%c0_10, %c0_11], %12 {strides = array<i32>} : memref<128x256xf32, #tpu.memory_space<vmem>>, vector<128x256xf32>,
    } else {
    }
    %c0 = arith.constant 0 : index
    %c0_1 = arith.constant 0 : index
    %3 = vector.load %arg4[%c0, %c0_1] : memref<128x256xf32, #tpu.memory_space<vmem>>, vector<128x256xf32>
    %c0_2 = arith.constant 0 : index
    %c0_3 = arith.constant 0 : index
    %4 = vector.load %arg1[%c0_2, %c0_3] : memref<128x512xbf16, #tpu.memory_space<vmem>>, vector<128x512xbf16>
    %c0_4 = arith.constant 0 : index
    %c0_5 = arith.constant 0 : index
    %5 = vector.load %arg2[%c0_4, %c0_5] : memref<512x256xbf16, #tpu.memory_space<vmem>>, vector<512x256xbf16>
    %cst = arith.constant dense<0.000000e+00> : vector<128x256xf32>
    %6 = tpu.matmul %4, %5, %cst {dimension_numbers = #tpu.dot_dimension_numbers<[1], [0], [0], [1], [0, 0, 1, 1], [], []>} : vector<128x512xbf16>, vector<512x256xbf16>, vector<128x256xf32> -> vector<128x256xf32>
    %7 = arith.addf %3, %6 : vector<128x256xf32>
    %c0_6 = arith.constant 0 : index
    %c0_7 = arith.constant 0 : index
    %8 = vector.load %arg4[%c0_6, %c0_7] : memref<128x256xf32, #tpu.memory_space<vmem>>, vector<128x256xf32>
    tpu.vector_store %arg4[%c0_6, %c0_7], %7 {strides = array<i32>} : memref<128x256xf32, #tpu.memory_space<vmem>>, vector<128x256xf32>,
    %c3_i32 = arith.constant 3 : i32
    %9 = arith.cmpi eq, %arg0, %c3_i32 : i32
    %10 = arith.extui %9 : i1 to i32
    %c0_i32_8 = arith.constant 0 : i32
    %11 = arith.cmpi ne, %10, %c0_i32_8 : i32
    scf.if %11 {
      %c0_9 = arith.constant 0 : index
      %c0_10 = arith.constant 0 : index
      %12 = vector.load %arg4[%c0_9, %c0_10] : memref<128x256xf32, #tpu.memory_space<vmem>>, vector<128x256xf32>
      %cst_11 = arith.constant dense<0.000000e+00> : vector<256xf32>
      %13 = vector.multi_reduction <add>, %12, %cst_11 [0] : vector<128x256xf32> to vector<256xf32>
      %14 = vector.shape_cast %13 : vector<256xf32> to vector<1x256xf32>
      %cst_12 = arith.constant 1.280000e+02 : f32
      %15 = vector.broadcast %cst_12 : f32 to vector<1x256xf32>
      %16 = arith.divf %14, %15 : vector<1x256xf32>
      %17 = vector.broadcast %16 : vector<1x256xf32> to vector<128x256xf32>
      %18 = arith.subf %12, %17 : vector<128x256xf32>
      %19 = arith.mulf %18, %18 : vector<128x256xf32>
      %cst_13 = arith.constant dense<0.000000e+00> : vector<256xf32>
      %20 = vector.multi_reduction <add>, %19, %cst_13 [0] : vector<128x256xf32> to vector<256xf32>
      %21 = vector.shape_cast %20 : vector<256xf32> to vector<1x256xf32>
      %cst_14 = arith.constant 1.280000e+02 : f32
      %22 = vector.broadcast %cst_14 : f32 to vector<1x256xf32>
      %23 = arith.divf %21, %22 : vector<1x256xf32>
      %cst_15 = arith.constant 9.99999974E-6 : f32
      %24 = vector.broadcast %cst_15 : f32 to vector<1x256xf32>
      %25 = arith.addf %23, %24 : vector<1x256xf32>
      %26 = math.rsqrt %25 : vector<1x256xf32>
      %27 = vector.broadcast %26 : vector<1x256xf32> to vector<128x256xf32>
      %28 = arith.mulf %18, %27 : vector<128x256xf32>
      %cst_16 = arith.constant 0.000000e+00 : f32
      %29 = vector.broadcast %cst_16 : f32 to vector<128x256xf32>
      %30 = arith.cmpf ogt, %28, %29 : vector<128x256xf32>
      %cst_17 = arith.constant 2.000000e-01 : f32
      %31 = vector.broadcast %cst_17 : f32 to vector<128x256xf32>
      %32 = arith.mulf %31, %28 : vector<128x256xf32>
      %33 = arith.select %30, %28, %32 : vector<128x256xi1>, vector<128x256xf32>
      %34 = arith.truncf %33 : vector<128x256xf32> to vector<128x256xbf16>
      %c0_18 = arith.constant 0 : index
      %c0_19 = arith.constant 0 : index
      %35 = vector.load %arg3[%c0_18, %c0_19] : memref<128x256xbf16, #tpu.memory_space<vmem>>, vector<128x256xbf16>
      tpu.vector_store %arg3[%c0_18, %c0_19], %34 {strides = array<i32>} : memref<128x256xbf16, #tpu.memory_space<vmem>>, vector<128x256xbf16>,
    } else {
    }
    return
  }
  func.func @transform_0(%arg0: i32) -> (i32, i32) {
    %c0_i32 = arith.constant 0 : i32
    %c0_i32_0 = arith.constant 0 : i32
    return %c0_i32, %arg0 : i32, i32
  }
  func.func @transform_1(%arg0: i32) -> (i32, i32) {
    %c0_i32 = arith.constant 0 : i32
    %c0_i32_0 = arith.constant 0 : i32
    return %arg0, %c0_i32 : i32, i32
  }
  func.func @transform_2(%arg0: i32) -> (i32, i32) {
    %c0_i32 = arith.constant 0 : i32
    %c0_i32_0 = arith.constant 0 : i32
    %c0_i32_1 = arith.constant 0 : i32
    return %c0_i32, %c0_i32_0 : i32, i32
  }
}

module attributes {stable_mosaic.version = 11 : i64} {
  func.func @_conv4_head_kernel(%arg0: i32, %arg1: memref<32x1024xbf16, #tpu.memory_space<vmem>>, %arg2: memref<1024x512xbf16, #tpu.memory_space<vmem>>, %arg3: memref<32x512xf32, #tpu.memory_space<vmem>>, %arg4: memref<2x32xf32, #tpu.memory_space<vmem>>, %arg5: memref<2x1xf32, #tpu.memory_space<vmem>>, %arg6: memref<32x512xf32, #tpu.memory_space<vmem>>) attributes {dimension_semantics = [#tpu.dimension_semantics<arbitrary>], iteration_bounds = array<i64: 4>, scalar_prefetch = 0 : i64, scratch_operands = 1 : i64, tpu.core_type = #tpu.core_type<tc>, window_params = [{transform_indices = @transform_0, window_bounds = array<i64: 32, 1024>}, {transform_indices = @transform_1, window_bounds = array<i64: 1024, 512>}, {pipeline_mode = #tpu.pipeline_mode<synchronous>, transform_indices = @transform_2, window_bounds = array<i64: 32, 512>}, {pipeline_mode = #tpu.pipeline_mode<synchronous>, transform_indices = @transform_3, window_bounds = array<i64: 2, 32>}, {pipeline_mode = #tpu.pipeline_mode<synchronous>, transform_indices = @transform_4, window_bounds = array<i64: 2, 1>}]} {
    %c0_i32 = arith.constant 0 : i32
    %0 = arith.cmpi eq, %arg0, %c0_i32 : i32
    %1 = arith.extui %0 : i1 to i32
    %c0_i32_0 = arith.constant 0 : i32
    %2 = arith.cmpi ne, %1, %c0_i32_0 : i32
    scf.if %2 {
      %cst_9 = arith.constant 0.000000e+00 : f32
      %12 = vector.broadcast %cst_9 : f32 to vector<32x512xf32>
      %c0_10 = arith.constant 0 : index
      %c0_11 = arith.constant 0 : index
      %13 = vector.load %arg6[%c0_10, %c0_11] : memref<32x512xf32, #tpu.memory_space<vmem>>, vector<32x512xf32>
      tpu.vector_store %arg6[%c0_10, %c0_11], %12 {strides = array<i32>} : memref<32x512xf32, #tpu.memory_space<vmem>>, vector<32x512xf32>,
    } else {
    }
    %c0 = arith.constant 0 : index
    %c0_1 = arith.constant 0 : index
    %3 = vector.load %arg6[%c0, %c0_1] : memref<32x512xf32, #tpu.memory_space<vmem>>, vector<32x512xf32>
    %c0_2 = arith.constant 0 : index
    %c0_3 = arith.constant 0 : index
    %4 = vector.load %arg1[%c0_2, %c0_3] : memref<32x1024xbf16, #tpu.memory_space<vmem>>, vector<32x1024xbf16>
    %c0_4 = arith.constant 0 : index
    %c0_5 = arith.constant 0 : index
    %5 = vector.load %arg2[%c0_4, %c0_5] : memref<1024x512xbf16, #tpu.memory_space<vmem>>, vector<1024x512xbf16>
    %cst = arith.constant dense<0.000000e+00> : vector<32x512xf32>
    %6 = tpu.matmul %4, %5, %cst {dimension_numbers = #tpu.dot_dimension_numbers<[1], [0], [0], [1], [0, 0, 1, 1], [], []>} : vector<32x1024xbf16>, vector<1024x512xbf16>, vector<32x512xf32> -> vector<32x512xf32>
    %7 = arith.addf %3, %6 : vector<32x512xf32>
    %c0_6 = arith.constant 0 : index
    %c0_7 = arith.constant 0 : index
    %8 = vector.load %arg6[%c0_6, %c0_7] : memref<32x512xf32, #tpu.memory_space<vmem>>, vector<32x512xf32>
    tpu.vector_store %arg6[%c0_6, %c0_7], %7 {strides = array<i32>} : memref<32x512xf32, #tpu.memory_space<vmem>>, vector<32x512xf32>,
    %c3_i32 = arith.constant 3 : i32
    %9 = arith.cmpi eq, %arg0, %c3_i32 : i32
    %10 = arith.extui %9 : i1 to i32
    %c0_i32_8 = arith.constant 0 : i32
    %11 = arith.cmpi ne, %10, %c0_i32_8 : i32
    scf.if %11 {
      %c0_9 = arith.constant 0 : index
      %c0_10 = arith.constant 0 : index
      %12 = vector.load %arg6[%c0_9, %c0_10] : memref<32x512xf32, #tpu.memory_space<vmem>>, vector<32x512xf32>
      %cst_11 = arith.constant dense<0.000000e+00> : vector<512xf32>
      %13 = vector.multi_reduction <add>, %12, %cst_11 [0] : vector<32x512xf32> to vector<512xf32>
      %14 = vector.shape_cast %13 : vector<512xf32> to vector<1x512xf32>
      %cst_12 = arith.constant 3.200000e+01 : f32
      %15 = vector.broadcast %cst_12 : f32 to vector<1x512xf32>
      %16 = arith.divf %14, %15 : vector<1x512xf32>
      %17 = vector.broadcast %16 : vector<1x512xf32> to vector<32x512xf32>
      %18 = arith.subf %12, %17 : vector<32x512xf32>
      %19 = arith.mulf %18, %18 : vector<32x512xf32>
      %cst_13 = arith.constant dense<0.000000e+00> : vector<512xf32>
      %20 = vector.multi_reduction <add>, %19, %cst_13 [0] : vector<32x512xf32> to vector<512xf32>
      %21 = vector.shape_cast %20 : vector<512xf32> to vector<1x512xf32>
      %cst_14 = arith.constant 3.200000e+01 : f32
      %22 = vector.broadcast %cst_14 : f32 to vector<1x512xf32>
      %23 = arith.divf %21, %22 : vector<1x512xf32>
      %cst_15 = arith.constant 9.99999974E-6 : f32
      %24 = vector.broadcast %cst_15 : f32 to vector<1x512xf32>
      %25 = arith.addf %23, %24 : vector<1x512xf32>
      %26 = math.rsqrt %25 : vector<1x512xf32>
      %27 = vector.broadcast %26 : vector<1x512xf32> to vector<32x512xf32>
      %28 = arith.mulf %18, %27 : vector<32x512xf32>
      %cst_16 = arith.constant 0.000000e+00 : f32
      %29 = vector.broadcast %cst_16 : f32 to vector<32x512xf32>
      %30 = arith.cmpf ogt, %28, %29 : vector<32x512xf32>
      %cst_17 = arith.constant 2.000000e-01 : f32
      %31 = vector.broadcast %cst_17 : f32 to vector<32x512xf32>
      %32 = arith.mulf %31, %28 : vector<32x512xf32>
      %33 = arith.select %30, %28, %32 : vector<32x512xi1>, vector<32x512xf32>
      %c0_18 = arith.constant 0 : index
      %c0_19 = arith.constant 0 : index
      %34 = vector.load %arg3[%c0_18, %c0_19] : memref<32x512xf32, #tpu.memory_space<vmem>>, vector<32x512xf32>
      %35 = arith.mulf %33, %34 : vector<32x512xf32>
      %c0_20 = arith.constant 0 : index
      %c0_21 = arith.constant 0 : index
      %36 = vector.load %arg4[%c0_20, %c0_21] : memref<2x32xf32, #tpu.memory_space<vmem>>, vector<2x32xf32>
      %cst_22 = arith.constant dense<0.000000e+00> : vector<2x512xf32>
      %37 = tpu.matmul %36, %35, %cst_22 {dimension_numbers = #tpu.dot_dimension_numbers<[1], [0], [0], [1], [0, 0, 1, 1], [], []>} : vector<2x32xf32>, vector<32x512xf32>, vector<2x512xf32> -> vector<2x512xf32>
      %cst_23 = arith.constant dense<0.000000e+00> : vector<2xf32>
      %38 = vector.multi_reduction <add>, %37, %cst_23 [1] : vector<2x512xf32> to vector<2xf32>
      %39 = vector.shape_cast %38 : vector<2xf32> to vector<2x1xf32>
      %40 = arith.negf %39 : vector<2x1xf32>
      %41 = math.exp %40 : vector<2x1xf32>
      %cst_24 = arith.constant 1.000000e+00 : f32
      %42 = vector.broadcast %cst_24 : f32 to vector<2x1xf32>
      %43 = arith.addf %42, %41 : vector<2x1xf32>
      %44 = arith.divf %42, %43 : vector<2x1xf32>
      %c0_25 = arith.constant 0 : index
      %c0_26 = arith.constant 0 : index
      %45 = vector.load %arg5[%c0_25, %c0_26] : memref<2x1xf32, #tpu.memory_space<vmem>>, vector<2x1xf32>
      tpu.vector_store %arg5[%c0_25, %c0_26], %44 {strides = array<i32>} : memref<2x1xf32, #tpu.memory_space<vmem>>, vector<2x1xf32>,
    } else {
    }
    return
  }
  func.func @transform_0(%arg0: i32) -> (i32, i32) {
    %c0_i32 = arith.constant 0 : i32
    %c0_i32_0 = arith.constant 0 : i32
    return %c0_i32, %arg0 : i32, i32
  }
  func.func @transform_1(%arg0: i32) -> (i32, i32) {
    %c0_i32 = arith.constant 0 : i32
    %c0_i32_0 = arith.constant 0 : i32
    return %arg0, %c0_i32 : i32, i32
  }
  func.func @transform_2(%arg0: i32) -> (i32, i32) {
    %c0_i32 = arith.constant 0 : i32
    %c0_i32_0 = arith.constant 0 : i32
    %c0_i32_1 = arith.constant 0 : i32
    return %c0_i32, %c0_i32_0 : i32, i32
  }
  func.func @transform_3(%arg0: i32) -> (i32, i32) {
    %c0_i32 = arith.constant 0 : i32
    %c0_i32_0 = arith.constant 0 : i32
    %c0_i32_1 = arith.constant 0 : i32
    return %c0_i32, %c0_i32_0 : i32, i32
  }
  func.func @transform_4(%arg0: i32) -> (i32, i32) {
    %c0_i32 = arith.constant 0 : i32
    %c0_i32_0 = arith.constant 0 : i32
    %c0_i32_1 = arith.constant 0 : i32
    return %c0_i32, %c0_i32_0 : i32, i32
  }
}

</mosaic_0001>

<bundles_post_ra>
// kernel: discriminator_forward.4
= control target key start
LH: loop header
LB: loop body
LE: loop exit
PB: predicated region body
PF: predicated region fallthrough
CT: control target
= control target key end

     0   :  { %v3505_v0 = vmov 0   ;;  %s4177_s1 = inlined_call_operand.vmem [shape: bf16[256,128], index: 1, kind: input, shape index: {}]   ;;  %s4178_s0 = inlined_call_operand.vmem [shape: bf16[1024,256], index: 0, kind: input, shape index: {}]   ;;  %s4179_s2 = inlined_call_operand.vmem [shape: bf16[1024,128], index: 2, kind: output, shape index: {}]  }
   0x1   :  { %908 = vmatprep.subr.bf16.mxu0 %v3505_v0  ;;  %3264 = vmatprep.subr.bf16.mxu1 %v3505_v0  ;;  %v3297_v1 = vld [vmem:[%s4177_s1 + $0x38] sm:$0xff]   ;;  %v3298_v2 = vld [vmem:[%s4177_s1 + $0x30] sm:$0xff]   ;;  %v3299_v3 = vld [vmem:[%s4177_s1 + $0x28] sm:$0xff]  }
   0x2   :  { %909 = vmatpush1.bf16.msra.mxu0 %v3297_v1  ;;  %3280 = vmatpush1.bf16.msra.mxu1 %v3297_v1  ;;  %v3300_v4 = vld [vmem:[%s4177_s1 + $0x20] sm:$0xff]   ;;  %v3301_v5 = vld [vmem:[%s4177_s1 + $0x18] sm:$0xff]   ;;  %v3302_v7 = vld [vmem:[%s4177_s1 + $0x10] sm:$0xff]  }
   0x3   :  { %910 = vmatprep.subr.bf16.mxu0 %v3505_v0  ;;  %3265 = vmatprep.subr.bf16.mxu1 %v3505_v0  ;;  %v3315_v6 = vld [vmem:[%s4178_s0 + $0x4] ss:$8 sps:$4 sm:$0xff]   ;;  %v3305_v11 = vld [vmem:[%s4177_s1 + $0x78] sm:$0xff]   ;;  %v3306_v12 = vld [vmem:[%s4177_s1 + $0x70] sm:$0xff]  }
   0x4   :  { %v3318_v8 = vld [vmem:[%s4178_s0 + $0x204] ss:$8 sps:$4 sm:$0xff]   ;;  %940 = vmatprep.mubr.bf16.mxu0 %v3315_v6  ;;  %v3309_v15 = vld [vmem:[%s4177_s1 + $0x58] sm:$0xff]   ;;  %v3310_v16 = vld [vmem:[%s4177_s1 + $0x50] sm:$0xff]  }
   0x5   :  { %1196 = vmatprep.mubr.bf16.mxu1 %v3318_v8  ;;  %v3303_v9 = vld [vmem:[%s4177_s1 + $0x8] sm:$0xff]   ;;  %v3304_v10 = vld [vmem:[%s4177_s1] sm:$0xff]   ;;  %v3319_v21 = vld [vmem:[%s4178_s0 + $0x14] ss:$8 sps:$4 sm:$0xff]  }
   0x6   :  { %911 = vmatpush1.bf16.msra.mxu0 %v3298_v2  ;;  %3281 = vmatpush1.bf16.msra.mxu1 %v3298_v2  ;;  %v3307_v13 = vld [vmem:[%s4177_s1 + $0x68] sm:$0xff]   ;;  %v3308_v14 = vld [vmem:[%s4177_s1 + $0x60] sm:$0xff]   ;;  %v3321_v22 = vld [vmem:[%s4178_s0 + $0x214] ss:$8 sps:$4 sm:$0xff]  }
   0x7   :  { %912 = vmatprep.subr.bf16.mxu0 %v3505_v0  ;;  %3266 = vmatprep.subr.bf16.mxu1 %v3505_v0  ;;  %v3311_v17 = vld [vmem:[%s4177_s1 + $0x48] sm:$0xff]   ;;  %v3312_v18 = vld [vmem:[%s4177_s1 + $0x40] sm:$0xff]   ;;  %v3323_v23 = vld [vmem:[%s4178_s0 + $0x10] ss:$8 sps:$4 sm:$0xff]  }
   0x8   :  { %v3313_v19 = vld [vmem:[%s4178_s0] ss:$8 sps:$4 sm:$0xff]   ;;  %v3324_v24 = vld [vmem:[%s4178_s0 + $0x210] ss:$8 sps:$4 sm:$0xff]   ;;  %v3325_v25 = vld [vmem:[%s4178_s0 + $0x24] ss:$8 sps:$4 sm:$0xff]  }
   0x9   :  { %v3316_v20 = vld [vmem:[%s4178_s0 + $0x200] ss:$8 sps:$4 sm:$0xff]   ;;  %v3327_v26 = vld [vmem:[%s4178_s0 + $0x224] ss:$8 sps:$4 sm:$0xff]   ;;  %v3331_v29 = vld [vmem:[%s4178_s0 + $0x34] ss:$8 sps:$4 sm:$0xff]  }
   0xa   :  { %913 = vmatpush1.bf16.msra.mxu0 %v3299_v3  ;;  %3282 = vmatpush1.bf16.msra.mxu1 %v3299_v3  ;;  %v3329_v27 = vld [vmem:[%s4178_s0 + $0x20] ss:$8 sps:$4 sm:$0xff]   ;;  %v3333_v30 = vld [vmem:[%s4178_s0 + $0x234] ss:$8 sps:$4 sm:$0xff]   ;;  %v3335_v31 = vld [vmem:[%s4178_s0 + $0x30] ss:$8 sps:$4 sm:$0xff]  }
   0xb   :  { %914 = vmatprep.subr.bf16.mxu0 %v3505_v0  ;;  %3267 = vmatprep.subr.bf16.mxu1 %v3505_v0  ;;  %v3330_v28 = vld [vmem:[%s4178_s0 + $0x220] ss:$8 sps:$4 sm:$0xff]   ;;  %v3336_v32 = vld [vmem:[%s4178_s0 + $0x230] ss:$8 sps:$4 sm:$0xff]   ;;  %v3337_v33 = vld [vmem:[%s4178_s0 + $0x44] ss:$8 sps:$4 sm:$0xff]  }
   0xc   :  { %v3339_v34 = vld [vmem:[%s4178_s0 + $0x244] ss:$8 sps:$4 sm:$0xff]   ;;  %v3341_v35 = vld [vmem:[%s4178_s0 + $0x40] ss:$8 sps:$4 sm:$0xff]   ;;  %v3343_v37 = vld [vmem:[%s4178_s0 + $0x54] ss:$8 sps:$4 sm:$0xff]  }
   0xd   :  { %v3342_v36 = vld [vmem:[%s4178_s0 + $0x240] ss:$8 sps:$4 sm:$0xff]   ;;  %v3345_v38 = vld [vmem:[%s4178_s0 + $0x254] ss:$8 sps:$4 sm:$0xff]   ;;  %v3347_v39 = vld [vmem:[%s4178_s0 + $0x50] ss:$8 sps:$4 sm:$0xff]  }
   0xe   :  { %915 = vmatpush1.bf16.msra.mxu0 %v3300_v4  ;;  %3283 = vmatpush1.bf16.msra.mxu1 %v3300_v4  ;;  %v3348_v40 = vld [vmem:[%s4178_s0 + $0x250] ss:$8 sps:$4 sm:$0xff]   ;;  %v3349_v41 = vld [vmem:[%s4178_s0 + $0x64] ss:$8 sps:$4 sm:$0xff]   ;;  %v3353_v43 = vld [vmem:[%s4178_s0 + $0x60] ss:$8 sps:$4 sm:$0xff]  }
   0xf   :  { %916 = vmatprep.subr.bf16.mxu0 %v3505_v0  ;;  %3268 = vmatprep.subr.bf16.mxu1 %v3505_v0  ;;  %v3351_v42 = vld [vmem:[%s4178_s0 + $0x264] ss:$8 sps:$4 sm:$0xff]   ;;  %v3354_v44 = vld [vmem:[%s4178_s0 + $0x260] ss:$8 sps:$4 sm:$0xff]   ;;  %v3355_v45 = vld [vmem:[%s4178_s0 + $0x74] ss:$8 sps:$4 sm:$0xff]  }
  0x10   :  { %v3357_v46 = vld [vmem:[%s4178_s0 + $0x274] ss:$8 sps:$4 sm:$0xff]   ;;  %v3359_v47 = vld [vmem:[%s4178_s0 + $0x70] ss:$8 sps:$4 sm:$0xff]   ;;  %v3361_v49 = vld [vmem:[%s4178_s0 + $0x84] ss:$8 sps:$4 sm:$0xff]  }
  0x11   :  { %v3360_v48 = vld [vmem:[%s4178_s0 + $0x270] ss:$8 sps:$4 sm:$0xff]   ;;  %v3363_v50 = vld [vmem:[%s4178_s0 + $0x284] ss:$8 sps:$4 sm:$0xff]   ;;  %v3365_v51 = vld [vmem:[%s4178_s0 + $0x80] ss:$8 sps:$4 sm:$0xff]  }
  0x12   :  { %917 = vmatpush1.bf16.msra.mxu0 %v3301_v5  ;;  %3284 = vmatpush1.bf16.msra.mxu1 %v3301_v5  ;;  %v3366_v52 = vld [vmem:[%s4178_s0 + $0x280] ss:$8 sps:$4 sm:$0xff]   ;;  %v3367_v53 = vld [vmem:[%s4178_s0 + $0x94] ss:$8 sps:$4 sm:$0xff]   ;;  %v3371_v55 = vld [vmem:[%s4178_s0 + $0x90] ss:$8 sps:$4 sm:$0xff]  }
  0x13   :  { %918 = vmatprep.subr.bf16.mxu0 %v3505_v0  ;;  %3269 = vmatprep.subr.bf16.mxu1 %v3505_v0  ;;  %v3369_v54 = vld [vmem:[%s4178_s0 + $0x294] ss:$8 sps:$4 sm:$0xff]   ;;  %v3372_v56 = vld [vmem:[%s4178_s0 + $0x290] ss:$8 sps:$4 sm:$0xff]   ;;  %v3373_v57 = vld [vmem:[%s4178_s0 + $0xa4] ss:$8 sps:$4 sm:$0xff]  }
  0x14   :  { %v3375_v58 = vld [vmem:[%s4178_s0 + $0x2a4] ss:$8 sps:$4 sm:$0xff]   ;;  %v3377_v59 = vld [vmem:[%s4178_s0 + $0xa0] ss:$8 sps:$4 sm:$0xff]   ;;  %v3379_v61 = vld [vmem:[%s4178_s0 + $0xb4] ss:$8 sps:$4 sm:$0xff]  }
  0x15   :  { %v3378_v60 = vld [vmem:[%s4178_s0 + $0x2a0] ss:$8 sps:$4 sm:$0xff]   ;;  %v3381_v62 = vld [vmem:[%s4178_s0 + $0x2b4] ss:$8 sps:$4 sm:$0xff]   ;;  %v3383_v63 = vld [vmem:[%s4178_s0 + $0xb0] ss:$8 sps:$4 sm:$0xff]  }
  0x16   :  { %919 = vmatpush1.bf16.msra.mxu0 %v3302_v7  ;;  %3285 = vmatpush1.bf16.msra.mxu1 %v3302_v7  ;;  %v3385_v1 = vld [vmem:[%s4178_s0 + $0xc4] ss:$8 sps:$4 sm:$0xff]   ;;  %v3389_v3 = vld [vmem:[%s4178_s0 + $0xc0] ss:$8 sps:$4 sm:$0xff]   ;;  %v3391_v5 = vld [vmem:[%s4178_s0 + $0xd4] ss:$8 sps:$4 sm:$0xff]  }
  0x17   :  { %920 = vmatprep.subr.bf16.mxu0 %v3505_v0  ;;  %3270 = vmatprep.subr.bf16.mxu1 %v3505_v0  ;;  %v3387_v2 = vld [vmem:[%s4178_s0 + $0x2c4] ss:$8 sps:$4 sm:$0xff]   ;;  %v3390_v4 = vld [vmem:[%s4178_s0 + $0x2c0] ss:$8 sps:$4 sm:$0xff]   ;;  %v3393_v6 = vld [vmem:[%s4178_s0 + $0x2d4] ss:$8 sps:$4 sm:$0xff]  }
  0x18   :  { %v3395_v7 = vld [vmem:[%s4178_s0 + $0xd0] ss:$8 sps:$4 sm:$0xff]  }
  0x19   :  { %v3396_v8 = vld [vmem:[%s4178_s0 + $0x2d0] ss:$8 sps:$4 sm:$0xff]  }
  0x1a   :  { %921 = vmatpush1.bf16.msra.mxu0 %v3303_v9  ;;  %3286 = vmatpush1.bf16.msra.mxu1 %v3303_v9  ;;  %v3397_v9 = vld [vmem:[%s4178_s0 + $0xe4] ss:$8 sps:$4 sm:$0xff]  }
  0x1b   :  { %922 = vmatprep.subr.bf16.mxu0 %v3505_v0  ;;  %3271 = vmatprep.subr.bf16.mxu1 %v3505_v0 }
  0x1e   :  { %923 = vmatpush1.bf16.msra.mxu0 %v3304_v10  ;;  %3287 = vmatpush1.bf16.msra.mxu1 %v3304_v10  ;;  %v3399_v10 = vld [vmem:[%s4178_s0 + $0x2e4] ss:$8 sps:$4 sm:$0xff]  }
  0x1f   :  { %924 = vmatprep.subr.bf16.mxu0 %v3505_v0  ;;  %3272 = vmatprep.subr.bf16.mxu1 %v3505_v0 }
  0x22   :  { %925 = vmatpush2.bf16.msra.mxu0 %v3305_v11  ;;  %3288 = vmatpush2.bf16.msra.mxu1 %v3305_v11  ;;  %v3401_v11 = vld [vmem:[%s4178_s0 + $0xe0] ss:$8 sps:$4 sm:$0xff]  }
  0x23   :  { %926 = vmatprep.subr.bf16.mxu0 %v3505_v0  ;;  %3273 = vmatprep.subr.bf16.mxu1 %v3505_v0 }
  0x26   :  { %927 = vmatpush2.bf16.msra.mxu0 %v3306_v12  ;;  %3289 = vmatpush2.bf16.msra.mxu1 %v3306_v12  ;;  %v3402_v12 = vld [vmem:[%s4178_s0 + $0x2e0] ss:$8 sps:$4 sm:$0xff]  }
  0x27   :  { %928 = vmatprep.subr.bf16.mxu0 %v3505_v0  ;;  %3274 = vmatprep.subr.bf16.mxu1 %v3505_v0 }
  0x2a   :  { %929 = vmatpush2.bf16.msra.mxu0 %v3307_v13  ;;  %3290 = vmatpush2.bf16.msra.mxu1 %v3307_v13  ;;  %v3403_v13 = vld [vmem:[%s4178_s0 + $0xf4] ss:$8 sps:$4 sm:$0xff]  }
  0x2b   :  { %930 = vmatprep.subr.bf16.mxu0 %v3505_v0  ;;  %3275 = vmatprep.subr.bf16.mxu1 %v3505_v0 }
  0x2e   :  { %931 = vmatpush2.bf16.msra.mxu0 %v3308_v14  ;;  %3291 = vmatpush2.bf16.msra.mxu1 %v3308_v14  ;;  %v3405_v14 = vld [vmem:[%s4178_s0 + $0x2f4] ss:$8 sps:$4 sm:$0xff]  }
  0x2f   :  { %932 = vmatprep.subr.bf16.mxu0 %v3505_v0  ;;  %3276 = vmatprep.subr.bf16.mxu1 %v3505_v0 }
  0x32   :  { %933 = vmatpush2.bf16.msra.mxu0 %v3309_v15  ;;  %3292 = vmatpush2.bf16.msra.mxu1 %v3309_v15  ;;  %v3407_v15 = vld [vmem:[%s4178_s0 + $0xf0] ss:$8 sps:$4 sm:$0xff]  }
  0x33   :  { %934 = vmatprep.subr.bf16.mxu0 %v3505_v0  ;;  %3277 = vmatprep.subr.bf16.mxu1 %v3505_v0 }
  0x36   :  { %935 = vmatpush2.bf16.msra.mxu0 %v3310_v16  ;;  %3293 = vmatpush2.bf16.msra.mxu1 %v3310_v16  ;;  %v3408_v16 = vld [vmem:[%s4178_s0 + $0x2f0] ss:$8 sps:$4 sm:$0xff]  }
  0x37   :  { %936 = vmatprep.subr.bf16.mxu0 %v3505_v0  ;;  %3278 = vmatprep.subr.bf16.mxu1 %v3505_v0 }
  0x3a   :  { %937 = vmatpush2.bf16.msra.mxu0 %v3311_v17  ;;  %3294 = vmatpush2.bf16.msra.mxu1 %v3311_v17  ;;  %v3409_v17 = vld [vmem:[%s4178_s0 + $0x104] ss:$8 sps:$4 sm:$0xff]  }
  0x3b   :  { %938 = vmatprep.subr.bf16.mxu0 %v3505_v0  ;;  %3279 = vmatprep.subr.bf16.mxu1 %v3505_v0  ;;  %v3384_v0 = vld [vmem:[%s4178_s0 + $0x2b0] ss:$8 sps:$4 sm:$0xff]  }
  0x3e   :  { %939 = vmatpush2.bf16.msra.mxu0 %v3312_v18  ;;  %3295 = vmatpush2.bf16.msra.mxu1 %v3312_v18  ;;  %v3411_v18 = vld [vmem:[%s4178_s0 + $0x304] ss:$8 sps:$4 sm:$0xff]  }
  0x41   :  { %941 = vmatmul.mubr.bf16.vlgmr.msra.gmra.mxu0 %v3313_v19  ;;  %1197 = vmatmul.mubr.bf16.vlgmr.msra.gmra.mxu1 %v3316_v20  ;;  %v3413_v19 = vld [vmem:[%s4178_s0 + $0x100] ss:$8 sps:$4 sm:$0xff]  }
  0x42   :  { %948 = vmatprep.mubr.bf16.mxu0 %v3319_v21  ;;  %1204 = vmatprep.mubr.bf16.mxu1 %v3321_v22  ;;  %v3414_v20 = vld [vmem:[%s4178_s0 + $0x300] ss:$8 sps:$4 sm:$0xff]   ;;  %v3415_v21 = vld [vmem:[%s4178_s0 + $0x114] ss:$8 sps:$4 sm:$0xff]  }
  0x43   :  { %v3417_v22 = vld [vmem:[%s4178_s0 + $0x314] ss:$8 sps:$4 sm:$0xff]  }
  0x49   :  { %949 = vmatmul.mubr.bf16.gmra.mxu0 %v3323_v23  ;;  %1205 = vmatmul.mubr.bf16.gmra.mxu1 %v3324_v24  ;;  %v3419_v23 = vld [vmem:[%s4178_s0 + $0x110] ss:$8 sps:$4 sm:$0xff]  }
  0x4a   :  { %956 = vmatprep.mubr.bf16.mxu0 %v3325_v25  ;;  %1212 = vmatprep.mubr.bf16.mxu1 %v3327_v26  ;;  %v3420_v24 = vld [vmem:[%s4178_s0 + $0x310] ss:$8 sps:$4 sm:$0xff]   ;;  %v3421_v25 = vld [vmem:[%s4178_s0 + $0x124] ss:$8 sps:$4 sm:$0xff]  }
  0x4b   :  { %v3423_v26 = vld [vmem:[%s4178_s0 + $0x324] ss:$8 sps:$4 sm:$0xff]  }
  0x51   :  { %957 = vmatmul.mubr.bf16.gmra.mxu0 %v3329_v27  ;;  %1213 = vmatmul.mubr.bf16.gmra.mxu1 %v3330_v28  ;;  %v3425_v27 = vld [vmem:[%s4178_s0 + $0x120] ss:$8 sps:$4 sm:$0xff]  }
  0x52   :  { %964 = vmatprep.mubr.bf16.mxu0 %v3331_v29  ;;  %1220 = vmatprep.mubr.bf16.mxu1 %v3333_v30  ;;  %v3426_v28 = vld [vmem:[%s4178_s0 + $0x320] ss:$8 sps:$4 sm:$0xff]   ;;  %v3427_v29 = vld [vmem:[%s4178_s0 + $0x134] ss:$8 sps:$4 sm:$0xff]  }
  0x53   :  { %v3429_v30 = vld [vmem:[%s4178_s0 + $0x334] ss:$8 sps:$4 sm:$0xff]  }
  0x59   :  { %965 = vmatmul.mubr.bf16.gmra.mxu0 %v3335_v31  ;;  %1221 = vmatmul.mubr.bf16.gmra.mxu1 %v3336_v32  ;;  %v3431_v31 = vld [vmem:[%s4178_s0 + $0x130] ss:$8 sps:$4 sm:$0xff]  }
  0x5a   :  { %972 = vmatprep.mubr.bf16.mxu0 %v3337_v33  ;;  %1228 = vmatprep.mubr.bf16.mxu1 %v3339_v34  ;;  %v3432_v32 = vld [vmem:[%s4178_s0 + $0x330] ss:$8 sps:$4 sm:$0xff]   ;;  %v3433_v33 = vld [vmem:[%s4178_s0 + $0x144] ss:$8 sps:$4 sm:$0xff]  }
  0x5b   :  { %v3435_v34 = vld [vmem:[%s4178_s0 + $0x344] ss:$8 sps:$4 sm:$0xff]  }
  0x61   :  { %973 = vmatmul.mubr.bf16.gmra.mxu0 %v3341_v35  ;;  %1229 = vmatmul.mubr.bf16.gmra.mxu1 %v3342_v36  ;;  %v3437_v35 = vld [vmem:[%s4178_s0 + $0x140] ss:$8 sps:$4 sm:$0xff]  }
  0x62   :  { %980 = vmatprep.mubr.bf16.mxu0 %v3343_v37  ;;  %1236 = vmatprep.mubr.bf16.mxu1 %v3345_v38  ;;  %v3438_v36 = vld [vmem:[%s4178_s0 + $0x340] ss:$8 sps:$4 sm:$0xff]   ;;  %v3439_v37 = vld [vmem:[%s4178_s0 + $0x154] ss:$8 sps:$4 sm:$0xff]  }
  0x63   :  { %v3441_v38 = vld [vmem:[%s4178_s0 + $0x354] ss:$8 sps:$4 sm:$0xff]  }
  0x69   :  { %981 = vmatmul.mubr.bf16.gmra.mxu0 %v3347_v39  ;;  %1237 = vmatmul.mubr.bf16.gmra.mxu1 %v3348_v40  ;;  %v3443_v39 = vld [vmem:[%s4178_s0 + $0x150] ss:$8 sps:$4 sm:$0xff]  }
  0x6a   :  { %988 = vmatprep.mubr.bf16.mxu0 %v3349_v41  ;;  %1244 = vmatprep.mubr.bf16.mxu1 %v3351_v42  ;;  %v3444_v40 = vld [vmem:[%s4178_s0 + $0x350] ss:$8 sps:$4 sm:$0xff]   ;;  %v3445_v41 = vld [vmem:[%s4178_s0 + $0x164] ss:$8 sps:$4 sm:$0xff]  }
  0x6b   :  { %v3447_v42 = vld [vmem:[%s4178_s0 + $0x364] ss:$8 sps:$4 sm:$0xff]  }
  0x71   :  { %989 = vmatmul.mubr.bf16.gmra.mxu0 %v3353_v43  ;;  %1245 = vmatmul.mubr.bf16.gmra.mxu1 %v3354_v44  ;;  %v3449_v43 = vld [vmem:[%s4178_s0 + $0x160] ss:$8 sps:$4 sm:$0xff]  }
  0x72   :  { %996 = vmatprep.mubr.bf16.mxu0 %v3355_v45  ;;  %1252 = vmatprep.mubr.bf16.mxu1 %v3357_v46  ;;  %v3450_v44 = vld [vmem:[%s4178_s0 + $0x360] ss:$8 sps:$4 sm:$0xff]   ;;  %v3451_v45 = vld [vmem:[%s4178_s0 + $0x174] ss:$8 sps:$4 sm:$0xff]  }
  0x73   :  { %v3453_v46 = vld [vmem:[%s4178_s0 + $0x374] ss:$8 sps:$4 sm:$0xff]  }
  0x79   :  { %997 = vmatmul.mubr.bf16.gmra.mxu0 %v3359_v47  ;;  %1253 = vmatmul.mubr.bf16.gmra.mxu1 %v3360_v48  ;;  %v3455_v47 = vld [vmem:[%s4178_s0 + $0x170] ss:$8 sps:$4 sm:$0xff]  }
  0x7a   :  { %1004 = vmatprep.mubr.bf16.mxu0 %v3361_v49  ;;  %1260 = vmatprep.mubr.bf16.mxu1 %v3363_v50  ;;  %v3456_v48 = vld [vmem:[%s4178_s0 + $0x370] ss:$8 sps:$4 sm:$0xff]   ;;  %v3457_v49 = vld [vmem:[%s4178_s0 + $0x184] ss:$8 sps:$4 sm:$0xff]  }
  0x7b   :  { %v3459_v50 = vld [vmem:[%s4178_s0 + $0x384] ss:$8 sps:$4 sm:$0xff]  }
  0x81   :  { %1005 = vmatmul.mubr.bf16.gmra.mxu0 %v3365_v51  ;;  %1261 = vmatmul.mubr.bf16.gmra.mxu1 %v3366_v52  ;;  %v3461_v51 = vld [vmem:[%s4178_s0 + $0x180] ss:$8 sps:$4 sm:$0xff]  }
  0x82   :  { %1012 = vmatprep.mubr.bf16.mxu0 %v3367_v53  ;;  %1268 = vmatprep.mubr.bf16.mxu1 %v3369_v54  ;;  %v3462_v52 = vld [vmem:[%s4178_s0 + $0x380] ss:$8 sps:$4 sm:$0xff]   ;;  %v3463_v53 = vld [vmem:[%s4178_s0 + $0x194] ss:$8 sps:$4 sm:$0xff]  }
  0x83   :  { %v3465_v54 = vld [vmem:[%s4178_s0 + $0x394] ss:$8 sps:$4 sm:$0xff]  }
  0x89   :  { %1013 = vmatmul.mubr.bf16.gmra.mxu0 %v3371_v55  ;;  %1269 = vmatmul.mubr.bf16.gmra.mxu1 %v3372_v56 }
  0x8a   :  { %1020 = vmatprep.mubr.bf16.mxu0 %v3373_v57  ;;  %1276 = vmatprep.mubr.bf16.mxu1 %v3375_v58 }
  0x91   :  { %1021 = vmatmul.mubr.bf16.gmra.mxu0 %v3377_v59  ;;  %1277 = vmatmul.mubr.bf16.gmra.mxu1 %v3378_v60  ;;  %v3467_v59 = vld [vmem:[%s4178_s0 + $0x190] ss:$8 sps:$4 sm:$0xff]  }
  0x92   :  { %1028 = vmatprep.mubr.bf16.mxu0 %v3379_v61  ;;  %1284 = vmatprep.mubr.bf16.mxu1 %v3381_v62  ;;  %v3468_v62 = vld [vmem:[%s4178_s0 + $0x390] ss:$8 sps:$4 sm:$0xff]  }
  0x99   :  { %1029 = vmatmul.mubr.bf16.gmra.mxu0 %v3383_v63  ;;  %1285 = vmatmul.mubr.bf16.gmra.mxu1 %v3384_v0 }
  0x9a   :  { %1036 = vmatprep.mubr.bf16.mxu0 %v3385_v1  ;;  %1292 = vmatprep.mubr.bf16.mxu1 %v3387_v2  ;;  %v3469_v1 = vld [vmem:[%s4178_s0 + $0x1a4] ss:$8 sps:$4 sm:$0xff]  }
  0x9b   :  { %v3471_v2 = vld [vmem:[%s4178_s0 + $0x3a4] ss:$8 sps:$4 sm:$0xff]  }
  0xa1   :  { %1037 = vmatmul.mubr.bf16.gmra.mxu0 %v3389_v3  ;;  %1293 = vmatmul.mubr.bf16.gmra.mxu1 %v3390_v4 }
  0xa2   :  { %1044 = vmatprep.mubr.bf16.mxu0 %v3391_v5  ;;  %1300 = vmatprep.mubr.bf16.mxu1 %v3393_v6 }
  0xa9   :  { %1045 = vmatmul.mubr.bf16.gmra.mxu0 %v3395_v7  ;;  %1301 = vmatmul.mubr.bf16.gmra.mxu1 %v3396_v8 }
  0xaa   :  { %1052 = vmatprep.mubr.bf16.mxu0 %v3397_v9  ;;  %1308 = vmatprep.mubr.bf16.mxu1 %v3399_v10 }
  0xb1   :  { %1053 = vmatmul.mubr.bf16.gmra.mxu0 %v3401_v11  ;;  %1309 = vmatmul.mubr.bf16.gmra.mxu1 %v3402_v12 }
  0xb2   :  { %1060 = vmatprep.mubr.bf16.mxu0 %v3403_v13  ;;  %1316 = vmatprep.mubr.bf16.mxu1 %v3405_v14 }
  0xb9   :  { %1061 = vmatmul.mubr.bf16.gmra.mxu0 %v3407_v15  ;;  %1317 = vmatmul.mubr.bf16.gmra.mxu1 %v3408_v16 }
  0xba   :  { %1068 = vmatprep.mubr.bf16.mxu0 %v3409_v17  ;;  %1324 = vmatprep.mubr.bf16.mxu1 %v3411_v18  ;;  %v3473_v17 = vld [vmem:[%s4178_s0 + $0x1a0] ss:$8 sps:$4 sm:$0xff]  }
  0xc1   :  { %1069 = vmatmul.mubr.bf16.gmra.mxu0 %v3413_v19  ;;  %1325 = vmatmul.mubr.bf16.gmra.mxu1 %v3414_v20  ;;  %v3474_v20 = vld [vmem:[%s4178_s0 + $0x3a0] ss:$8 sps:$4 sm:$0xff]  }
  0xc2   :  { %1076 = vmatprep.mubr.bf16.mxu0 %v3415_v21  ;;  %1332 = vmatprep.mubr.bf16.mxu1 %v3417_v22 }
  0xc9   :  { %1077 = vmatmul.mubr.bf16.gmra.mxu0 %v3419_v23  ;;  %1333 = vmatmul.mubr.bf16.gmra.mxu1 %v3420_v24  ;;  %v3475_v23 = vld [vmem:[%s4178_s0 + $0x1b4] ss:$8 sps:$4 sm:$0xff]  }
  0xca   :  { %1084 = vmatprep.mubr.bf16.mxu0 %v3421_v25  ;;  %1340 = vmatprep.mubr.bf16.mxu1 %v3423_v26  ;;  %v3477_v24 = vld [vmem:[%s4178_s0 + $0x3b4] ss:$8 sps:$4 sm:$0xff]  }
  0xd1   :  { %1085 = vmatmul.mubr.bf16.gmra.mxu0 %v3425_v27  ;;  %1341 = vmatmul.mubr.bf16.gmra.mxu1 %v3426_v28 }
  0xd2   :  { %1092 = vmatprep.mubr.bf16.mxu0 %v3427_v29  ;;  %1348 = vmatprep.mubr.bf16.mxu1 %v3429_v30 }
  0xd9   :  { %1093 = vmatmul.mubr.bf16.gmra.mxu0 %v3431_v31  ;;  %1349 = vmatmul.mubr.bf16.gmra.mxu1 %v3432_v32 }
  0xda   :  { %1100 = vmatprep.mubr.bf16.mxu0 %v3433_v33  ;;  %1356 = vmatprep.mubr.bf16.mxu1 %v3435_v34 }
  0xe1   :  { %1101 = vmatmul.mubr.bf16.gmra.mxu0 %v3437_v35  ;;  %1357 = vmatmul.mubr.bf16.gmra.mxu1 %v3438_v36 }
  0xe2   :  { %1108 = vmatprep.mubr.bf16.mxu0 %v3439_v37  ;;  %1364 = vmatprep.mubr.bf16.mxu1 %v3441_v38 }
  0xe9   :  { %1109 = vmatmul.mubr.bf16.gmra.mxu0 %v3443_v39  ;;  %1365 = vmatmul.mubr.bf16.gmra.mxu1 %v3444_v40  ;;  %v3479_v39 = vld [vmem:[%s4178_s0 + $0x1b0] ss:$8 sps:$4 sm:$0xff]  }
  0xea   :  { %1116 = vmatprep.mubr.bf16.mxu0 %v3445_v41  ;;  %1372 = vmatprep.mubr.bf16.mxu1 %v3447_v42  ;;  %v3480_v42 = vld [vmem:[%s4178_s0 + $0x3b0] ss:$8 sps:$4 sm:$0xff]  }
  0xf1   :  { %1117 = vmatmul.mubr.bf16.gmra.mxu0 %v3449_v43  ;;  %1373 = vmatmul.mubr.bf16.gmra.mxu1 %v3450_v44 }
  0xf2   :  { %1124 = vmatprep.mubr.bf16.mxu0 %v3451_v45  ;;  %1380 = vmatprep.mubr.bf16.mxu1 %v3453_v46  ;;  %v3483_v45 = vld [vmem:[%s4178_s0 + $0x1c4] ss:$8 sps:$4 sm:$0xff]  }
  0xf3   :  { %v3486_v46 = vld [vmem:[%s4178_s0 + $0x3c4] ss:$8 sps:$4 sm:$0xff]  }
  0xf9   :  { %1125 = vmatmul.mubr.bf16.gmra.mxu0 %v3455_v47  ;;  %1381 = vmatmul.mubr.bf16.gmra.mxu1 %v3456_v48 }
  0xfa   :  { %1132 = vmatprep.mubr.bf16.mxu0 %v3457_v49  ;;  %1388 = vmatprep.mubr.bf16.mxu1 %v3459_v50 }
 0x101   :  { %v942_v55 = vpop.f32.mrf.mxu0  ;;  %1133 = vmatmul.mubr.bf16.gmra.mxu0 %v3461_v51  ;;  %v1198_v56 = vpop.f32.mrf.mxu1  ;;  %1389 = vmatmul.mubr.bf16.gmra.mxu1 %v3462_v52 }
 0x102   :  { %1140 = vmatprep.mubr.bf16.mxu0 %v3463_v53  ;;  %1396 = vmatprep.mubr.bf16.mxu1 %v3465_v54  ;;  %v1581_v60 = vmul.f32 0.2, %v942_v55  ;;  %v1645_v61 = vmul.f32 0.2, %v1198_v56  ;;  %vm1453_vm0 = vcmp.gt.f32.partialorder %v942_v55, 0.0  ;;  %vm1517_vm1 = vcmp.gt.f32.partialorder %v1198_v56, 0.0 }
 0x103   :  { %v944_v57 = vpop.f32.mrf.mxu0  ;;  %v1200_v58 = vpop.f32.mrf.mxu1 }
 0x104   :  { %v1709_v7 = vsel %vm1453_vm0, %v942_v55, %v1581_v60  ;;  %v1773_v8 = vsel %vm1517_vm1, %v1198_v56, %v1645_v61  ;;  %v3481_v61 = vld [vmem:[%s4178_s0 + $0x1c0] ss:$8 sps:$4 sm:$0xff]  }
 0x105   :  { %v945_v63 = vpop.f32.mrf.mxu0  ;;  %v1201_v0 = vpop.f32.mrf.mxu1 }
 0x106   :  { %vm1454_vm2 = vcmp.gt.f32.partialorder %v945_v63, 0.0  ;;  %v1582_v3 = vmul.f32 0.2, %v945_v63  ;;  %vm1518_vm3 = vcmp.gt.f32.partialorder %v1201_v0, 0.0  ;;  %v1646_v4 = vmul.f32 0.2, %v1201_v0 }
 0x107   :  { %v947_v5 = vpop.f32.mrf.mxu0  ;;  %v1203_v6 = vpop.f32.mrf.mxu1 }
 0x108   :  { %v1710_v9 = vsel %vm1454_vm2, %v945_v63, %v1582_v3  ;;  %v1774_v10 = vsel %vm1518_vm3, %v1201_v0, %v1646_v4  ;;  %v3484_v0 = vld [vmem:[%s4178_s0 + $0x3c0] ss:$8 sps:$4 sm:$0xff]   ;;  %v3489_v3 = vld [vmem:[%s4178_s0 + $0x1d4] ss:$8 sps:$4 sm:$0xff]  }
 0x109   :  { %v2884_v11 = vpack.c.bf16 %v1710_v9, %v1709_v7  ;;  %v3044_v12 = vpack.c.bf16 %v1774_v10, %v1773_v8  ;;  %v950_v13 = vpop.f32.mrf.mxu0  ;;  %1141 = vmatmul.mubr.bf16.gmra.mxu0 %v3467_v59  ;;  %v1206_v14 = vpop.f32.mrf.mxu1  ;;  %1397 = vmatmul.mubr.bf16.gmra.mxu1 %v3468_v62  ;;  %v3492_v4 = vld [vmem:[%s4178_s0 + $0x3d4] ss:$8 sps:$4 sm:$0xff]  }
 0x10a   :  { %1148 = vmatprep.mubr.bf16.mxu0 %v3469_v1  ;;  %1404 = vmatprep.mubr.bf16.mxu1 %v3471_v2  ;;  %v1583_v18 = vmul.f32 0.2, %v950_v13  ;;  %v1647_v19 = vmul.f32 0.2, %v1206_v14  ;;  %vm1455_vm4 = vcmp.gt.f32.partialorder %v950_v13, 0.0  ;;  %vm1519_vm5 = vcmp.gt.f32.partialorder %v1206_v14, 0.0 }
 0x10b   :  { %2885 = vst [vmem:[%s4179_s2] sm:$0xff] %v2884_v11   ;;  %3232 = vst [vmem:[%s4179_s2 + $0x100] sm:$0xff] %v3044_v12   ;;  %v952_v15 = vpop.f32.mrf.mxu0  ;;  %v1208_v16 = vpop.f32.mrf.mxu1 }
 0x10c   :  { %v1711_v29 = vsel %vm1455_vm4, %v950_v13, %v1583_v18  ;;  %v1775_v30 = vsel %vm1519_vm5, %v1206_v14, %v1647_v19  ;;  %v3487_v19 = vld [vmem:[%s4178_s0 + $0x1d0] ss:$8 sps:$4 sm:$0xff]  }
 0x10d   :  { %v953_v21 = vpop.f32.mrf.mxu0  ;;  %v1209_v22 = vpop.f32.mrf.mxu1 }
 0x10e   :  { %vm1456_vm6 = vcmp.gt.f32.partialorder %v953_v21, 0.0  ;;  %v1584_v25 = vmul.f32 0.2, %v953_v21  ;;  %vm1520_vm7 = vcmp.gt.f32.partialorder %v1209_v22, 0.0  ;;  %v1648_v26 = vmul.f32 0.2, %v1209_v22 }
 0x10f   :  { %v955_v27 = vpop.f32.mrf.mxu0  ;;  %v1211_v28 = vpop.f32.mrf.mxu1 }
 0x110   :  { %v1712_v31 = vsel %vm1456_vm6, %v953_v21, %v1584_v25  ;;  %v1776_v32 = vsel %vm1520_vm7, %v1209_v22, %v1648_v26  ;;  %v3490_v22 = vld [vmem:[%s4178_s0 + $0x3d0] ss:$8 sps:$4 sm:$0xff]   ;;  %v3495_v25 = vld [vmem:[%s4178_s0 + $0x1e4] ss:$8 sps:$4 sm:$0xff]  }
 0x111   :  { %v2889_v33 = vpack.c.bf16 %v1712_v31, %v1711_v29  ;;  %v3049_v34 = vpack.c.bf16 %v1776_v32, %v1775_v30  ;;  %v958_v35 = vpop.f32.mrf.mxu0  ;;  %1149 = vmatmul.mubr.bf16.gmra.mxu0 %v3473_v17  ;;  %v1214_v36 = vpop.f32.mrf.mxu1  ;;  %1405 = vmatmul.mubr.bf16.gmra.mxu1 %v3474_v20  ;;  %v3498_v26 = vld [vmem:[%s4178_s0 + $0x3e4] ss:$8 sps:$4 sm:$0xff]  }
 0x112   :  { %1156 = vmatprep.mubr.bf16.mxu0 %v3475_v23  ;;  %1412 = vmatprep.mubr.bf16.mxu1 %v3477_v24  ;;  %v1585_v40 = vmul.f32 0.2, %v958_v35  ;;  %v1649_v41 = vmul.f32 0.2, %v1214_v36  ;;  %vm1457_vm8 = vcmp.gt.f32.partialorder %v958_v35, 0.0  ;;  %vm1521_vm9 = vcmp.gt.f32.partialorder %v1214_v36, 0.0 }
 0x113   :  { %3201 = vst [vmem:[%s4179_s2 + $0x8] sm:$0xff] %v2889_v33   ;;  %3233 = vst [vmem:[%s4179_s2 + $0x108] sm:$0xff] %v3049_v34   ;;  %v960_v37 = vpop.f32.mrf.mxu0  ;;  %v1216_v38 = vpop.f32.mrf.mxu1 }
 0x114   :  { %v1713_v51 = vsel %vm1457_vm8, %v958_v35, %v1585_v40  ;;  %v1777_v52 = vsel %vm1521_vm9, %v1214_v36, %v1649_v41  ;;  %v3493_v41 = vld [vmem:[%s4178_s0 + $0x1e0] ss:$8 sps:$4 sm:$0xff]  }
 0x115   :  { %v961_v43 = vpop.f32.mrf.mxu0  ;;  %v1217_v44 = vpop.f32.mrf.mxu1 }
 0x116   :  { %vm1458_vm10 = vcmp.gt.f32.partialorder %v961_v43, 0.0  ;;  %v1586_v47 = vmul.f32 0.2, %v961_v43  ;;  %vm1522_vm11 = vcmp.gt.f32.partialorder %v1217_v44, 0.0  ;;  %v1650_v48 = vmul.f32 0.2, %v1217_v44 }
 0x117   :  { %v963_v49 = vpop.f32.mrf.mxu0  ;;  %v1219_v50 = vpop.f32.mrf.mxu1 }
 0x118   :  { %v1714_v53 = vsel %vm1458_vm10, %v961_v43, %v1586_v47  ;;  %v1778_v54 = vsel %vm1522_vm11, %v1217_v44, %v1650_v48  ;;  %v3496_v44 = vld [vmem:[%s4178_s0 + $0x3e0] ss:$8 sps:$4 sm:$0xff]   ;;  %v3501_v47 = vld [vmem:[%s4178_s0 + $0x1f4] ss:$8 sps:$4 sm:$0xff]  }
 0x119   :  { %v2894_v55 = vpack.c.bf16 %v1714_v53, %v1713_v51  ;;  %v3054_v56 = vpack.c.bf16 %v1778_v54, %v1777_v52  ;;  %v966_v57 = vpop.f32.mrf.mxu0  ;;  %1157 = vmatmul.mubr.bf16.gmra.mxu0 %v3479_v39  ;;  %v1222_v58 = vpop.f32.mrf.mxu1  ;;  %1413 = vmatmul.mubr.bf16.gmra.mxu1 %v3480_v42  ;;  %v3504_v48 = vld [vmem:[%s4178_s0 + $0x3f4] ss:$8 sps:$4 sm:$0xff]  }
 0x11a   :  { %1164 = vmatprep.mubr.bf16.mxu0 %v3483_v45  ;;  %1420 = vmatprep.mubr.bf16.mxu1 %v3486_v46  ;;  %v1587_v62 = vmul.f32 0.2, %v966_v57  ;;  %v1651_v63 = vmul.f32 0.2, %v1222_v58  ;;  %vm1459_vm12 = vcmp.gt.f32.partialorder %v966_v57, 0.0  ;;  %vm1523_vm13 = vcmp.gt.f32.partialorder %v1222_v58, 0.0 }
 0x11b   :  { %3202 = vst [vmem:[%s4179_s2 + $0x10] sm:$0xff] %v2894_v55   ;;  %3234 = vst [vmem:[%s4179_s2 + $0x110] sm:$0xff] %v3054_v56   ;;  %v968_v59 = vpop.f32.mrf.mxu0  ;;  %v1224_v60 = vpop.f32.mrf.mxu1 }
 0x11c   :  { %v1715_v9 = vsel %vm1459_vm12, %v966_v57, %v1587_v62  ;;  %v1779_v10 = vsel %vm1523_vm13, %v1222_v58, %v1651_v63 }
 0x11d   :  { %v969_v1 = vpop.f32.mrf.mxu0  ;;  %v1225_v2 = vpop.f32.mrf.mxu1 }
 0x11e   :  { %vm1460_vm14 = vcmp.gt.f32.partialorder %v969_v1, 0.0  ;;  %v1588_v5 = vmul.f32 0.2, %v969_v1  ;;  %vm1524_vm15 = vcmp.gt.f32.partialorder %v1225_v2, 0.0  ;;  %v1652_v6 = vmul.f32 0.2, %v1225_v2 }
 0x11f   :  { %v971_v7 = vpop.f32.mrf.mxu0  ;;  %v1227_v8 = vpop.f32.mrf.mxu1 }
 0x120   :  { %v1716_v11 = vsel %vm1460_vm14, %v969_v1, %v1588_v5  ;;  %v1780_v12 = vsel %vm1524_vm15, %v1225_v2, %v1652_v6 }
 0x121   :  { %v2899_v13 = vpack.c.bf16 %v1716_v11, %v1715_v9  ;;  %v3059_v14 = vpack.c.bf16 %v1780_v12, %v1779_v10  ;;  %v974_v15 = vpop.f32.mrf.mxu0  ;;  %1165 = vmatmul.mubr.bf16.gmra.mxu0 %v3481_v61  ;;  %v1230_v16 = vpop.f32.mrf.mxu1  ;;  %1421 = vmatmul.mubr.bf16.gmra.mxu1 %v3484_v0 }
 0x122   :  { %1172 = vmatprep.mubr.bf16.mxu0 %v3489_v3  ;;  %1428 = vmatprep.mubr.bf16.mxu1 %v3492_v4  ;;  %v1589_v20 = vmul.f32 0.2, %v974_v15  ;;  %v1653_v21 = vmul.f32 0.2, %v1230_v16  ;;  %vm1461_vm0 = vcmp.gt.f32.partialorder %v974_v15, 0.0  ;;  %vm1525_vm1 = vcmp.gt.f32.partialorder %v1230_v16, 0.0 }
 0x123   :  { %3203 = vst [vmem:[%s4179_s2 + $0x18] sm:$0xff] %v2899_v13   ;;  %3235 = vst [vmem:[%s4179_s2 + $0x118] sm:$0xff] %v3059_v14   ;;  %v976_v17 = vpop.f32.mrf.mxu0  ;;  %v1232_v18 = vpop.f32.mrf.mxu1  ;;  %v3499_v3 = vld [vmem:[%s4178_s0 + $0x1f0] ss:$8 sps:$4 sm:$0xff]  }
 0x124   :  { %v1717_v31 = vsel %vm1461_vm0, %v974_v15, %v1589_v20  ;;  %v1781_v32 = vsel %vm1525_vm1, %v1230_v16, %v1653_v21  ;;  %v3502_v4 = vld [vmem:[%s4178_s0 + $0x3f0] ss:$8 sps:$4 sm:$0xff]  }
 0x125   :  { %v977_v23 = vpop.f32.mrf.mxu0  ;;  %v1233_v24 = vpop.f32.mrf.mxu1 }
 0x126   :  { %vm1462_vm2 = vcmp.gt.f32.partialorder %v977_v23, 0.0  ;;  %v1590_v27 = vmul.f32 0.2, %v977_v23  ;;  %vm1526_vm3 = vcmp.gt.f32.partialorder %v1233_v24, 0.0  ;;  %v1654_v28 = vmul.f32 0.2, %v1233_v24 }
 0x127   :  { %v979_v29 = vpop.f32.mrf.mxu0  ;;  %v1235_v30 = vpop.f32.mrf.mxu1 }
 0x128   :  { %v1718_v33 = vsel %vm1462_vm2, %v977_v23, %v1590_v27  ;;  %v1782_v34 = vsel %vm1526_vm3, %v1233_v24, %v1654_v28 }
 0x129   :  { %v2904_v35 = vpack.c.bf16 %v1718_v33, %v1717_v31  ;;  %v3064_v36 = vpack.c.bf16 %v1782_v34, %v1781_v32  ;;  %v982_v37 = vpop.f32.mrf.mxu0  ;;  %1173 = vmatmul.mubr.bf16.gmra.mxu0 %v3487_v19  ;;  %v1238_v38 = vpop.f32.mrf.mxu1  ;;  %1429 = vmatmul.mubr.bf16.gmra.mxu1 %v3490_v22 }
 0x12a   :  { %1180 = vmatprep.mubr.bf16.mxu0 %v3495_v25  ;;  %1436 = vmatprep.mubr.bf16.mxu1 %v3498_v26  ;;  %v1591_v42 = vmul.f32 0.2, %v982_v37  ;;  %v1655_v43 = vmul.f32 0.2, %v1238_v38  ;;  %vm1463_vm4 = vcmp.gt.f32.partialorder %v982_v37, 0.0  ;;  %vm1527_vm5 = vcmp.gt.f32.partialorder %v1238_v38, 0.0 }
 0x12b   :  { %3204 = vst [vmem:[%s4179_s2 + $0x20] sm:$0xff] %v2904_v35   ;;  %3236 = vst [vmem:[%s4179_s2 + $0x120] sm:$0xff] %v3064_v36   ;;  %v984_v39 = vpop.f32.mrf.mxu0  ;;  %v1240_v40 = vpop.f32.mrf.mxu1 }
 0x12c   :  { %v1719_v53 = vsel %vm1463_vm4, %v982_v37, %v1591_v42  ;;  %v1783_v54 = vsel %vm1527_vm5, %v1238_v38, %v1655_v43 }
 0x12d   :  { %v985_v45 = vpop.f32.mrf.mxu0  ;;  %v1241_v46 = vpop.f32.mrf.mxu1 }
 0x12e   :  { %vm1464_vm6 = vcmp.gt.f32.partialorder %v985_v45, 0.0  ;;  %v1592_v49 = vmul.f32 0.2, %v985_v45  ;;  %vm1528_vm7 = vcmp.gt.f32.partialorder %v1241_v46, 0.0  ;;  %v1656_v50 = vmul.f32 0.2, %v1241_v46 }
 0x12f   :  { %v987_v51 = vpop.f32.mrf.mxu0  ;;  %v1243_v52 = vpop.f32.mrf.mxu1 }
 0x130   :  { %v1720_v55 = vsel %vm1464_vm6, %v985_v45, %v1592_v49  ;;  %v1784_v56 = vsel %vm1528_vm7, %v1241_v46, %v1656_v50 }
 0x131   :  { %v2909_v57 = vpack.c.bf16 %v1720_v55, %v1719_v53  ;;  %v3069_v58 = vpack.c.bf16 %v1784_v56, %v1783_v54  ;;  %v990_v59 = vpop.f32.mrf.mxu0  ;;  %1181 = vmatmul.mubr.bf16.gmra.mxu0 %v3493_v41  ;;  %v1246_v60 = vpop.f32.mrf.mxu1  ;;  %1437 = vmatmul.mubr.bf16.gmra.mxu1 %v3496_v44 }
 0x132   :  { %1188 = vmatprep.mubr.bf16.mxu0 %v3501_v47  ;;  %1444 = vmatprep.mubr.bf16.mxu1 %v3504_v48  ;;  %v1593_v63 = vmul.f32 0.2, %v990_v59  ;;  %v1657_v0 = vmul.f32 0.2, %v1246_v60  ;;  %vm1465_vm8 = vcmp.gt.f32.partialorder %v990_v59, 0.0  ;;  %vm1529_vm9 = vcmp.gt.f32.partialorder %v1246_v60, 0.0 }
 0x133   :  { %3205 = vst [vmem:[%s4179_s2 + $0x28] sm:$0xff] %v2909_v57   ;;  %3237 = vst [vmem:[%s4179_s2 + $0x128] sm:$0xff] %v3069_v58   ;;  %v992_v61 = vpop.f32.mrf.mxu0  ;;  %v1248_v62 = vpop.f32.mrf.mxu1 }
 0x134   :  { %v1721_v9 = vsel %vm1465_vm8, %v990_v59, %v1593_v63  ;;  %v1785_v10 = vsel %vm1529_vm9, %v1246_v60, %v1657_v0 }
 0x135   :  { %v993_v1 = vpop.f32.mrf.mxu0  ;;  %v1249_v2 = vpop.f32.mrf.mxu1 }
 0x136   :  { %vm1466_vm10 = vcmp.gt.f32.partialorder %v993_v1, 0.0  ;;  %v1594_v5 = vmul.f32 0.2, %v993_v1  ;;  %vm1530_vm11 = vcmp.gt.f32.partialorder %v1249_v2, 0.0  ;;  %v1658_v6 = vmul.f32 0.2, %v1249_v2 }
 0x137   :  { %v995_v7 = vpop.f32.mrf.mxu0  ;;  %v1251_v8 = vpop.f32.mrf.mxu1 }
 0x138   :  { %v1722_v11 = vsel %vm1466_vm10, %v993_v1, %v1594_v5  ;;  %v1786_v12 = vsel %vm1530_vm11, %v1249_v2, %v1658_v6 }
 0x139   :  { %v2914_v13 = vpack.c.bf16 %v1722_v11, %v1721_v9  ;;  %v3074_v14 = vpack.c.bf16 %v1786_v12, %v1785_v10  ;;  %v998_v15 = vpop.f32.mrf.mxu0  ;;  %1189 = vmatmul.mubr.bf16.gmra.mxu0 %v3499_v3  ;;  %v1254_v16 = vpop.f32.mrf.mxu1  ;;  %1445 = vmatmul.mubr.bf16.gmra.mxu1 %v3502_v4 }
 0x13a   :  { %v1595_v19 = vmul.f32 0.2, %v998_v15  ;;  %v1659_v20 = vmul.f32 0.2, %v1254_v16  ;;  %vm1467_vm12 = vcmp.gt.f32.partialorder %v998_v15, 0.0  ;;  %vm1531_vm13 = vcmp.gt.f32.partialorder %v1254_v16, 0.0 }
 0x13b   :  { %3206 = vst [vmem:[%s4179_s2 + $0x30] sm:$0xff] %v2914_v13   ;;  %3238 = vst [vmem:[%s4179_s2 + $0x130] sm:$0xff] %v3074_v14   ;;  %v1000_v17 = vpop.f32.mrf.mxu0  ;;  %v1256_v18 = vpop.f32.mrf.mxu1 }
 0x13c   :  { %v1723_v27 = vsel %vm1467_vm12, %v998_v15, %v1595_v19  ;;  %v1787_v28 = vsel %vm1531_vm13, %v1254_v16, %v1659_v20 }
 0x13d   :  { %v1001_v21 = vpop.f32.mrf.mxu0  ;;  %v1257_v22 = vpop.f32.mrf.mxu1 }
 0x13e   :  { %vm1468_vm14 = vcmp.gt.f32.partialorder %v1001_v21, 0.0  ;;  %v1596_v23 = vmul.f32 0.2, %v1001_v21  ;;  %vm1532_vm15 = vcmp.gt.f32.partialorder %v1257_v22, 0.0  ;;  %v1660_v24 = vmul.f32 0.2, %v1257_v22 }
 0x13f   :  { %v1003_v25 = vpop.f32.mrf.mxu0  ;;  %v1259_v26 = vpop.f32.mrf.mxu1 }
 0x140   :  { %v1724_v29 = vsel %vm1468_vm14, %v1001_v21, %v1596_v23  ;;  %v1788_v30 = vsel %vm1532_vm15, %v1257_v22, %v1660_v24 }
 0x141   :  { %v2919_v31 = vpack.c.bf16 %v1724_v29, %v1723_v27  ;;  %v3079_v32 = vpack.c.bf16 %v1788_v30, %v1787_v28  ;;  %v1006_v33 = vpop.f32.mrf.mxu0  ;;  %v1262_v34 = vpop.f32.mrf.mxu1 }
 0x142   :  { %v1597_v37 = vmul.f32 0.2, %v1006_v33  ;;  %v1661_v38 = vmul.f32 0.2, %v1262_v34  ;;  %vm1469_vm0 = vcmp.gt.f32.partialorder %v1006_v33, 0.0  ;;  %vm1533_vm1 = vcmp.gt.f32.partialorder %v1262_v34, 0.0 }
 0x143   :  { %3207 = vst [vmem:[%s4179_s2 + $0x38] sm:$0xff] %v2919_v31   ;;  %3239 = vst [vmem:[%s4179_s2 + $0x138] sm:$0xff] %v3079_v32   ;;  %v1008_v35 = vpop.f32.mrf.mxu0  ;;  %v1264_v36 = vpop.f32.mrf.mxu1 }
 0x144   :  { %v1725_v45 = vsel %vm1469_vm0, %v1006_v33, %v1597_v37  ;;  %v1789_v46 = vsel %vm1533_vm1, %v1262_v34, %v1661_v38 }
 0x145   :  { %v1009_v39 = vpop.f32.mrf.mxu0  ;;  %v1265_v40 = vpop.f32.mrf.mxu1 }
 0x146   :  { %vm1470_vm2 = vcmp.gt.f32.partialorder %v1009_v39, 0.0  ;;  %v1598_v41 = vmul.f32 0.2, %v1009_v39  ;;  %vm1534_vm3 = vcmp.gt.f32.partialorder %v1265_v40, 0.0  ;;  %v1662_v42 = vmul.f32 0.2, %v1265_v40 }
 0x147   :  { %v1011_v43 = vpop.f32.mrf.mxu0  ;;  %v1267_v44 = vpop.f32.mrf.mxu1 }
 0x148   :  { %v1726_v47 = vsel %vm1470_vm2, %v1009_v39, %v1598_v41  ;;  %v1790_v48 = vsel %vm1534_vm3, %v1265_v40, %v1662_v42 }
 0x149   :  { %v2924_v49 = vpack.c.bf16 %v1726_v47, %v1725_v45  ;;  %v3084_v50 = vpack.c.bf16 %v1790_v48, %v1789_v46  ;;  %v1014_v51 = vpop.f32.mrf.mxu0  ;;  %v1270_v52 = vpop.f32.mrf.mxu1 }
 0x14a   :  { %v1599_v55 = vmul.f32 0.2, %v1014_v51  ;;  %v1663_v56 = vmul.f32 0.2, %v1270_v52  ;;  %vm1471_vm4 = vcmp.gt.f32.partialorder %v1014_v51, 0.0  ;;  %vm1535_vm5 = vcmp.gt.f32.partialorder %v1270_v52, 0.0 }
 0x14b   :  { %3208 = vst [vmem:[%s4179_s2 + $0x40] sm:$0xff] %v2924_v49   ;;  %3240 = vst [vmem:[%s4179_s2 + $0x140] sm:$0xff] %v3084_v50   ;;  %v1016_v53 = vpop.f32.mrf.mxu0  ;;  %v1272_v54 = vpop.f32.mrf.mxu1 }
 0x14c   :  { %v1727_v63 = vsel %vm1471_vm4, %v1014_v51, %v1599_v55  ;;  %v1791_v0 = vsel %vm1535_vm5, %v1270_v52, %v1663_v56 }
 0x14d   :  { %v1017_v57 = vpop.f32.mrf.mxu0  ;;  %v1273_v58 = vpop.f32.mrf.mxu1 }
 0x14e   :  { %vm1472_vm6 = vcmp.gt.f32.partialorder %v1017_v57, 0.0  ;;  %v1600_v59 = vmul.f32 0.2, %v1017_v57  ;;  %vm1536_vm7 = vcmp.gt.f32.partialorder %v1273_v58, 0.0  ;;  %v1664_v60 = vmul.f32 0.2, %v1273_v58 }
 0x14f   :  { %v1019_v61 = vpop.f32.mrf.mxu0  ;;  %v1275_v62 = vpop.f32.mrf.mxu1 }
 0x150   :  { %v1728_v1 = vsel %vm1472_vm6, %v1017_v57, %v1600_v59  ;;  %v1792_v2 = vsel %vm1536_vm7, %v1273_v58, %v1664_v60 }
 0x151   :  { %v2929_v3 = vpack.c.bf16 %v1728_v1, %v1727_v63  ;;  %v3089_v4 = vpack.c.bf16 %v1792_v2, %v1791_v0  ;;  %v1022_v5 = vpop.f32.mrf.mxu0  ;;  %v1278_v6 = vpop.f32.mrf.mxu1 }
 0x152   :  { %v1601_v9 = vmul.f32 0.2, %v1022_v5  ;;  %v1665_v10 = vmul.f32 0.2, %v1278_v6  ;;  %vm1473_vm8 = vcmp.gt.f32.partialorder %v1022_v5, 0.0  ;;  %vm1537_vm9 = vcmp.gt.f32.partialorder %v1278_v6, 0.0 }
 0x153   :  { %3209 = vst [vmem:[%s4179_s2 + $0x48] sm:$0xff] %v2929_v3   ;;  %3241 = vst [vmem:[%s4179_s2 + $0x148] sm:$0xff] %v3089_v4   ;;  %v1024_v7 = vpop.f32.mrf.mxu0  ;;  %v1280_v8 = vpop.f32.mrf.mxu1 }
 0x154   :  { %v1729_v17 = vsel %vm1473_vm8, %v1022_v5, %v1601_v9  ;;  %v1793_v18 = vsel %vm1537_vm9, %v1278_v6, %v1665_v10 }
 0x155   :  { %v1025_v11 = vpop.f32.mrf.mxu0  ;;  %v1281_v12 = vpop.f32.mrf.mxu1 }
 0x156   :  { %vm1474_vm10 = vcmp.gt.f32.partialorder %v1025_v11, 0.0  ;;  %v1602_v13 = vmul.f32 0.2, %v1025_v11  ;;  %vm1538_vm11 = vcmp.gt.f32.partialorder %v1281_v12, 0.0  ;;  %v1666_v14 = vmul.f32 0.2, %v1281_v12 }
 0x157   :  { %v1027_v15 = vpop.f32.mrf.mxu0  ;;  %v1283_v16 = vpop.f32.mrf.mxu1 }
 0x158   :  { %v1730_v19 = vsel %vm1474_vm10, %v1025_v11, %v1602_v13  ;;  %v1794_v20 = vsel %vm1538_vm11, %v1281_v12, %v1666_v14 }
 0x159   :  { %v2934_v21 = vpack.c.bf16 %v1730_v19, %v1729_v17  ;;  %v3094_v22 = vpack.c.bf16 %v1794_v20, %v1793_v18  ;;  %v1030_v23 = vpop.f32.mrf.mxu0  ;;  %v1286_v24 = vpop.f32.mrf.mxu1 }
 0x15a   :  { %v1603_v27 = vmul.f32 0.2, %v1030_v23  ;;  %v1667_v28 = vmul.f32 0.2, %v1286_v24  ;;  %vm1475_vm12 = vcmp.gt.f32.partialorder %v1030_v23, 0.0  ;;  %vm1539_vm13 = vcmp.gt.f32.partialorder %v1286_v24, 0.0 }
 0x15b   :  { %3210 = vst [vmem:[%s4179_s2 + $0x50] sm:$0xff] %v2934_v21   ;;  %3242 = vst [vmem:[%s4179_s2 + $0x150] sm:$0xff] %v3094_v22   ;;  %v1032_v25 = vpop.f32.mrf.mxu0  ;;  %v1288_v26 = vpop.f32.mrf.mxu1 }
 0x15c   :  { %v1731_v35 = vsel %vm1475_vm12, %v1030_v23, %v1603_v27  ;;  %v1795_v36 = vsel %vm1539_vm13, %v1286_v24, %v1667_v28 }
 0x15d   :  { %v1033_v29 = vpop.f32.mrf.mxu0  ;;  %v1289_v30 = vpop.f32.mrf.mxu1 }
 0x15e   :  { %vm1476_vm14 = vcmp.gt.f32.partialorder %v1033_v29, 0.0  ;;  %v1604_v31 = vmul.f32 0.2, %v1033_v29  ;;  %vm1540_vm15 = vcmp.gt.f32.partialorder %v1289_v30, 0.0  ;;  %v1668_v32 = vmul.f32 0.2, %v1289_v30 }
 0x15f   :  { %v1035_v33 = vpop.f32.mrf.mxu0  ;;  %v1291_v34 = vpop.f32.mrf.mxu1 }
 0x160   :  { %v1732_v37 = vsel %vm1476_vm14, %v1033_v29, %v1604_v31  ;;  %v1796_v38 = vsel %vm1540_vm15, %v1289_v30, %v1668_v32 }
 0x161   :  { %v2939_v39 = vpack.c.bf16 %v1732_v37, %v1731_v35  ;;  %v3099_v40 = vpack.c.bf16 %v1796_v38, %v1795_v36  ;;  %v1038_v41 = vpop.f32.mrf.mxu0  ;;  %v1294_v42 = vpop.f32.mrf.mxu1 }
 0x162   :  { %v1605_v45 = vmul.f32 0.2, %v1038_v41  ;;  %v1669_v46 = vmul.f32 0.2, %v1294_v42  ;;  %vm1477_vm0 = vcmp.gt.f32.partialorder %v1038_v41, 0.0  ;;  %vm1541_vm1 = vcmp.gt.f32.partialorder %v1294_v42, 0.0 }
 0x163   :  { %3211 = vst [vmem:[%s4179_s2 + $0x58] sm:$0xff] %v2939_v39   ;;  %3243 = vst [vmem:[%s4179_s2 + $0x158] sm:$0xff] %v3099_v40   ;;  %v1040_v43 = vpop.f32.mrf.mxu0  ;;  %v1296_v44 = vpop.f32.mrf.mxu1 }
 0x164   :  { %v1733_v53 = vsel %vm1477_vm0, %v1038_v41, %v1605_v45  ;;  %v1797_v54 = vsel %vm1541_vm1, %v1294_v42, %v1669_v46 }
 0x165   :  { %v1041_v47 = vpop.f32.mrf.mxu0  ;;  %v1297_v48 = vpop.f32.mrf.mxu1 }
 0x166   :  { %vm1478_vm2 = vcmp.gt.f32.partialorder %v1041_v47, 0.0  ;;  %v1606_v49 = vmul.f32 0.2, %v1041_v47  ;;  %vm1542_vm3 = vcmp.gt.f32.partialorder %v1297_v48, 0.0  ;;  %v1670_v50 = vmul.f32 0.2, %v1297_v48 }
 0x167   :  { %v1043_v51 = vpop.f32.mrf.mxu0  ;;  %v1299_v52 = vpop.f32.mrf.mxu1 }
 0x168   :  { %v1734_v55 = vsel %vm1478_vm2, %v1041_v47, %v1606_v49  ;;  %v1798_v56 = vsel %vm1542_vm3, %v1297_v48, %v1670_v50 }
 0x169   :  { %v2944_v57 = vpack.c.bf16 %v1734_v55, %v1733_v53  ;;  %v3104_v58 = vpack.c.bf16 %v1798_v56, %v1797_v54  ;;  %v1046_v59 = vpop.f32.mrf.mxu0  ;;  %v1302_v60 = vpop.f32.mrf.mxu1 }
 0x16a   :  { %v1607_v63 = vmul.f32 0.2, %v1046_v59  ;;  %v1671_v0 = vmul.f32 0.2, %v1302_v60  ;;  %vm1479_vm4 = vcmp.gt.f32.partialorder %v1046_v59, 0.0  ;;  %vm1543_vm5 = vcmp.gt.f32.partialorder %v1302_v60, 0.0 }
 0x16b   :  { %3212 = vst [vmem:[%s4179_s2 + $0x60] sm:$0xff] %v2944_v57   ;;  %3244 = vst [vmem:[%s4179_s2 + $0x160] sm:$0xff] %v3104_v58   ;;  %v1048_v61 = vpop.f32.mrf.mxu0  ;;  %v1304_v62 = vpop.f32.mrf.mxu1 }
 0x16c   :  { %v1735_v7 = vsel %vm1479_vm4, %v1046_v59, %v1607_v63  ;;  %v1799_v8 = vsel %vm1543_vm5, %v1302_v60, %v1671_v0 }
 0x16d   :  { %v1049_v1 = vpop.f32.mrf.mxu0  ;;  %v1305_v2 = vpop.f32.mrf.mxu1 }
 0x16e   :  { %vm1480_vm6 = vcmp.gt.f32.partialorder %v1049_v1, 0.0  ;;  %v1608_v3 = vmul.f32 0.2, %v1049_v1  ;;  %vm1544_vm7 = vcmp.gt.f32.partialorder %v1305_v2, 0.0  ;;  %v1672_v4 = vmul.f32 0.2, %v1305_v2 }
 0x16f   :  { %v1051_v5 = vpop.f32.mrf.mxu0  ;;  %v1307_v6 = vpop.f32.mrf.mxu1 }
 0x170   :  { %v1736_v9 = vsel %vm1480_vm6, %v1049_v1, %v1608_v3  ;;  %v1800_v10 = vsel %vm1544_vm7, %v1305_v2, %v1672_v4 }
 0x171   :  { %v2949_v11 = vpack.c.bf16 %v1736_v9, %v1735_v7  ;;  %v3109_v12 = vpack.c.bf16 %v1800_v10, %v1799_v8  ;;  %v1054_v13 = vpop.f32.mrf.mxu0  ;;  %v1310_v14 = vpop.f32.mrf.mxu1 }
 0x172   :  { %v1609_v17 = vmul.f32 0.2, %v1054_v13  ;;  %v1673_v18 = vmul.f32 0.2, %v1310_v14  ;;  %vm1481_vm8 = vcmp.gt.f32.partialorder %v1054_v13, 0.0  ;;  %vm1545_vm9 = vcmp.gt.f32.partialorder %v1310_v14, 0.0 }
 0x173   :  { %3213 = vst [vmem:[%s4179_s2 + $0x68] sm:$0xff] %v2949_v11   ;;  %3245 = vst [vmem:[%s4179_s2 + $0x168] sm:$0xff] %v3109_v12   ;;  %v1056_v15 = vpop.f32.mrf.mxu0  ;;  %v1312_v16 = vpop.f32.mrf.mxu1 }
 0x174   :  { %v1737_v25 = vsel %vm1481_vm8, %v1054_v13, %v1609_v17  ;;  %v1801_v26 = vsel %vm1545_vm9, %v1310_v14, %v1673_v18 }
 0x175   :  { %v1057_v19 = vpop.f32.mrf.mxu0  ;;  %v1313_v20 = vpop.f32.mrf.mxu1 }
 0x176   :  { %vm1482_vm10 = vcmp.gt.f32.partialorder %v1057_v19, 0.0  ;;  %v1610_v21 = vmul.f32 0.2, %v1057_v19  ;;  %vm1546_vm11 = vcmp.gt.f32.partialorder %v1313_v20, 0.0  ;;  %v1674_v22 = vmul.f32 0.2, %v1313_v20 }
 0x177   :  { %v1059_v23 = vpop.f32.mrf.mxu0  ;;  %v1315_v24 = vpop.f32.mrf.mxu1 }
 0x178   :  { %v1738_v27 = vsel %vm1482_vm10, %v1057_v19, %v1610_v21  ;;  %v1802_v28 = vsel %vm1546_vm11, %v1313_v20, %v1674_v22 }
 0x179   :  { %v2954_v29 = vpack.c.bf16 %v1738_v27, %v1737_v25  ;;  %v3114_v30 = vpack.c.bf16 %v1802_v28, %v1801_v26  ;;  %v1062_v31 = vpop.f32.mrf.mxu0  ;;  %v1318_v32 = vpop.f32.mrf.mxu1 }
 0x17a   :  { %v1611_v35 = vmul.f32 0.2, %v1062_v31  ;;  %v1675_v36 = vmul.f32 0.2, %v1318_v32  ;;  %vm1483_vm12 = vcmp.gt.f32.partialorder %v1062_v31, 0.0  ;;  %vm1547_vm13 = vcmp.gt.f32.partialorder %v1318_v32, 0.0 }
 0x17b   :  { %3214 = vst [vmem:[%s4179_s2 + $0x70] sm:$0xff] %v2954_v29   ;;  %3246 = vst [vmem:[%s4179_s2 + $0x170] sm:$0xff] %v3114_v30   ;;  %v1064_v33 = vpop.f32.mrf.mxu0  ;;  %v1320_v34 = vpop.f32.mrf.mxu1 }
 0x17c   :  { %v1739_v43 = vsel %vm1483_vm12, %v1062_v31, %v1611_v35  ;;  %v1803_v44 = vsel %vm1547_vm13, %v1318_v32, %v1675_v36 }
 0x17d   :  { %v1065_v37 = vpop.f32.mrf.mxu0  ;;  %v1321_v38 = vpop.f32.mrf.mxu1 }
 0x17e   :  { %vm1484_vm14 = vcmp.gt.f32.partialorder %v1065_v37, 0.0  ;;  %v1612_v39 = vmul.f32 0.2, %v1065_v37  ;;  %vm1548_vm15 = vcmp.gt.f32.partialorder %v1321_v38, 0.0  ;;  %v1676_v40 = vmul.f32 0.2, %v1321_v38 }
 0x17f   :  { %v1067_v41 = vpop.f32.mrf.mxu0  ;;  %v1323_v42 = vpop.f32.mrf.mxu1 }
 0x180   :  { %v1740_v45 = vsel %vm1484_vm14, %v1065_v37, %v1612_v39  ;;  %v1804_v46 = vsel %vm1548_vm15, %v1321_v38, %v1676_v40 }
 0x181   :  { %v2959_v47 = vpack.c.bf16 %v1740_v45, %v1739_v43  ;;  %v3119_v48 = vpack.c.bf16 %v1804_v46, %v1803_v44  ;;  %v1070_v49 = vpop.f32.mrf.mxu0  ;;  %v1326_v50 = vpop.f32.mrf.mxu1 }
 0x182   :  { %v1613_v53 = vmul.f32 0.2, %v1070_v49  ;;  %v1677_v54 = vmul.f32 0.2, %v1326_v50  ;;  %vm1485_vm0 = vcmp.gt.f32.partialorder %v1070_v49, 0.0  ;;  %vm1549_vm1 = vcmp.gt.f32.partialorder %v1326_v50, 0.0 }
 0x183   :  { %3215 = vst [vmem:[%s4179_s2 + $0x78] sm:$0xff] %v2959_v47   ;;  %3247 = vst [vmem:[%s4179_s2 + $0x178] sm:$0xff] %v3119_v48   ;;  %v1072_v51 = vpop.f32.mrf.mxu0  ;;  %v1328_v52 = vpop.f32.mrf.mxu1 }
 0x184   :  { %v1741_v61 = vsel %vm1485_vm0, %v1070_v49, %v1613_v53  ;;  %v1805_v62 = vsel %vm1549_vm1, %v1326_v50, %v1677_v54 }
 0x185   :  { %v1073_v55 = vpop.f32.mrf.mxu0  ;;  %v1329_v56 = vpop.f32.mrf.mxu1 }
 0x186   :  { %vm1486_vm2 = vcmp.gt.f32.partialorder %v1073_v55, 0.0  ;;  %v1614_v57 = vmul.f32 0.2, %v1073_v55  ;;  %vm1550_vm3 = vcmp.gt.f32.partialorder %v1329_v56, 0.0  ;;  %v1678_v58 = vmul.f32 0.2, %v1329_v56 }
 0x187   :  { %v1075_v59 = vpop.f32.mrf.mxu0  ;;  %v1331_v60 = vpop.f32.mrf.mxu1 }
 0x188   :  { %v1742_v63 = vsel %vm1486_vm2, %v1073_v55, %v1614_v57  ;;  %v1806_v0 = vsel %vm1550_vm3, %v1329_v56, %v1678_v58 }
 0x189   :  { %v2964_v1 = vpack.c.bf16 %v1742_v63, %v1741_v61  ;;  %v3124_v2 = vpack.c.bf16 %v1806_v0, %v1805_v62  ;;  %v1078_v3 = vpop.f32.mrf.mxu0  ;;  %v1334_v4 = vpop.f32.mrf.mxu1 }
 0x18a   :  { %v1615_v7 = vmul.f32 0.2, %v1078_v3  ;;  %v1679_v8 = vmul.f32 0.2, %v1334_v4  ;;  %vm1487_vm4 = vcmp.gt.f32.partialorder %v1078_v3, 0.0  ;;  %vm1551_vm5 = vcmp.gt.f32.partialorder %v1334_v4, 0.0 }
 0x18b   :  { %3216 = vst [vmem:[%s4179_s2 + $0x80] sm:$0xff] %v2964_v1   ;;  %3248 = vst [vmem:[%s4179_s2 + $0x180] sm:$0xff] %v3124_v2   ;;  %v1080_v5 = vpop.f32.mrf.mxu0  ;;  %v1336_v6 = vpop.f32.mrf.mxu1 }
 0x18c   :  { %v1743_v15 = vsel %vm1487_vm4, %v1078_v3, %v1615_v7  ;;  %v1807_v16 = vsel %vm1551_vm5, %v1334_v4, %v1679_v8 }
 0x18d   :  { %v1081_v9 = vpop.f32.mrf.mxu0  ;;  %v1337_v10 = vpop.f32.mrf.mxu1 }
 0x18e   :  { %vm1488_vm6 = vcmp.gt.f32.partialorder %v1081_v9, 0.0  ;;  %v1616_v11 = vmul.f32 0.2, %v1081_v9  ;;  %vm1552_vm7 = vcmp.gt.f32.partialorder %v1337_v10, 0.0  ;;  %v1680_v12 = vmul.f32 0.2, %v1337_v10 }
 0x18f   :  { %v1083_v13 = vpop.f32.mrf.mxu0  ;;  %v1339_v14 = vpop.f32.mrf.mxu1 }
 0x190   :  { %v1744_v17 = vsel %vm1488_vm6, %v1081_v9, %v1616_v11  ;;  %v1808_v18 = vsel %vm1552_vm7, %v1337_v10, %v1680_v12 }
 0x191   :  { %v2969_v19 = vpack.c.bf16 %v1744_v17, %v1743_v15  ;;  %v3129_v20 = vpack.c.bf16 %v1808_v18, %v1807_v16  ;;  %v1086_v21 = vpop.f32.mrf.mxu0  ;;  %v1342_v22 = vpop.f32.mrf.mxu1 }
 0x192   :  { %v1617_v25 = vmul.f32 0.2, %v1086_v21  ;;  %v1681_v26 = vmul.f32 0.2, %v1342_v22  ;;  %vm1489_vm8 = vcmp.gt.f32.partialorder %v1086_v21, 0.0  ;;  %vm1553_vm9 = vcmp.gt.f32.partialorder %v1342_v22, 0.0 }
 0x193   :  { %3217 = vst [vmem:[%s4179_s2 + $0x88] sm:$0xff] %v2969_v19   ;;  %3249 = vst [vmem:[%s4179_s2 + $0x188] sm:$0xff] %v3129_v20   ;;  %v1088_v23 = vpop.f32.mrf.mxu0  ;;  %v1344_v24 = vpop.f32.mrf.mxu1 }
 0x194   :  { %v1745_v33 = vsel %vm1489_vm8, %v1086_v21, %v1617_v25  ;;  %v1809_v34 = vsel %vm1553_vm9, %v1342_v22, %v1681_v26 }
 0x195   :  { %v1089_v27 = vpop.f32.mrf.mxu0  ;;  %v1345_v28 = vpop.f32.mrf.mxu1 }
 0x196   :  { %vm1490_vm10 = vcmp.gt.f32.partialorder %v1089_v27, 0.0  ;;  %v1618_v29 = vmul.f32 0.2, %v1089_v27  ;;  %vm1554_vm11 = vcmp.gt.f32.partialorder %v1345_v28, 0.0  ;;  %v1682_v30 = vmul.f32 0.2, %v1345_v28 }
 0x197   :  { %v1091_v31 = vpop.f32.mrf.mxu0  ;;  %v1347_v32 = vpop.f32.mrf.mxu1 }
 0x198   :  { %v1746_v35 = vsel %vm1490_vm10, %v1089_v27, %v1618_v29  ;;  %v1810_v36 = vsel %vm1554_vm11, %v1345_v28, %v1682_v30 }
 0x199   :  { %v2974_v37 = vpack.c.bf16 %v1746_v35, %v1745_v33  ;;  %v3134_v38 = vpack.c.bf16 %v1810_v36, %v1809_v34  ;;  %v1094_v39 = vpop.f32.mrf.mxu0  ;;  %v1350_v40 = vpop.f32.mrf.mxu1 }
 0x19a   :  { %v1619_v43 = vmul.f32 0.2, %v1094_v39  ;;  %v1683_v44 = vmul.f32 0.2, %v1350_v40  ;;  %vm1491_vm12 = vcmp.gt.f32.partialorder %v1094_v39, 0.0  ;;  %vm1555_vm13 = vcmp.gt.f32.partialorder %v1350_v40, 0.0 }
 0x19b   :  { %3218 = vst [vmem:[%s4179_s2 + $0x90] sm:$0xff] %v2974_v37   ;;  %3250 = vst [vmem:[%s4179_s2 + $0x190] sm:$0xff] %v3134_v38   ;;  %v1096_v41 = vpop.f32.mrf.mxu0  ;;  %v1352_v42 = vpop.f32.mrf.mxu1 }
 0x19c   :  { %v1747_v51 = vsel %vm1491_vm12, %v1094_v39, %v1619_v43  ;;  %v1811_v52 = vsel %vm1555_vm13, %v1350_v40, %v1683_v44 }
 0x19d   :  { %v1097_v45 = vpop.f32.mrf.mxu0  ;;  %v1353_v46 = vpop.f32.mrf.mxu1 }
 0x19e   :  { %vm1492_vm14 = vcmp.gt.f32.partialorder %v1097_v45, 0.0  ;;  %v1620_v47 = vmul.f32 0.2, %v1097_v45  ;;  %vm1556_vm15 = vcmp.gt.f32.partialorder %v1353_v46, 0.0  ;;  %v1684_v48 = vmul.f32 0.2, %v1353_v46 }
 0x19f   :  { %v1099_v49 = vpop.f32.mrf.mxu0  ;;  %v1355_v50 = vpop.f32.mrf.mxu1 }
 0x1a0   :  { %v1748_v53 = vsel %vm1492_vm14, %v1097_v45, %v1620_v47  ;;  %v1812_v54 = vsel %vm1556_vm15, %v1353_v46, %v1684_v48 }
 0x1a1   :  { %v2979_v55 = vpack.c.bf16 %v1748_v53, %v1747_v51  ;;  %v3139_v56 = vpack.c.bf16 %v1812_v54, %v1811_v52  ;;  %v1102_v57 = vpop.f32.mrf.mxu0  ;;  %v1358_v58 = vpop.f32.mrf.mxu1 }
 0x1a2   :  { %v1621_v61 = vmul.f32 0.2, %v1102_v57  ;;  %v1685_v62 = vmul.f32 0.2, %v1358_v58  ;;  %vm1493_vm0 = vcmp.gt.f32.partialorder %v1102_v57, 0.0  ;;  %vm1557_vm1 = vcmp.gt.f32.partialorder %v1358_v58, 0.0 }
 0x1a3   :  { %3219 = vst [vmem:[%s4179_s2 + $0x98] sm:$0xff] %v2979_v55   ;;  %3251 = vst [vmem:[%s4179_s2 + $0x198] sm:$0xff] %v3139_v56   ;;  %v1104_v59 = vpop.f32.mrf.mxu0  ;;  %v1360_v60 = vpop.f32.mrf.mxu1 }
 0x1a4   :  { %v1749_v5 = vsel %vm1493_vm0, %v1102_v57, %v1621_v61  ;;  %v1813_v6 = vsel %vm1557_vm1, %v1358_v58, %v1685_v62 }
 0x1a5   :  { %v1105_v63 = vpop.f32.mrf.mxu0  ;;  %v1361_v0 = vpop.f32.mrf.mxu1 }
 0x1a6   :  { %vm1494_vm2 = vcmp.gt.f32.partialorder %v1105_v63, 0.0  ;;  %v1622_v1 = vmul.f32 0.2, %v1105_v63  ;;  %vm1558_vm3 = vcmp.gt.f32.partialorder %v1361_v0, 0.0  ;;  %v1686_v2 = vmul.f32 0.2, %v1361_v0 }
 0x1a7   :  { %v1107_v3 = vpop.f32.mrf.mxu0  ;;  %v1363_v4 = vpop.f32.mrf.mxu1 }
 0x1a8   :  { %v1750_v7 = vsel %vm1494_vm2, %v1105_v63, %v1622_v1  ;;  %v1814_v8 = vsel %vm1558_vm3, %v1361_v0, %v1686_v2 }
 0x1a9   :  { %v2984_v9 = vpack.c.bf16 %v1750_v7, %v1749_v5  ;;  %v3144_v10 = vpack.c.bf16 %v1814_v8, %v1813_v6  ;;  %v1110_v11 = vpop.f32.mrf.mxu0  ;;  %v1366_v12 = vpop.f32.mrf.mxu1 }
 0x1aa   :  { %v1623_v15 = vmul.f32 0.2, %v1110_v11  ;;  %v1687_v16 = vmul.f32 0.2, %v1366_v12  ;;  %vm1495_vm4 = vcmp.gt.f32.partialorder %v1110_v11, 0.0  ;;  %vm1559_vm5 = vcmp.gt.f32.partialorder %v1366_v12, 0.0 }
 0x1ab   :  { %3220 = vst [vmem:[%s4179_s2 + $0xa0] sm:$0xff] %v2984_v9   ;;  %3252 = vst [vmem:[%s4179_s2 + $0x1a0] sm:$0xff] %v3144_v10   ;;  %v1112_v13 = vpop.f32.mrf.mxu0  ;;  %v1368_v14 = vpop.f32.mrf.mxu1 }
 0x1ac   :  { %v1751_v23 = vsel %vm1495_vm4, %v1110_v11, %v1623_v15  ;;  %v1815_v24 = vsel %vm1559_vm5, %v1366_v12, %v1687_v16 }
 0x1ad   :  { %v1113_v17 = vpop.f32.mrf.mxu0  ;;  %v1369_v18 = vpop.f32.mrf.mxu1 }
 0x1ae   :  { %vm1496_vm6 = vcmp.gt.f32.partialorder %v1113_v17, 0.0  ;;  %v1624_v19 = vmul.f32 0.2, %v1113_v17  ;;  %vm1560_vm7 = vcmp.gt.f32.partialorder %v1369_v18, 0.0  ;;  %v1688_v20 = vmul.f32 0.2, %v1369_v18 }
 0x1af   :  { %v1115_v21 = vpop.f32.mrf.mxu0  ;;  %v1371_v22 = vpop.f32.mrf.mxu1 }
 0x1b0   :  { %v1752_v25 = vsel %vm1496_vm6, %v1113_v17, %v1624_v19  ;;  %v1816_v26 = vsel %vm1560_vm7, %v1369_v18, %v1688_v20 }
 0x1b1   :  { %v2989_v27 = vpack.c.bf16 %v1752_v25, %v1751_v23  ;;  %v3149_v28 = vpack.c.bf16 %v1816_v26, %v1815_v24  ;;  %v1118_v29 = vpop.f32.mrf.mxu0  ;;  %v1374_v30 = vpop.f32.mrf.mxu1 }
 0x1b2   :  { %v1625_v33 = vmul.f32 0.2, %v1118_v29  ;;  %v1689_v34 = vmul.f32 0.2, %v1374_v30  ;;  %vm1497_vm8 = vcmp.gt.f32.partialorder %v1118_v29, 0.0  ;;  %vm1561_vm9 = vcmp.gt.f32.partialorder %v1374_v30, 0.0 }
 0x1b3   :  { %3221 = vst [vmem:[%s4179_s2 + $0xa8] sm:$0xff] %v2989_v27   ;;  %3253 = vst [vmem:[%s4179_s2 + $0x1a8] sm:$0xff] %v3149_v28   ;;  %v1120_v31 = vpop.f32.mrf.mxu0  ;;  %v1376_v32 = vpop.f32.mrf.mxu1 }
 0x1b4   :  { %v1753_v41 = vsel %vm1497_vm8, %v1118_v29, %v1625_v33  ;;  %v1817_v42 = vsel %vm1561_vm9, %v1374_v30, %v1689_v34 }
 0x1b5   :  { %v1121_v35 = vpop.f32.mrf.mxu0  ;;  %v1377_v36 = vpop.f32.mrf.mxu1 }
 0x1b6   :  { %vm1498_vm10 = vcmp.gt.f32.partialorder %v1121_v35, 0.0  ;;  %v1626_v37 = vmul.f32 0.2, %v1121_v35  ;;  %vm1562_vm11 = vcmp.gt.f32.partialorder %v1377_v36, 0.0  ;;  %v1690_v38 = vmul.f32 0.2, %v1377_v36 }
 0x1b7   :  { %v1123_v39 = vpop.f32.mrf.mxu0  ;;  %v1379_v40 = vpop.f32.mrf.mxu1 }
 0x1b8   :  { %v1754_v43 = vsel %vm1498_vm10, %v1121_v35, %v1626_v37  ;;  %v1818_v44 = vsel %vm1562_vm11, %v1377_v36, %v1690_v38 }
 0x1b9   :  { %v2994_v45 = vpack.c.bf16 %v1754_v43, %v1753_v41  ;;  %v3154_v46 = vpack.c.bf16 %v1818_v44, %v1817_v42  ;;  %v1126_v47 = vpop.f32.mrf.mxu0  ;;  %v1382_v48 = vpop.f32.mrf.mxu1 }
 0x1ba   :  { %v1627_v51 = vmul.f32 0.2, %v1126_v47  ;;  %v1691_v52 = vmul.f32 0.2, %v1382_v48  ;;  %vm1499_vm12 = vcmp.gt.f32.partialorder %v1126_v47, 0.0  ;;  %vm1563_vm13 = vcmp.gt.f32.partialorder %v1382_v48, 0.0 }
 0x1bb   :  { %3222 = vst [vmem:[%s4179_s2 + $0xb0] sm:$0xff] %v2994_v45   ;;  %3254 = vst [vmem:[%s4179_s2 + $0x1b0] sm:$0xff] %v3154_v46   ;;  %v1128_v49 = vpop.f32.mrf.mxu0  ;;  %v1384_v50 = vpop.f32.mrf.mxu1 }
 0x1bc   :  { %v1755_v59 = vsel %vm1499_vm12, %v1126_v47, %v1627_v51  ;;  %v1819_v60 = vsel %vm1563_vm13, %v1382_v48, %v1691_v52 }
 0x1bd   :  { %v1129_v53 = vpop.f32.mrf.mxu0  ;;  %v1385_v54 = vpop.f32.mrf.mxu1 }
 0x1be   :  { %vm1500_vm14 = vcmp.gt.f32.partialorder %v1129_v53, 0.0  ;;  %v1628_v55 = vmul.f32 0.2, %v1129_v53  ;;  %vm1564_vm15 = vcmp.gt.f32.partialorder %v1385_v54, 0.0  ;;  %v1692_v56 = vmul.f32 0.2, %v1385_v54 }
 0x1bf   :  { %v1131_v57 = vpop.f32.mrf.mxu0  ;;  %v1387_v58 = vpop.f32.mrf.mxu1 }
 0x1c0   :  { %v1756_v61 = vsel %vm1500_vm14, %v1129_v53, %v1628_v55  ;;  %v1820_v62 = vsel %vm1564_vm15, %v1385_v54, %v1692_v56 }
 0x1c1   :  { %v2999_v63 = vpack.c.bf16 %v1756_v61, %v1755_v59  ;;  %v3159_v0 = vpack.c.bf16 %v1820_v62, %v1819_v60  ;;  %v1134_v1 = vpop.f32.mrf.mxu0  ;;  %v1390_v2 = vpop.f32.mrf.mxu1 }
 0x1c2   :  { %v1629_v5 = vmul.f32 0.2, %v1134_v1  ;;  %v1693_v6 = vmul.f32 0.2, %v1390_v2  ;;  %vm1501_vm0 = vcmp.gt.f32.partialorder %v1134_v1, 0.0  ;;  %vm1565_vm1 = vcmp.gt.f32.partialorder %v1390_v2, 0.0 }
 0x1c3   :  { %3223 = vst [vmem:[%s4179_s2 + $0xb8] sm:$0xff] %v2999_v63   ;;  %3255 = vst [vmem:[%s4179_s2 + $0x1b8] sm:$0xff] %v3159_v0   ;;  %v1136_v3 = vpop.f32.mrf.mxu0  ;;  %v1392_v4 = vpop.f32.mrf.mxu1 }
 0x1c4   :  { %v1757_v13 = vsel %vm1501_vm0, %v1134_v1, %v1629_v5  ;;  %v1821_v14 = vsel %vm1565_vm1, %v1390_v2, %v1693_v6 }
 0x1c5   :  { %v1137_v7 = vpop.f32.mrf.mxu0  ;;  %v1393_v8 = vpop.f32.mrf.mxu1 }
 0x1c6   :  { %vm1502_vm2 = vcmp.gt.f32.partialorder %v1137_v7, 0.0  ;;  %v1630_v9 = vmul.f32 0.2, %v1137_v7  ;;  %vm1566_vm3 = vcmp.gt.f32.partialorder %v1393_v8, 0.0  ;;  %v1694_v10 = vmul.f32 0.2, %v1393_v8 }
 0x1c7   :  { %v1139_v11 = vpop.f32.mrf.mxu0  ;;  %v1395_v12 = vpop.f32.mrf.mxu1 }
 0x1c8   :  { %v1758_v15 = vsel %vm1502_vm2, %v1137_v7, %v1630_v9  ;;  %v1822_v16 = vsel %vm1566_vm3, %v1393_v8, %v1694_v10 }
 0x1c9   :  { %v3004_v17 = vpack.c.bf16 %v1758_v15, %v1757_v13  ;;  %v3164_v18 = vpack.c.bf16 %v1822_v16, %v1821_v14  ;;  %v1142_v19 = vpop.f32.mrf.mxu0  ;;  %v1398_v20 = vpop.f32.mrf.mxu1 }
 0x1ca   :  { %v1631_v23 = vmul.f32 0.2, %v1142_v19  ;;  %v1695_v24 = vmul.f32 0.2, %v1398_v20  ;;  %vm1503_vm4 = vcmp.gt.f32.partialorder %v1142_v19, 0.0  ;;  %vm1567_vm5 = vcmp.gt.f32.partialorder %v1398_v20, 0.0 }
 0x1cb   :  { %3224 = vst [vmem:[%s4179_s2 + $0xc0] sm:$0xff] %v3004_v17   ;;  %3256 = vst [vmem:[%s4179_s2 + $0x1c0] sm:$0xff] %v3164_v18   ;;  %v1144_v21 = vpop.f32.mrf.mxu0  ;;  %v1400_v22 = vpop.f32.mrf.mxu1 }
 0x1cc   :  { %v1759_v31 = vsel %vm1503_vm4, %v1142_v19, %v1631_v23  ;;  %v1823_v32 = vsel %vm1567_vm5, %v1398_v20, %v1695_v24 }
 0x1cd   :  { %v1145_v25 = vpop.f32.mrf.mxu0  ;;  %v1401_v26 = vpop.f32.mrf.mxu1 }
 0x1ce   :  { %vm1504_vm6 = vcmp.gt.f32.partialorder %v1145_v25, 0.0  ;;  %v1632_v27 = vmul.f32 0.2, %v1145_v25  ;;  %vm1568_vm7 = vcmp.gt.f32.partialorder %v1401_v26, 0.0  ;;  %v1696_v28 = vmul.f32 0.2, %v1401_v26 }
 0x1cf   :  { %v1147_v29 = vpop.f32.mrf.mxu0  ;;  %v1403_v30 = vpop.f32.mrf.mxu1 }
 0x1d0   :  { %v1760_v33 = vsel %vm1504_vm6, %v1145_v25, %v1632_v27  ;;  %v1824_v34 = vsel %vm1568_vm7, %v1401_v26, %v1696_v28 }
 0x1d1   :  { %v3009_v35 = vpack.c.bf16 %v1760_v33, %v1759_v31  ;;  %v3169_v36 = vpack.c.bf16 %v1824_v34, %v1823_v32  ;;  %v1150_v37 = vpop.f32.mrf.mxu0  ;;  %v1406_v38 = vpop.f32.mrf.mxu1 }
 0x1d2   :  { %v1633_v41 = vmul.f32 0.2, %v1150_v37  ;;  %v1697_v42 = vmul.f32 0.2, %v1406_v38  ;;  %vm1505_vm8 = vcmp.gt.f32.partialorder %v1150_v37, 0.0  ;;  %vm1569_vm9 = vcmp.gt.f32.partialorder %v1406_v38, 0.0 }
 0x1d3   :  { %3225 = vst [vmem:[%s4179_s2 + $0xc8] sm:$0xff] %v3009_v35   ;;  %3257 = vst [vmem:[%s4179_s2 + $0x1c8] sm:$0xff] %v3169_v36   ;;  %v1152_v39 = vpop.f32.mrf.mxu0  ;;  %v1408_v40 = vpop.f32.mrf.mxu1 }
 0x1d4   :  { %v1761_v49 = vsel %vm1505_vm8, %v1150_v37, %v1633_v41  ;;  %v1825_v50 = vsel %vm1569_vm9, %v1406_v38, %v1697_v42 }
 0x1d5   :  { %v1153_v43 = vpop.f32.mrf.mxu0  ;;  %v1409_v44 = vpop.f32.mrf.mxu1 }
 0x1d6   :  { %vm1506_vm10 = vcmp.gt.f32.partialorder %v1153_v43, 0.0  ;;  %v1634_v45 = vmul.f32 0.2, %v1153_v43  ;;  %vm1570_vm11 = vcmp.gt.f32.partialorder %v1409_v44, 0.0  ;;  %v1698_v46 = vmul.f32 0.2, %v1409_v44 }
 0x1d7   :  { %v1155_v47 = vpop.f32.mrf.mxu0  ;;  %v1411_v48 = vpop.f32.mrf.mxu1 }
 0x1d8   :  { %v1762_v51 = vsel %vm1506_vm10, %v1153_v43, %v1634_v45  ;;  %v1826_v52 = vsel %vm1570_vm11, %v1409_v44, %v1698_v46 }
 0x1d9   :  { %v3014_v53 = vpack.c.bf16 %v1762_v51, %v1761_v49  ;;  %v3174_v54 = vpack.c.bf16 %v1826_v52, %v1825_v50  ;;  %v1158_v55 = vpop.f32.mrf.mxu0  ;;  %v1414_v56 = vpop.f32.mrf.mxu1 }
 0x1da   :  { %v1635_v59 = vmul.f32 0.2, %v1158_v55  ;;  %v1699_v60 = vmul.f32 0.2, %v1414_v56  ;;  %vm1507_vm12 = vcmp.gt.f32.partialorder %v1158_v55, 0.0  ;;  %vm1571_vm13 = vcmp.gt.f32.partialorder %v1414_v56, 0.0 }
 0x1db   :  { %3226 = vst [vmem:[%s4179_s2 + $0xd0] sm:$0xff] %v3014_v53   ;;  %3258 = vst [vmem:[%s4179_s2 + $0x1d0] sm:$0xff] %v3174_v54   ;;  %v1160_v57 = vpop.f32.mrf.mxu0  ;;  %v1416_v58 = vpop.f32.mrf.mxu1 }
 0x1dc   :  { %v1763_v3 = vsel %vm1507_vm12, %v1158_v55, %v1635_v59  ;;  %v1827_v4 = vsel %vm1571_vm13, %v1414_v56, %v1699_v60 }
 0x1dd   :  { %v1161_v61 = vpop.f32.mrf.mxu0  ;;  %v1417_v62 = vpop.f32.mrf.mxu1 }
 0x1de   :  { %vm1508_vm14 = vcmp.gt.f32.partialorder %v1161_v61, 0.0  ;;  %v1636_v63 = vmul.f32 0.2, %v1161_v61  ;;  %vm1572_vm15 = vcmp.gt.f32.partialorder %v1417_v62, 0.0  ;;  %v1700_v0 = vmul.f32 0.2, %v1417_v62 }
 0x1df   :  { %v1163_v1 = vpop.f32.mrf.mxu0  ;;  %v1419_v2 = vpop.f32.mrf.mxu1 }
 0x1e0   :  { %v1764_v5 = vsel %vm1508_vm14, %v1161_v61, %v1636_v63  ;;  %v1828_v6 = vsel %vm1572_vm15, %v1417_v62, %v1700_v0 }
 0x1e1   :  { %v3019_v7 = vpack.c.bf16 %v1764_v5, %v1763_v3  ;;  %v3179_v8 = vpack.c.bf16 %v1828_v6, %v1827_v4  ;;  %v1166_v9 = vpop.f32.mrf.mxu0  ;;  %v1422_v10 = vpop.f32.mrf.mxu1 }
 0x1e2   :  { %v1637_v13 = vmul.f32 0.2, %v1166_v9  ;;  %v1701_v14 = vmul.f32 0.2, %v1422_v10  ;;  %vm1509_vm0 = vcmp.gt.f32.partialorder %v1166_v9, 0.0  ;;  %vm1573_vm1 = vcmp.gt.f32.partialorder %v1422_v10, 0.0 }
 0x1e3   :  { %3227 = vst [vmem:[%s4179_s2 + $0xd8] sm:$0xff] %v3019_v7   ;;  %3259 = vst [vmem:[%s4179_s2 + $0x1d8] sm:$0xff] %v3179_v8   ;;  %v1168_v11 = vpop.f32.mrf.mxu0  ;;  %v1424_v12 = vpop.f32.mrf.mxu1 }
 0x1e4   :  { %v1765_v21 = vsel %vm1509_vm0, %v1166_v9, %v1637_v13  ;;  %v1829_v22 = vsel %vm1573_vm1, %v1422_v10, %v1701_v14 }
 0x1e5   :  { %v1169_v15 = vpop.f32.mrf.mxu0  ;;  %v1425_v16 = vpop.f32.mrf.mxu1 }
 0x1e6   :  { %vm1510_vm2 = vcmp.gt.f32.partialorder %v1169_v15, 0.0  ;;  %v1638_v17 = vmul.f32 0.2, %v1169_v15  ;;  %vm1574_vm3 = vcmp.gt.f32.partialorder %v1425_v16, 0.0  ;;  %v1702_v18 = vmul.f32 0.2, %v1425_v16 }
 0x1e7   :  { %v1171_v19 = vpop.f32.mrf.mxu0  ;;  %v1427_v20 = vpop.f32.mrf.mxu1 }
 0x1e8   :  { %v1766_v23 = vsel %vm1510_vm2, %v1169_v15, %v1638_v17  ;;  %v1830_v24 = vsel %vm1574_vm3, %v1425_v16, %v1702_v18 }
 0x1e9   :  { %v3024_v25 = vpack.c.bf16 %v1766_v23, %v1765_v21  ;;  %v3184_v26 = vpack.c.bf16 %v1830_v24, %v1829_v22  ;;  %v1174_v27 = vpop.f32.mrf.mxu0  ;;  %v1430_v28 = vpop.f32.mrf.mxu1 }
 0x1ea   :  { %v1639_v31 = vmul.f32 0.2, %v1174_v27  ;;  %v1703_v32 = vmul.f32 0.2, %v1430_v28  ;;  %vm1511_vm4 = vcmp.gt.f32.partialorder %v1174_v27, 0.0  ;;  %vm1575_vm5 = vcmp.gt.f32.partialorder %v1430_v28, 0.0 }
 0x1eb   :  { %3228 = vst [vmem:[%s4179_s2 + $0xe0] sm:$0xff] %v3024_v25   ;;  %3260 = vst [vmem:[%s4179_s2 + $0x1e0] sm:$0xff] %v3184_v26   ;;  %v1176_v29 = vpop.f32.mrf.mxu0  ;;  %v1432_v30 = vpop.f32.mrf.mxu1 }
 0x1ec   :  { %v1767_v39 = vsel %vm1511_vm4, %v1174_v27, %v1639_v31  ;;  %v1831_v40 = vsel %vm1575_vm5, %v1430_v28, %v1703_v32 }
 0x1ed   :  { %v1177_v33 = vpop.f32.mrf.mxu0  ;;  %v1433_v34 = vpop.f32.mrf.mxu1 }
 0x1ee   :  { %vm1512_vm6 = vcmp.gt.f32.partialorder %v1177_v33, 0.0  ;;  %v1640_v35 = vmul.f32 0.2, %v1177_v33  ;;  %vm1576_vm7 = vcmp.gt.f32.partialorder %v1433_v34, 0.0  ;;  %v1704_v36 = vmul.f32 0.2, %v1433_v34 }
 0x1ef   :  { %v1179_v37 = vpop.f32.mrf.mxu0  ;;  %v1435_v38 = vpop.f32.mrf.mxu1 }
 0x1f0   :  { %v1768_v41 = vsel %vm1512_vm6, %v1177_v33, %v1640_v35  ;;  %v1832_v42 = vsel %vm1576_vm7, %v1433_v34, %v1704_v36 }
 0x1f1   :  { %v3029_v43 = vpack.c.bf16 %v1768_v41, %v1767_v39  ;;  %v3189_v44 = vpack.c.bf16 %v1832_v42, %v1831_v40  ;;  %v1182_v45 = vpop.f32.mrf.mxu0  ;;  %v1438_v46 = vpop.f32.mrf.mxu1 }
 0x1f2   :  { %v1641_v49 = vmul.f32 0.2, %v1182_v45  ;;  %v1705_v50 = vmul.f32 0.2, %v1438_v46  ;;  %vm1513_vm8 = vcmp.gt.f32.partialorder %v1182_v45, 0.0  ;;  %vm1577_vm9 = vcmp.gt.f32.partialorder %v1438_v46, 0.0 }
 0x1f3   :  { %3229 = vst [vmem:[%s4179_s2 + $0xe8] sm:$0xff] %v3029_v43   ;;  %3261 = vst [vmem:[%s4179_s2 + $0x1e8] sm:$0xff] %v3189_v44   ;;  %v1184_v47 = vpop.f32.mrf.mxu0  ;;  %v1440_v48 = vpop.f32.mrf.mxu1 }
 0x1f4   :  { %v1769_v57 = vsel %vm1513_vm8, %v1182_v45, %v1641_v49  ;;  %v1833_v58 = vsel %vm1577_vm9, %v1438_v46, %v1705_v50 }
 0x1f5   :  { %v1185_v51 = vpop.f32.mrf.mxu0  ;;  %v1441_v52 = vpop.f32.mrf.mxu1 }
 0x1f6   :  { %vm1514_vm10 = vcmp.gt.f32.partialorder %v1185_v51, 0.0  ;;  %v1642_v53 = vmul.f32 0.2, %v1185_v51  ;;  %vm1578_vm11 = vcmp.gt.f32.partialorder %v1441_v52, 0.0  ;;  %v1706_v54 = vmul.f32 0.2, %v1441_v52 }
 0x1f7   :  { %v1187_v55 = vpop.f32.mrf.mxu0  ;;  %v1443_v56 = vpop.f32.mrf.mxu1 }
 0x1f8   :  { %v1770_v59 = vsel %vm1514_vm10, %v1185_v51, %v1642_v53  ;;  %v1834_v60 = vsel %vm1578_vm11, %v1441_v52, %v1706_v54 }
 0x1f9   :  { %v3034_v61 = vpack.c.bf16 %v1770_v59, %v1769_v57  ;;  %v3194_v62 = vpack.c.bf16 %v1834_v60, %v1833_v58  ;;  %v1190_v63 = vpop.f32.mrf.mxu0  ;;  %v1446_v0 = vpop.f32.mrf.mxu1 }
 0x1fa   :  { %v1643_v3 = vmul.f32 0.2, %v1190_v63  ;;  %v1707_v4 = vmul.f32 0.2, %v1446_v0  ;;  %vm1515_vm12 = vcmp.gt.f32.partialorder %v1190_v63, 0.0  ;;  %vm1579_vm13 = vcmp.gt.f32.partialorder %v1446_v0, 0.0 }
 0x1fb   :  { %3230 = vst [vmem:[%s4179_s2 + $0xf0] sm:$0xff] %v3034_v61   ;;  %3262 = vst [vmem:[%s4179_s2 + $0x1f0] sm:$0xff] %v3194_v62   ;;  %v1192_v1 = vpop.f32.mrf.mxu0  ;;  %v1448_v2 = vpop.f32.mrf.mxu1 }
 0x1fc   :  { %v1771_v11 = vsel %vm1515_vm12, %v1190_v63, %v1643_v3  ;;  %v1835_v12 = vsel %vm1579_vm13, %v1446_v0, %v1707_v4 }
 0x1fd   :  { %v1193_v5 = vpop.f32.mrf.mxu0  ;;  %v1449_v6 = vpop.f32.mrf.mxu1 }
 0x1fe   :  { %vm1516_vm14 = vcmp.gt.f32.partialorder %v1193_v5, 0.0  ;;  %v1644_v7 = vmul.f32 0.2, %v1193_v5  ;;  %vm1580_vm15 = vcmp.gt.f32.partialorder %v1449_v6, 0.0  ;;  %v1708_v8 = vmul.f32 0.2, %v1449_v6 }
 0x1ff   :  { %v1195_v9 = vpop.f32.mrf.mxu0  ;;  %v1451_v10 = vpop.f32.mrf.mxu1 }
 0x200   :  { %v1772_v13 = vsel %vm1516_vm14, %v1193_v5, %v1644_v7  ;;  %v1836_v14 = vsel %vm1580_vm15, %v1449_v6, %v1708_v8 }
 0x201   :  { %v3039_v15 = vpack.c.bf16 %v1772_v13, %v1771_v11  ;;  %v3199_v16 = vpack.c.bf16 %v1836_v14, %v1835_v12 }
 0x203   :  { %3231 = vst [vmem:[%s4179_s2 + $0xf8] sm:$0xff] %v3039_v15   ;;  %3263 = vst [vmem:[%s4179_s2 + $0x1f8] sm:$0xff] %v3199_v16  }

// kernel: discriminator_forward.5
= control target key start
LH: loop header
LB: loop body
LE: loop exit
PB: predicated region body
PF: predicated region fallthrough
CT: control target
= control target key end

     0   :  { %s4037_s9 = smov 0   ;;  %s4039_s10 = smov 0   ;;  %s5340_s0 = inlined_call_operand.vmem [shape: bf16[512,1024], index: 0, kind: input, shape index: {}]   ;;  %s5341_s1 = inlined_call_operand.vmem [shape: bf16[1024,128], index: 1, kind: input, shape index: {}]   ;;  %s5342_s2 = inlined_call_operand.vmem [shape: bf16[512,128], index: 2, kind: output, shape index: {}]  }
   0x1   :  { %s4041_s11 = smov 0  }
   0x2 LB: > { %s4053_s12 = sadd.s32 4294967295, %s4018_s11   ;;  %s4056_s13 = sadd.s32 1, %s4018_s11   ;;  %s4018_s11 = sphi %s4041_s11, %s5447_s11   ;;  %s4014_s10 = sphi %s4039_s10, %s5446_s10   ;;  %s4010_s9 = sphi %s4037_s9, %s5445_s9  }
   0x3   : > { %s16_s14 = ssub.s32 %s4018_s11, %s4056_s13  ;;  %s19_s15 = sadd.s32 1, %s4014_s10 }
   0x4   : > { %p17_p0 = scmp.eq.s32.totalorder %s16_s14, 0  ;;  %p26_p1 = scmp.ne.s32.totalorder %s4014_s10, %s4010_s9 }
   0x5   : > { %p27_p2 = scmp.eq.s32.totalorder %s4018_s11, 0  ;;  %p3252_p4 = scmp.ge.s32.totalorder %s4018_s11, 2 }
   0x6   : > { %s4065_s16 = scalar_select %p17_p0, %s4014_s10, %s19_s15  }
   0x7   : > { %p28_p3 = por %p27_p2, %p26_p1  ;;  %99 = sbr.rel (%p3252_p4) target bundleno = 80 (0x50), region = 16 }
   0xc   : > { %102 = sbr.rel (!%p28_p3) target bundleno = 80 (0x50), region = 20  ;;  %s104_s17 = sand.u32 (%p28_p3), 1, %s4014_s10  }
   0xd   : > { %s3488_s18 = sshll.u32 (%p28_p3), %s4018_s11, 4  ;;  %s3253_s19 = sshll.u32 (%p28_p3), %s104_s17, 10 }
   0xe   : > { %s4073_s22 = scalar_lea.vmem (%p28_p3), %s5340_s0, %s3488_s18  ;;  %s4078_s23 = scalar_lea.vmem (%p28_p3), [#allocation3], %s3253_s19 }
   0xf   : > { %v122_v0 = vld [vmem:[%s4073_s22] sm:$0xff] (%p28_p3)  ;;  %v124_v1 = vld [vmem:[%s4073_s22 + $0x8] sm:$0xff] (%p28_p3) }
  0x10   : > { %v126_v2 = vld [vmem:[%s4073_s22 + $0x20] sm:$0xff] (%p28_p3)  ;;  %123 = vst [vmem:[%s4078_s23] sm:$0xff] (%p28_p3), %v122_v0  ;;  %125 = vst [vmem:[%s4078_s23 + $0x8] sm:$0xff] (%p28_p3), %v124_v1  ;;  %v128_v3 = vld [vmem:[%s4073_s22 + $0x28] sm:$0xff] (%p28_p3) }
  0x11   : > { %127 = vst [vmem:[%s4078_s23 + $0x10] sm:$0xff] %v126_v2  ;;  %v130_v4 = vld [vmem:[%s4073_s22 + $0x40] sm:$0xff]  ;;  %v132_v5 = vld [vmem:[%s4073_s22 + $0x48] sm:$0xff]  ;;  %129 = vst [vmem:[%s4078_s23 + $0x18] sm:$0xff] %v128_v3 }
  0x12   : > { %131 = vst [vmem:[%s4078_s23 + $0x20] sm:$0xff] %v130_v4  ;;  %133 = vst [vmem:[%s4078_s23 + $0x28] sm:$0xff] %v132_v5  ;;  %v134_v6 = vld [vmem:[%s4073_s22 + $0x60] sm:$0xff]  ;;  %v136_v7 = vld [vmem:[%s4073_s22 + $0x68] sm:$0xff] }
  0x13   : > { %v138_v8 = vld [vmem:[%s4073_s22 + $0x80] sm:$0xff]  ;;  %135 = vst [vmem:[%s4078_s23 + $0x30] sm:$0xff] %v134_v6  ;;  %137 = vst [vmem:[%s4078_s23 + $0x38] sm:$0xff] %v136_v7  ;;  %v140_v9 = vld [vmem:[%s4073_s22 + $0x88] sm:$0xff] }
  0x14   : > { %139 = vst [vmem:[%s4078_s23 + $0x40] sm:$0xff] %v138_v8  ;;  %v142_v10 = vld [vmem:[%s4073_s22 + $0xa0] sm:$0xff]  ;;  %v144_v11 = vld [vmem:[%s4073_s22 + $0xa8] sm:$0xff]  ;;  %141 = vst [vmem:[%s4078_s23 + $0x48] sm:$0xff] %v140_v9 }
  0x15   : > { %143 = vst [vmem:[%s4078_s23 + $0x50] sm:$0xff] %v142_v10  ;;  %145 = vst [vmem:[%s4078_s23 + $0x58] sm:$0xff] %v144_v11  ;;  %v146_v12 = vld [vmem:[%s4073_s22 + $0xc0] sm:$0xff]  ;;  %v148_v13 = vld [vmem:[%s4073_s22 + $0xc8] sm:$0xff] }
  0x16   : > { %v150_v14 = vld [vmem:[%s4073_s22 + $0xe0] sm:$0xff]  ;;  %147 = vst [vmem:[%s4078_s23 + $0x60] sm:$0xff] %v146_v12  ;;  %149 = vst [vmem:[%s4078_s23 + $0x68] sm:$0xff] %v148_v13  ;;  %v152_v15 = vld [vmem:[%s4073_s22 + $0xe8] sm:$0xff] }
  0x17   : > { %151 = vst [vmem:[%s4078_s23 + $0x70] sm:$0xff] %v150_v14  ;;  %v154_v16 = vld [vmem:[%s4073_s22 + $0x100] sm:$0xff]  ;;  %v156_v17 = vld [vmem:[%s4073_s22 + $0x108] sm:$0xff]  ;;  %153 = vst [vmem:[%s4078_s23 + $0x78] sm:$0xff] %v152_v15 }
  0x18   : > { %155 = vst [vmem:[%s4078_s23 + $0x80] sm:$0xff] %v154_v16  ;;  %157 = vst [vmem:[%s4078_s23 + $0x88] sm:$0xff] %v156_v17  ;;  %v158_v18 = vld [vmem:[%s4073_s22 + $0x120] sm:$0xff]  ;;  %v160_v19 = vld [vmem:[%s4073_s22 + $0x128] sm:$0xff] }
  0x19   : > { %v162_v20 = vld [vmem:[%s4073_s22 + $0x140] sm:$0xff]  ;;  %159 = vst [vmem:[%s4078_s23 + $0x90] sm:$0xff] %v158_v18  ;;  %161 = vst [vmem:[%s4078_s23 + $0x98] sm:$0xff] %v160_v19  ;;  %v164_v21 = vld [vmem:[%s4073_s22 + $0x148] sm:$0xff] }
  0x1a   : > { %163 = vst [vmem:[%s4078_s23 + $0xa0] sm:$0xff] %v162_v20  ;;  %v166_v22 = vld [vmem:[%s4073_s22 + $0x160] sm:$0xff]  ;;  %v168_v23 = vld [vmem:[%s4073_s22 + $0x168] sm:$0xff]  ;;  %165 = vst [vmem:[%s4078_s23 + $0xa8] sm:$0xff] %v164_v21 }
  0x1b   : > { %167 = vst [vmem:[%s4078_s23 + $0xb0] sm:$0xff] %v166_v22  ;;  %169 = vst [vmem:[%s4078_s23 + $0xb8] sm:$0xff] %v168_v23  ;;  %v170_v24 = vld [vmem:[%s4073_s22 + $0x180] sm:$0xff]  ;;  %v172_v25 = vld [vmem:[%s4073_s22 + $0x188] sm:$0xff] }
  0x1c   : > { %v174_v26 = vld [vmem:[%s4073_s22 + $0x1a0] sm:$0xff]  ;;  %171 = vst [vmem:[%s4078_s23 + $0xc0] sm:$0xff] %v170_v24  ;;  %173 = vst [vmem:[%s4078_s23 + $0xc8] sm:$0xff] %v172_v25  ;;  %v176_v27 = vld [vmem:[%s4073_s22 + $0x1a8] sm:$0xff] }
  0x1d   : > { %175 = vst [vmem:[%s4078_s23 + $0xd0] sm:$0xff] %v174_v26  ;;  %v178_v28 = vld [vmem:[%s4073_s22 + $0x1c0] sm:$0xff]  ;;  %v180_v29 = vld [vmem:[%s4073_s22 + $0x1c8] sm:$0xff]  ;;  %177 = vst [vmem:[%s4078_s23 + $0xd8] sm:$0xff] %v176_v27 }
  0x1e   : > { %179 = vst [vmem:[%s4078_s23 + $0xe0] sm:$0xff] %v178_v28  ;;  %181 = vst [vmem:[%s4078_s23 + $0xe8] sm:$0xff] %v180_v29  ;;  %v182_v30 = vld [vmem:[%s4073_s22 + $0x1e0] sm:$0xff]  ;;  %v184_v31 = vld [vmem:[%s4073_s22 + $0x1e8] sm:$0xff] }
  0x1f   : > { %v186_v32 = vld [vmem:[%s4073_s22 + $0x200] sm:$0xff]  ;;  %183 = vst [vmem:[%s4078_s23 + $0xf0] sm:$0xff] %v182_v30  ;;  %185 = vst [vmem:[%s4078_s23 + $0xf8] sm:$0xff] %v184_v31  ;;  %v188_v33 = vld [vmem:[%s4073_s22 + $0x208] sm:$0xff] }
  0x20   : > { %187 = vst [vmem:[%s4078_s23 + $0x100] sm:$0xff] %v186_v32  ;;  %v190_v34 = vld [vmem:[%s4073_s22 + $0x220] sm:$0xff]  ;;  %v192_v35 = vld [vmem:[%s4073_s22 + $0x228] sm:$0xff]  ;;  %189 = vst [vmem:[%s4078_s23 + $0x108] sm:$0xff] %v188_v33 }
  0x21   : > { %191 = vst [vmem:[%s4078_s23 + $0x110] sm:$0xff] %v190_v34  ;;  %193 = vst [vmem:[%s4078_s23 + $0x118] sm:$0xff] %v192_v35  ;;  %v194_v36 = vld [vmem:[%s4073_s22 + $0x240] sm:$0xff]  ;;  %v196_v37 = vld [vmem:[%s4073_s22 + $0x248] sm:$0xff] }
  0x22   : > { %v198_v38 = vld [vmem:[%s4073_s22 + $0x260] sm:$0xff]  ;;  %195 = vst [vmem:[%s4078_s23 + $0x120] sm:$0xff] %v194_v36  ;;  %197 = vst [vmem:[%s4078_s23 + $0x128] sm:$0xff] %v196_v37  ;;  %v200_v39 = vld [vmem:[%s4073_s22 + $0x268] sm:$0xff] }
  0x23   : > { %199 = vst [vmem:[%s4078_s23 + $0x130] sm:$0xff] %v198_v38  ;;  %v202_v40 = vld [vmem:[%s4073_s22 + $0x280] sm:$0xff]  ;;  %v204_v41 = vld [vmem:[%s4073_s22 + $0x288] sm:$0xff]  ;;  %201 = vst [vmem:[%s4078_s23 + $0x138] sm:$0xff] %v200_v39 }
  0x24   : > { %203 = vst [vmem:[%s4078_s23 + $0x140] sm:$0xff] %v202_v40  ;;  %205 = vst [vmem:[%s4078_s23 + $0x148] sm:$0xff] %v204_v41  ;;  %v206_v42 = vld [vmem:[%s4073_s22 + $0x2a0] sm:$0xff]  ;;  %v208_v43 = vld [vmem:[%s4073_s22 + $0x2a8] sm:$0xff] }
  0x25   : > { %v210_v44 = vld [vmem:[%s4073_s22 + $0x2c0] sm:$0xff]  ;;  %207 = vst [vmem:[%s4078_s23 + $0x150] sm:$0xff] %v206_v42  ;;  %209 = vst [vmem:[%s4078_s23 + $0x158] sm:$0xff] %v208_v43  ;;  %v212_v45 = vld [vmem:[%s4073_s22 + $0x2c8] sm:$0xff] }
  0x26   : > { %211 = vst [vmem:[%s4078_s23 + $0x160] sm:$0xff] %v210_v44  ;;  %v214_v46 = vld [vmem:[%s4073_s22 + $0x2e0] sm:$0xff]  ;;  %v216_v47 = vld [vmem:[%s4073_s22 + $0x2e8] sm:$0xff]  ;;  %213 = vst [vmem:[%s4078_s23 + $0x168] sm:$0xff] %v212_v45 }
  0x27   : > { %215 = vst [vmem:[%s4078_s23 + $0x170] sm:$0xff] %v214_v46  ;;  %217 = vst [vmem:[%s4078_s23 + $0x178] sm:$0xff] %v216_v47  ;;  %v218_v48 = vld [vmem:[%s4073_s22 + $0x300] sm:$0xff]  ;;  %v220_v49 = vld [vmem:[%s4073_s22 + $0x308] sm:$0xff] }
  0x28   : > { %v222_v50 = vld [vmem:[%s4073_s22 + $0x320] sm:$0xff]  ;;  %219 = vst [vmem:[%s4078_s23 + $0x180] sm:$0xff] %v218_v48  ;;  %221 = vst [vmem:[%s4078_s23 + $0x188] sm:$0xff] %v220_v49  ;;  %v224_v51 = vld [vmem:[%s4073_s22 + $0x328] sm:$0xff] }
  0x29   : > { %223 = vst [vmem:[%s4078_s23 + $0x190] sm:$0xff] %v222_v50  ;;  %v226_v52 = vld [vmem:[%s4073_s22 + $0x340] sm:$0xff]  ;;  %v228_v53 = vld [vmem:[%s4073_s22 + $0x348] sm:$0xff]  ;;  %225 = vst [vmem:[%s4078_s23 + $0x198] sm:$0xff] %v224_v51 }
  0x2a   : > { %227 = vst [vmem:[%s4078_s23 + $0x1a0] sm:$0xff] %v226_v52  ;;  %229 = vst [vmem:[%s4078_s23 + $0x1a8] sm:$0xff] %v228_v53  ;;  %v230_v54 = vld [vmem:[%s4073_s22 + $0x360] sm:$0xff]  ;;  %v232_v55 = vld [vmem:[%s4073_s22 + $0x368] sm:$0xff] }
  0x2b   : > { %v234_v56 = vld [vmem:[%s4073_s22 + $0x380] sm:$0xff]  ;;  %231 = vst [vmem:[%s4078_s23 + $0x1b0] sm:$0xff] %v230_v54  ;;  %233 = vst [vmem:[%s4078_s23 + $0x1b8] sm:$0xff] %v232_v55  ;;  %v236_v57 = vld [vmem:[%s4073_s22 + $0x388] sm:$0xff] }
  0x2c   : > { %235 = vst [vmem:[%s4078_s23 + $0x1c0] sm:$0xff] %v234_v56  ;;  %v238_v58 = vld [vmem:[%s4073_s22 + $0x3a0] sm:$0xff]  ;;  %v240_v59 = vld [vmem:[%s4073_s22 + $0x3a8] sm:$0xff]  ;;  %237 = vst [vmem:[%s4078_s23 + $0x1c8] sm:$0xff] %v236_v57 }
  0x2d   : > { %239 = vst [vmem:[%s4078_s23 + $0x1d0] sm:$0xff] %v238_v58  ;;  %241 = vst [vmem:[%s4078_s23 + $0x1d8] sm:$0xff] %v240_v59  ;;  %v242_v60 = vld [vmem:[%s4073_s22 + $0x3c0] sm:$0xff]  ;;  %v244_v61 = vld [vmem:[%s4073_s22 + $0x3c8] sm:$0xff] }
  0x2e   : > { %v246_v62 = vld [vmem:[%s4073_s22 + $0x3e0] sm:$0xff]  ;;  %243 = vst [vmem:[%s4078_s23 + $0x1e0] sm:$0xff] %v242_v60  ;;  %245 = vst [vmem:[%s4078_s23 + $0x1e8] sm:$0xff] %v244_v61  ;;  %v248_v63 = vld [vmem:[%s4073_s22 + $0x3e8] sm:$0xff] }
  0x2f   : > { %247 = vst [vmem:[%s4078_s23 + $0x1f0] sm:$0xff] %v246_v62  ;;  %v250_v0 = vld [vmem:[%s4073_s22 + $0x400] sm:$0xff]  ;;  %v252_v1 = vld [vmem:[%s4073_s22 + $0x408] sm:$0xff]  ;;  %249 = vst [vmem:[%s4078_s23 + $0x1f8] sm:$0xff] %v248_v63 }
  0x30   : > { %251 = vst [vmem:[%s4078_s23 + $0x200] sm:$0xff] %v250_v0  ;;  %253 = vst [vmem:[%s4078_s23 + $0x208] sm:$0xff] %v252_v1  ;;  %v254_v2 = vld [vmem:[%s4073_s22 + $0x420] sm:$0xff]  ;;  %v256_v3 = vld [vmem:[%s4073_s22 + $0x428] sm:$0xff] }
  0x31   : > { %v258_v4 = vld [vmem:[%s4073_s22 + $0x440] sm:$0xff]  ;;  %255 = vst [vmem:[%s4078_s23 + $0x210] sm:$0xff] %v254_v2  ;;  %257 = vst [vmem:[%s4078_s23 + $0x218] sm:$0xff] %v256_v3  ;;  %v260_v5 = vld [vmem:[%s4073_s22 + $0x448] sm:$0xff] }
  0x32   : > { %259 = vst [vmem:[%s4078_s23 + $0x220] sm:$0xff] %v258_v4  ;;  %v262_v6 = vld [vmem:[%s4073_s22 + $0x460] sm:$0xff]  ;;  %v264_v7 = vld [vmem:[%s4073_s22 + $0x468] sm:$0xff]  ;;  %261 = vst [vmem:[%s4078_s23 + $0x228] sm:$0xff] %v260_v5 }
  0x33   : > { %263 = vst [vmem:[%s4078_s23 + $0x230] sm:$0xff] %v262_v6  ;;  %265 = vst [vmem:[%s4078_s23 + $0x238] sm:$0xff] %v264_v7  ;;  %v266_v8 = vld [vmem:[%s4073_s22 + $0x480] sm:$0xff]  ;;  %v268_v9 = vld [vmem:[%s4073_s22 + $0x488] sm:$0xff] }
  0x34   : > { %v270_v10 = vld [vmem:[%s4073_s22 + $0x4a0] sm:$0xff]  ;;  %267 = vst [vmem:[%s4078_s23 + $0x240] sm:$0xff] %v266_v8  ;;  %269 = vst [vmem:[%s4078_s23 + $0x248] sm:$0xff] %v268_v9  ;;  %v272_v11 = vld [vmem:[%s4073_s22 + $0x4a8] sm:$0xff] }
  0x35   : > { %271 = vst [vmem:[%s4078_s23 + $0x250] sm:$0xff] %v270_v10  ;;  %v274_v12 = vld [vmem:[%s4073_s22 + $0x4c0] sm:$0xff]  ;;  %v276_v13 = vld [vmem:[%s4073_s22 + $0x4c8] sm:$0xff]  ;;  %273 = vst [vmem:[%s4078_s23 + $0x258] sm:$0xff] %v272_v11 }
  0x36   : > { %275 = vst [vmem:[%s4078_s23 + $0x260] sm:$0xff] %v274_v12  ;;  %277 = vst [vmem:[%s4078_s23 + $0x268] sm:$0xff] %v276_v13  ;;  %v278_v14 = vld [vmem:[%s4073_s22 + $0x4e0] sm:$0xff]  ;;  %v280_v15 = vld [vmem:[%s4073_s22 + $0x4e8] sm:$0xff] }
  0x37   : > { %v282_v16 = vld [vmem:[%s4073_s22 + $0x500] sm:$0xff]  ;;  %279 = vst [vmem:[%s4078_s23 + $0x270] sm:$0xff] %v278_v14  ;;  %281 = vst [vmem:[%s4078_s23 + $0x278] sm:$0xff] %v280_v15  ;;  %v284_v17 = vld [vmem:[%s4073_s22 + $0x508] sm:$0xff] }
  0x38   : > { %283 = vst [vmem:[%s4078_s23 + $0x280] sm:$0xff] %v282_v16  ;;  %v286_v18 = vld [vmem:[%s4073_s22 + $0x520] sm:$0xff]  ;;  %v288_v19 = vld [vmem:[%s4073_s22 + $0x528] sm:$0xff]  ;;  %285 = vst [vmem:[%s4078_s23 + $0x288] sm:$0xff] %v284_v17 }
  0x39   : > { %287 = vst [vmem:[%s4078_s23 + $0x290] sm:$0xff] %v286_v18  ;;  %289 = vst [vmem:[%s4078_s23 + $0x298] sm:$0xff] %v288_v19  ;;  %v290_v20 = vld [vmem:[%s4073_s22 + $0x540] sm:$0xff]  ;;  %v292_v21 = vld [vmem:[%s4073_s22 + $0x548] sm:$0xff] }
  0x3a   : > { %v294_v22 = vld [vmem:[%s4073_s22 + $0x560] sm:$0xff]  ;;  %291 = vst [vmem:[%s4078_s23 + $0x2a0] sm:$0xff] %v290_v20  ;;  %293 = vst [vmem:[%s4078_s23 + $0x2a8] sm:$0xff] %v292_v21  ;;  %v296_v23 = vld [vmem:[%s4073_s22 + $0x568] sm:$0xff] }
  0x3b   : > { %295 = vst [vmem:[%s4078_s23 + $0x2b0] sm:$0xff] %v294_v22  ;;  %v298_v24 = vld [vmem:[%s4073_s22 + $0x580] sm:$0xff]  ;;  %v300_v25 = vld [vmem:[%s4073_s22 + $0x588] sm:$0xff]  ;;  %297 = vst [vmem:[%s4078_s23 + $0x2b8] sm:$0xff] %v296_v23 }
  0x3c   : > { %299 = vst [vmem:[%s4078_s23 + $0x2c0] sm:$0xff] %v298_v24  ;;  %301 = vst [vmem:[%s4078_s23 + $0x2c8] sm:$0xff] %v300_v25  ;;  %v302_v26 = vld [vmem:[%s4073_s22 + $0x5a0] sm:$0xff]  ;;  %v304_v27 = vld [vmem:[%s4073_s22 + $0x5a8] sm:$0xff] }
  0x3d   : > { %v306_v28 = vld [vmem:[%s4073_s22 + $0x5c0] sm:$0xff]  ;;  %303 = vst [vmem:[%s4078_s23 + $0x2d0] sm:$0xff] %v302_v26  ;;  %305 = vst [vmem:[%s4078_s23 + $0x2d8] sm:$0xff] %v304_v27  ;;  %v308_v29 = vld [vmem:[%s4073_s22 + $0x5c8] sm:$0xff] }
  0x3e   : > { %307 = vst [vmem:[%s4078_s23 + $0x2e0] sm:$0xff] %v306_v28  ;;  %v310_v30 = vld [vmem:[%s4073_s22 + $0x5e0] sm:$0xff]  ;;  %v312_v31 = vld [vmem:[%s4073_s22 + $0x5e8] sm:$0xff]  ;;  %309 = vst [vmem:[%s4078_s23 + $0x2e8] sm:$0xff] %v308_v29 }
  0x3f   : > { %311 = vst [vmem:[%s4078_s23 + $0x2f0] sm:$0xff] %v310_v30  ;;  %313 = vst [vmem:[%s4078_s23 + $0x2f8] sm:$0xff] %v312_v31  ;;  %v314_v32 = vld [vmem:[%s4073_s22 + $0x600] sm:$0xff]  ;;  %v316_v33 = vld [vmem:[%s4073_s22 + $0x608] sm:$0xff] }
  0x40   : > { %v318_v34 = vld [vmem:[%s4073_s22 + $0x620] sm:$0xff]  ;;  %315 = vst [vmem:[%s4078_s23 + $0x300] sm:$0xff] %v314_v32  ;;  %317 = vst [vmem:[%s4078_s23 + $0x308] sm:$0xff] %v316_v33  ;;  %v320_v35 = vld [vmem:[%s4073_s22 + $0x628] sm:$0xff] }
  0x41   : > { %319 = vst [vmem:[%s4078_s23 + $0x310] sm:$0xff] %v318_v34  ;;  %v322_v36 = vld [vmem:[%s4073_s22 + $0x640] sm:$0xff]  ;;  %v324_v37 = vld [vmem:[%s4073_s22 + $0x648] sm:$0xff]  ;;  %321 = vst [vmem:[%s4078_s23 + $0x318] sm:$0xff] %v320_v35 }
  0x42   : > { %323 = vst [vmem:[%s4078_s23 + $0x320] sm:$0xff] %v322_v36  ;;  %325 = vst [vmem:[%s4078_s23 + $0x328] sm:$0xff] %v324_v37  ;;  %v326_v38 = vld [vmem:[%s4073_s22 + $0x660] sm:$0xff]  ;;  %v328_v39 = vld [vmem:[%s4073_s22 + $0x668] sm:$0xff] }
  0x43   : > { %v330_v40 = vld [vmem:[%s4073_s22 + $0x680] sm:$0xff]  ;;  %327 = vst [vmem:[%s4078_s23 + $0x330] sm:$0xff] %v326_v38  ;;  %329 = vst [vmem:[%s4078_s23 + $0x338] sm:$0xff] %v328_v39  ;;  %v332_v41 = vld [vmem:[%s4073_s22 + $0x688] sm:$0xff] }
  0x44   : > { %331 = vst [vmem:[%s4078_s23 + $0x340] sm:$0xff] %v330_v40  ;;  %v334_v42 = vld [vmem:[%s4073_s22 + $0x6a0] sm:$0xff]  ;;  %v336_v43 = vld [vmem:[%s4073_s22 + $0x6a8] sm:$0xff]  ;;  %333 = vst [vmem:[%s4078_s23 + $0x348] sm:$0xff] %v332_v41 }
  0x45   : > { %335 = vst [vmem:[%s4078_s23 + $0x350] sm:$0xff] %v334_v42  ;;  %337 = vst [vmem:[%s4078_s23 + $0x358] sm:$0xff] %v336_v43  ;;  %v338_v44 = vld [vmem:[%s4073_s22 + $0x6c0] sm:$0xff]  ;;  %v340_v45 = vld [vmem:[%s4073_s22 + $0x6c8] sm:$0xff] }
  0x46   : > { %v342_v46 = vld [vmem:[%s4073_s22 + $0x6e0] sm:$0xff]  ;;  %339 = vst [vmem:[%s4078_s23 + $0x360] sm:$0xff] %v338_v44  ;;  %341 = vst [vmem:[%s4078_s23 + $0x368] sm:$0xff] %v340_v45  ;;  %v344_v47 = vld [vmem:[%s4073_s22 + $0x6e8] sm:$0xff] }
  0x47   : > { %343 = vst [vmem:[%s4078_s23 + $0x370] sm:$0xff] %v342_v46  ;;  %v346_v48 = vld [vmem:[%s4073_s22 + $0x700] sm:$0xff]  ;;  %v348_v49 = vld [vmem:[%s4073_s22 + $0x708] sm:$0xff]  ;;  %345 = vst [vmem:[%s4078_s23 + $0x378] sm:$0xff] %v344_v47 }
  0x48   : > { %347 = vst [vmem:[%s4078_s23 + $0x380] sm:$0xff] %v346_v48  ;;  %349 = vst [vmem:[%s4078_s23 + $0x388] sm:$0xff] %v348_v49  ;;  %v350_v50 = vld [vmem:[%s4073_s22 + $0x720] sm:$0xff]  ;;  %v352_v51 = vld [vmem:[%s4073_s22 + $0x728] sm:$0xff] }
  0x49   : > { %v354_v52 = vld [vmem:[%s4073_s22 + $0x740] sm:$0xff]  ;;  %351 = vst [vmem:[%s4078_s23 + $0x390] sm:$0xff] %v350_v50  ;;  %353 = vst [vmem:[%s4078_s23 + $0x398] sm:$0xff] %v352_v51  ;;  %v356_v53 = vld [vmem:[%s4073_s22 + $0x748] sm:$0xff] }
  0x4a   : > { %355 = vst [vmem:[%s4078_s23 + $0x3a0] sm:$0xff] %v354_v52  ;;  %v358_v54 = vld [vmem:[%s4073_s22 + $0x760] sm:$0xff]  ;;  %v360_v55 = vld [vmem:[%s4073_s22 + $0x768] sm:$0xff]  ;;  %357 = vst [vmem:[%s4078_s23 + $0x3a8] sm:$0xff] %v356_v53 }
  0x4b   : > { %359 = vst [vmem:[%s4078_s23 + $0x3b0] sm:$0xff] %v358_v54  ;;  %361 = vst [vmem:[%s4078_s23 + $0x3b8] sm:$0xff] %v360_v55  ;;  %v362_v56 = vld [vmem:[%s4073_s22 + $0x780] sm:$0xff]  ;;  %v364_v57 = vld [vmem:[%s4073_s22 + $0x788] sm:$0xff] }
  0x4c   : > { %v366_v58 = vld [vmem:[%s4073_s22 + $0x7a0] sm:$0xff]  ;;  %363 = vst [vmem:[%s4078_s23 + $0x3c0] sm:$0xff] %v362_v56  ;;  %365 = vst [vmem:[%s4078_s23 + $0x3c8] sm:$0xff] %v364_v57  ;;  %v368_v59 = vld [vmem:[%s4073_s22 + $0x7a8] sm:$0xff] }
  0x4d   : > { %367 = vst [vmem:[%s4078_s23 + $0x3d0] sm:$0xff] %v366_v58  ;;  %v370_v60 = vld [vmem:[%s4073_s22 + $0x7c0] sm:$0xff]  ;;  %v372_v61 = vld [vmem:[%s4073_s22 + $0x7c8] sm:$0xff]  ;;  %369 = vst [vmem:[%s4078_s23 + $0x3d8] sm:$0xff] %v368_v59 }
  0x4e   : > { %371 = vst [vmem:[%s4078_s23 + $0x3e0] sm:$0xff] %v370_v60  ;;  %373 = vst [vmem:[%s4078_s23 + $0x3e8] sm:$0xff] %v372_v61  ;;  %v374_v62 = vld [vmem:[%s4073_s22 + $0x7e0] sm:$0xff]  ;;  %v376_v63 = vld [vmem:[%s4073_s22 + $0x7e8] sm:$0xff] }
  0x4f   : > { %375 = vst [vmem:[%s4078_s23 + $0x3f0] sm:$0xff] %v374_v62  ;;  %377 = vst [vmem:[%s4078_s23 + $0x3f8] sm:$0xff] %v376_v63 }
  0x50 PF: > { %p3256_p5 = scmp.ge.s32.totalorder %s4018_s11, 1  ;;  %p391_p6 = scmp.lt.s32.totalorder %s4018_s11, 3 }
  0x52   : > { %p392_p7 = pnand %p3256_p5, %p391_p6 }
  0x53   : > { %s398_s24 = sand.u32 (!%p392_p7), 1, %s4010_s9   ;;  %s3258_s25 = sshll.u32 (!%p392_p7), %s4053_s12, 6 }
  0x54   : > { %395 = sbr.rel (%p392_p7) target bundleno = 1026 (0x402), region = 47  ;;  %s3257_s26 = sshll.u32 (!%p392_p7), %s398_s24, 10 }
  0x55   : > { %p421_p8 = scmp.lt.s32.totalorder (!%p392_p7), %s3258_s25, 127  ;;  %s4342_s3 = scalar_lea.vmem (!%p392_p7), [#allocation3], %s3257_s26 }
  0x56   : > { %p3260_p9 = scmp.ne.s32.totalorder (!%p392_p7), %s4053_s12, 0 }
  0x59   : > { %s5449_s25 = smov (!%p421_p8, %s3258_s25), 127  ;;  %430 = sbr.rel (%p3260_p9) target bundleno = 127 (0x7f), region = 55 }
  0x5a   : > { %s3259_s27 = sshll.u32 %s5449_s25, 2 }
  0x5b   : > { %s4340_s30 = scalar_lea.vmem %s5341_s1, %s3259_s27 }
  0x5e   : > { %v4020_v0 = vmov 0.0  }
  0x5f   : > { %431 = vst [vmem:[#allocation2 + $0xb0] sm:$0xff] %v4020_v0  ;;  %432 = vst [vmem:[#allocation2 + $0x1b0] sm:$0xff] %v4020_v0 }
  0x60   : > { %433 = vst [vmem:[#allocation2 + $0xd8] sm:$0xff] %v4020_v0  ;;  %434 = vst [vmem:[#allocation2 + $0x18] sm:$0xff] %v4020_v0 }
  0x61   : > { %435 = vst [vmem:[#allocation2 + $0x50] sm:$0xff] %v4020_v0  ;;  %436 = vst [vmem:[#allocation2 + $0x168] sm:$0xff] %v4020_v0 }
  0x62   : > { %437 = vst [vmem:[#allocation2 + $0x130] sm:$0xff] %v4020_v0  ;;  %438 = vst [vmem:[#allocation2 + $0x48] sm:$0xff] %v4020_v0 }
  0x63   : > { %439 = vst [vmem:[#allocation2 + $0x180] sm:$0xff] %v4020_v0  ;;  %440 = vst [vmem:[#allocation2 + $0x110] sm:$0xff] %v4020_v0 }
  0x64   : > { %441 = vst [vmem:[#allocation2 + $0x118] sm:$0xff] %v4020_v0  ;;  %442 = vst [vmem:[#allocation2 + $0x98] sm:$0xff] %v4020_v0 }
  0x65   : > { %443 = vst [vmem:[#allocation2 + $0x120] sm:$0xff] %v4020_v0  ;;  %444 = vst [vmem:[#allocation2 + $0x150] sm:$0xff] %v4020_v0 }
  0x66   : > { %445 = vst [vmem:[#allocation2 + $0x108] sm:$0xff] %v4020_v0  ;;  %446 = vst [vmem:[#allocation2 + $0x60] sm:$0xff] %v4020_v0 }
  0x67   : > { %447 = vst [vmem:[#allocation2 + $0xe0] sm:$0xff] %v4020_v0  ;;  %448 = vst [vmem:[#allocation2 + $0x188] sm:$0xff] %v4020_v0 }
  0x68   : > { %449 = vst [vmem:[#allocation2 + $0x138] sm:$0xff] %v4020_v0  ;;  %450 = vst [vmem:[#allocation2 + $0x140] sm:$0xff] %v4020_v0 }
  0x69   : > { %451 = vst [vmem:[#allocation2 + $0x80] sm:$0xff] %v4020_v0  ;;  %452 = vst [vmem:[#allocation2 + $0x1a8] sm:$0xff] %v4020_v0 }
  0x6a   : > { %453 = vst [vmem:[#allocation2 + $0x1b8] sm:$0xff] %v4020_v0  ;;  %454 = vst [vmem:[#allocation2 + $0x28] sm:$0xff] %v4020_v0 }
  0x6b   : > { %455 = vst [vmem:[#allocation2 + $0x1e8] sm:$0xff] %v4020_v0  ;;  %456 = vst [vmem:[#allocation2 + $0xf8] sm:$0xff] %v4020_v0 }
  0x6c   : > { %457 = vst [vmem:[#allocation2 + $0x160] sm:$0xff] %v4020_v0  ;;  %458 = vst [vmem:[#allocation2 + $0x30] sm:$0xff] %v4020_v0 }
  0x6d   : > { %459 = vst [vmem:[#allocation2 + $0x1e0] sm:$0xff] %v4020_v0  ;;  %460 = vst [vmem:[#allocation2] sm:$0xff] %v4020_v0 }
  0x6e   : > { %461 = vst [vmem:[#allocation2 + $0xf0] sm:$0xff] %v4020_v0  ;;  %462 = vst [vmem:[#allocation2 + $0x8] sm:$0xff] %v4020_v0 }
  0x6f   : > { %463 = vst [vmem:[#allocation2 + $0x148] sm:$0xff] %v4020_v0  ;;  %464 = vst [vmem:[#allocation2 + $0x1d0] sm:$0xff] %v4020_v0 }
  0x70   : > { %465 = vst [vmem:[#allocation2 + $0x100] sm:$0xff] %v4020_v0  ;;  %466 = vst [vmem:[#allocation2 + $0xc8] sm:$0xff] %v4020_v0 }
  0x71   : > { %467 = vst [vmem:[#allocation2 + $0x40] sm:$0xff] %v4020_v0  ;;  %468 = vst [vmem:[#allocation2 + $0x1f8] sm:$0xff] %v4020_v0 }
  0x72   : > { %469 = vst [vmem:[#allocation2 + $0x20] sm:$0xff] %v4020_v0  ;;  %470 = vst [vmem:[#allocation2 + $0x128] sm:$0xff] %v4020_v0 }
  0x73   : > { %471 = vst [vmem:[#allocation2 + $0x1a0] sm:$0xff] %v4020_v0  ;;  %472 = vst [vmem:[#allocation2 + $0x1f0] sm:$0xff] %v4020_v0 }
  0x74   : > { %473 = vst [vmem:[#allocation2 + $0xe8] sm:$0xff] %v4020_v0  ;;  %474 = vst [vmem:[#allocation2 + $0x78] sm:$0xff] %v4020_v0 }
  0x75   : > { %475 = vst [vmem:[#allocation2 + $0x70] sm:$0xff] %v4020_v0  ;;  %476 = vst [vmem:[#allocation2 + $0x90] sm:$0xff] %v4020_v0 }
  0x76   : > { %477 = vst [vmem:[#allocation2 + $0x1d8] sm:$0xff] %v4020_v0  ;;  %478 = vst [vmem:[#allocation2 + $0xd0] sm:$0xff] %v4020_v0 }
  0x77   : > { %479 = vst [vmem:[#allocation2 + $0xb8] sm:$0xff] %v4020_v0  ;;  %480 = vst [vmem:[#allocation2 + $0x88] sm:$0xff] %v4020_v0 }
  0x78   : > { %481 = vst [vmem:[#allocation2 + $0xa8] sm:$0xff] %v4020_v0  ;;  %482 = vst [vmem:[#allocation2 + $0x1c8] sm:$0xff] %v4020_v0 }
  0x79   : > { %483 = vst [vmem:[#allocation2 + $0x170] sm:$0xff] %v4020_v0  ;;  %484 = vst [vmem:[#allocation2 + $0x178] sm:$0xff] %v4020_v0 }
  0x7a   : > { %485 = vst [vmem:[#allocation2 + $0x68] sm:$0xff] %v4020_v0  ;;  %486 = vst [vmem:[#allocation2 + $0x190] sm:$0xff] %v4020_v0 }
  0x7b   : > { %487 = vst [vmem:[#allocation2 + $0x198] sm:$0xff] %v4020_v0  ;;  %488 = vst [vmem:[#allocation2 + $0x38] sm:$0xff] %v4020_v0 }
  0x7c   : > { %489 = vst [vmem:[#allocation2 + $0xc0] sm:$0xff] %v4020_v0  ;;  %490 = vst [vmem:[#allocation2 + $0x1c0] sm:$0xff] %v4020_v0 }
  0x7d   : > { %491 = vst [vmem:[#allocation2 + $0x158] sm:$0xff] %v4020_v0  ;;  %492 = vst [vmem:[#allocation2 + $0x10] sm:$0xff] %v4020_v0 }
  0x7e   : > { %493 = vst [vmem:[#allocation2 + $0x58] sm:$0xff] %v4020_v0  ;;  %494 = vst [vmem:[#allocation2 + $0xa0] sm:$0xff] %v4020_v0 }
  0x7f PF: > { %v3770_v1 = vld [vmem:[%s4340_s30 + $0x38] sm:$0xff]   ;;  %v4021_v2 = vmov 0   ;;  %v3772_v4 = vld [vmem:[%s4340_s30 + $0x30] sm:$0xff]   ;;  %v3774_v6 = vld [vmem:[%s4340_s30 + $0x28] sm:$0xff]   ;;  %p3421_p10 = scmp.ne.s32.totalorder %s4053_s12, 1 }
  0x80   : > { %1583 = vmatprep.subr.bf16.mxu0 %v4021_v2  ;;  %1872 = vmatprep.subr.bf16.mxu1 %v4021_v2  ;;  %v3771_v3 = vld [vmem:[%s4340_s30 + $0xb8] sm:$0xff]   ;;  %v3773_v5 = vld [vmem:[%s4340_s30 + $0xb0] sm:$0xff]   ;;  %v3775_v7 = vld [vmem:[%s4340_s30 + $0xa8] sm:$0xff]  }
  0x81   : > { %1584 = vmatpush1.bf16.msra.mxu0 %v3770_v1  ;;  %1873 = vmatpush1.bf16.msra.mxu1 %v3771_v3  ;;  %v3776_v8 = vld [vmem:[%s4340_s30 + $0x20] sm:$0xff]   ;;  %v3778_v10 = vld [vmem:[%s4340_s30 + $0x18] sm:$0xff]   ;;  %v3780_v12 = vld [vmem:[%s4340_s30 + $0x10] sm:$0xff]  }
  0x82   : > { %1585 = vmatprep.subr.bf16.mxu0 %v4021_v2  ;;  %1874 = vmatprep.subr.bf16.mxu1 %v4021_v2  ;;  %v3777_v9 = vld [vmem:[%s4340_s30 + $0xa0] sm:$0xff]   ;;  %v3779_v11 = vld [vmem:[%s4340_s30 + $0x98] sm:$0xff]   ;;  %v3781_v13 = vld [vmem:[%s4340_s30 + $0x90] sm:$0xff]  }
  0x83   : > { %v3782_v14 = vld [vmem:[%s4340_s30 + $0x8] sm:$0xff]   ;;  %v3784_v16 = vld [vmem:[%s4340_s30] sm:$0xff]   ;;  %v3786_v18 = vld [vmem:[%s4340_s30 + $0x78] sm:$0xff]  }
  0x84   : > { %v3783_v15 = vld [vmem:[%s4340_s30 + $0x88] sm:$0xff]   ;;  %v3785_v17 = vld [vmem:[%s4340_s30 + $0x80] sm:$0xff]   ;;  %v3787_v19 = vld [vmem:[%s4340_s30 + $0xf8] sm:$0xff]  }
  0x85   : > { %1586 = vmatpush1.bf16.msra.mxu0 %v3772_v4  ;;  %1875 = vmatpush1.bf16.msra.mxu1 %v3773_v5  ;;  %v3804_v20 = vld [vmem:[%s4342_s3 + $0x4] ss:$16 sps:$4 sm:$0xff]   ;;  %v3807_v22 = vld [vmem:[%s4342_s3 + $0xc] ss:$16 sps:$4 sm:$0xff]   ;;  %v3802_v36 = vld [vmem:[%s4342_s3] ss:$16 sps:$4 sm:$0xff]  }
  0x86   : > { %1587 = vmatprep.subr.bf16.mxu0 %v4021_v2  ;;  %1876 = vmatprep.subr.bf16.mxu1 %v4021_v2  ;;  %v3788_v21 = vld [vmem:[%s4340_s30 + $0x70] sm:$0xff]   ;;  %v3790_v24 = vld [vmem:[%s4340_s30 + $0x68] sm:$0xff]   ;;  %v3792_v26 = vld [vmem:[%s4340_s30 + $0x60] sm:$0xff]  }
  0x87   : > { %v3789_v23 = vld [vmem:[%s4340_s30 + $0xf0] sm:$0xff]   ;;  %1615 = vmatprep.mubr.bf16.mxu0 %v3804_v20  ;;  %1904 = vmatprep.mubr.bf16.mxu1 %v3807_v22  ;;  %v3791_v25 = vld [vmem:[%s4340_s30 + $0xe8] sm:$0xff]   ;;  %v3793_v27 = vld [vmem:[%s4340_s30 + $0xe0] sm:$0xff]  }
  0x88   : > { %v3794_v28 = vld [vmem:[%s4340_s30 + $0x58] sm:$0xff]   ;;  %v3796_v30 = vld [vmem:[%s4340_s30 + $0x50] sm:$0xff]   ;;  %v3798_v32 = vld [vmem:[%s4340_s30 + $0x48] sm:$0xff]  }
  0x89   : > { %1588 = vmatpush1.bf16.msra.mxu0 %v3774_v6  ;;  %1877 = vmatpush1.bf16.msra.mxu1 %v3775_v7  ;;  %v3795_v29 = vld [vmem:[%s4340_s30 + $0xd8] sm:$0xff]   ;;  %v3797_v31 = vld [vmem:[%s4340_s30 + $0xd0] sm:$0xff]   ;;  %v3799_v33 = vld [vmem:[%s4340_s30 + $0xc8] sm:$0xff]  }
  0x8a   : > { %1589 = vmatprep.subr.bf16.mxu0 %v4021_v2  ;;  %1878 = vmatprep.subr.bf16.mxu1 %v4021_v2  ;;  %v3800_v34 = vld [vmem:[%s4340_s30 + $0x40] sm:$0xff]   ;;  %v3805_v37 = vld [vmem:[%s4342_s3 + $0x8] ss:$16 sps:$4 sm:$0xff]   ;;  %v3810_v39 = vld [vmem:[%s4342_s3 + $0x2c] ss:$16 sps:$4 sm:$0xff]  }
  0x8b   : > { %v3801_v35 = vld [vmem:[%s4340_s30 + $0xc0] sm:$0xff]   ;;  %v3813_v41 = vld [vmem:[%s4342_s3 + $0x28] ss:$16 sps:$4 sm:$0xff]   ;;  %v3816_v43 = vld [vmem:[%s4342_s3 + $0x4c] ss:$16 sps:$4 sm:$0xff]  }
  0x8c   : > { %v3808_v38 = vld [vmem:[%s4342_s3 + $0x24] ss:$16 sps:$4 sm:$0xff]   ;;  %v3812_v40 = vld [vmem:[%s4342_s3 + $0x20] ss:$16 sps:$4 sm:$0xff]   ;;  %v3819_v45 = vld [vmem:[%s4342_s3 + $0x48] ss:$16 sps:$4 sm:$0xff]  }
  0x8d   : > { %1590 = vmatpush1.bf16.msra.mxu0 %v3776_v8  ;;  %1879 = vmatpush1.bf16.msra.mxu1 %v3777_v9  ;;  %v3814_v42 = vld [vmem:[%s4342_s3 + $0x44] ss:$16 sps:$4 sm:$0xff]   ;;  %v3818_v44 = vld [vmem:[%s4342_s3 + $0x40] ss:$16 sps:$4 sm:$0xff]   ;;  %v3822_v47 = vld [vmem:[%s4342_s3 + $0x6c] ss:$16 sps:$4 sm:$0xff]  }
  0x8e   : > { %1591 = vmatprep.subr.bf16.mxu0 %v4021_v2  ;;  %1880 = vmatprep.subr.bf16.mxu1 %v4021_v2  ;;  %v3820_v46 = vld [vmem:[%s4342_s3 + $0x64] ss:$16 sps:$4 sm:$0xff]   ;;  %v3824_v48 = vld [vmem:[%s4342_s3 + $0x60] ss:$16 sps:$4 sm:$0xff]   ;;  %v3825_v49 = vld [vmem:[%s4342_s3 + $0x68] ss:$16 sps:$4 sm:$0xff]  }
  0x8f   : > { %v3826_v50 = vld [vmem:[%s4342_s3 + $0x84] ss:$16 sps:$4 sm:$0xff]   ;;  %v3828_v51 = vld [vmem:[%s4342_s3 + $0x8c] ss:$16 sps:$4 sm:$0xff]   ;;  %v3830_v52 = vld [vmem:[%s4342_s3 + $0x80] ss:$16 sps:$4 sm:$0xff]  }
  0x90   : > { %v3831_v53 = vld [vmem:[%s4342_s3 + $0x88] ss:$16 sps:$4 sm:$0xff]   ;;  %v3832_v54 = vld [vmem:[%s4342_s3 + $0xa4] ss:$16 sps:$4 sm:$0xff]   ;;  %v3834_v55 = vld [vmem:[%s4342_s3 + $0xac] ss:$16 sps:$4 sm:$0xff]  }
  0x91   : > { %1592 = vmatpush1.bf16.msra.mxu0 %v3778_v10  ;;  %1881 = vmatpush1.bf16.msra.mxu1 %v3779_v11  ;;  %v3836_v56 = vld [vmem:[%s4342_s3 + $0xa0] ss:$16 sps:$4 sm:$0xff]   ;;  %v3837_v57 = vld [vmem:[%s4342_s3 + $0xa8] ss:$16 sps:$4 sm:$0xff]   ;;  %v3838_v58 = vld [vmem:[%s4342_s3 + $0xc4] ss:$16 sps:$4 sm:$0xff]  }
  0x92   : > { %1593 = vmatprep.subr.bf16.mxu0 %v4021_v2  ;;  %1882 = vmatprep.subr.bf16.mxu1 %v4021_v2  ;;  %v3840_v59 = vld [vmem:[%s4342_s3 + $0xcc] ss:$16 sps:$4 sm:$0xff]   ;;  %v3842_v60 = vld [vmem:[%s4342_s3 + $0xc0] ss:$16 sps:$4 sm:$0xff]   ;;  %v3843_v61 = vld [vmem:[%s4342_s3 + $0xc8] ss:$16 sps:$4 sm:$0xff]  }
  0x93   : > { %v3844_v62 = vld [vmem:[%s4342_s3 + $0xe4] ss:$16 sps:$4 sm:$0xff]   ;;  %v3846_v63 = vld [vmem:[%s4342_s3 + $0xec] ss:$16 sps:$4 sm:$0xff]   ;;  %v3848_v0 = vld [vmem:[%s4342_s3 + $0xe0] ss:$16 sps:$4 sm:$0xff]  }
  0x94   : > { %v3849_v1 = vld [vmem:[%s4342_s3 + $0xe8] ss:$16 sps:$4 sm:$0xff]   ;;  %v3852_v3 = vld [vmem:[%s4342_s3 + $0x10c] ss:$16 sps:$4 sm:$0xff]   ;;  %v3854_v4 = vld [vmem:[%s4342_s3 + $0x100] ss:$16 sps:$4 sm:$0xff]  }
  0x95   : > { %1594 = vmatpush1.bf16.msra.mxu0 %v3780_v12  ;;  %1883 = vmatpush1.bf16.msra.mxu1 %v3781_v13  ;;  %v3855_v5 = vld [vmem:[%s4342_s3 + $0x108] ss:$16 sps:$4 sm:$0xff]   ;;  %v3856_v6 = vld [vmem:[%s4342_s3 + $0x124] ss:$16 sps:$4 sm:$0xff]   ;;  %v3858_v7 = vld [vmem:[%s4342_s3 + $0x12c] ss:$16 sps:$4 sm:$0xff]  }
  0x96   : > { %1595 = vmatprep.subr.bf16.mxu0 %v4021_v2  ;;  %1884 = vmatprep.subr.bf16.mxu1 %v4021_v2  ;;  %v3860_v8 = vld [vmem:[%s4342_s3 + $0x120] ss:$16 sps:$4 sm:$0xff]   ;;  %v3861_v9 = vld [vmem:[%s4342_s3 + $0x128] ss:$16 sps:$4 sm:$0xff]   ;;  %v3862_v10 = vld [vmem:[%s4342_s3 + $0x144] ss:$16 sps:$4 sm:$0xff]  }
  0x97   : > { %v3864_v11 = vld [vmem:[%s4342_s3 + $0x14c] ss:$16 sps:$4 sm:$0xff]   ;;  %v3866_v12 = vld [vmem:[%s4342_s3 + $0x140] ss:$16 sps:$4 sm:$0xff]   ;;  %v3867_v13 = vld [vmem:[%s4342_s3 + $0x148] ss:$16 sps:$4 sm:$0xff]  }
  0x98   : > { %v3878_v20 = vld [vmem:[%s4342_s3 + $0x180] ss:$16 sps:$4 sm:$0xff]   ;;  %v3880_v22 = vld [vmem:[%s4342_s3 + $0x1a4] ss:$16 sps:$4 sm:$0xff]  }
  0x99   : > { %1596 = vmatpush1.bf16.msra.mxu0 %v3782_v14  ;;  %1885 = vmatpush1.bf16.msra.mxu1 %v3783_v15  ;;  %v3868_v14 = vld [vmem:[%s4342_s3 + $0x164] ss:$16 sps:$4 sm:$0xff]   ;;  %v3870_v15 = vld [vmem:[%s4342_s3 + $0x16c] ss:$16 sps:$4 sm:$0xff]  }
  0x9a   : > { %1597 = vmatprep.subr.bf16.mxu0 %v4021_v2  ;;  %1886 = vmatprep.subr.bf16.mxu1 %v4021_v2 }
  0x9d   : > { %1598 = vmatpush1.bf16.msra.mxu0 %v3784_v16  ;;  %1887 = vmatpush1.bf16.msra.mxu1 %v3785_v17  ;;  %v3872_v16 = vld [vmem:[%s4342_s3 + $0x160] ss:$16 sps:$4 sm:$0xff]   ;;  %v3873_v17 = vld [vmem:[%s4342_s3 + $0x168] ss:$16 sps:$4 sm:$0xff]  }
  0x9e   : > { %1599 = vmatprep.subr.bf16.mxu0 %v4021_v2  ;;  %1888 = vmatprep.subr.bf16.mxu1 %v4021_v2 }
  0xa1   : > { %1600 = vmatpush2.bf16.msra.mxu0 %v3786_v18  ;;  %1889 = vmatpush2.bf16.msra.mxu1 %v3787_v19  ;;  %v3874_v18 = vld [vmem:[%s4342_s3 + $0x184] ss:$16 sps:$4 sm:$0xff]   ;;  %v3876_v19 = vld [vmem:[%s4342_s3 + $0x18c] ss:$16 sps:$4 sm:$0xff]  }
  0xa2   : > { %1601 = vmatprep.subr.bf16.mxu0 %v4021_v2  ;;  %1890 = vmatprep.subr.bf16.mxu1 %v4021_v2 }
  0xa5   : > { %1602 = vmatpush2.bf16.msra.mxu0 %v3788_v21  ;;  %1891 = vmatpush2.bf16.msra.mxu1 %v3789_v23  ;;  %v3879_v21 = vld [vmem:[%s4342_s3 + $0x188] ss:$16 sps:$4 sm:$0xff]   ;;  %v3882_v23 = vld [vmem:[%s4342_s3 + $0x1ac] ss:$16 sps:$4 sm:$0xff]  }
  0xa6   : > { %1603 = vmatprep.subr.bf16.mxu0 %v4021_v2  ;;  %1892 = vmatprep.subr.bf16.mxu1 %v4021_v2 }
  0xa9   : > { %1604 = vmatpush2.bf16.msra.mxu0 %v3790_v24  ;;  %1893 = vmatpush2.bf16.msra.mxu1 %v3791_v25  ;;  %v3884_v24 = vld [vmem:[%s4342_s3 + $0x1a0] ss:$16 sps:$4 sm:$0xff]   ;;  %v3885_v25 = vld [vmem:[%s4342_s3 + $0x1a8] ss:$16 sps:$4 sm:$0xff]  }
  0xaa   : > { %1605 = vmatprep.subr.bf16.mxu0 %v4021_v2  ;;  %1894 = vmatprep.subr.bf16.mxu1 %v4021_v2 }
  0xad   : > { %1606 = vmatpush2.bf16.msra.mxu0 %v3792_v26  ;;  %1895 = vmatpush2.bf16.msra.mxu1 %v3793_v27  ;;  %v3886_v26 = vld [vmem:[%s4342_s3 + $0x1c4] ss:$16 sps:$4 sm:$0xff]   ;;  %v3888_v27 = vld [vmem:[%s4342_s3 + $0x1cc] ss:$16 sps:$4 sm:$0xff]  }
  0xae   : > { %1607 = vmatprep.subr.bf16.mxu0 %v4021_v2  ;;  %1896 = vmatprep.subr.bf16.mxu1 %v4021_v2 }
  0xb1   : > { %1608 = vmatpush2.bf16.msra.mxu0 %v3794_v28  ;;  %1897 = vmatpush2.bf16.msra.mxu1 %v3795_v29  ;;  %v3890_v28 = vld [vmem:[%s4342_s3 + $0x1c0] ss:$16 sps:$4 sm:$0xff]   ;;  %v3891_v29 = vld [vmem:[%s4342_s3 + $0x1c8] ss:$16 sps:$4 sm:$0xff]  }
  0xb2   : > { %1609 = vmatprep.subr.bf16.mxu0 %v4021_v2  ;;  %1898 = vmatprep.subr.bf16.mxu1 %v4021_v2 }
  0xb5   : > { %1610 = vmatpush2.bf16.msra.mxu0 %v3796_v30  ;;  %1899 = vmatpush2.bf16.msra.mxu1 %v3797_v31  ;;  %v3892_v30 = vld [vmem:[%s4342_s3 + $0x1e4] ss:$16 sps:$4 sm:$0xff]   ;;  %v3894_v31 = vld [vmem:[%s4342_s3 + $0x1ec] ss:$16 sps:$4 sm:$0xff]  }
  0xb6   : > { %1611 = vmatprep.subr.bf16.mxu0 %v4021_v2  ;;  %1900 = vmatprep.subr.bf16.mxu1 %v4021_v2 }
  0xb9   : > { %1612 = vmatpush2.bf16.msra.mxu0 %v3798_v32  ;;  %1901 = vmatpush2.bf16.msra.mxu1 %v3799_v33  ;;  %v3896_v32 = vld [vmem:[%s4342_s3 + $0x1e0] ss:$16 sps:$4 sm:$0xff]   ;;  %v3897_v33 = vld [vmem:[%s4342_s3 + $0x1e8] ss:$16 sps:$4 sm:$0xff]  }
  0xba   : > { %1613 = vmatprep.subr.bf16.mxu0 %v4021_v2  ;;  %1902 = vmatprep.subr.bf16.mxu1 %v4021_v2  ;;  %v3850_v2 = vld [vmem:[%s4342_s3 + $0x104] ss:$16 sps:$4 sm:$0xff]  }
  0xbd   : > { %1614 = vmatpush2.bf16.msra.mxu0 %v3800_v34  ;;  %1903 = vmatpush2.bf16.msra.mxu1 %v3801_v35  ;;  %v3898_v34 = vld [vmem:[%s4342_s3 + $0x204] ss:$16 sps:$4 sm:$0xff]   ;;  %v3900_v35 = vld [vmem:[%s4342_s3 + $0x20c] ss:$16 sps:$4 sm:$0xff]  }
  0xc0   : > { %1616 = vmatmul.mubr.bf16.vlgmr.msra.gmra.mxu0 %v3802_v36  ;;  %1905 = vmatmul.mubr.bf16.vlgmr.msra.gmra.mxu1 %v3805_v37  ;;  %v3902_v36 = vld [vmem:[%s4342_s3 + $0x200] ss:$16 sps:$4 sm:$0xff]   ;;  %v3903_v37 = vld [vmem:[%s4342_s3 + $0x208] ss:$16 sps:$4 sm:$0xff]  }
  0xc1   : > { %1623 = vmatprep.mubr.bf16.mxu0 %v3808_v38  ;;  %1912 = vmatprep.mubr.bf16.mxu1 %v3810_v39  ;;  %v3904_v38 = vld [vmem:[%s4342_s3 + $0x224] ss:$16 sps:$4 sm:$0xff]   ;;  %v3906_v39 = vld [vmem:[%s4342_s3 + $0x22c] ss:$16 sps:$4 sm:$0xff]  }
  0xc8   : > { %1624 = vmatmul.mubr.bf16.gmra.mxu0 %v3812_v40  ;;  %1913 = vmatmul.mubr.bf16.gmra.mxu1 %v3813_v41  ;;  %v3908_v40 = vld [vmem:[%s4342_s3 + $0x220] ss:$16 sps:$4 sm:$0xff]   ;;  %v3909_v41 = vld [vmem:[%s4342_s3 + $0x228] ss:$16 sps:$4 sm:$0xff]  }
  0xc9   : > { %1631 = vmatprep.mubr.bf16.mxu0 %v3814_v42  ;;  %1920 = vmatprep.mubr.bf16.mxu1 %v3816_v43  ;;  %v3910_v42 = vld [vmem:[%s4342_s3 + $0x244] ss:$16 sps:$4 sm:$0xff]   ;;  %v3912_v43 = vld [vmem:[%s4342_s3 + $0x24c] ss:$16 sps:$4 sm:$0xff]  }
  0xd0   : > { %1632 = vmatmul.mubr.bf16.gmra.mxu0 %v3818_v44  ;;  %1921 = vmatmul.mubr.bf16.gmra.mxu1 %v3819_v45  ;;  %v3914_v44 = vld [vmem:[%s4342_s3 + $0x240] ss:$16 sps:$4 sm:$0xff]   ;;  %v3915_v45 = vld [vmem:[%s4342_s3 + $0x248] ss:$16 sps:$4 sm:$0xff]  }
  0xd1   : > { %1639 = vmatprep.mubr.bf16.mxu0 %v3820_v46  ;;  %1928 = vmatprep.mubr.bf16.mxu1 %v3822_v47  ;;  %v3916_v46 = vld [vmem:[%s4342_s3 + $0x264] ss:$16 sps:$4 sm:$0xff]   ;;  %v3918_v47 = vld [vmem:[%s4342_s3 + $0x26c] ss:$16 sps:$4 sm:$0xff]  }
  0xd8   : > { %1640 = vmatmul.mubr.bf16.gmra.mxu0 %v3824_v48  ;;  %1929 = vmatmul.mubr.bf16.gmra.mxu1 %v3825_v49  ;;  %v3920_v48 = vld [vmem:[%s4342_s3 + $0x260] ss:$16 sps:$4 sm:$0xff]   ;;  %v3921_v49 = vld [vmem:[%s4342_s3 + $0x268] ss:$16 sps:$4 sm:$0xff]  }
  0xd9   : > { %1647 = vmatprep.mubr.bf16.mxu0 %v3826_v50  ;;  %1936 = vmatprep.mubr.bf16.mxu1 %v3828_v51  ;;  %v3922_v50 = vld [vmem:[%s4342_s3 + $0x284] ss:$16 sps:$4 sm:$0xff]   ;;  %v3924_v51 = vld [vmem:[%s4342_s3 + $0x28c] ss:$16 sps:$4 sm:$0xff]  }
  0xe0   : > { %1648 = vmatmul.mubr.bf16.gmra.mxu0 %v3830_v52  ;;  %1937 = vmatmul.mubr.bf16.gmra.mxu1 %v3831_v53  ;;  %v3926_v52 = vld [vmem:[%s4342_s3 + $0x280] ss:$16 sps:$4 sm:$0xff]   ;;  %v3927_v53 = vld [vmem:[%s4342_s3 + $0x288] ss:$16 sps:$4 sm:$0xff]  }
  0xe1   : > { %1655 = vmatprep.mubr.bf16.mxu0 %v3832_v54  ;;  %1944 = vmatprep.mubr.bf16.mxu1 %v3834_v55  ;;  %v3928_v54 = vld [vmem:[%s4342_s3 + $0x2a4] ss:$16 sps:$4 sm:$0xff]   ;;  %v3930_v55 = vld [vmem:[%s4342_s3 + $0x2ac] ss:$16 sps:$4 sm:$0xff]  }
  0xe8   : > { %1656 = vmatmul.mubr.bf16.gmra.mxu0 %v3836_v56  ;;  %1945 = vmatmul.mubr.bf16.gmra.mxu1 %v3837_v57  ;;  %v3932_v56 = vld [vmem:[%s4342_s3 + $0x2a0] ss:$16 sps:$4 sm:$0xff]   ;;  %v3933_v57 = vld [vmem:[%s4342_s3 + $0x2a8] ss:$16 sps:$4 sm:$0xff]  }
  0xe9   : > { %1663 = vmatprep.mubr.bf16.mxu0 %v3838_v58  ;;  %1952 = vmatprep.mubr.bf16.mxu1 %v3840_v59  ;;  %v3934_v58 = vld [vmem:[%s4342_s3 + $0x2c4] ss:$16 sps:$4 sm:$0xff]   ;;  %v3936_v59 = vld [vmem:[%s4342_s3 + $0x2cc] ss:$16 sps:$4 sm:$0xff]  }
  0xf0   : > { %1664 = vmatmul.mubr.bf16.gmra.mxu0 %v3842_v60  ;;  %1953 = vmatmul.mubr.bf16.gmra.mxu1 %v3843_v61  ;;  %v3938_v60 = vld [vmem:[%s4342_s3 + $0x2c0] ss:$16 sps:$4 sm:$0xff]   ;;  %v3939_v61 = vld [vmem:[%s4342_s3 + $0x2c8] ss:$16 sps:$4 sm:$0xff]  }
  0xf1   : > { %1671 = vmatprep.mubr.bf16.mxu0 %v3844_v62  ;;  %1960 = vmatprep.mubr.bf16.mxu1 %v3846_v63  ;;  %v3940_v62 = vld [vmem:[%s4342_s3 + $0x2e4] ss:$16 sps:$4 sm:$0xff]   ;;  %v3942_v63 = vld [vmem:[%s4342_s3 + $0x2ec] ss:$16 sps:$4 sm:$0xff]  }
  0xf8   : > { %1672 = vmatmul.mubr.bf16.gmra.mxu0 %v3848_v0  ;;  %1961 = vmatmul.mubr.bf16.gmra.mxu1 %v3849_v1  ;;  %v3944_v0 = vld [vmem:[%s4342_s3 + $0x2e0] ss:$16 sps:$4 sm:$0xff]   ;;  %v3945_v1 = vld [vmem:[%s4342_s3 + $0x2e8] ss:$16 sps:$4 sm:$0xff]  }
  0xf9   : > { %1679 = vmatprep.mubr.bf16.mxu0 %v3850_v2  ;;  %1968 = vmatprep.mubr.bf16.mxu1 %v3852_v3  ;;  %v3946_v2 = vld [vmem:[%s4342_s3 + $0x304] ss:$16 sps:$4 sm:$0xff]   ;;  %v3948_v3 = vld [vmem:[%s4342_s3 + $0x30c] ss:$16 sps:$4 sm:$0xff]  }
 0x100   : > { %1680 = vmatmul.mubr.bf16.gmra.mxu0 %v3854_v4  ;;  %1969 = vmatmul.mubr.bf16.gmra.mxu1 %v3855_v5  ;;  %v3950_v4 = vld [vmem:[%s4342_s3 + $0x300] ss:$16 sps:$4 sm:$0xff]   ;;  %v3951_v5 = vld [vmem:[%s4342_s3 + $0x308] ss:$16 sps:$4 sm:$0xff]  }
 0x101   : > { %1687 = vmatprep.mubr.bf16.mxu0 %v3856_v6  ;;  %1976 = vmatprep.mubr.bf16.mxu1 %v3858_v7  ;;  %v3952_v6 = vld [vmem:[%s4342_s3 + $0x324] ss:$16 sps:$4 sm:$0xff]   ;;  %v3954_v7 = vld [vmem:[%s4342_s3 + $0x32c] ss:$16 sps:$4 sm:$0xff]  }
 0x108   : > { %1688 = vmatmul.mubr.bf16.gmra.mxu0 %v3860_v8  ;;  %1977 = vmatmul.mubr.bf16.gmra.mxu1 %v3861_v9  ;;  %v495_v9 = vld [vmem:[#allocation2 + $0xb0] sm:$0xff] }
 0x109   : > { %1695 = vmatprep.mubr.bf16.mxu0 %v3862_v10  ;;  %1984 = vmatprep.mubr.bf16.mxu1 %v3864_v11 }
 0x110   : > { %1696 = vmatmul.mubr.bf16.gmra.mxu0 %v3866_v12  ;;  %1985 = vmatmul.mubr.bf16.gmra.mxu1 %v3867_v13 }
 0x111   : > { %1703 = vmatprep.mubr.bf16.mxu0 %v3868_v14  ;;  %1992 = vmatprep.mubr.bf16.mxu1 %v3870_v15 }
 0x118   : > { %1704 = vmatmul.mubr.bf16.gmra.mxu0 %v3872_v16  ;;  %1993 = vmatmul.mubr.bf16.gmra.mxu1 %v3873_v17  ;;  %v3956_v16 = vld [vmem:[%s4342_s3 + $0x320] ss:$16 sps:$4 sm:$0xff]  }
 0x119   : > { %1711 = vmatprep.mubr.bf16.mxu0 %v3874_v18  ;;  %2000 = vmatprep.mubr.bf16.mxu1 %v3876_v19  ;;  %v496_v17 = vld [vmem:[#allocation2 + $0x1b0] sm:$0xff]  ;;  %v3957_v19 = vld [vmem:[%s4342_s3 + $0x328] ss:$16 sps:$4 sm:$0xff]  }
 0x120   : > { %1712 = vmatmul.mubr.bf16.gmra.mxu0 %v3878_v20  ;;  %2001 = vmatmul.mubr.bf16.gmra.mxu1 %v3879_v21  ;;  %v3958_v20 = vld [vmem:[%s4342_s3 + $0x344] ss:$16 sps:$4 sm:$0xff]  }
 0x121   : > { %1719 = vmatprep.mubr.bf16.mxu0 %v3880_v22  ;;  %2008 = vmatprep.mubr.bf16.mxu1 %v3882_v23  ;;  %v3960_v23 = vld [vmem:[%s4342_s3 + $0x34c] ss:$16 sps:$4 sm:$0xff]  }
 0x128   : > { %1720 = vmatmul.mubr.bf16.gmra.mxu0 %v3884_v24  ;;  %2009 = vmatmul.mubr.bf16.gmra.mxu1 %v3885_v25 }
 0x129   : > { %1727 = vmatprep.mubr.bf16.mxu0 %v3886_v26  ;;  %2016 = vmatprep.mubr.bf16.mxu1 %v3888_v27  ;;  %v497_v27 = vld [vmem:[#allocation2 + $0xd8] sm:$0xff] }
 0x130   : > { %1728 = vmatmul.mubr.bf16.gmra.mxu0 %v3890_v28  ;;  %2017 = vmatmul.mubr.bf16.gmra.mxu1 %v3891_v29 }
 0x131   : > { %1735 = vmatprep.mubr.bf16.mxu0 %v3892_v30  ;;  %2024 = vmatprep.mubr.bf16.mxu1 %v3894_v31 }
 0x138   : > { %1736 = vmatmul.mubr.bf16.gmra.mxu0 %v3896_v32  ;;  %2025 = vmatmul.mubr.bf16.gmra.mxu1 %v3897_v33 }
 0x139   : > { %1743 = vmatprep.mubr.bf16.mxu0 %v3898_v34  ;;  %2032 = vmatprep.mubr.bf16.mxu1 %v3900_v35  ;;  %v3962_v34 = vld [vmem:[%s4342_s3 + $0x340] ss:$16 sps:$4 sm:$0xff]   ;;  %v498_v35 = vld [vmem:[#allocation2 + $0x18] sm:$0xff] }
 0x140   : > { %1744 = vmatmul.mubr.bf16.gmra.mxu0 %v3902_v36  ;;  %2033 = vmatmul.mubr.bf16.gmra.mxu1 %v3903_v37  ;;  %v3963_v37 = vld [vmem:[%s4342_s3 + $0x348] ss:$16 sps:$4 sm:$0xff]  }
 0x141   : > { %1751 = vmatprep.mubr.bf16.mxu0 %v3904_v38  ;;  %2040 = vmatprep.mubr.bf16.mxu1 %v3906_v39  ;;  %v3964_v38 = vld [vmem:[%s4342_s3 + $0x364] ss:$16 sps:$4 sm:$0xff]  }
 0x148   : > { %1752 = vmatmul.mubr.bf16.gmra.mxu0 %v3908_v40  ;;  %2041 = vmatmul.mubr.bf16.gmra.mxu1 %v3909_v41  ;;  %v3966_v41 = vld [vmem:[%s4342_s3 + $0x36c] ss:$16 sps:$4 sm:$0xff]  }
 0x149   : > { %1759 = vmatprep.mubr.bf16.mxu0 %v3910_v42  ;;  %2048 = vmatprep.mubr.bf16.mxu1 %v3912_v43 }
 0x150   : > { %1760 = vmatmul.mubr.bf16.gmra.mxu0 %v3914_v44  ;;  %2049 = vmatmul.mubr.bf16.gmra.mxu1 %v3915_v45  ;;  %v499_v45 = vld [vmem:[#allocation2 + $0x50] sm:$0xff] }
 0x151   : > { %1767 = vmatprep.mubr.bf16.mxu0 %v3916_v46  ;;  %2056 = vmatprep.mubr.bf16.mxu1 %v3918_v47 }
 0x158   : > { %1768 = vmatmul.mubr.bf16.gmra.mxu0 %v3920_v48  ;;  %2057 = vmatmul.mubr.bf16.gmra.mxu1 %v3921_v49 }
 0x159   : > { %1775 = vmatprep.mubr.bf16.mxu0 %v3922_v50  ;;  %2064 = vmatprep.mubr.bf16.mxu1 %v3924_v51 }
 0x160   : > { %1776 = vmatmul.mubr.bf16.gmra.mxu0 %v3926_v52  ;;  %2065 = vmatmul.mubr.bf16.gmra.mxu1 %v3927_v53  ;;  %v3968_v52 = vld [vmem:[%s4342_s3 + $0x360] ss:$16 sps:$4 sm:$0xff]   ;;  %v500_v53 = vld [vmem:[#allocation2 + $0x168] sm:$0xff] }
 0x161   : > { %1783 = vmatprep.mubr.bf16.mxu0 %v3928_v54  ;;  %2072 = vmatprep.mubr.bf16.mxu1 %v3930_v55  ;;  %v3969_v55 = vld [vmem:[%s4342_s3 + $0x368] ss:$16 sps:$4 sm:$0xff]  }
 0x168   : > { %1784 = vmatmul.mubr.bf16.gmra.mxu0 %v3932_v56  ;;  %2073 = vmatmul.mubr.bf16.gmra.mxu1 %v3933_v57  ;;  %v3972_v56 = vld [vmem:[%s4342_s3 + $0x384] ss:$16 sps:$4 sm:$0xff]  }
 0x169   : > { %1791 = vmatprep.mubr.bf16.mxu0 %v3934_v58  ;;  %2080 = vmatprep.mubr.bf16.mxu1 %v3936_v59  ;;  %v3975_v59 = vld [vmem:[%s4342_s3 + $0x38c] ss:$16 sps:$4 sm:$0xff]  }
 0x170   : > { %1792 = vmatmul.mubr.bf16.gmra.mxu0 %v3938_v60  ;;  %2081 = vmatmul.mubr.bf16.gmra.mxu1 %v3939_v61 }
 0x171   : > { %1799 = vmatprep.mubr.bf16.mxu0 %v3940_v62  ;;  %2088 = vmatprep.mubr.bf16.mxu1 %v3942_v63  ;;  %v501_v63 = vld [vmem:[#allocation2 + $0x130] sm:$0xff] }
 0x178   : > { %1800 = vmatmul.mubr.bf16.gmra.mxu0 %v3944_v0  ;;  %2089 = vmatmul.mubr.bf16.gmra.mxu1 %v3945_v1 }
 0x179   : > { %1807 = vmatprep.mubr.bf16.mxu0 %v3946_v2  ;;  %2096 = vmatprep.mubr.bf16.mxu1 %v3948_v3 }
 0x180   : > { %v1617_v8 = vpop.f32.mrf.mxu0  ;;  %1808 = vmatmul.mubr.bf16.gmra.mxu0 %v3950_v4  ;;  %v1906_v10 = vpop.f32.mrf.mxu1  ;;  %2097 = vmatmul.mubr.bf16.gmra.mxu1 %v3951_v5 }
 0x181   : > { %1815 = vmatprep.mubr.bf16.mxu0 %v3952_v6  ;;  %v1907_v11 = vadd.f32 %v1906_v10, %v1617_v8  ;;  %2104 = vmatprep.mubr.bf16.mxu1 %v3954_v7  ;;  %v3970_v6 = vld [vmem:[%s4342_s3 + $0x380] ss:$16 sps:$4 sm:$0xff]   ;;  %v502_v7 = vld [vmem:[#allocation2 + $0x48] sm:$0xff]  ;;  %v3978_v10 = vld [vmem:[%s4342_s3 + $0x3a4] ss:$16 sps:$4 sm:$0xff]  }
 0x182   : > { %v1619_v12 = vpop.f32.mrf.mxu0  ;;  %v1908_v13 = vpop.f32.mrf.mxu1 }
 0x183   : > { %v2161_v14 = vadd.f32 %v1907_v11, %v495_v9  ;;  %v3973_v9 = vld [vmem:[%s4342_s3 + $0x388] ss:$16 sps:$4 sm:$0xff]   ;;  %v3981_v13 = vld [vmem:[%s4342_s3 + $0x3ac] ss:$16 sps:$4 sm:$0xff]  }
 0x184   : > { %v1620_v15 = vpop.f32.mrf.mxu0  ;;  %v1909_v18 = vpop.f32.mrf.mxu1 }
 0x185   : > { %2225 = vst [vmem:[#allocation2 + $0xb0] sm:$0xff] %v2161_v14  ;;  %v1910_v21 = vadd.f32 %v1909_v18, %v1620_v15 }
 0x186   : > { %v1622_v22 = vpop.f32.mrf.mxu0  ;;  %v1911_v24 = vpop.f32.mrf.mxu1 }
 0x187   : > { %v2162_v25 = vadd.f32 %v1910_v21, %v496_v17  ;;  %v503_v17 = vld [vmem:[#allocation2 + $0x180] sm:$0xff] }
 0x188   : > { %v1625_v26 = vpop.f32.mrf.mxu0  ;;  %1816 = vmatmul.mubr.bf16.gmra.mxu0 %v3956_v16  ;;  %v1914_v28 = vpop.f32.mrf.mxu1  ;;  %2105 = vmatmul.mubr.bf16.gmra.mxu1 %v3957_v19  ;;  %v3976_v24 = vld [vmem:[%s4342_s3 + $0x3a0] ss:$16 sps:$4 sm:$0xff]  }
 0x189   : > { %1823 = vmatprep.mubr.bf16.mxu0 %v3958_v20  ;;  %2226 = vst [vmem:[#allocation2 + $0x1b0] sm:$0xff] %v2162_v25  ;;  %v1915_v29 = vadd.f32 %v1914_v28, %v1625_v26  ;;  %2112 = vmatprep.mubr.bf16.mxu1 %v3960_v23  ;;  %v504_v25 = vld [vmem:[#allocation2 + $0x110] sm:$0xff] }
 0x18a   : > { %v1627_v30 = vpop.f32.mrf.mxu0  ;;  %v1916_v31 = vpop.f32.mrf.mxu1  ;;  %v3984_v28 = vld [vmem:[%s4342_s3 + $0x3c4] ss:$16 sps:$4 sm:$0xff]  }
 0x18b   : > { %v2163_v32 = vadd.f32 %v1915_v29, %v497_v27  ;;  %v3979_v27 = vld [vmem:[%s4342_s3 + $0x3a8] ss:$16 sps:$4 sm:$0xff]   ;;  %v3987_v31 = vld [vmem:[%s4342_s3 + $0x3cc] ss:$16 sps:$4 sm:$0xff]  }
 0x18c   : > { %v1628_v33 = vpop.f32.mrf.mxu0  ;;  %v1917_v36 = vpop.f32.mrf.mxu1 }
 0x18d   : > { %2227 = vst [vmem:[#allocation2 + $0xd8] sm:$0xff] %v2163_v32  ;;  %v1918_v39 = vadd.f32 %v1917_v36, %v1628_v33 }
 0x18e   : > { %v1630_v40 = vpop.f32.mrf.mxu0  ;;  %v1919_v42 = vpop.f32.mrf.mxu1 }
 0x18f   : > { %v2164_v43 = vadd.f32 %v1918_v39, %v498_v35  ;;  %v505_v35 = vld [vmem:[#allocation2 + $0x118] sm:$0xff]  ;;  %v3982_v42 = vld [vmem:[%s4342_s3 + $0x3c0] ss:$16 sps:$4 sm:$0xff]  }
 0x190   : > { %v1633_v44 = vpop.f32.mrf.mxu0  ;;  %1824 = vmatmul.mubr.bf16.gmra.mxu0 %v3962_v34  ;;  %v1922_v46 = vpop.f32.mrf.mxu1  ;;  %2113 = vmatmul.mubr.bf16.gmra.mxu1 %v3963_v37 }
 0x191   : > { %1831 = vmatprep.mubr.bf16.mxu0 %v3964_v38  ;;  %2228 = vst [vmem:[#allocation2 + $0x18] sm:$0xff] %v2164_v43  ;;  %v1923_v47 = vadd.f32 %v1922_v46, %v1633_v44  ;;  %2120 = vmatprep.mubr.bf16.mxu1 %v3966_v41  ;;  %v506_v43 = vld [vmem:[#allocation2 + $0x98] sm:$0xff]  ;;  %v3990_v46 = vld [vmem:[%s4342_s3 + $0x3e4] ss:$16 sps:$4 sm:$0xff]  }
 0x192   : > { %v1635_v48 = vpop.f32.mrf.mxu0  ;;  %v1924_v49 = vpop.f32.mrf.mxu1 }
 0x193   : > { %v2165_v50 = vadd.f32 %v1923_v47, %v499_v45  ;;  %v3985_v45 = vld [vmem:[%s4342_s3 + $0x3c8] ss:$16 sps:$4 sm:$0xff]   ;;  %v3993_v49 = vld [vmem:[%s4342_s3 + $0x3ec] ss:$16 sps:$4 sm:$0xff]  }
 0x194   : > { %v1636_v51 = vpop.f32.mrf.mxu0  ;;  %v1925_v54 = vpop.f32.mrf.mxu1 }
 0x195   : > { %2229 = vst [vmem:[#allocation2 + $0x50] sm:$0xff] %v2165_v50  ;;  %v1926_v57 = vadd.f32 %v1925_v54, %v1636_v51 }
 0x196   : > { %v1638_v58 = vpop.f32.mrf.mxu0  ;;  %v1927_v60 = vpop.f32.mrf.mxu1 }
 0x197   : > { %v2166_v61 = vadd.f32 %v1926_v57, %v500_v53  ;;  %v507_v53 = vld [vmem:[#allocation2 + $0x120] sm:$0xff] }
 0x198   : > { %v1641_v62 = vpop.f32.mrf.mxu0  ;;  %1832 = vmatmul.mubr.bf16.gmra.mxu0 %v3968_v52  ;;  %v1930_v0 = vpop.f32.mrf.mxu1  ;;  %2121 = vmatmul.mubr.bf16.gmra.mxu1 %v3969_v55  ;;  %v3988_v60 = vld [vmem:[%s4342_s3 + $0x3e0] ss:$16 sps:$4 sm:$0xff]  }
 0x199   : > { %1839 = vmatprep.mubr.bf16.mxu0 %v3972_v56  ;;  %2230 = vst [vmem:[#allocation2 + $0x168] sm:$0xff] %v2166_v61  ;;  %v1931_v1 = vadd.f32 %v1930_v0, %v1641_v62  ;;  %2128 = vmatprep.mubr.bf16.mxu1 %v3975_v59  ;;  %v508_v61 = vld [vmem:[#allocation2 + $0x150] sm:$0xff] }
 0x19a   : > { %v1643_v2 = vpop.f32.mrf.mxu0  ;;  %v1932_v3 = vpop.f32.mrf.mxu1 }
 0x19b   : > { %v2167_v4 = vadd.f32 %v1931_v1, %v501_v63  ;;  %v3991_v63 = vld [vmem:[%s4342_s3 + $0x3e8] ss:$16 sps:$4 sm:$0xff]  }
 0x19c   : > { %v1644_v5 = vpop.f32.mrf.mxu0  ;;  %v1933_v8 = vpop.f32.mrf.mxu1 }
 0x19d   : > { %2231 = vst [vmem:[#allocation2 + $0x130] sm:$0xff] %v2167_v4  ;;  %v1934_v11 = vadd.f32 %v1933_v8, %v1644_v5  ;;  %v509_v5 = vld [vmem:[#allocation2 + $0x108] sm:$0xff] }
 0x19e   : > { %v1646_v12 = vpop.f32.mrf.mxu0  ;;  %v1935_v14 = vpop.f32.mrf.mxu1 }
 0x19f   : > { %v2168_v15 = vadd.f32 %v1934_v11, %v502_v7  ;;  %v510_v12 = vld [vmem:[#allocation2 + $0x60] sm:$0xff] }
 0x1a0   : > { %v1649_v16 = vpop.f32.mrf.mxu0  ;;  %1840 = vmatmul.mubr.bf16.gmra.mxu0 %v3970_v6  ;;  %v1938_v18 = vpop.f32.mrf.mxu1  ;;  %2129 = vmatmul.mubr.bf16.gmra.mxu1 %v3973_v9 }
 0x1a1   : > { %1847 = vmatprep.mubr.bf16.mxu0 %v3978_v10  ;;  %2232 = vst [vmem:[#allocation2 + $0x48] sm:$0xff] %v2168_v15  ;;  %v1939_v19 = vadd.f32 %v1938_v18, %v1649_v16  ;;  %2136 = vmatprep.mubr.bf16.mxu1 %v3981_v13 }
 0x1a2   : > { %v1651_v20 = vpop.f32.mrf.mxu0  ;;  %v1940_v21 = vpop.f32.mrf.mxu1 }
 0x1a3   : > { %v2169_v22 = vadd.f32 %v1939_v19, %v503_v17  ;;  %v511_v19 = vld [vmem:[#allocation2 + $0xe0] sm:$0xff] }
 0x1a4   : > { %v1652_v23 = vpop.f32.mrf.mxu0  ;;  %v1941_v26 = vpop.f32.mrf.mxu1 }
 0x1a5   : > { %2233 = vst [vmem:[#allocation2 + $0x180] sm:$0xff] %v2169_v22  ;;  %v1942_v29 = vadd.f32 %v1941_v26, %v1652_v23  ;;  %v512_v26 = vld [vmem:[#allocation2 + $0x188] sm:$0xff] }
 0x1a6   : > { %v1654_v30 = vpop.f32.mrf.mxu0  ;;  %v1943_v32 = vpop.f32.mrf.mxu1 }
 0x1a7   : > { %v2170_v33 = vadd.f32 %v1942_v29, %v504_v25 }
 0x1a8   : > { %v1657_v34 = vpop.f32.mrf.mxu0  ;;  %1848 = vmatmul.mubr.bf16.gmra.mxu0 %v3976_v24  ;;  %v1946_v36 = vpop.f32.mrf.mxu1  ;;  %2137 = vmatmul.mubr.bf16.gmra.mxu1 %v3979_v27 }
 0x1a9   : > { %1855 = vmatprep.mubr.bf16.mxu0 %v3984_v28  ;;  %2234 = vst [vmem:[#allocation2 + $0x110] sm:$0xff] %v2170_v33  ;;  %v1947_v37 = vadd.f32 %v1946_v36, %v1657_v34  ;;  %2144 = vmatprep.mubr.bf16.mxu1 %v3987_v31  ;;  %v513_v33 = vld [vmem:[#allocation2 + $0x138] sm:$0xff] }
 0x1aa   : > { %v1659_v38 = vpop.f32.mrf.mxu0  ;;  %v1948_v39 = vpop.f32.mrf.mxu1 }
 0x1ab   : > { %v2171_v40 = vadd.f32 %v1947_v37, %v505_v35 }
 0x1ac   : > { %v1660_v41 = vpop.f32.mrf.mxu0  ;;  %v1949_v44 = vpop.f32.mrf.mxu1 }
 0x1ad   : > { %2235 = vst [vmem:[#allocation2 + $0x118] sm:$0xff] %v2171_v40  ;;  %v1950_v47 = vadd.f32 %v1949_v44, %v1660_v41  ;;  %v514_v40 = vld [vmem:[#allocation2 + $0x140] sm:$0xff] }
 0x1ae   : > { %v1662_v48 = vpop.f32.mrf.mxu0  ;;  %v1951_v50 = vpop.f32.mrf.mxu1 }
 0x1af   : > { %v2172_v51 = vadd.f32 %v1950_v47, %v506_v43  ;;  %v515_v47 = vld [vmem:[#allocation2 + $0x80] sm:$0xff] }
 0x1b0   : > { %v1665_v52 = vpop.f32.mrf.mxu0  ;;  %1856 = vmatmul.mubr.bf16.gmra.mxu0 %v3982_v42  ;;  %v1954_v54 = vpop.f32.mrf.mxu1  ;;  %2145 = vmatmul.mubr.bf16.gmra.mxu1 %v3985_v45 }
 0x1b1   : > { %1863 = vmatprep.mubr.bf16.mxu0 %v3990_v46  ;;  %2236 = vst [vmem:[#allocation2 + $0x98] sm:$0xff] %v2172_v51  ;;  %v1955_v55 = vadd.f32 %v1954_v54, %v1665_v52  ;;  %2152 = vmatprep.mubr.bf16.mxu1 %v3993_v49  ;;  %v516_v54 = vld [vmem:[#allocation2 + $0x1a8] sm:$0xff] }
 0x1b2   : > { %v1667_v56 = vpop.f32.mrf.mxu0  ;;  %v1956_v57 = vpop.f32.mrf.mxu1 }
 0x1b3   : > { %v2173_v58 = vadd.f32 %v1955_v55, %v507_v53 }
 0x1b4   : > { %v1668_v59 = vpop.f32.mrf.mxu0  ;;  %v1957_v62 = vpop.f32.mrf.mxu1 }
 0x1b5   : > { %2237 = vst [vmem:[#allocation2 + $0x120] sm:$0xff] %v2173_v58  ;;  %v1958_v0 = vadd.f32 %v1957_v62, %v1668_v59 }
 0x1b6   : > { %v1670_v1 = vpop.f32.mrf.mxu0  ;;  %v1959_v2 = vpop.f32.mrf.mxu1 }
 0x1b7   : > { %v2174_v3 = vadd.f32 %v1958_v0, %v508_v61  ;;  %v517_v61 = vld [vmem:[#allocation2 + $0x1b8] sm:$0xff] }
 0x1b8   : > { %v1673_v4 = vpop.f32.mrf.mxu0  ;;  %1864 = vmatmul.mubr.bf16.gmra.mxu0 %v3988_v60  ;;  %v1962_v6 = vpop.f32.mrf.mxu1  ;;  %2153 = vmatmul.mubr.bf16.gmra.mxu1 %v3991_v63 }
 0x1b9   : > { %2238 = vst [vmem:[#allocation2 + $0x150] sm:$0xff] %v2174_v3  ;;  %v1963_v7 = vadd.f32 %v1962_v6, %v1673_v4  ;;  %v518_v4 = vld [vmem:[#allocation2 + $0x28] sm:$0xff] }
 0x1ba   : > { %v1675_v8 = vpop.f32.mrf.mxu0  ;;  %v1964_v9 = vpop.f32.mrf.mxu1 }
 0x1bb   : > { %v2175_v10 = vadd.f32 %v1963_v7, %v509_v5 }
 0x1bc   : > { %v1676_v11 = vpop.f32.mrf.mxu0  ;;  %v1965_v13 = vpop.f32.mrf.mxu1 }
 0x1bd   : > { %2239 = vst [vmem:[#allocation2 + $0x108] sm:$0xff] %v2175_v10  ;;  %v1966_v14 = vadd.f32 %v1965_v13, %v1676_v11  ;;  %v519_v11 = vld [vmem:[#allocation2 + $0x1e8] sm:$0xff] }
 0x1be   : > { %v1678_v15 = vpop.f32.mrf.mxu0  ;;  %v1967_v16 = vpop.f32.mrf.mxu1 }
 0x1bf   : > { %v2176_v17 = vadd.f32 %v1966_v14, %v510_v12 }
 0x1c0   : > { %v1681_v18 = vpop.f32.mrf.mxu0  ;;  %v1970_v20 = vpop.f32.mrf.mxu1 }
 0x1c1   : > { %2240 = vst [vmem:[#allocation2 + $0x60] sm:$0xff] %v2176_v17  ;;  %v1971_v21 = vadd.f32 %v1970_v20, %v1681_v18  ;;  %v520_v18 = vld [vmem:[#allocation2 + $0xf8] sm:$0xff] }
 0x1c2   : > { %v1683_v22 = vpop.f32.mrf.mxu0  ;;  %v1972_v23 = vpop.f32.mrf.mxu1 }
 0x1c3   : > { %v2177_v24 = vadd.f32 %v1971_v21, %v511_v19 }
 0x1c4   : > { %v1684_v25 = vpop.f32.mrf.mxu0  ;;  %v1973_v27 = vpop.f32.mrf.mxu1 }
 0x1c5   : > { %2241 = vst [vmem:[#allocation2 + $0xe0] sm:$0xff] %v2177_v24  ;;  %v1974_v28 = vadd.f32 %v1973_v27, %v1684_v25  ;;  %v521_v25 = vld [vmem:[#allocation2 + $0x160] sm:$0xff] }
 0x1c6   : > { %v1686_v29 = vpop.f32.mrf.mxu0  ;;  %v1975_v30 = vpop.f32.mrf.mxu1 }
 0x1c7   : > { %v2178_v31 = vadd.f32 %v1974_v28, %v512_v26 }
 0x1c8   : > { %v1689_v32 = vpop.f32.mrf.mxu0  ;;  %v1978_v34 = vpop.f32.mrf.mxu1 }
 0x1c9   : > { %2242 = vst [vmem:[#allocation2 + $0x188] sm:$0xff] %v2178_v31  ;;  %v1979_v35 = vadd.f32 %v1978_v34, %v1689_v32  ;;  %v522_v32 = vld [vmem:[#allocation2 + $0x30] sm:$0xff] }
 0x1ca   : > { %v1691_v36 = vpop.f32.mrf.mxu0  ;;  %v1980_v37 = vpop.f32.mrf.mxu1 }
 0x1cb   : > { %v2179_v38 = vadd.f32 %v1979_v35, %v513_v33 }
 0x1cc   : > { %v1692_v39 = vpop.f32.mrf.mxu0  ;;  %v1981_v41 = vpop.f32.mrf.mxu1 }
 0x1cd   : > { %2243 = vst [vmem:[#allocation2 + $0x138] sm:$0xff] %v2179_v38  ;;  %v1982_v42 = vadd.f32 %v1981_v41, %v1692_v39  ;;  %v523_v39 = vld [vmem:[#allocation2 + $0x1e0] sm:$0xff] }
 0x1ce   : > { %v1694_v43 = vpop.f32.mrf.mxu0  ;;  %v1983_v44 = vpop.f32.mrf.mxu1 }
 0x1cf   : > { %v2180_v45 = vadd.f32 %v1982_v42, %v514_v40 }
 0x1d0   : > { %v1697_v46 = vpop.f32.mrf.mxu0  ;;  %v1986_v48 = vpop.f32.mrf.mxu1 }
 0x1d1   : > { %2244 = vst [vmem:[#allocation2 + $0x140] sm:$0xff] %v2180_v45  ;;  %v1987_v49 = vadd.f32 %v1986_v48, %v1697_v46  ;;  %v524_v46 = vld [vmem:[#allocation2] sm:$0xff] }
 0x1d2   : > { %v1699_v50 = vpop.f32.mrf.mxu0  ;;  %v1988_v51 = vpop.f32.mrf.mxu1 }
 0x1d3   : > { %v2181_v52 = vadd.f32 %v1987_v49, %v515_v47 }
 0x1d4   : > { %v1700_v53 = vpop.f32.mrf.mxu0  ;;  %v1989_v55 = vpop.f32.mrf.mxu1 }
 0x1d5   : > { %2245 = vst [vmem:[#allocation2 + $0x80] sm:$0xff] %v2181_v52  ;;  %v1990_v56 = vadd.f32 %v1989_v55, %v1700_v53  ;;  %v525_v53 = vld [vmem:[#allocation2 + $0xf0] sm:$0xff] }
 0x1d6   : > { %v1702_v57 = vpop.f32.mrf.mxu0  ;;  %v1991_v58 = vpop.f32.mrf.mxu1 }
 0x1d7   : > { %v2182_v59 = vadd.f32 %v1990_v56, %v516_v54 }
 0x1d8   : > { %v1705_v60 = vpop.f32.mrf.mxu0  ;;  %v1994_v62 = vpop.f32.mrf.mxu1 }
 0x1d9   : > { %2246 = vst [vmem:[#allocation2 + $0x1a8] sm:$0xff] %v2182_v59  ;;  %v1995_v63 = vadd.f32 %v1994_v62, %v1705_v60  ;;  %v526_v60 = vld [vmem:[#allocation2 + $0x8] sm:$0xff] }
 0x1da   : > { %v1707_v0 = vpop.f32.mrf.mxu0  ;;  %v1996_v1 = vpop.f32.mrf.mxu1 }
 0x1db   : > { %v2183_v2 = vadd.f32 %v1995_v63, %v517_v61 }
 0x1dc   : > { %v1708_v3 = vpop.f32.mrf.mxu0  ;;  %v1997_v5 = vpop.f32.mrf.mxu1 }
 0x1dd   : > { %2247 = vst [vmem:[#allocation2 + $0x1b8] sm:$0xff] %v2183_v2  ;;  %v1998_v6 = vadd.f32 %v1997_v5, %v1708_v3  ;;  %v527_v3 = vld [vmem:[#allocation2 + $0x148] sm:$0xff] }
 0x1de   : > { %v1710_v7 = vpop.f32.mrf.mxu0  ;;  %v1999_v8 = vpop.f32.mrf.mxu1 }
 0x1df   : > { %v2184_v9 = vadd.f32 %v1998_v6, %v518_v4 }
 0x1e0   : > { %v1713_v10 = vpop.f32.mrf.mxu0  ;;  %v2002_v12 = vpop.f32.mrf.mxu1 }
 0x1e1   : > { %2248 = vst [vmem:[#allocation2 + $0x28] sm:$0xff] %v2184_v9  ;;  %v2003_v13 = vadd.f32 %v2002_v12, %v1713_v10  ;;  %v528_v10 = vld [vmem:[#allocation2 + $0x1d0] sm:$0xff] }
 0x1e2   : > { %v1715_v14 = vpop.f32.mrf.mxu0  ;;  %v2004_v15 = vpop.f32.mrf.mxu1 }
 0x1e3   : > { %v2185_v16 = vadd.f32 %v2003_v13, %v519_v11 }
 0x1e4   : > { %v1716_v17 = vpop.f32.mrf.mxu0  ;;  %v2005_v19 = vpop.f32.mrf.mxu1 }
 0x1e5   : > { %2249 = vst [vmem:[#allocation2 + $0x1e8] sm:$0xff] %v2185_v16  ;;  %v2006_v20 = vadd.f32 %v2005_v19, %v1716_v17  ;;  %v529_v17 = vld [vmem:[#allocation2 + $0x100] sm:$0xff] }
 0x1e6   : > { %v1718_v21 = vpop.f32.mrf.mxu0  ;;  %v2007_v22 = vpop.f32.mrf.mxu1 }
 0x1e7   : > { %v2186_v23 = vadd.f32 %v2006_v20, %v520_v18 }
 0x1e8   : > { %v1721_v24 = vpop.f32.mrf.mxu0  ;;  %v2010_v26 = vpop.f32.mrf.mxu1 }
 0x1e9   : > { %2250 = vst [vmem:[#allocation2 + $0xf8] sm:$0xff] %v2186_v23  ;;  %v2011_v27 = vadd.f32 %v2010_v26, %v1721_v24  ;;  %v530_v24 = vld [vmem:[#allocation2 + $0xc8] sm:$0xff] }
 0x1ea   : > { %v1723_v28 = vpop.f32.mrf.mxu0  ;;  %v2012_v29 = vpop.f32.mrf.mxu1 }
 0x1eb   : > { %v2187_v30 = vadd.f32 %v2011_v27, %v521_v25 }
 0x1ec   : > { %v1724_v31 = vpop.f32.mrf.mxu0  ;;  %v2013_v33 = vpop.f32.mrf.mxu1 }
 0x1ed   : > { %2251 = vst [vmem:[#allocation2 + $0x160] sm:$0xff] %v2187_v30  ;;  %v2014_v34 = vadd.f32 %v2013_v33, %v1724_v31  ;;  %v531_v31 = vld [vmem:[#allocation2 + $0x40] sm:$0xff] }
 0x1ee   : > { %v1726_v35 = vpop.f32.mrf.mxu0  ;;  %v2015_v36 = vpop.f32.mrf.mxu1 }
 0x1ef   : > { %v2188_v37 = vadd.f32 %v2014_v34, %v522_v32 }
 0x1f0   : > { %v1729_v38 = vpop.f32.mrf.mxu0  ;;  %v2018_v40 = vpop.f32.mrf.mxu1 }
 0x1f1   : > { %2252 = vst [vmem:[#allocation2 + $0x30] sm:$0xff] %v2188_v37  ;;  %v2019_v41 = vadd.f32 %v2018_v40, %v1729_v38  ;;  %v532_v38 = vld [vmem:[#allocation2 + $0x1f8] sm:$0xff] }
 0x1f2   : > { %v1731_v42 = vpop.f32.mrf.mxu0  ;;  %v2020_v43 = vpop.f32.mrf.mxu1 }
 0x1f3   : > { %v2189_v44 = vadd.f32 %v2019_v41, %v523_v39 }
 0x1f4   : > { %v1732_v45 = vpop.f32.mrf.mxu0  ;;  %v2021_v47 = vpop.f32.mrf.mxu1 }
 0x1f5   : > { %2253 = vst [vmem:[#allocation2 + $0x1e0] sm:$0xff] %v2189_v44  ;;  %v2022_v48 = vadd.f32 %v2021_v47, %v1732_v45  ;;  %v533_v45 = vld [vmem:[#allocation2 + $0x20] sm:$0xff] }
 0x1f6   : > { %v1734_v49 = vpop.f32.mrf.mxu0  ;;  %v2023_v50 = vpop.f32.mrf.mxu1 }
 0x1f7   : > { %v2190_v51 = vadd.f32 %v2022_v48, %v524_v46 }
 0x1f8   : > { %v1737_v52 = vpop.f32.mrf.mxu0  ;;  %v2026_v54 = vpop.f32.mrf.mxu1 }
 0x1f9   : > { %2254 = vst [vmem:[#allocation2] sm:$0xff] %v2190_v51  ;;  %v2027_v55 = vadd.f32 %v2026_v54, %v1737_v52  ;;  %v534_v52 = vld [vmem:[#allocation2 + $0x128] sm:$0xff] }
 0x1fa   : > { %v1739_v56 = vpop.f32.mrf.mxu0  ;;  %v2028_v57 = vpop.f32.mrf.mxu1 }
 0x1fb   : > { %v2191_v58 = vadd.f32 %v2027_v55, %v525_v53 }
 0x1fc   : > { %v1740_v59 = vpop.f32.mrf.mxu0  ;;  %v2029_v61 = vpop.f32.mrf.mxu1 }
 0x1fd   : > { %2255 = vst [vmem:[#allocation2 + $0xf0] sm:$0xff] %v2191_v58  ;;  %v2030_v62 = vadd.f32 %v2029_v61, %v1740_v59  ;;  %v535_v59 = vld [vmem:[#allocation2 + $0x1a0] sm:$0xff] }
 0x1fe   : > { %v1742_v63 = vpop.f32.mrf.mxu0  ;;  %v2031_v0 = vpop.f32.mrf.mxu1 }
 0x1ff   : > { %v2192_v1 = vadd.f32 %v2030_v62, %v526_v60 }
 0x200   : > { %v1745_v2 = vpop.f32.mrf.mxu0  ;;  %v2034_v4 = vpop.f32.mrf.mxu1 }
 0x201   : > { %2256 = vst [vmem:[#allocation2 + $0x8] sm:$0xff] %v2192_v1  ;;  %v2035_v5 = vadd.f32 %v2034_v4, %v1745_v2  ;;  %v536_v2 = vld [vmem:[#allocation2 + $0x1f0] sm:$0xff] }
 0x202   : > { %v1747_v6 = vpop.f32.mrf.mxu0  ;;  %v2036_v7 = vpop.f32.mrf.mxu1 }
 0x203   : > { %v2193_v8 = vadd.f32 %v2035_v5, %v527_v3 }
 0x204   : > { %v1748_v9 = vpop.f32.mrf.mxu0  ;;  %v2037_v11 = vpop.f32.mrf.mxu1 }
 0x205   : > { %2257 = vst [vmem:[#allocation2 + $0x148] sm:$0xff] %v2193_v8  ;;  %v2038_v12 = vadd.f32 %v2037_v11, %v1748_v9  ;;  %v537_v9 = vld [vmem:[#allocation2 + $0xe8] sm:$0xff] }
 0x206   : > { %v1750_v13 = vpop.f32.mrf.mxu0  ;;  %v2039_v14 = vpop.f32.mrf.mxu1 }
 0x207   : > { %v2194_v15 = vadd.f32 %v2038_v12, %v528_v10 }
 0x208   : > { %v1753_v16 = vpop.f32.mrf.mxu0  ;;  %v2042_v18 = vpop.f32.mrf.mxu1 }
 0x209   : > { %2258 = vst [vmem:[#allocation2 + $0x1d0] sm:$0xff] %v2194_v15  ;;  %v2043_v19 = vadd.f32 %v2042_v18, %v1753_v16  ;;  %v538_v16 = vld [vmem:[#allocation2 + $0x78] sm:$0xff] }
 0x20a   : > { %v1755_v20 = vpop.f32.mrf.mxu0  ;;  %v2044_v21 = vpop.f32.mrf.mxu1 }
 0x20b   : > { %v2195_v22 = vadd.f32 %v2043_v19, %v529_v17 }
 0x20c   : > { %v1756_v23 = vpop.f32.mrf.mxu0  ;;  %v2045_v25 = vpop.f32.mrf.mxu1 }
 0x20d   : > { %2259 = vst [vmem:[#allocation2 + $0x100] sm:$0xff] %v2195_v22  ;;  %v2046_v26 = vadd.f32 %v2045_v25, %v1756_v23  ;;  %v539_v23 = vld [vmem:[#allocation2 + $0x70] sm:$0xff] }
 0x20e   : > { %v1758_v27 = vpop.f32.mrf.mxu0  ;;  %v2047_v28 = vpop.f32.mrf.mxu1 }
 0x20f   : > { %v2196_v29 = vadd.f32 %v2046_v26, %v530_v24 }
 0x210   : > { %v1761_v30 = vpop.f32.mrf.mxu0  ;;  %v2050_v32 = vpop.f32.mrf.mxu1 }
 0x211   : > { %2260 = vst [vmem:[#allocation2 + $0xc8] sm:$0xff] %v2196_v29  ;;  %v2051_v33 = vadd.f32 %v2050_v32, %v1761_v30  ;;  %v540_v30 = vld [vmem:[#allocation2 + $0x90] sm:$0xff] }
 0x212   : > { %v1763_v34 = vpop.f32.mrf.mxu0  ;;  %v2052_v35 = vpop.f32.mrf.mxu1 }
 0x213   : > { %v2197_v36 = vadd.f32 %v2051_v33, %v531_v31 }
 0x214   : > { %v1764_v37 = vpop.f32.mrf.mxu0  ;;  %v2053_v39 = vpop.f32.mrf.mxu1 }
 0x215   : > { %2261 = vst [vmem:[#allocation2 + $0x40] sm:$0xff] %v2197_v36  ;;  %v2054_v40 = vadd.f32 %v2053_v39, %v1764_v37  ;;  %v541_v37 = vld [vmem:[#allocation2 + $0x1d8] sm:$0xff] }
 0x216   : > { %v1766_v41 = vpop.f32.mrf.mxu0  ;;  %v2055_v42 = vpop.f32.mrf.mxu1 }
 0x217   : > { %v2198_v43 = vadd.f32 %v2054_v40, %v532_v38 }
 0x218   : > { %v1769_v44 = vpop.f32.mrf.mxu0  ;;  %v2058_v46 = vpop.f32.mrf.mxu1 }
 0x219   : > { %2262 = vst [vmem:[#allocation2 + $0x1f8] sm:$0xff] %v2198_v43  ;;  %v2059_v47 = vadd.f32 %v2058_v46, %v1769_v44  ;;  %v542_v44 = vld [vmem:[#allocation2 + $0xd0] sm:$0xff] }
 0x21a   : > { %v1771_v48 = vpop.f32.mrf.mxu0  ;;  %v2060_v49 = vpop.f32.mrf.mxu1 }
 0x21b   : > { %v2199_v50 = vadd.f32 %v2059_v47, %v533_v45 }
 0x21c   : > { %v1772_v51 = vpop.f32.mrf.mxu0  ;;  %v2061_v53 = vpop.f32.mrf.mxu1 }
 0x21d   : > { %2263 = vst [vmem:[#allocation2 + $0x20] sm:$0xff] %v2199_v50  ;;  %v2062_v54 = vadd.f32 %v2061_v53, %v1772_v51  ;;  %v543_v51 = vld [vmem:[#allocation2 + $0xb8] sm:$0xff] }
 0x21e   : > { %v1774_v55 = vpop.f32.mrf.mxu0  ;;  %v2063_v56 = vpop.f32.mrf.mxu1 }
 0x21f   : > { %v2200_v57 = vadd.f32 %v2062_v54, %v534_v52 }
 0x220   : > { %v1777_v58 = vpop.f32.mrf.mxu0  ;;  %v2066_v60 = vpop.f32.mrf.mxu1 }
 0x221   : > { %2264 = vst [vmem:[#allocation2 + $0x128] sm:$0xff] %v2200_v57  ;;  %v2067_v61 = vadd.f32 %v2066_v60, %v1777_v58  ;;  %v544_v58 = vld [vmem:[#allocation2 + $0x88] sm:$0xff] }
 0x222   : > { %v1779_v62 = vpop.f32.mrf.mxu0  ;;  %v2068_v63 = vpop.f32.mrf.mxu1 }
 0x223   : > { %v2201_v0 = vadd.f32 %v2067_v61, %v535_v59 }
 0x224   : > { %v1780_v1 = vpop.f32.mrf.mxu0  ;;  %v2069_v3 = vpop.f32.mrf.mxu1 }
 0x225   : > { %2265 = vst [vmem:[#allocation2 + $0x1a0] sm:$0xff] %v2201_v0  ;;  %v2070_v4 = vadd.f32 %v2069_v3, %v1780_v1  ;;  %v545_v1 = vld [vmem:[#allocation2 + $0xa8] sm:$0xff] }
 0x226   : > { %v1782_v5 = vpop.f32.mrf.mxu0  ;;  %v2071_v6 = vpop.f32.mrf.mxu1 }
 0x227   : > { %v2202_v7 = vadd.f32 %v2070_v4, %v536_v2 }
 0x228   : > { %v1785_v8 = vpop.f32.mrf.mxu0  ;;  %v2074_v10 = vpop.f32.mrf.mxu1 }
 0x229   : > { %2266 = vst [vmem:[#allocation2 + $0x1f0] sm:$0xff] %v2202_v7  ;;  %v2075_v11 = vadd.f32 %v2074_v10, %v1785_v8  ;;  %v546_v8 = vld [vmem:[#allocation2 + $0x1c8] sm:$0xff] }
 0x22a   : > { %v1787_v12 = vpop.f32.mrf.mxu0  ;;  %v2076_v13 = vpop.f32.mrf.mxu1 }
 0x22b   : > { %v2203_v14 = vadd.f32 %v2075_v11, %v537_v9 }
 0x22c   : > { %v1788_v15 = vpop.f32.mrf.mxu0  ;;  %v2077_v17 = vpop.f32.mrf.mxu1 }
 0x22d   : > { %2267 = vst [vmem:[#allocation2 + $0xe8] sm:$0xff] %v2203_v14  ;;  %v2078_v18 = vadd.f32 %v2077_v17, %v1788_v15  ;;  %v547_v15 = vld [vmem:[#allocation2 + $0x170] sm:$0xff] }
 0x22e   : > { %v1790_v19 = vpop.f32.mrf.mxu0  ;;  %v2079_v20 = vpop.f32.mrf.mxu1 }
 0x22f   : > { %v2204_v21 = vadd.f32 %v2078_v18, %v538_v16 }
 0x230   : > { %v1793_v22 = vpop.f32.mrf.mxu0  ;;  %v2082_v24 = vpop.f32.mrf.mxu1 }
 0x231   : > { %2268 = vst [vmem:[#allocation2 + $0x78] sm:$0xff] %v2204_v21  ;;  %v2083_v25 = vadd.f32 %v2082_v24, %v1793_v22  ;;  %v548_v22 = vld [vmem:[#allocation2 + $0x178] sm:$0xff] }
 0x232   : > { %v1795_v26 = vpop.f32.mrf.mxu0  ;;  %v2084_v27 = vpop.f32.mrf.mxu1 }
 0x233   : > { %v2205_v28 = vadd.f32 %v2083_v25, %v539_v23 }
 0x234   : > { %v1796_v29 = vpop.f32.mrf.mxu0  ;;  %v2085_v31 = vpop.f32.mrf.mxu1 }
 0x235   : > { %2269 = vst [vmem:[#allocation2 + $0x70] sm:$0xff] %v2205_v28  ;;  %v2086_v32 = vadd.f32 %v2085_v31, %v1796_v29  ;;  %v549_v29 = vld [vmem:[#allocation2 + $0x68] sm:$0xff] }
 0x236   : > { %v1798_v33 = vpop.f32.mrf.mxu0  ;;  %v2087_v34 = vpop.f32.mrf.mxu1 }
 0x237   : > { %v2206_v35 = vadd.f32 %v2086_v32, %v540_v30 }
 0x238   : > { %v1801_v36 = vpop.f32.mrf.mxu0  ;;  %v2090_v38 = vpop.f32.mrf.mxu1 }
 0x239   : > { %2270 = vst [vmem:[#allocation2 + $0x90] sm:$0xff] %v2206_v35  ;;  %v2091_v39 = vadd.f32 %v2090_v38, %v1801_v36  ;;  %v550_v36 = vld [vmem:[#allocation2 + $0x190] sm:$0xff] }
 0x23a   : > { %v1803_v40 = vpop.f32.mrf.mxu0  ;;  %v2092_v41 = vpop.f32.mrf.mxu1 }
 0x23b   : > { %v2207_v42 = vadd.f32 %v2091_v39, %v541_v37 }
 0x23c   : > { %v1804_v43 = vpop.f32.mrf.mxu0  ;;  %v2093_v45 = vpop.f32.mrf.mxu1 }
 0x23d   : > { %2271 = vst [vmem:[#allocation2 + $0x1d8] sm:$0xff] %v2207_v42  ;;  %v2094_v46 = vadd.f32 %v2093_v45, %v1804_v43  ;;  %v551_v43 = vld [vmem:[#allocation2 + $0x198] sm:$0xff] }
 0x23e   : > { %v1806_v47 = vpop.f32.mrf.mxu0  ;;  %v2095_v48 = vpop.f32.mrf.mxu1 }
 0x23f   : > { %v2208_v49 = vadd.f32 %v2094_v46, %v542_v44 }
 0x240   : > { %v1809_v50 = vpop.f32.mrf.mxu0  ;;  %v2098_v52 = vpop.f32.mrf.mxu1 }
 0x241   : > { %2272 = vst [vmem:[#allocation2 + $0xd0] sm:$0xff] %v2208_v49  ;;  %v2099_v53 = vadd.f32 %v2098_v52, %v1809_v50  ;;  %v552_v50 = vld [vmem:[#allocation2 + $0x38] sm:$0xff] }
 0x242   : > { %v1811_v54 = vpop.f32.mrf.mxu0  ;;  %v2100_v55 = vpop.f32.mrf.mxu1 }
 0x243   : > { %v2209_v56 = vadd.f32 %v2099_v53, %v543_v51 }
 0x244   : > { %v1812_v57 = vpop.f32.mrf.mxu0  ;;  %v2101_v59 = vpop.f32.mrf.mxu1 }
 0x245   : > { %2273 = vst [vmem:[#allocation2 + $0xb8] sm:$0xff] %v2209_v56  ;;  %v2102_v60 = vadd.f32 %v2101_v59, %v1812_v57  ;;  %v553_v57 = vld [vmem:[#allocation2 + $0xc0] sm:$0xff] }
 0x246   : > { %v1814_v61 = vpop.f32.mrf.mxu0  ;;  %v2103_v62 = vpop.f32.mrf.mxu1 }
 0x247   : > { %v2210_v63 = vadd.f32 %v2102_v60, %v544_v58 }
 0x248   : > { %v1817_v0 = vpop.f32.mrf.mxu0  ;;  %v2106_v2 = vpop.f32.mrf.mxu1 }
 0x249   : > { %2274 = vst [vmem:[#allocation2 + $0x88] sm:$0xff] %v2210_v63  ;;  %v2107_v3 = vadd.f32 %v2106_v2, %v1817_v0  ;;  %v554_v0 = vld [vmem:[#allocation2 + $0x1c0] sm:$0xff] }
 0x24a   : > { %v1819_v4 = vpop.f32.mrf.mxu0  ;;  %v2108_v5 = vpop.f32.mrf.mxu1 }
 0x24b   : > { %v2211_v6 = vadd.f32 %v2107_v3, %v545_v1 }
 0x24c   : > { %v1820_v7 = vpop.f32.mrf.mxu0  ;;  %v2109_v9 = vpop.f32.mrf.mxu1 }
 0x24d   : > { %2275 = vst [vmem:[#allocation2 + $0xa8] sm:$0xff] %v2211_v6  ;;  %v2110_v10 = vadd.f32 %v2109_v9, %v1820_v7  ;;  %v555_v7 = vld [vmem:[#allocation2 + $0x158] sm:$0xff] }
 0x24e   : > { %v1822_v11 = vpop.f32.mrf.mxu0  ;;  %v2111_v12 = vpop.f32.mrf.mxu1 }
 0x24f   : > { %v2212_v13 = vadd.f32 %v2110_v10, %v546_v8 }
 0x250   : > { %v1825_v14 = vpop.f32.mrf.mxu0  ;;  %v2114_v16 = vpop.f32.mrf.mxu1 }
 0x251   : > { %2276 = vst [vmem:[#allocation2 + $0x1c8] sm:$0xff] %v2212_v13  ;;  %v2115_v17 = vadd.f32 %v2114_v16, %v1825_v14  ;;  %v556_v14 = vld [vmem:[#allocation2 + $0x10] sm:$0xff] }
 0x252   : > { %v1827_v18 = vpop.f32.mrf.mxu0  ;;  %v2116_v19 = vpop.f32.mrf.mxu1 }
 0x253   : > { %v2213_v20 = vadd.f32 %v2115_v17, %v547_v15 }
 0x254   : > { %v1828_v21 = vpop.f32.mrf.mxu0  ;;  %v2117_v23 = vpop.f32.mrf.mxu1 }
 0x255   : > { %2277 = vst [vmem:[#allocation2 + $0x170] sm:$0xff] %v2213_v20  ;;  %v2118_v24 = vadd.f32 %v2117_v23, %v1828_v21  ;;  %v557_v21 = vld [vmem:[#allocation2 + $0x58] sm:$0xff] }
 0x256   : > { %v1830_v25 = vpop.f32.mrf.mxu0  ;;  %v2119_v26 = vpop.f32.mrf.mxu1 }
 0x257   : > { %v2214_v27 = vadd.f32 %v2118_v24, %v548_v22 }
 0x258   : > { %v1833_v28 = vpop.f32.mrf.mxu0  ;;  %v2122_v30 = vpop.f32.mrf.mxu1 }
 0x259   : > { %2278 = vst [vmem:[#allocation2 + $0x178] sm:$0xff] %v2214_v27  ;;  %v2123_v31 = vadd.f32 %v2122_v30, %v1833_v28  ;;  %v558_v28 = vld [vmem:[#allocation2 + $0xa0] sm:$0xff] }
 0x25a   : > { %v1835_v32 = vpop.f32.mrf.mxu0  ;;  %v2124_v33 = vpop.f32.mrf.mxu1 }
 0x25b   : > { %v2215_v34 = vadd.f32 %v2123_v31, %v549_v29 }
 0x25c   : > { %v1836_v35 = vpop.f32.mrf.mxu0  ;;  %v2125_v37 = vpop.f32.mrf.mxu1 }
 0x25d   : > { %2279 = vst [vmem:[#allocation2 + $0x68] sm:$0xff] %v2215_v34  ;;  %v2126_v38 = vadd.f32 %v2125_v37, %v1836_v35 }
 0x25e   : > { %v1838_v39 = vpop.f32.mrf.mxu0  ;;  %v2127_v40 = vpop.f32.mrf.mxu1 }
 0x25f   : > { %v2216_v41 = vadd.f32 %v2126_v38, %v550_v36 }
 0x260   : > { %v1841_v42 = vpop.f32.mrf.mxu0  ;;  %v2130_v44 = vpop.f32.mrf.mxu1 }
 0x261   : > { %2280 = vst [vmem:[#allocation2 + $0x190] sm:$0xff] %v2216_v41  ;;  %v2131_v45 = vadd.f32 %v2130_v44, %v1841_v42 }
 0x262   : > { %v1843_v46 = vpop.f32.mrf.mxu0  ;;  %v2132_v47 = vpop.f32.mrf.mxu1 }
 0x263   : > { %v2217_v48 = vadd.f32 %v2131_v45, %v551_v43 }
 0x264   : > { %v1844_v49 = vpop.f32.mrf.mxu0  ;;  %v2133_v51 = vpop.f32.mrf.mxu1 }
 0x265   : > { %2281 = vst [vmem:[#allocation2 + $0x198] sm:$0xff] %v2217_v48  ;;  %v2134_v52 = vadd.f32 %v2133_v51, %v1844_v49 }
 0x266   : > { %v1846_v53 = vpop.f32.mrf.mxu0  ;;  %v2135_v54 = vpop.f32.mrf.mxu1 }
 0x267   : > { %v2218_v55 = vadd.f32 %v2134_v52, %v552_v50 }
 0x268   : > { %v1849_v56 = vpop.f32.mrf.mxu0  ;;  %v2138_v58 = vpop.f32.mrf.mxu1 }
 0x269   : > { %2282 = vst [vmem:[#allocation2 + $0x38] sm:$0xff] %v2218_v55  ;;  %v2139_v59 = vadd.f32 %v2138_v58, %v1849_v56 }
 0x26a   : > { %v1851_v60 = vpop.f32.mrf.mxu0  ;;  %v2140_v61 = vpop.f32.mrf.mxu1 }
 0x26b   : > { %v2219_v62 = vadd.f32 %v2139_v59, %v553_v57 }
 0x26c   : > { %v1852_v63 = vpop.f32.mrf.mxu0  ;;  %v2141_v1 = vpop.f32.mrf.mxu1 }
 0x26d   : > { %2283 = vst [vmem:[#allocation2 + $0xc0] sm:$0xff] %v2219_v62  ;;  %v2142_v2 = vadd.f32 %v2141_v1, %v1852_v63 }
 0x26e   : > { %v1854_v3 = vpop.f32.mrf.mxu0  ;;  %v2143_v4 = vpop.f32.mrf.mxu1 }
 0x26f   : > { %v2220_v5 = vadd.f32 %v2142_v2, %v554_v0 }
 0x270   : > { %v1857_v6 = vpop.f32.mrf.mxu0  ;;  %v2146_v8 = vpop.f32.mrf.mxu1 }
 0x271   : > { %2284 = vst [vmem:[#allocation2 + $0x1c0] sm:$0xff] %v2220_v5  ;;  %v2147_v9 = vadd.f32 %v2146_v8, %v1857_v6 }
 0x272   : > { %v1859_v10 = vpop.f32.mrf.mxu0  ;;  %v2148_v11 = vpop.f32.mrf.mxu1 }
 0x273   : > { %v2221_v12 = vadd.f32 %v2147_v9, %v555_v7 }
 0x274   : > { %v1860_v13 = vpop.f32.mrf.mxu0  ;;  %v2149_v15 = vpop.f32.mrf.mxu1 }
 0x275   : > { %2285 = vst [vmem:[#allocation2 + $0x158] sm:$0xff] %v2221_v12  ;;  %v2150_v16 = vadd.f32 %v2149_v15, %v1860_v13 }
 0x276   : > { %v1862_v17 = vpop.f32.mrf.mxu0  ;;  %v2151_v18 = vpop.f32.mrf.mxu1 }
 0x277   : > { %v2222_v19 = vadd.f32 %v2150_v16, %v556_v14 }
 0x278   : > { %v1865_v20 = vpop.f32.mrf.mxu0  ;;  %v2154_v22 = vpop.f32.mrf.mxu1 }
 0x279   : > { %2286 = vst [vmem:[#allocation2 + $0x10] sm:$0xff] %v2222_v19  ;;  %v2155_v23 = vadd.f32 %v2154_v22, %v1865_v20 }
 0x27a   : > { %v1867_v24 = vpop.f32.mrf.mxu0  ;;  %v2156_v25 = vpop.f32.mrf.mxu1 }
 0x27b   : > { %v2223_v26 = vadd.f32 %v2155_v23, %v557_v21 }
 0x27c   : > { %v1868_v27 = vpop.f32.mrf.mxu0  ;;  %v2157_v29 = vpop.f32.mrf.mxu1 }
 0x27d   : > { %2287 = vst [vmem:[#allocation2 + $0x58] sm:$0xff] %v2223_v26  ;;  %v2158_v30 = vadd.f32 %v2157_v29, %v1868_v27  ;;  %2292 = sbr.rel (%p3421_p10) target bundleno = 1026 (0x402), region = 59 }
 0x27e   : > { %v1870_v31 = vpop.f32.mrf.mxu0  ;;  %v2159_v32 = vpop.f32.mrf.mxu1 }
 0x27f   : > { %v2224_v33 = vadd.f32 %v2158_v30, %v558_v28 }
 0x281   : > { %2288 = vst [vmem:[#allocation2 + $0xa0] sm:$0xff] %v2224_v33 }
 0x282   : > { %v4602_v34 = vld [vmem:[#allocation2 + $0xb0] sm:$0xff]  ;;  %v4606_v36 = vld [vmem:[#allocation2 + $0xd8] sm:$0xff]  ;;  %v4616_v42 = vld [vmem:[#allocation2 + $0x168] sm:$0xff] }
 0x283   : > { %v4604_v35 = vld [vmem:[#allocation2 + $0x1b0] sm:$0xff]  ;;  %v4610_v38 = vld [vmem:[#allocation2 + $0x18] sm:$0xff]  ;;  %v4622_v46 = vld [vmem:[#allocation2 + $0x48] sm:$0xff] }
 0x284   : > { %v2357_v37 = vadd.f32 %v4604_v35, %v4602_v34  ;;  %v4613_v40 = vld [vmem:[#allocation2 + $0x50] sm:$0xff]  ;;  %v4625_v48 = vld [vmem:[#allocation2 + $0x180] sm:$0xff]  ;;  %v4631_v52 = vld [vmem:[#allocation2 + $0x118] sm:$0xff] }
 0x285   : > { %v4619_v44 = vld [vmem:[#allocation2 + $0x130] sm:$0xff]  ;;  %v4634_v54 = vld [vmem:[#allocation2 + $0x98] sm:$0xff]  ;;  %v4637_v56 = vld [vmem:[#allocation2 + $0x120] sm:$0xff] }
 0x286   : > { %v2358_v39 = vadd.f32 %v2357_v37, %v4606_v36  ;;  %v4628_v50 = vld [vmem:[#allocation2 + $0x110] sm:$0xff]  ;;  %v4643_v60 = vld [vmem:[#allocation2 + $0x108] sm:$0xff]  ;;  %v4646_v62 = vld [vmem:[#allocation2 + $0x60] sm:$0xff] }
 0x287   : > { %v4640_v58 = vld [vmem:[#allocation2 + $0x150] sm:$0xff]  ;;  %v4649_v0 = vld [vmem:[#allocation2 + $0xe0] sm:$0xff]  ;;  %v4652_v2 = vld [vmem:[#allocation2 + $0x188] sm:$0xff] }
 0x288   : > { %v2359_v41 = vadd.f32 %v2358_v39, %v4610_v38  ;;  %v4655_v4 = vld [vmem:[#allocation2 + $0x138] sm:$0xff]  ;;  %v4658_v6 = vld [vmem:[#allocation2 + $0x140] sm:$0xff]  ;;  %v4664_v10 = vld [vmem:[#allocation2 + $0x1a8] sm:$0xff] }
 0x289   : > { %v4661_v8 = vld [vmem:[#allocation2 + $0x80] sm:$0xff]  ;;  %v4667_v12 = vld [vmem:[#allocation2 + $0x1b8] sm:$0xff]  ;;  %v4670_v14 = vld [vmem:[#allocation2 + $0x28] sm:$0xff] }
 0x28a   : > { %v2360_v43 = vadd.f32 %v2359_v41, %v4613_v40  ;;  %v4673_v16 = vld [vmem:[#allocation2 + $0x1e8] sm:$0xff]  ;;  %v4676_v18 = vld [vmem:[#allocation2 + $0xf8] sm:$0xff]  ;;  %v4679_v20 = vld [vmem:[#allocation2 + $0x160] sm:$0xff] }
 0x28b   : > { %v4682_v22 = vld [vmem:[#allocation2 + $0x30] sm:$0xff]  ;;  %v4685_v24 = vld [vmem:[#allocation2 + $0x1e0] sm:$0xff]  ;;  %v4694_v30 = vld [vmem:[#allocation2 + $0x8] sm:$0xff] }
 0x28c   : > { %v2361_v45 = vadd.f32 %v2360_v43, %v4616_v42  ;;  %v4688_v26 = vld [vmem:[#allocation2] sm:$0xff]  ;;  %v4691_v28 = vld [vmem:[#allocation2 + $0xf0] sm:$0xff]  ;;  %5378 = vst [vmem:[#allocation5_spill] sm:$0xff] %v4694_v30  ;;  %v4697_v32 = vld [vmem:[#allocation2 + $0x148] sm:$0xff] }
 0x28d   : > { %5377 = vst [vmem:[#allocation4_spill] sm:$0xff] %v4691_v28  ;;  %5379 = vst [vmem:[#allocation6_spill] sm:$0xff] %v4697_v32  ;;  %v4700_v37 = vld [vmem:[#allocation2 + $0x1d0] sm:$0xff]  ;;  %v4703_v41 = vld [vmem:[#allocation2 + $0x100] sm:$0xff] }
 0x28e   : > { %v2362_v47 = vadd.f32 %v2361_v45, %v4619_v44  ;;  %5380 = vst [vmem:[#allocation7_spill] sm:$0xff] %v4700_v37  ;;  %5381 = vst [vmem:[#allocation8_spill] sm:$0xff] %v4703_v41  ;;  %v4706_v45 = vld [vmem:[#allocation2 + $0xc8] sm:$0xff] }
 0x28f   : > { %5382 = vst [vmem:[#allocation9_spill] sm:$0xff] %v4706_v45 }
 0x290   : > { %v2363_v49 = vadd.f32 %v2362_v47, %v4622_v46 }
 0x292   : > { %v2364_v51 = vadd.f32 %v2363_v49, %v4625_v48  ;;  %v4709_v49 = vld [vmem:[#allocation2 + $0x40] sm:$0xff] }
 0x293   : > { %5383 = vst [vmem:[#allocation10_spill] sm:$0xff] %v4709_v49 }
 0x294   : > { %v2365_v53 = vadd.f32 %v2364_v51, %v4628_v50 }
 0x296   : > { %v2366_v55 = vadd.f32 %v2365_v53, %v4631_v52  ;;  %v4712_v53 = vld [vmem:[#allocation2 + $0x1f8] sm:$0xff] }
 0x297   : > { %5384 = vst [vmem:[#allocation11_spill] sm:$0xff] %v4712_v53 }
 0x298   : > { %v2367_v57 = vadd.f32 %v2366_v55, %v4634_v54 }
 0x29a   : > { %v2368_v59 = vadd.f32 %v2367_v57, %v4637_v56  ;;  %v4715_v57 = vld [vmem:[#allocation2 + $0x20] sm:$0xff] }
 0x29b   : > { %5385 = vst [vmem:[#allocation12_spill] sm:$0xff] %v4715_v57 }
 0x29c   : > { %v2369_v61 = vadd.f32 %v2368_v59, %v4640_v58 }
 0x29e   : > { %v2370_v63 = vadd.f32 %v2369_v61, %v4643_v60  ;;  %v4718_v61 = vld [vmem:[#allocation2 + $0x128] sm:$0xff] }
 0x29f   : > { %5386 = vst [vmem:[#allocation13_spill] sm:$0xff] %v4718_v61 }
 0x2a0   : > { %v2371_v1 = vadd.f32 %v2370_v63, %v4646_v62 }
 0x2a2   : > { %v2372_v3 = vadd.f32 %v2371_v1, %v4649_v0  ;;  %v4721_v1 = vld [vmem:[#allocation2 + $0x1a0] sm:$0xff] }
 0x2a3   : > { %5387 = vst [vmem:[#allocation14_spill] sm:$0xff] %v4721_v1 }
 0x2a4   : > { %v2373_v5 = vadd.f32 %v2372_v3, %v4652_v2 }
 0x2a6   : > { %v2374_v7 = vadd.f32 %v2373_v5, %v4655_v4  ;;  %v4724_v5 = vld [vmem:[#allocation2 + $0x1f0] sm:$0xff] }
 0x2a7   : > { %5388 = vst [vmem:[#allocation15_spill] sm:$0xff] %v4724_v5 }
 0x2a8   : > { %v2375_v9 = vadd.f32 %v2374_v7, %v4658_v6 }
 0x2aa   : > { %v2376_v11 = vadd.f32 %v2375_v9, %v4661_v8  ;;  %v4727_v9 = vld [vmem:[#allocation2 + $0xe8] sm:$0xff] }
 0x2ab   : > { %5389 = vst [vmem:[#allocation16_spill] sm:$0xff] %v4727_v9 }
 0x2ac   : > { %v2377_v13 = vadd.f32 %v2376_v11, %v4664_v10 }
 0x2ae   : > { %v2378_v15 = vadd.f32 %v2377_v13, %v4667_v12  ;;  %v4730_v13 = vld [vmem:[#allocation2 + $0x78] sm:$0xff] }
 0x2af   : > { %5390 = vst [vmem:[#allocation17_spill] sm:$0xff] %v4730_v13 }
 0x2b0   : > { %v2379_v17 = vadd.f32 %v2378_v15, %v4670_v14 }
 0x2b2   : > { %v2380_v19 = vadd.f32 %v2379_v17, %v4673_v16  ;;  %v4733_v17 = vld [vmem:[#allocation2 + $0x70] sm:$0xff] }
 0x2b3   : > { %5391 = vst [vmem:[#allocation18_spill] sm:$0xff] %v4733_v17 }
 0x2b4   : > { %v2381_v21 = vadd.f32 %v2380_v19, %v4676_v18 }
 0x2b6   : > { %v2382_v23 = vadd.f32 %v2381_v21, %v4679_v20  ;;  %v2338_v21 = vld [vmem:[#allocation2 + $0x90] sm:$0xff] }
 0x2b8   : > { %v2383_v25 = vadd.f32 %v2382_v23, %v4682_v22 }
 0x2ba   : > { %v2384_v27 = vadd.f32 %v2383_v25, %v4685_v24  ;;  %v2339_v25 = vld [vmem:[#allocation2 + $0x1d8] sm:$0xff] }
 0x2bc   : > { %v2385_v29 = vadd.f32 %v2384_v27, %v4688_v26 }
 0x2be   : > { %v2386_v31 = vadd.f32 %v2385_v29, %v4691_v28  ;;  %v2340_v29 = vld [vmem:[#allocation2 + $0xd0] sm:$0xff] }
 0x2c0   : > { %v2387_v33 = vadd.f32 %v2386_v31, %v4694_v30 }
 0x2c2   : > { %v2388_v39 = vadd.f32 %v2387_v33, %v4697_v32  ;;  %v2341_v33 = vld [vmem:[#allocation2 + $0xb8] sm:$0xff] }
 0x2c4   : > { %v2389_v43 = vadd.f32 %v2388_v39, %v4700_v37 }
 0x2c6   : > { %v2390_v47 = vadd.f32 %v2389_v43, %v4703_v41  ;;  %v2342_v43 = vld [vmem:[#allocation2 + $0x88] sm:$0xff]  ;;  %v2356_v41 = vld [vmem:[#allocation2 + $0xa0] sm:$0xff] }
 0x2c8   : > { %v2391_v51 = vadd.f32 %v2390_v47, %v4706_v45  ;;  %v2355_v45 = vld [vmem:[#allocation2 + $0x58] sm:$0xff] }
 0x2ca   : > { %v2392_v55 = vadd.f32 %v2391_v51, %v4709_v49  ;;  %v2343_v51 = vld [vmem:[#allocation2 + $0xa8] sm:$0xff]  ;;  %v2354_v49 = vld [vmem:[#allocation2 + $0x10] sm:$0xff] }
 0x2cc   : > { %v2393_v59 = vadd.f32 %v2392_v55, %v4712_v53  ;;  %v2353_v53 = vld [vmem:[#allocation2 + $0x158] sm:$0xff] }
 0x2ce   : > { %v2394_v63 = vadd.f32 %v2393_v59, %v4715_v57  ;;  %v2344_v59 = vld [vmem:[#allocation2 + $0x1c8] sm:$0xff]  ;;  %v2352_v57 = vld [vmem:[#allocation2 + $0x1c0] sm:$0xff] }
 0x2d0   : > { %v2395_v3 = vadd.f32 %v2394_v63, %v4718_v61  ;;  %v2351_v61 = vld [vmem:[#allocation2 + $0xc0] sm:$0xff] }
 0x2d2   : > { %v2396_v7 = vadd.f32 %v2395_v3, %v4721_v1  ;;  %v2345_v3 = vld [vmem:[#allocation2 + $0x170] sm:$0xff]  ;;  %v2350_v1 = vld [vmem:[#allocation2 + $0x38] sm:$0xff] }
 0x2d4   : > { %v2397_v11 = vadd.f32 %v2396_v7, %v4724_v5  ;;  %v2348_v5 = vld [vmem:[#allocation2 + $0x190] sm:$0xff] }
 0x2d6   : > { %v2398_v15 = vadd.f32 %v2397_v11, %v4727_v9  ;;  %v2346_v11 = vld [vmem:[#allocation2 + $0x178] sm:$0xff] }
 0x2d8   : > { %v2399_v19 = vadd.f32 %v2398_v15, %v4730_v13  ;;  %v2347_v15 = vld [vmem:[#allocation2 + $0x68] sm:$0xff] }
 0x2da   : > { %v2400_v23 = vadd.f32 %v2399_v19, %v4733_v17  ;;  %v2349_v17 = vld [vmem:[#allocation2 + $0x198] sm:$0xff] }
 0x2dc   : > { %v2401_v27 = vadd.f32 %v2400_v23, %v2338_v21 }
 0x2de   : > { %v2402_v31 = vadd.f32 %v2401_v27, %v2339_v25 }
 0x2e0   : > { %v2403_v39 = vadd.f32 %v2402_v31, %v2340_v29 }
 0x2e2   : > { %v2404_v47 = vadd.f32 %v2403_v39, %v2341_v33 }
 0x2e4   : > { %v2405_v55 = vadd.f32 %v2404_v47, %v2342_v43 }
 0x2e6   : > { %v2406_v63 = vadd.f32 %v2405_v55, %v2343_v51 }
 0x2e8   : > { %v2407_v7 = vadd.f32 %v2406_v63, %v2344_v59 }
 0x2ea   : > { %v2408_v9 = vadd.f32 %v2407_v7, %v2345_v3 }
 0x2ec   : > { %v2409_v13 = vadd.f32 %v2408_v9, %v2346_v11 }
 0x2ee   : > { %v2410_v19 = vadd.f32 %v2409_v13, %v2347_v15 }
 0x2f0   : > { %v2411_v23 = vadd.f32 %v2410_v19, %v2348_v5 }
 0x2f2   : > { %v2412_v27 = vadd.f32 %v2411_v23, %v2349_v17 }
 0x2f4   : > { %v2413_v31 = vadd.f32 %v2412_v27, %v2350_v1 }
 0x2f6   : > { %v2414_v39 = vadd.f32 %v2413_v31, %v2351_v61 }
 0x2f8   : > { %v2415_v47 = vadd.f32 %v2414_v39, %v2352_v57 }
 0x2fa   : > { %v2416_v55 = vadd.f32 %v2415_v47, %v2353_v53 }
 0x2fc   : > { %v2417_v63 = vadd.f32 %v2416_v55, %v2354_v49 }
 0x2fe   : > { %v2418_v7 = vadd.f32 %v2417_v63, %v2355_v45 }
 0x300   : > { %v2419_v37 = vadd.f32 %v2418_v7, %v2356_v41 }
 0x302   : > { %v2420_v9 = vrot.slane %v2419_v37, 4 }
 0x304   : > { %v2421_v32 = vadd.f32 %v2420_v9, %v2419_v37 }
 0x306   : > { %v2422_v13 = vrot.slane %v2421_v32, 2 }
 0x308   : > { %v2423_v30 = vadd.f32 %v2422_v13, %v2421_v32 }
 0x30a   : > { %v2424_v19 = vrot.slane %v2423_v30, 1 }
 0x30c   : > { %v2425_v28 = vadd.f32 %v2424_v19, %v2423_v30 }
 0x30e   : > { %v4737_v23 = vmul.f32 0.001953125, %v2425_v28 }
 0x310   : > { %v4740_v27 = vsub.f32 %v2338_v21, %v4737_v23  ;;  %v4743_v31 = vsub.f32 %v2339_v25, %v4737_v23  ;;  %v4746_v39 = vsub.f32 %v2340_v29, %v4737_v23  ;;  %v4749_v47 = vsub.f32 %v2341_v33, %v4737_v23 }
 0x311   : > { %v4752_v37 = vsub.f32 %v2342_v43, %v4737_v23  ;;  %v4755_v32 = vsub.f32 %v2343_v51, %v4737_v23  ;;  %v4758_v28 = vsub.f32 %v2344_v59, %v4737_v23  ;;  %v4761_v30 = vsub.f32 %v2345_v3, %v4737_v23 }
 0x312   : > { %v4764_v21 = vsub.f32 %v2346_v11, %v4737_v23  ;;  %v4767_v25 = vsub.f32 %v2347_v15, %v4737_v23  ;;  %v4770_v29 = vsub.f32 %v2348_v5, %v4737_v23  ;;  %v4773_v33 = vsub.f32 %v2349_v17, %v4737_v23 }
 0x313   : > { %v4776_v43 = vsub.f32 %v2350_v1, %v4737_v23  ;;  %v4779_v51 = vsub.f32 %v2351_v61, %v4737_v23  ;;  %v4782_v59 = vsub.f32 %v2352_v57, %v4737_v23  ;;  %v4785_v3 = vsub.f32 %v2353_v53, %v4737_v23 }
 0x314   : > { %5392 = vst [vmem:[#allocation19_spill] sm:$0xff] %v4773_v33  ;;  %v4788_v11 = vsub.f32 %v2354_v49, %v4737_v23  ;;  %v4791_v5 = vsub.f32 %v2355_v45, %v4737_v23  ;;  %v4794_v17 = vsub.f32 %v2356_v41, %v4737_v23  ;;  %v4798_v1 = vsub.f32 %v4602_v34, %v4737_v23 }
 0x315   : > { %5393 = vst [vmem:[#allocation20_spill] sm:$0xff] %v4776_v43  ;;  %5394 = vst [vmem:[#allocation21_spill] sm:$0xff] %v4779_v51  ;;  %v4802_v57 = vsub.f32 %v4604_v35, %v4737_v23  ;;  %v4806_v53 = vsub.f32 %v4606_v36, %v4737_v23  ;;  %v4810_v49 = vsub.f32 %v4610_v38, %v4737_v23 }
 0x316   : > { %5395 = vst [vmem:[#allocation22_spill] sm:$0xff] %v4782_v59  ;;  %5396 = vst [vmem:[#allocation23_spill] sm:$0xff] %v4785_v3  ;;  %v2492_v41 = vmul.f32 %v4798_v1, %v4798_v1  ;;  %v4818_v34 = vsub.f32 %v4613_v40, %v4737_v23  ;;  %v4824_v36 = vsub.f32 %v4616_v42, %v4737_v23 }
 0x317   : > { %v2493_v45 = vmul.f32 %v4802_v57, %v4802_v57  ;;  %v2494_v35 = vmul.f32 %v4806_v53, %v4806_v53  ;;  %v2495_v38 = vmul.f32 %v4810_v49, %v4810_v49  ;;  %v4830_v15 = vsub.f32 %v4619_v44, %v4737_v23 }
 0x318   : > { %v2496_v55 = vmul.f32 %v4818_v34, %v4818_v34  ;;  %v4836_v63 = vsub.f32 %v4622_v46, %v4737_v23  ;;  %v2497_v42 = vmul.f32 %v4824_v36, %v4824_v36  ;;  %v4842_v9 = vsub.f32 %v4625_v48, %v4737_v23 }
 0x319   : > { %v2556_v61 = vadd.f32 %v2493_v45, %v2492_v41  ;;  %v2498_v44 = vmul.f32 %v4830_v15, %v4830_v15  ;;  %v4848_v19 = vsub.f32 %v4628_v50, %v4737_v23  ;;  %v4854_v45 = vsub.f32 %v4631_v52, %v4737_v23 }
 0x31a   : > { %v2499_v46 = vmul.f32 %v4836_v63, %v4836_v63  ;;  %v2500_v48 = vmul.f32 %v4842_v9, %v4842_v9 }
 0x31b   : > { %v2557_v40 = vadd.f32 %v2556_v61, %v2494_v35  ;;  %v2501_v50 = vmul.f32 %v4848_v19, %v4848_v19  ;;  %v2502_v52 = vmul.f32 %v4854_v45, %v4854_v45 }
 0x31d   : > { %v2558_v7 = vadd.f32 %v2557_v40, %v2495_v38  ;;  %v4860_v38 = vsub.f32 %v4634_v54, %v4737_v23 }
 0x31f   : > { %v2559_v13 = vadd.f32 %v2558_v7, %v2496_v55  ;;  %v4866_v55 = vsub.f32 %v4637_v56, %v4737_v23  ;;  %v2503_v54 = vmul.f32 %v4860_v38, %v4860_v38 }
 0x321   : > { %v2560_v41 = vadd.f32 %v2559_v13, %v2497_v42  ;;  %v4872_v42 = vsub.f32 %v4640_v58, %v4737_v23  ;;  %v2504_v56 = vmul.f32 %v4866_v55, %v4866_v55 }
 0x323   : > { %v2561_v35 = vadd.f32 %v2560_v41, %v2498_v44  ;;  %v4878_v44 = vsub.f32 %v4643_v60, %v4737_v23  ;;  %v2505_v58 = vmul.f32 %v4872_v42, %v4872_v42 }
 0x325   : > { %v2562_v61 = vadd.f32 %v2561_v35, %v2499_v46  ;;  %v4884_v46 = vsub.f32 %v4646_v62, %v4737_v23  ;;  %v2506_v60 = vmul.f32 %v4878_v44, %v4878_v44 }
 0x327   : > { %v2563_v40 = vadd.f32 %v2562_v61, %v2500_v48  ;;  %v4890_v48 = vsub.f32 %v4649_v0, %v4737_v23  ;;  %v2507_v62 = vmul.f32 %v4884_v46, %v4884_v46 }
 0x329   : > { %v2564_v7 = vadd.f32 %v2563_v40, %v2501_v50  ;;  %v4896_v50 = vsub.f32 %v4652_v2, %v4737_v23  ;;  %v2508_v0 = vmul.f32 %v4890_v48, %v4890_v48 }
 0x32b   : > { %v2565_v13 = vadd.f32 %v2564_v7, %v2502_v52  ;;  %v4902_v52 = vsub.f32 %v4655_v4, %v4737_v23  ;;  %v2509_v2 = vmul.f32 %v4896_v50, %v4896_v50 }
 0x32d   : > { %v2566_v41 = vadd.f32 %v2565_v13, %v2503_v54  ;;  %v4908_v54 = vsub.f32 %v4658_v6, %v4737_v23  ;;  %v2510_v4 = vmul.f32 %v4902_v52, %v4902_v52 }
 0x32f   : > { %v2567_v35 = vadd.f32 %v2566_v41, %v2504_v56  ;;  %v4914_v56 = vsub.f32 %v4661_v8, %v4737_v23  ;;  %v2511_v6 = vmul.f32 %v4908_v54, %v4908_v54 }
 0x331   : > { %v2568_v61 = vadd.f32 %v2567_v35, %v2505_v58  ;;  %v4920_v58 = vsub.f32 %v4664_v10, %v4737_v23  ;;  %v2512_v8 = vmul.f32 %v4914_v56, %v4914_v56 }
 0x333   : > { %v2569_v40 = vadd.f32 %v2568_v61, %v2506_v60  ;;  %v4926_v60 = vsub.f32 %v4667_v12, %v4737_v23  ;;  %v2513_v10 = vmul.f32 %v4920_v58, %v4920_v58 }
 0x335   : > { %v2570_v7 = vadd.f32 %v2569_v40, %v2507_v62  ;;  %v4932_v62 = vsub.f32 %v4670_v14, %v4737_v23  ;;  %v2514_v12 = vmul.f32 %v4926_v60, %v4926_v60 }
 0x337   : > { %v2571_v13 = vadd.f32 %v2570_v7, %v2508_v0  ;;  %v4938_v0 = vsub.f32 %v4673_v16, %v4737_v23  ;;  %v2515_v14 = vmul.f32 %v4932_v62, %v4932_v62 }
 0x339   : > { %v2572_v41 = vadd.f32 %v2571_v13, %v2509_v2  ;;  %v4944_v2 = vsub.f32 %v4676_v18, %v4737_v23  ;;  %v2516_v16 = vmul.f32 %v4938_v0, %v4938_v0 }
 0x33b   : > { %v2573_v35 = vadd.f32 %v2572_v41, %v2510_v4  ;;  %v4950_v4 = vsub.f32 %v4679_v20, %v4737_v23  ;;  %v2517_v18 = vmul.f32 %v4944_v2, %v4944_v2 }
 0x33d   : > { %v2574_v61 = vadd.f32 %v2573_v35, %v2511_v6  ;;  %v4956_v6 = vsub.f32 %v4682_v22, %v4737_v23  ;;  %v2518_v20 = vmul.f32 %v4950_v4, %v4950_v4 }
 0x33f   : > { %v2575_v40 = vadd.f32 %v2574_v61, %v2512_v8  ;;  %5397 = vst [vmem:[#allocation24_spill] sm:$0xff] %v4956_v6  ;;  %v4962_v8 = vsub.f32 %v4685_v24, %v4737_v23  ;;  %v2519_v22 = vmul.f32 %v4956_v6, %v4956_v6 }
 0x341   : > { %v2576_v7 = vadd.f32 %v2575_v40, %v2513_v10  ;;  %5398 = vst [vmem:[#allocation25_spill] sm:$0xff] %v4962_v8  ;;  %v4968_v10 = vsub.f32 %v4688_v26, %v4737_v23  ;;  %v2520_v24 = vmul.f32 %v4962_v8, %v4962_v8 }
 0x343   : > { %v2577_v13 = vadd.f32 %v2576_v7, %v2514_v12  ;;  %5399 = vst [vmem:[#allocation26_spill] sm:$0xff] %v4968_v10  ;;  %v5400_v12 = vld [vmem:[#allocation4_spill] sm:$0xff]  ;;  %v5402_v7 = vld [vmem:[#allocation5_spill] sm:$0xff]  ;;  %v2521_v26 = vmul.f32 %v4968_v10, %v4968_v10 }
 0x344   : > { %v4974_v40 = vsub.f32 %v5400_v12, %v4737_v23  ;;  %v5406_v12 = vld [vmem:[#allocation7_spill] sm:$0xff] }
 0x345   : > { %v2578_v41 = vadd.f32 %v2577_v13, %v2515_v14  ;;  %v4980_v13 = vsub.f32 %v5402_v7, %v4737_v23  ;;  %v4992_v8 = vsub.f32 %v5406_v12, %v4737_v23  ;;  %v5408_v7 = vld [vmem:[#allocation8_spill] sm:$0xff]  ;;  %v5412_v12 = vld [vmem:[#allocation10_spill] sm:$0xff] }
 0x346   : > { %5401 = vst [vmem:[#allocation4_spill] sm:$0xff] %v4974_v40  ;;  %v4998_v10 = vsub.f32 %v5408_v7, %v4737_v23  ;;  %v5414_v7 = vld [vmem:[#allocation11_spill] sm:$0xff] }
 0x347   : > { %v2579_v35 = vadd.f32 %v2578_v41, %v2516_v16  ;;  %5403 = vst [vmem:[#allocation5_spill] sm:$0xff] %v4980_v13  ;;  %v5404_v41 = vld [vmem:[#allocation6_spill] sm:$0xff]  ;;  %5407 = vst [vmem:[#allocation7_spill] sm:$0xff] %v4992_v8 }
 0x348   : > { %v4986_v6 = vsub.f32 %v5404_v41, %v4737_v23  ;;  %5409 = vst [vmem:[#allocation8_spill] sm:$0xff] %v4998_v10  ;;  %v5410_v41 = vld [vmem:[#allocation9_spill] sm:$0xff] }
 0x349   : > { %v2580_v61 = vadd.f32 %v2579_v35, %v2517_v18  ;;  %v2522_v18 = vmul.f32 %v4974_v40, %v4974_v40  ;;  %v5004_v40 = vsub.f32 %v5410_v41, %v4737_v23  ;;  %v5416_v41 = vld [vmem:[#allocation12_spill] sm:$0xff] }
 0x34a   : > { %5405 = vst [vmem:[#allocation6_spill] sm:$0xff] %v4986_v6 }
 0x34b   : > { %v2581_v14 = vadd.f32 %v2580_v61, %v2518_v20  ;;  %v2523_v20 = vmul.f32 %v4980_v13, %v4980_v13  ;;  %5411 = vst [vmem:[#allocation9_spill] sm:$0xff] %v5004_v40  ;;  %v5010_v13 = vsub.f32 %v5412_v12, %v4737_v23  ;;  %v5418_v12 = vld [vmem:[#allocation13_spill] sm:$0xff] }
 0x34d   : > { %v2582_v16 = vadd.f32 %v2581_v14, %v2519_v22  ;;  %v2524_v22 = vmul.f32 %v4986_v6, %v4986_v6  ;;  %5413 = vst [vmem:[#allocation10_spill] sm:$0xff] %v5010_v13  ;;  %v5016_v6 = vsub.f32 %v5414_v7, %v4737_v23  ;;  %v5420_v7 = vld [vmem:[#allocation14_spill] sm:$0xff] }
 0x34f   : > { %v2583_v35 = vadd.f32 %v2582_v16, %v2520_v24  ;;  %v2525_v24 = vmul.f32 %v4992_v8, %v4992_v8  ;;  %5415 = vst [vmem:[#allocation11_spill] sm:$0xff] %v5016_v6  ;;  %v5022_v8 = vsub.f32 %v5416_v41, %v4737_v23  ;;  %v5421_v41 = vld [vmem:[#allocation15_spill] sm:$0xff] }
 0x351   : > { %v2584_v61 = vadd.f32 %v2583_v35, %v2521_v26  ;;  %v2526_v26 = vmul.f32 %v4998_v10, %v4998_v10  ;;  %5417 = vst [vmem:[#allocation12_spill] sm:$0xff] %v5022_v8  ;;  %v5028_v10 = vsub.f32 %v5418_v12, %v4737_v23  ;;  %v5423_v12 = vld [vmem:[#allocation16_spill] sm:$0xff] }
 0x353   : > { %v2585_v14 = vadd.f32 %v2584_v61, %v2522_v18  ;;  %v2527_v18 = vmul.f32 %v5004_v40, %v5004_v40  ;;  %5419 = vst [vmem:[#allocation13_spill] sm:$0xff] %v5028_v10  ;;  %v5034_v40 = vsub.f32 %v5420_v7, %v4737_v23  ;;  %v5424_v7 = vld [vmem:[#allocation17_spill] sm:$0xff] }
 0x355   : > { %v2586_v16 = vadd.f32 %v2585_v14, %v2523_v20  ;;  %v2528_v20 = vmul.f32 %v5010_v13, %v5010_v13  ;;  %v5040_v13 = vsub.f32 %v5421_v41, %v4737_v23  ;;  %v5425_v41 = vld [vmem:[#allocation18_spill] sm:$0xff] }
 0x357   : > { %v2587_v35 = vadd.f32 %v2586_v16, %v2524_v22  ;;  %v2529_v22 = vmul.f32 %v5016_v6, %v5016_v6  ;;  %5422 = vst [vmem:[#allocation14_spill] sm:$0xff] %v5040_v13  ;;  %v5046_v6 = vsub.f32 %v5423_v12, %v4737_v23 }
 0x359   : > { %v2588_v61 = vadd.f32 %v2587_v35, %v2525_v24  ;;  %v2530_v24 = vmul.f32 %v5022_v8, %v5022_v8  ;;  %v5052_v8 = vsub.f32 %v5424_v7, %v4737_v23 }
 0x35b   : > { %v2589_v14 = vadd.f32 %v2588_v61, %v2526_v26  ;;  %v2531_v26 = vmul.f32 %v5028_v10, %v5028_v10  ;;  %v5058_v10 = vsub.f32 %v5425_v41, %v4737_v23  ;;  %v2535_v12 = vmul.f32 %v5052_v8, %v5052_v8 }
 0x35c   : > { %v2538_v23 = vmul.f32 %v4743_v31, %v4743_v31  ;;  %v2539_v41 = vmul.f32 %v4746_v39, %v4746_v39 }
 0x35d   : > { %v2590_v16 = vadd.f32 %v2589_v14, %v2527_v18  ;;  %v2532_v18 = vmul.f32 %v5034_v40, %v5034_v40 }
 0x35f   : > { %v2591_v35 = vadd.f32 %v2590_v16, %v2528_v20  ;;  %v2533_v20 = vmul.f32 %v5040_v13, %v5040_v13  ;;  %v2537_v13 = vmul.f32 %v4740_v27, %v4740_v27 }
 0x361   : > { %v2592_v61 = vadd.f32 %v2591_v35, %v2529_v22  ;;  %v2534_v22 = vmul.f32 %v5046_v6, %v5046_v6 }
 0x363   : > { %v2593_v14 = vadd.f32 %v2592_v61, %v2530_v24  ;;  %v2536_v61 = vmul.f32 %v5058_v10, %v5058_v10 }
 0x365   : > { %v2594_v16 = vadd.f32 %v2593_v14, %v2531_v26 }
 0x367   : > { %v2595_v35 = vadd.f32 %v2594_v16, %v2532_v18  ;;  %v2540_v16 = vmul.f32 %v4749_v47, %v4749_v47 }
 0x369   : > { %v2596_v24 = vadd.f32 %v2595_v35, %v2533_v20  ;;  %v2541_v35 = vmul.f32 %v4752_v37, %v4752_v37 }
 0x36b   : > { %v2597_v7 = vadd.f32 %v2596_v24, %v2534_v22  ;;  %v2542_v24 = vmul.f32 %v4755_v32, %v4755_v32 }
 0x36d   : > { %v2598_v26 = vadd.f32 %v2597_v7, %v2535_v12  ;;  %v2543_v7 = vmul.f32 %v4758_v28, %v4758_v28 }
 0x36f   : > { %v2599_v14 = vadd.f32 %v2598_v26, %v2536_v61  ;;  %v2544_v26 = vmul.f32 %v4761_v30, %v4761_v30 }
 0x371   : > { %v2600_v18 = vadd.f32 %v2599_v14, %v2537_v13  ;;  %v2545_v14 = vmul.f32 %v4764_v21, %v4764_v21 }
 0x373   : > { %v2601_v20 = vadd.f32 %v2600_v18, %v2538_v23  ;;  %v2546_v18 = vmul.f32 %v4767_v25, %v4767_v25 }
 0x375   : > { %v2602_v22 = vadd.f32 %v2601_v20, %v2539_v41  ;;  %v2547_v20 = vmul.f32 %v4770_v29, %v4770_v29 }
 0x377   : > { %v2603_v12 = vadd.f32 %v2602_v22, %v2540_v16  ;;  %v2548_v22 = vmul.f32 %v4773_v33, %v4773_v33 }
 0x379   : > { %v2604_v61 = vadd.f32 %v2603_v12, %v2541_v35  ;;  %v2549_v12 = vmul.f32 %v4776_v43, %v4776_v43 }
 0x37b   : > { %v2605_v13 = vadd.f32 %v2604_v61, %v2542_v24  ;;  %v2550_v61 = vmul.f32 %v4779_v51, %v4779_v51 }
 0x37d   : > { %v2606_v23 = vadd.f32 %v2605_v13, %v2543_v7  ;;  %v2551_v13 = vmul.f32 %v4782_v59, %v4782_v59 }
 0x37f   : > { %v2607_v41 = vadd.f32 %v2606_v23, %v2544_v26  ;;  %v2552_v23 = vmul.f32 %v4785_v3, %v4785_v3 }
 0x381   : > { %v2608_v16 = vadd.f32 %v2607_v41, %v2545_v14  ;;  %v2553_v41 = vmul.f32 %v4788_v11, %v4788_v11 }
 0x383   : > { %v2609_v35 = vadd.f32 %v2608_v16, %v2546_v18  ;;  %v2554_v16 = vmul.f32 %v4791_v5, %v4791_v5 }
 0x385   : > { %v2610_v24 = vadd.f32 %v2609_v35, %v2547_v20  ;;  %v2555_v35 = vmul.f32 %v4794_v17, %v4794_v17 }
 0x387   : > { %v2611_v7 = vadd.f32 %v2610_v24, %v2548_v22 }
 0x389   : > { %v2612_v26 = vadd.f32 %v2611_v7, %v2549_v12 }
 0x38b   : > { %v2613_v14 = vadd.f32 %v2612_v26, %v2550_v61 }
 0x38d   : > { %v2614_v18 = vadd.f32 %v2613_v14, %v2551_v13 }
 0x38f   : > { %v2615_v20 = vadd.f32 %v2614_v18, %v2552_v23 }
 0x391   : > { %v2616_v22 = vadd.f32 %v2615_v20, %v2553_v41 }
 0x393   : > { %v2617_v24 = vadd.f32 %v2616_v22, %v2554_v16 }
 0x395   : > { %v2618_v51 = vadd.f32 %v2617_v24, %v2555_v35 }
 0x397   : > { %v2619_v59 = vrot.slane %v2618_v51, 4 }
 0x399   : > { %v2620_v12 = vadd.f32 %v2619_v59, %v2618_v51 }
 0x39b   : > { %v2621_v7 = vrot.slane %v2620_v12, 2 }
 0x39d   : > { %v2622_v43 = vadd.f32 %v2621_v7, %v2620_v12 }
 0x39f   : > { %v2623_v3 = vrot.slane %v2622_v43, 1 }
 0x3a1   : > { %v2624_v61 = vadd.f32 %v2623_v3, %v2622_v43 }
 0x3a3   : > { %v2625_v26 = vmul.f32 0.001953125, %v2624_v61 }
 0x3a5   : > { %v2626_v33 = vadd.f32 1e-05, %v2625_v26 }
 0x3a7   : > { %3994 = vrsqrt.f32 %v2626_v33 }
 0x3b4   : > { %v5104_v13 = vpop.eup %3994 }
 0x3b5   : > { %v2628_v23 = vmul.f32 %v5104_v13, %v4798_v1  ;;  %v2629_v14 = vmul.f32 %v5104_v13, %v4802_v57  ;;  %v2630_v41 = vmul.f32 %v5104_v13, %v4806_v53  ;;  %v2631_v51 = vmul.f32 %v5104_v13, %v4810_v49 }
 0x3b6   : > { %v2632_v43 = vmul.f32 %v5104_v13, %v4818_v34  ;;  %v2633_v33 = vmul.f32 %v5104_v13, %v4824_v36  ;;  %v2634_v59 = vmul.f32 %v5104_v13, %v4830_v15  ;;  %v2635_v3 = vmul.f32 %v5104_v13, %v4836_v63 }
 0x3b7   : > { %vm2692_vm0 = vcmp.gt.f32.partialorder %v2628_v23, 0.0  ;;  %vm2693_vm1 = vcmp.gt.f32.partialorder %v2629_v14, 0.0  ;;  %v2756_v1 = vmul.f32 0.2, %v2628_v23  ;;  %v2757_v57 = vmul.f32 0.2, %v2629_v14 }
 0x3b8   : > { %vm2694_vm2 = vcmp.gt.f32.partialorder %v2630_v41, 0.0  ;;  %vm2695_vm3 = vcmp.gt.f32.partialorder %v2631_v51, 0.0  ;;  %v2758_v53 = vmul.f32 0.2, %v2630_v41  ;;  %v2759_v49 = vmul.f32 0.2, %v2631_v51 }
 0x3b9   : > { %v2820_v18 = vsel %vm2692_vm0, %v2628_v23, %v2756_v1  ;;  %v2821_v16 = vsel %vm2693_vm1, %v2629_v14, %v2757_v57  ;;  %vm2696_vm4 = vcmp.gt.f32.partialorder %v2632_v43, 0.0  ;;  %vm2697_vm5 = vcmp.gt.f32.partialorder %v2633_v33, 0.0 }
 0x3ba   : > { %v3556_v34 = vpack.c.bf16 %v2821_v16, %v2820_v18  ;;  %v2822_v36 = vsel %vm2694_vm2, %v2630_v41, %v2758_v53  ;;  %v2823_v20 = vsel %vm2695_vm3, %v2631_v51, %v2759_v49  ;;  %v2760_v35 = vmul.f32 0.2, %v2632_v43 }
 0x3bb   : > { %v3561_v15 = vpack.c.bf16 %v2823_v20, %v2822_v36  ;;  %v2761_v22 = vmul.f32 0.2, %v2633_v33  ;;  %vm2698_vm6 = vcmp.gt.f32.partialorder %v2634_v59, 0.0  ;;  %vm2699_vm7 = vcmp.gt.f32.partialorder %v2635_v3, 0.0 }
 0x3bc   : > { %3557 = vst [vmem:[%s5342_s2] sm:$0xff] %v3556_v34   ;;  %v2824_v63 = vsel %vm2696_vm4, %v2632_v43, %v2760_v35  ;;  %v2762_v24 = vmul.f32 0.2, %v2634_v59  ;;  %v2763_v12 = vmul.f32 0.2, %v2635_v3  ;;  %v2636_v7 = vmul.f32 %v5104_v13, %v4842_v9 }
 0x3bd   : > { %3713 = vst [vmem:[%s5342_s2 + $0x8] sm:$0xff] %v3561_v15   ;;  %v2825_v61 = vsel %vm2697_vm5, %v2633_v33, %v2761_v22  ;;  %v2637_v26 = vmul.f32 %v5104_v13, %v4848_v19  ;;  %v2638_v23 = vmul.f32 %v5104_v13, %v4854_v45  ;;  %v2639_v14 = vmul.f32 %v5104_v13, %v4860_v38 }
 0x3be   : > { %v3566_v41 = vpack.c.bf16 %v2825_v61, %v2824_v63  ;;  %v2826_v51 = vsel %vm2698_vm6, %v2634_v59, %v2762_v24  ;;  %v2827_v43 = vsel %vm2699_vm7, %v2635_v3, %v2763_v12  ;;  %vm2700_vm8 = vcmp.gt.f32.partialorder %v2636_v7, 0.0 }
 0x3bf   : > { %v3571_v1 = vpack.c.bf16 %v2827_v43, %v2826_v51  ;;  %vm2701_vm9 = vcmp.gt.f32.partialorder %v2637_v26, 0.0  ;;  %v2764_v9 = vmul.f32 0.2, %v2636_v7  ;;  %v2765_v57 = vmul.f32 0.2, %v2637_v26 }
 0x3c0   : > { %3714 = vst [vmem:[%s5342_s2 + $0x10] sm:$0xff] %v3566_v41   ;;  %vm2702_vm10 = vcmp.gt.f32.partialorder %v2638_v23, 0.0  ;;  %vm2703_vm11 = vcmp.gt.f32.partialorder %v2639_v14, 0.0  ;;  %v2766_v19 = vmul.f32 0.2, %v2638_v23  ;;  %v2640_v59 = vmul.f32 %v5104_v13, %v4866_v55 }
 0x3c1   : > { %v2767_v33 = vmul.f32 0.2, %v2639_v14  ;;  %3715 = vst [vmem:[%s5342_s2 + $0x18] sm:$0xff] %v3571_v1   ;;  %v2828_v45 = vsel %vm2700_vm8, %v2636_v7, %v2764_v9  ;;  %v2829_v38 = vsel %vm2701_vm9, %v2637_v26, %v2765_v57  ;;  %v2641_v3 = vmul.f32 %v5104_v13, %v4872_v42 }
 0x3c2   : > { %v3576_v53 = vpack.c.bf16 %v2829_v38, %v2828_v45  ;;  %v2830_v49 = vsel %vm2702_vm10, %v2638_v23, %v2766_v19  ;;  %v2642_v16 = vmul.f32 %v5104_v13, %v4878_v44  ;;  %vm2704_vm12 = vcmp.gt.f32.partialorder %v2640_v59, 0.0 }
 0x3c3   : > { %v2831_v18 = vsel %vm2703_vm11, %v2639_v14, %v2767_v33  ;;  %vm2705_vm13 = vcmp.gt.f32.partialorder %v2641_v3, 0.0  ;;  %v2768_v36 = vmul.f32 0.2, %v2640_v59  ;;  %v2769_v20 = vmul.f32 0.2, %v2641_v3 }
 0x3c4   : > { %v3581_v34 = vpack.c.bf16 %v2831_v18, %v2830_v49  ;;  %3716 = vst [vmem:[%s5342_s2 + $0x20] sm:$0xff] %v3576_v53   ;;  %v2643_v55 = vmul.f32 %v5104_v13, %v4884_v46  ;;  %vm2706_vm14 = vcmp.gt.f32.partialorder %v2642_v16, 0.0  ;;  %v2770_v42 = vmul.f32 0.2, %v2642_v16 }
 0x3c5   : > { %v2832_v35 = vsel %vm2704_vm12, %v2640_v59, %v2768_v36  ;;  %v2644_v44 = vmul.f32 %v5104_v13, %v4890_v48  ;;  %v2645_v15 = vmul.f32 %v5104_v13, %v4896_v50  ;;  %v2646_v22 = vmul.f32 %v5104_v13, %v4902_v52 }
 0x3c6   : > { %3717 = vst [vmem:[%s5342_s2 + $0x28] sm:$0xff] %v3581_v34   ;;  %v2833_v63 = vsel %vm2705_vm13, %v2641_v3, %v2769_v20  ;;  %vm2707_vm15 = vcmp.gt.f32.partialorder %v2643_v55, 0.0  ;;  %v2771_v24 = vmul.f32 0.2, %v2643_v55  ;;  %v2834_v46 = vsel %vm2706_vm14, %v2642_v16, %v2770_v42  ;;  %v5426_v34 = vld [vmem:[#allocation24_spill] sm:$0xff]  ;;  %v5427_v20 = vld [vmem:[#allocation25_spill] sm:$0xff] }
 0x3c7   : > { %v3586_v12 = vpack.c.bf16 %v2833_v63, %v2832_v35  ;;  %vm2708_vm0 = vcmp.gt.f32.partialorder %v2644_v44, 0.0  ;;  %vm2709_vm1 = vcmp.gt.f32.partialorder %v2645_v15, 0.0  ;;  %v2772_v7 = vmul.f32 0.2, %v2644_v44 }
 0x3c8   : > { %v2835_v61 = vsel %vm2707_vm15, %v2643_v55, %v2771_v24  ;;  %v2773_v26 = vmul.f32 0.2, %v2645_v15  ;;  %v2647_v23 = vmul.f32 %v5104_v13, %v4908_v54  ;;  %vm2710_vm2 = vcmp.gt.f32.partialorder %v2646_v22, 0.0 }
 0x3c9   : > { %3718 = vst [vmem:[%s5342_s2 + $0x30] sm:$0xff] %v3586_v12   ;;  %v3591_v48 = vpack.c.bf16 %v2835_v61, %v2834_v46  ;;  %v2836_v50 = vsel %vm2708_vm0, %v2644_v44, %v2772_v7  ;;  %v2774_v52 = vmul.f32 0.2, %v2646_v22  ;;  %v2648_v14 = vmul.f32 %v5104_v13, %v4914_v56  ;;  %v5429_v61 = vld [vmem:[#allocation4_spill] sm:$0xff] }
 0x3ca   : > { %v2837_v41 = vsel %vm2709_vm1, %v2645_v15, %v2773_v26  ;;  %vm2711_vm3 = vcmp.gt.f32.partialorder %v2647_v23, 0.0  ;;  %v2775_v51 = vmul.f32 0.2, %v2647_v23  ;;  %v2649_v43 = vmul.f32 %v5104_v13, %v4920_v58  ;;  %v5428_v15 = vld [vmem:[#allocation26_spill] sm:$0xff] }
 0x3cb   : > { %3719 = vst [vmem:[%s5342_s2 + $0x38] sm:$0xff] %v3591_v48   ;;  %v3596_v54 = vpack.c.bf16 %v2837_v41, %v2836_v50  ;;  %v2838_v1 = vsel %vm2710_vm2, %v2646_v22, %v2774_v52  ;;  %vm2712_vm4 = vcmp.gt.f32.partialorder %v2648_v14, 0.0  ;;  %v2776_v9 = vmul.f32 0.2, %v2648_v14 }
 0x3cc   : > { %v2839_v57 = vsel %vm2711_vm3, %v2647_v23, %v2775_v51  ;;  %vm2713_vm5 = vcmp.gt.f32.partialorder %v2649_v43, 0.0  ;;  %v2777_v19 = vmul.f32 0.2, %v2649_v43  ;;  %v2650_v56 = vmul.f32 %v5104_v13, %v4926_v60  ;;  %v5430_v23 = vld [vmem:[#allocation5_spill] sm:$0xff]  ;;  %v5432_v51 = vld [vmem:[#allocation7_spill] sm:$0xff] }
 0x3cd   : > { %3720 = vst [vmem:[%s5342_s2 + $0x40] sm:$0xff] %v3596_v54   ;;  %v3601_v33 = vpack.c.bf16 %v2839_v57, %v2838_v1  ;;  %v2840_v58 = vsel %vm2712_vm4, %v2648_v14, %v2776_v9  ;;  %v2651_v45 = vmul.f32 %v5104_v13, %v4932_v62  ;;  %v2652_v38 = vmul.f32 %v5104_v13, %v4938_v0  ;;  %v5431_v14 = vld [vmem:[#allocation6_spill] sm:$0xff] }
 0x3ce   : > { %v2841_v59 = vsel %vm2713_vm5, %v2649_v43, %v2777_v19  ;;  %vm2714_vm6 = vcmp.gt.f32.partialorder %v2650_v56, 0.0  ;;  %v2778_v3 = vmul.f32 0.2, %v2650_v56  ;;  %v2653_v53 = vmul.f32 %v5104_v13, %v4944_v2 }
 0x3cf   : > { %3721 = vst [vmem:[%s5342_s2 + $0x48] sm:$0xff] %v3601_v33   ;;  %v3606_v60 = vpack.c.bf16 %v2841_v59, %v2840_v58  ;;  %vm2715_vm7 = vcmp.gt.f32.partialorder %v2651_v45, 0.0  ;;  %v2779_v49 = vmul.f32 0.2, %v2651_v45  ;;  %vm2716_vm8 = vcmp.gt.f32.partialorder %v2652_v38, 0.0  ;;  %v5433_v58 = vld [vmem:[#allocation8_spill] sm:$0xff] }
 0x3d0   : > { %v2842_v18 = vsel %vm2714_vm6, %v2650_v56, %v2778_v3  ;;  %vm2717_vm9 = vcmp.gt.f32.partialorder %v2653_v53, 0.0  ;;  %v2780_v62 = vmul.f32 0.2, %v2652_v38  ;;  %v2781_v16 = vmul.f32 0.2, %v2653_v53  ;;  %v5434_v3 = vld [vmem:[#allocation9_spill] sm:$0xff] }
 0x3d1   : > { %3722 = vst [vmem:[%s5342_s2 + $0x50] sm:$0xff] %v3606_v60   ;;  %v2843_v0 = vsel %vm2715_vm7, %v2651_v45, %v2779_v49  ;;  %v2654_v2 = vmul.f32 %v5104_v13, %v4950_v4  ;;  %v2655_v36 = vmul.f32 %v5104_v13, %v5426_v34  ;;  %v2656_v55 = vmul.f32 %v5104_v13, %v5427_v20  ;;  %v5435_v60 = vld [vmem:[#allocation10_spill] sm:$0xff] }
 0x3d2   : > { %v3611_v42 = vpack.c.bf16 %v2843_v0, %v2842_v18  ;;  %v2844_v35 = vsel %vm2716_vm8, %v2652_v38, %v2780_v62  ;;  %v2845_v44 = vsel %vm2717_vm9, %v2653_v53, %v2781_v16  ;;  %v2657_v22 = vmul.f32 %v5104_v13, %v5428_v15 }
 0x3d3   : > { %v3616_v63 = vpack.c.bf16 %v2845_v44, %v2844_v35  ;;  %vm2718_vm10 = vcmp.gt.f32.partialorder %v2654_v2, 0.0  ;;  %vm2719_vm11 = vcmp.gt.f32.partialorder %v2655_v36, 0.0  ;;  %v2782_v24 = vmul.f32 0.2, %v2654_v2 }
 0x3d4   : > { %3723 = vst [vmem:[%s5342_s2 + $0x58] sm:$0xff] %v3611_v42   ;;  %v2783_v4 = vmul.f32 0.2, %v2655_v36  ;;  %vm2720_vm12 = vcmp.gt.f32.partialorder %v2656_v55, 0.0  ;;  %vm2721_vm13 = vcmp.gt.f32.partialorder %v2657_v22, 0.0  ;;  %v2658_v26 = vmul.f32 %v5104_v13, %v5429_v61  ;;  %v5437_v42 = vld [vmem:[#allocation12_spill] sm:$0xff] }
 0x3d5   : > { %v2784_v46 = vmul.f32 0.2, %v2656_v55  ;;  %3724 = vst [vmem:[%s5342_s2 + $0x60] sm:$0xff] %v3616_v63   ;;  %v2846_v12 = vsel %vm2718_vm10, %v2654_v2, %v2782_v24  ;;  %v2785_v7 = vmul.f32 0.2, %v2657_v22  ;;  %v2659_v48 = vmul.f32 %v5104_v13, %v5430_v23  ;;  %v5439_v23 = vld [vmem:[#allocation14_spill] sm:$0xff] }
 0x3d6   : > { %v2847_v50 = vsel %vm2719_vm11, %v2655_v36, %v2783_v4  ;;  %v2660_v41 = vmul.f32 %v5104_v13, %v5431_v14  ;;  %v2661_v43 = vmul.f32 %v5104_v13, %v5432_v51  ;;  %vm2722_vm14 = vcmp.gt.f32.partialorder %v2658_v26, 0.0  ;;  %v5436_v36 = vld [vmem:[#allocation11_spill] sm:$0xff] }
 0x3d7   : > { %v2848_v52 = vsel %vm2720_vm12, %v2656_v55, %v2784_v46  ;;  %v3621_v54 = vpack.c.bf16 %v2847_v50, %v2846_v12  ;;  %v2849_v1 = vsel %vm2721_vm13, %v2657_v22, %v2785_v7  ;;  %vm2723_vm15 = vcmp.gt.f32.partialorder %v2659_v48, 0.0  ;;  %v5438_v22 = vld [vmem:[#allocation13_spill] sm:$0xff] }
 0x3d8   : > { %v3626_v9 = vpack.c.bf16 %v2849_v1, %v2848_v52  ;;  %v2786_v57 = vmul.f32 0.2, %v2658_v26  ;;  %v2787_v19 = vmul.f32 0.2, %v2659_v48  ;;  %vm2724_vm0 = vcmp.gt.f32.partialorder %v2660_v41, 0.0 }
 0x3d9   : > { %3725 = vst [vmem:[%s5342_s2 + $0x68] sm:$0xff] %v3621_v54   ;;  %vm2725_vm1 = vcmp.gt.f32.partialorder %v2661_v43, 0.0  ;;  %v2788_v56 = vmul.f32 0.2, %v2660_v41  ;;  %v2789_v33 = vmul.f32 0.2, %v2661_v43  ;;  %v2662_v45 = vmul.f32 %v5104_v13, %v5433_v58 }
 0x3da   : > { %3726 = vst [vmem:[%s5342_s2 + $0x70] sm:$0xff] %v3626_v9   ;;  %v2850_v38 = vsel %vm2722_vm14, %v2658_v26, %v2786_v57  ;;  %v2851_v59 = vsel %vm2723_vm15, %v2659_v48, %v2787_v19  ;;  %v2663_v53 = vmul.f32 %v5104_v13, %v5434_v3  ;;  %v2664_v49 = vmul.f32 %v5104_v13, %v5435_v60 }
 0x3db   : > { %v3631_v18 = vpack.c.bf16 %v2851_v59, %v2850_v38  ;;  %v2852_v62 = vsel %vm2724_vm0, %v2660_v41, %v2788_v56  ;;  %v2853_v16 = vsel %vm2725_vm1, %v2661_v43, %v2789_v33  ;;  %vm2726_vm2 = vcmp.gt.f32.partialorder %v2662_v45, 0.0 }
 0x3dc   : > { %v3636_v0 = vpack.c.bf16 %v2853_v16, %v2852_v62  ;;  %vm2727_vm3 = vcmp.gt.f32.partialorder %v2663_v53, 0.0  ;;  %v2790_v2 = vmul.f32 0.2, %v2662_v45  ;;  %v2791_v34 = vmul.f32 0.2, %v2663_v53 }
 0x3dd   : > { %3727 = vst [vmem:[%s5342_s2 + $0x78] sm:$0xff] %v3631_v18   ;;  %v2665_v20 = vmul.f32 %v5104_v13, %v5436_v36  ;;  %vm2728_vm4 = vcmp.gt.f32.partialorder %v2664_v49, 0.0  ;;  %v2792_v55 = vmul.f32 0.2, %v2664_v49  ;;  %v2666_v35 = vmul.f32 %v5104_v13, %v5437_v42 }
 0x3de   : > { %3728 = vst [vmem:[%s5342_s2 + $0x80] sm:$0xff] %v3636_v0   ;;  %v2854_v44 = vsel %vm2726_vm2, %v2662_v45, %v2790_v2  ;;  %v2855_v15 = vsel %vm2727_vm3, %v2663_v53, %v2791_v34  ;;  %v2667_v63 = vmul.f32 %v5104_v13, %v5438_v22  ;;  %v2668_v24 = vmul.f32 %v5104_v13, %v5034_v40 }
 0x3df   : > { %v3641_v4 = vpack.c.bf16 %v2855_v15, %v2854_v44  ;;  %vm2729_vm5 = vcmp.gt.f32.partialorder %v2665_v20, 0.0  ;;  %v2793_v46 = vmul.f32 0.2, %v2665_v20  ;;  %v2856_v12 = vsel %vm2728_vm4, %v2664_v49, %v2792_v55 }
 0x3e0   : > { %vm2730_vm6 = vcmp.gt.f32.partialorder %v2666_v35, 0.0  ;;  %vm2731_vm7 = vcmp.gt.f32.partialorder %v2667_v63, 0.0  ;;  %v2794_v7 = vmul.f32 0.2, %v2666_v35  ;;  %v2795_v61 = vmul.f32 0.2, %v2667_v63 }
 0x3e1   : > { %3729 = vst [vmem:[%s5342_s2 + $0x88] sm:$0xff] %v3641_v4   ;;  %v2857_v26 = vsel %vm2729_vm5, %v2665_v20, %v2793_v46  ;;  %v2669_v48 = vmul.f32 %v5104_v13, %v5439_v23  ;;  %vm2732_vm8 = vcmp.gt.f32.partialorder %v2668_v24, 0.0  ;;  %v2796_v50 = vmul.f32 0.2, %v2668_v24 }
 0x3e2   : > { %v3646_v52 = vpack.c.bf16 %v2857_v26, %v2856_v12  ;;  %v2858_v40 = vsel %vm2730_vm6, %v2666_v35, %v2794_v7  ;;  %v2859_v14 = vsel %vm2731_vm7, %v2667_v63, %v2795_v61  ;;  %v2670_v41 = vmul.f32 %v5104_v13, %v5046_v6  ;;  %v5440_v7 = vld [vmem:[#allocation19_spill] sm:$0xff] }
 0x3e3   : > { %v3651_v51 = vpack.c.bf16 %v2859_v14, %v2858_v40  ;;  %vm2733_vm9 = vcmp.gt.f32.partialorder %v2669_v48, 0.0  ;;  %v2797_v43 = vmul.f32 0.2, %v2669_v48  ;;  %v2860_v54 = vsel %vm2732_vm8, %v2668_v24, %v2796_v50 }
 0x3e4   : > { %3730 = vst [vmem:[%s5342_s2 + $0x90] sm:$0xff] %v3646_v52   ;;  %v2671_v1 = vmul.f32 %v5104_v13, %v5052_v8  ;;  %vm2734_vm10 = vcmp.gt.f32.partialorder %v2670_v41, 0.0  ;;  %v2798_v9 = vmul.f32 0.2, %v2670_v41  ;;  %v2672_v57 = vmul.f32 %v5104_v13, %v5058_v10 }
 0x3e5   : > { %3731 = vst [vmem:[%s5342_s2 + $0x98] sm:$0xff] %v3651_v51   ;;  %v2861_v6 = vsel %vm2733_vm9, %v2669_v48, %v2797_v43  ;;  %v2673_v19 = vmul.f32 %v5104_v13, %v4740_v27  ;;  %v2674_v56 = vmul.f32 %v5104_v13, %v4743_v31  ;;  %v2675_v33 = vmul.f32 %v5104_v13, %v4746_v39  ;;  %v5442_v48 = vld [vmem:[#allocation21_spill] sm:$0xff]  ;;  %v5443_v51 = vld [vmem:[#allocation22_spill] sm:$0xff] }
 0x3e6   : > { %v3656_v8 = vpack.c.bf16 %v2861_v6, %v2860_v54  ;;  %vm2735_vm11 = vcmp.gt.f32.partialorder %v2671_v1, 0.0  ;;  %v2799_v58 = vmul.f32 0.2, %v2671_v1  ;;  %v2862_v45 = vsel %vm2734_vm10, %v2670_v41, %v2798_v9 }
 0x3e7   : > { %vm2736_vm12 = vcmp.gt.f32.partialorder %v2672_v57, 0.0  ;;  %vm2737_vm13 = vcmp.gt.f32.partialorder %v2673_v19, 0.0  ;;  %v2800_v10 = vmul.f32 0.2, %v2672_v57  ;;  %v2801_v38 = vmul.f32 0.2, %v2673_v19 }
 0x3e8   : > { %3732 = vst [vmem:[%s5342_s2 + $0xa0] sm:$0xff] %v3656_v8   ;;  %v2863_v59 = vsel %vm2735_vm11, %v2671_v1, %v2799_v58  ;;  %vm2738_vm14 = vcmp.gt.f32.partialorder %v2674_v56, 0.0  ;;  %vm2739_vm15 = vcmp.gt.f32.partialorder %v2675_v33, 0.0  ;;  %v2802_v27 = vmul.f32 0.2, %v2674_v56 }
 0x3e9   : > { %v3661_v31 = vpack.c.bf16 %v2863_v59, %v2862_v45  ;;  %v2864_v3 = vsel %vm2736_vm12, %v2672_v57, %v2800_v10  ;;  %v2865_v53 = vsel %vm2737_vm13, %v2673_v19, %v2801_v38  ;;  %v2803_v39 = vmul.f32 0.2, %v2675_v33  ;;  %v5444_v57 = vld [vmem:[#allocation23_spill] sm:$0xff] }
 0x3ea   : > { %v3666_v60 = vpack.c.bf16 %v2865_v53, %v2864_v3  ;;  %v2866_v49 = vsel %vm2738_vm14, %v2674_v56, %v2802_v27  ;;  %v2676_v18 = vmul.f32 %v5104_v13, %v4749_v47  ;;  %v2677_v62 = vmul.f32 %v5104_v13, %v4752_v37 }
 0x3eb   : > { %3733 = vst [vmem:[%s5342_s2 + $0xa8] sm:$0xff] %v3661_v31   ;;  %v2867_v16 = vsel %vm2739_vm15, %v2675_v33, %v2803_v39  ;;  %v2678_v0 = vmul.f32 %v5104_v13, %v4755_v32  ;;  %v2679_v2 = vmul.f32 %v5104_v13, %v4758_v28  ;;  %v2680_v34 = vmul.f32 %v5104_v13, %v4761_v30 }
 0x3ec   : > { %3734 = vst [vmem:[%s5342_s2 + $0xb0] sm:$0xff] %v3666_v60   ;;  %v3671_v47 = vpack.c.bf16 %v2867_v16, %v2866_v49  ;;  %vm2740_vm0 = vcmp.gt.f32.partialorder %v2676_v18, 0.0  ;;  %vm2741_vm1 = vcmp.gt.f32.partialorder %v2677_v62, 0.0  ;;  %v2804_v37 = vmul.f32 0.2, %v2676_v18 }
 0x3ed   : > { %v2805_v36 = vmul.f32 0.2, %v2677_v62  ;;  %vm2742_vm2 = vcmp.gt.f32.partialorder %v2678_v0, 0.0  ;;  %vm2743_vm3 = vcmp.gt.f32.partialorder %v2679_v2, 0.0  ;;  %v2806_v20 = vmul.f32 0.2, %v2678_v0 }
 0x3ee   : > { %3735 = vst [vmem:[%s5342_s2 + $0xb8] sm:$0xff] %v3671_v47   ;;  %v2868_v32 = vsel %vm2740_vm0, %v2676_v18, %v2804_v37  ;;  %v2807_v28 = vmul.f32 0.2, %v2679_v2  ;;  %v2681_v30 = vmul.f32 %v5104_v13, %v4764_v21  ;;  %vm2744_vm4 = vcmp.gt.f32.partialorder %v2680_v34, 0.0 }
 0x3ef   : > { %v2869_v55 = vsel %vm2741_vm1, %v2677_v62, %v2805_v36  ;;  %v2870_v42 = vsel %vm2742_vm2, %v2678_v0, %v2806_v20  ;;  %v2808_v35 = vmul.f32 0.2, %v2680_v34  ;;  %v2682_v44 = vmul.f32 %v5104_v13, %v4767_v25  ;;  %v5441_v25 = vld [vmem:[#allocation20_spill] sm:$0xff] }
 0x3f0   : > { %v3676_v15 = vpack.c.bf16 %v2869_v55, %v2868_v32  ;;  %v2871_v22 = vsel %vm2743_vm3, %v2679_v2, %v2807_v28  ;;  %vm2745_vm5 = vcmp.gt.f32.partialorder %v2681_v30, 0.0  ;;  %v2809_v63 = vmul.f32 0.2, %v2681_v30 }
 0x3f1   : > { %v3681_v24 = vpack.c.bf16 %v2871_v22, %v2870_v42  ;;  %v2872_v4 = vsel %vm2744_vm4, %v2680_v34, %v2808_v35  ;;  %v2683_v46 = vmul.f32 %v5104_v13, %v4770_v29  ;;  %vm2746_vm6 = vcmp.gt.f32.partialorder %v2682_v44, 0.0 }
 0x3f2   : > { %3736 = vst [vmem:[%s5342_s2 + $0xc0] sm:$0xff] %v3676_v15   ;;  %v2873_v21 = vsel %vm2745_vm5, %v2681_v30, %v2809_v63  ;;  %v2810_v12 = vmul.f32 0.2, %v2682_v44  ;;  %v2684_v61 = vmul.f32 %v5104_v13, %v5440_v7  ;;  %v2685_v26 = vmul.f32 %v5104_v13, %v5441_v25 }
 0x3f3   : > { %3737 = vst [vmem:[%s5342_s2 + $0xc8] sm:$0xff] %v3681_v24   ;;  %v3686_v23 = vpack.c.bf16 %v2873_v21, %v2872_v4  ;;  %vm2747_vm7 = vcmp.gt.f32.partialorder %v2683_v46, 0.0  ;;  %v2811_v29 = vmul.f32 0.2, %v2683_v46  ;;  %v2686_v50 = vmul.f32 %v5104_v13, %v5442_v48 }
 0x3f4   : > { %v2874_v52 = vsel %vm2746_vm6, %v2682_v44, %v2810_v12  ;;  %vm2748_vm8 = vcmp.gt.f32.partialorder %v2684_v61, 0.0  ;;  %vm2749_vm9 = vcmp.gt.f32.partialorder %v2685_v26, 0.0  ;;  %v2812_v40 = vmul.f32 0.2, %v2684_v61 }
 0x3f5   : > { %3738 = vst [vmem:[%s5342_s2 + $0xd0] sm:$0xff] %v3686_v23   ;;  %v2875_v14 = vsel %vm2747_vm7, %v2683_v46, %v2811_v29  ;;  %v2813_v41 = vmul.f32 0.2, %v2685_v26  ;;  %v2687_v43 = vmul.f32 %v5104_v13, %v5443_v51  ;;  %vm2750_vm10 = vcmp.gt.f32.partialorder %v2686_v50, 0.0 }
 0x3f6   : > { %v3691_v54 = vpack.c.bf16 %v2875_v14, %v2874_v52  ;;  %v2876_v1 = vsel %vm2748_vm8, %v2684_v61, %v2812_v40  ;;  %v2814_v9 = vmul.f32 0.2, %v2686_v50  ;;  %v2688_v6 = vmul.f32 %v5104_v13, %v5444_v57 }
 0x3f7   : > { %v2877_v19 = vsel %vm2749_vm9, %v2685_v26, %v2813_v41  ;;  %vm2751_vm11 = vcmp.gt.f32.partialorder %v2687_v43, 0.0  ;;  %v2815_v56 = vmul.f32 0.2, %v2687_v43  ;;  %v2689_v33 = vmul.f32 %v5104_v13, %v4788_v11 }
 0x3f8   : > { %3739 = vst [vmem:[%s5342_s2 + $0xd8] sm:$0xff] %v3691_v54   ;;  %v3696_v8 = vpack.c.bf16 %v2877_v19, %v2876_v1  ;;  %v2878_v58 = vsel %vm2750_vm10, %v2686_v50, %v2814_v9  ;;  %vm2752_vm12 = vcmp.gt.f32.partialorder %v2688_v6, 0.0  ;;  %v2816_v45 = vmul.f32 0.2, %v2688_v6 }
 0x3f9   : > { %v2879_v10 = vsel %vm2751_vm11, %v2687_v43, %v2815_v56  ;;  %vm2753_vm13 = vcmp.gt.f32.partialorder %v2689_v33, 0.0  ;;  %v2817_v38 = vmul.f32 0.2, %v2689_v33  ;;  %v2690_v59 = vmul.f32 %v5104_v13, %v4791_v5 }
 0x3fa   : > { %3740 = vst [vmem:[%s5342_s2 + $0xe0] sm:$0xff] %v3696_v8   ;;  %v3701_v27 = vpack.c.bf16 %v2879_v10, %v2878_v58  ;;  %v2880_v11 = vsel %vm2752_vm12, %v2688_v6, %v2816_v45  ;;  %v2691_v31 = vmul.f32 %v5104_v13, %v4794_v17 }
 0x3fb   : > { %v2881_v3 = vsel %vm2753_vm13, %v2689_v33, %v2817_v38  ;;  %vm2754_vm14 = vcmp.gt.f32.partialorder %v2690_v59, 0.0  ;;  %v2818_v53 = vmul.f32 0.2, %v2690_v59 }
 0x3fc   : > { %3741 = vst [vmem:[%s5342_s2 + $0xe8] sm:$0xff] %v3701_v27   ;;  %v3706_v39 = vpack.c.bf16 %v2881_v3, %v2880_v11  ;;  %vm2755_vm15 = vcmp.gt.f32.partialorder %v2691_v31, 0.0  ;;  %v2819_v60 = vmul.f32 0.2, %v2691_v31 }
 0x3fd   : > { %v2882_v5 = vsel %vm2754_vm14, %v2690_v59, %v2818_v53 }
 0x3fe   : > { %3742 = vst [vmem:[%s5342_s2 + $0xf0] sm:$0xff] %v3706_v39   ;;  %v2883_v49 = vsel %vm2755_vm15, %v2691_v31, %v2819_v60 }
 0x3ff   : > { %v3711_v18 = vpack.c.bf16 %v2883_v49, %v2882_v5 }
 0x401   : > { %3743 = vst [vmem:[%s5342_s2 + $0xf8] sm:$0xff] %v3711_v18  }
 0x402 PF: > { %p9_p11 = scmp.ge.s32.totalorder %s4056_s13, 4   ;;  %s5445_s9 = smov %s4014_s10 }
 0x403   : > { %s5446_s10 = smov %s4065_s16  ;;  %s5447_s11 = smov %s4056_s13 }
 0x404   :  { %11 = sbr.rel (!%p9_p11) target bundleno = 2 (0x2), region = 93 }

// kernel: discriminator_forward.6
= control target key start
LH: loop header
LB: loop body
LE: loop exit
PB: predicated region body
PF: predicated region fallthrough
CT: control target
= control target key end

     0   :  { %s2008_s9 = smov 0   ;;  %s2010_s10 = smov 0   ;;  %s2639_s0 = inlined_call_operand.vmem [shape: bf16[128,2048], index: 0, kind: input, shape index: {}]   ;;  %s2640_s1 = inlined_call_operand.vmem [shape: bf16[2048,256], index: 1, kind: input, shape index: {}]   ;;  %s2641_s2 = inlined_call_operand.vmem [shape: bf16[128,256], index: 2, kind: output, shape index: {}]  }
   0x1   :  { %s2012_s11 = smov 0  }
   0x2 LB: > { %s2024_s12 = sadd.s32 4294967295, %s1990_s11   ;;  %s2027_s13 = sadd.s32 1, %s1990_s11   ;;  %s1990_s11 = sphi %s2012_s11, %s2644_s11   ;;  %s1986_s10 = sphi %s2010_s10, %s2643_s10   ;;  %s1982_s9 = sphi %s2008_s9, %s2642_s9  }
   0x3   : > { %s16_s14 = ssub.s32 %s1990_s11, %s2027_s13  ;;  %s19_s15 = sadd.s32 1, %s1986_s10 }
   0x4   : > { %p17_p0 = scmp.eq.s32.totalorder %s16_s14, 0  ;;  %p26_p1 = scmp.ne.s32.totalorder %s1986_s10, %s1982_s9 }
   0x5   : > { %p27_p2 = scmp.eq.s32.totalorder %s1990_s11, 0  ;;  %p1652_p4 = scmp.ge.s32.totalorder %s1990_s11, 4 }
   0x6   : > { %s2036_s16 = scalar_select %p17_p0, %s1986_s10, %s19_s15  }
   0x7   : > { %p28_p3 = por %p27_p2, %p26_p1  ;;  %99 = sbr.rel (%p1652_p4) target bundleno = 32 (0x20), region = 16 }
   0xc   : > { %102 = sbr.rel (!%p28_p3) target bundleno = 32 (0x20), region = 20  ;;  %s104_s17 = sand.u32 (%p28_p3), 1, %s1986_s10  }
   0xd   : > { %s1777_s18 = sshll.u32 (%p28_p3), %s1990_s11, 4  ;;  %s1653_s19 = sshll.u32 (%p28_p3), %s104_s17, 8 }
   0xe   : > { %s2044_s22 = scalar_lea.vmem (%p28_p3), %s2639_s0, %s1777_s18  ;;  %s2049_s23 = scalar_lea.vmem (%p28_p3), [#allocation3], %s1653_s19 }
   0xf   : > { %v122_v0 = vld [vmem:[%s2044_s22] sm:$0xff] (%p28_p3)  ;;  %v124_v1 = vld [vmem:[%s2044_s22 + $0x8] sm:$0xff] (%p28_p3) }
  0x10   : > { %v126_v2 = vld [vmem:[%s2044_s22 + $0x40] sm:$0xff] (%p28_p3)  ;;  %123 = vst [vmem:[%s2049_s23] sm:$0xff] (%p28_p3), %v122_v0  ;;  %125 = vst [vmem:[%s2049_s23 + $0x8] sm:$0xff] (%p28_p3), %v124_v1  ;;  %v128_v3 = vld [vmem:[%s2044_s22 + $0x48] sm:$0xff] (%p28_p3) }
  0x11   : > { %127 = vst [vmem:[%s2049_s23 + $0x10] sm:$0xff] %v126_v2  ;;  %v130_v4 = vld [vmem:[%s2044_s22 + $0x80] sm:$0xff]  ;;  %v132_v5 = vld [vmem:[%s2044_s22 + $0x88] sm:$0xff]  ;;  %129 = vst [vmem:[%s2049_s23 + $0x18] sm:$0xff] %v128_v3 }
  0x12   : > { %131 = vst [vmem:[%s2049_s23 + $0x20] sm:$0xff] %v130_v4  ;;  %133 = vst [vmem:[%s2049_s23 + $0x28] sm:$0xff] %v132_v5  ;;  %v134_v6 = vld [vmem:[%s2044_s22 + $0xc0] sm:$0xff]  ;;  %v136_v7 = vld [vmem:[%s2044_s22 + $0xc8] sm:$0xff] }
  0x13   : > { %v138_v8 = vld [vmem:[%s2044_s22 + $0x100] sm:$0xff]  ;;  %135 = vst [vmem:[%s2049_s23 + $0x30] sm:$0xff] %v134_v6  ;;  %137 = vst [vmem:[%s2049_s23 + $0x38] sm:$0xff] %v136_v7  ;;  %v140_v9 = vld [vmem:[%s2044_s22 + $0x108] sm:$0xff] }
  0x14   : > { %139 = vst [vmem:[%s2049_s23 + $0x40] sm:$0xff] %v138_v8  ;;  %v142_v10 = vld [vmem:[%s2044_s22 + $0x140] sm:$0xff]  ;;  %v144_v11 = vld [vmem:[%s2044_s22 + $0x148] sm:$0xff]  ;;  %141 = vst [vmem:[%s2049_s23 + $0x48] sm:$0xff] %v140_v9 }
  0x15   : > { %143 = vst [vmem:[%s2049_s23 + $0x50] sm:$0xff] %v142_v10  ;;  %145 = vst [vmem:[%s2049_s23 + $0x58] sm:$0xff] %v144_v11  ;;  %v146_v12 = vld [vmem:[%s2044_s22 + $0x180] sm:$0xff]  ;;  %v148_v13 = vld [vmem:[%s2044_s22 + $0x188] sm:$0xff] }
  0x16   : > { %v150_v14 = vld [vmem:[%s2044_s22 + $0x1c0] sm:$0xff]  ;;  %147 = vst [vmem:[%s2049_s23 + $0x60] sm:$0xff] %v146_v12  ;;  %149 = vst [vmem:[%s2049_s23 + $0x68] sm:$0xff] %v148_v13  ;;  %v152_v15 = vld [vmem:[%s2044_s22 + $0x1c8] sm:$0xff] }
  0x17   : > { %151 = vst [vmem:[%s2049_s23 + $0x70] sm:$0xff] %v150_v14  ;;  %v154_v16 = vld [vmem:[%s2044_s22 + $0x200] sm:$0xff]  ;;  %v156_v17 = vld [vmem:[%s2044_s22 + $0x208] sm:$0xff]  ;;  %153 = vst [vmem:[%s2049_s23 + $0x78] sm:$0xff] %v152_v15 }
  0x18   : > { %155 = vst [vmem:[%s2049_s23 + $0x80] sm:$0xff] %v154_v16  ;;  %157 = vst [vmem:[%s2049_s23 + $0x88] sm:$0xff] %v156_v17  ;;  %v158_v18 = vld [vmem:[%s2044_s22 + $0x240] sm:$0xff]  ;;  %v160_v19 = vld [vmem:[%s2044_s22 + $0x248] sm:$0xff] }
  0x19   : > { %v162_v20 = vld [vmem:[%s2044_s22 + $0x280] sm:$0xff]  ;;  %159 = vst [vmem:[%s2049_s23 + $0x90] sm:$0xff] %v158_v18  ;;  %161 = vst [vmem:[%s2049_s23 + $0x98] sm:$0xff] %v160_v19  ;;  %v164_v21 = vld [vmem:[%s2044_s22 + $0x288] sm:$0xff] }
  0x1a   : > { %163 = vst [vmem:[%s2049_s23 + $0xa0] sm:$0xff] %v162_v20  ;;  %v166_v22 = vld [vmem:[%s2044_s22 + $0x2c0] sm:$0xff]  ;;  %v168_v23 = vld [vmem:[%s2044_s22 + $0x2c8] sm:$0xff]  ;;  %165 = vst [vmem:[%s2049_s23 + $0xa8] sm:$0xff] %v164_v21 }
  0x1b   : > { %167 = vst [vmem:[%s2049_s23 + $0xb0] sm:$0xff] %v166_v22  ;;  %169 = vst [vmem:[%s2049_s23 + $0xb8] sm:$0xff] %v168_v23  ;;  %v170_v24 = vld [vmem:[%s2044_s22 + $0x300] sm:$0xff]  ;;  %v172_v25 = vld [vmem:[%s2044_s22 + $0x308] sm:$0xff] }
  0x1c   : > { %v174_v26 = vld [vmem:[%s2044_s22 + $0x340] sm:$0xff]  ;;  %171 = vst [vmem:[%s2049_s23 + $0xc0] sm:$0xff] %v170_v24  ;;  %173 = vst [vmem:[%s2049_s23 + $0xc8] sm:$0xff] %v172_v25  ;;  %v176_v27 = vld [vmem:[%s2044_s22 + $0x348] sm:$0xff] }
  0x1d   : > { %175 = vst [vmem:[%s2049_s23 + $0xd0] sm:$0xff] %v174_v26  ;;  %v178_v28 = vld [vmem:[%s2044_s22 + $0x380] sm:$0xff]  ;;  %v180_v29 = vld [vmem:[%s2044_s22 + $0x388] sm:$0xff]  ;;  %177 = vst [vmem:[%s2049_s23 + $0xd8] sm:$0xff] %v176_v27 }
  0x1e   : > { %179 = vst [vmem:[%s2049_s23 + $0xe0] sm:$0xff] %v178_v28  ;;  %181 = vst [vmem:[%s2049_s23 + $0xe8] sm:$0xff] %v180_v29  ;;  %v182_v30 = vld [vmem:[%s2044_s22 + $0x3c0] sm:$0xff]  ;;  %v184_v31 = vld [vmem:[%s2044_s22 + $0x3c8] sm:$0xff] }
  0x1f   : > { %183 = vst [vmem:[%s2049_s23 + $0xf0] sm:$0xff] %v182_v30  ;;  %185 = vst [vmem:[%s2049_s23 + $0xf8] sm:$0xff] %v184_v31 }
  0x20 PF: > { %p1656_p5 = scmp.ge.s32.totalorder %s1990_s11, 1  ;;  %p200_p6 = scmp.lt.s32.totalorder %s1990_s11, 5 }
  0x22   : > { %p201_p7 = pnand %p1656_p5, %p200_p6 }
  0x23   : > { %s207_s24 = sand.u32 (!%p201_p7), 1, %s1982_s9   ;;  %s1658_s25 = sshll.u32 (!%p201_p7), %s2024_s12, 6 }
  0x24   : > { %204 = sbr.rel (%p201_p7) target bundleno = 540 (0x21c), region = 47  ;;  %s1657_s26 = sshll.u32 (!%p201_p7), %s207_s24, 8 }
  0x25   : > { %p231_p8 = scmp.lt.s32.totalorder (!%p201_p7), %s1658_s25, 255  ;;  %s2121_s3 = scalar_lea.vmem (!%p201_p7), [#allocation3], %s1657_s26 }
  0x26   : > { %p1661_p9 = scmp.ne.s32.totalorder (!%p201_p7), %s2024_s12, 0 }
  0x29   : > { %s2646_s25 = smov (!%p231_p8, %s1658_s25), 255  ;;  %240 = sbr.rel (%p1661_p9) target bundleno = 63 (0x3f), region = 55 }
  0x2a   : > { %s1778_s27 = sshll.u32 %s2646_s25, 3 }
  0x2b   : > { %s2119_s30 = scalar_lea.vmem %s2640_s1, %s1778_s27 }
  0x2e   : > { %v1992_v32 = vmov 0.0  }
  0x2f   : > { %241 = vst [vmem:[#allocation2 + $0xb0] sm:$0xff] %v1992_v32  ;;  %242 = vst [vmem:[#allocation2] sm:$0xff] %v1992_v32 }
  0x30   : > { %243 = vst [vmem:[#allocation2 + $0xd8] sm:$0xff] %v1992_v32  ;;  %244 = vst [vmem:[#allocation2 + $0x18] sm:$0xff] %v1992_v32 }
  0x31   : > { %245 = vst [vmem:[#allocation2 + $0x50] sm:$0xff] %v1992_v32  ;;  %246 = vst [vmem:[#allocation2 + $0x68] sm:$0xff] %v1992_v32 }
  0x32   : > { %247 = vst [vmem:[#allocation2 + $0x30] sm:$0xff] %v1992_v32  ;;  %248 = vst [vmem:[#allocation2 + $0x48] sm:$0xff] %v1992_v32 }
  0x33   : > { %249 = vst [vmem:[#allocation2 + $0x80] sm:$0xff] %v1992_v32  ;;  %250 = vst [vmem:[#allocation2 + $0x88] sm:$0xff] %v1992_v32 }
  0x34   : > { %251 = vst [vmem:[#allocation2 + $0xe8] sm:$0xff] %v1992_v32  ;;  %252 = vst [vmem:[#allocation2 + $0xb8] sm:$0xff] %v1992_v32 }
  0x35   : > { %253 = vst [vmem:[#allocation2 + $0x60] sm:$0xff] %v1992_v32  ;;  %254 = vst [vmem:[#allocation2 + $0xf0] sm:$0xff] %v1992_v32 }
  0x36   : > { %255 = vst [vmem:[#allocation2 + $0x8] sm:$0xff] %v1992_v32  ;;  %256 = vst [vmem:[#allocation2 + $0x78] sm:$0xff] %v1992_v32 }
  0x37   : > { %257 = vst [vmem:[#allocation2 + $0x38] sm:$0xff] %v1992_v32  ;;  %258 = vst [vmem:[#allocation2 + $0x58] sm:$0xff] %v1992_v32 }
  0x38   : > { %259 = vst [vmem:[#allocation2 + $0x40] sm:$0xff] %v1992_v32  ;;  %260 = vst [vmem:[#allocation2 + $0xc8] sm:$0xff] %v1992_v32 }
  0x39   : > { %261 = vst [vmem:[#allocation2 + $0xe0] sm:$0xff] %v1992_v32  ;;  %262 = vst [vmem:[#allocation2 + $0x90] sm:$0xff] %v1992_v32 }
  0x3a   : > { %263 = vst [vmem:[#allocation2 + $0x70] sm:$0xff] %v1992_v32  ;;  %264 = vst [vmem:[#allocation2 + $0xc0] sm:$0xff] %v1992_v32 }
  0x3b   : > { %265 = vst [vmem:[#allocation2 + $0xa8] sm:$0xff] %v1992_v32  ;;  %266 = vst [vmem:[#allocation2 + $0xd0] sm:$0xff] %v1992_v32 }
  0x3c   : > { %267 = vst [vmem:[#allocation2 + $0x10] sm:$0xff] %v1992_v32  ;;  %268 = vst [vmem:[#allocation2 + $0x28] sm:$0xff] %v1992_v32 }
  0x3d   : > { %269 = vst [vmem:[#allocation2 + $0xa0] sm:$0xff] %v1992_v32  ;;  %270 = vst [vmem:[#allocation2 + $0xf8] sm:$0xff] %v1992_v32 }
  0x3e   : > { %271 = vst [vmem:[#allocation2 + $0x20] sm:$0xff] %v1992_v32  ;;  %272 = vst [vmem:[#allocation2 + $0x98] sm:$0xff] %v1992_v32 }
  0x3f PF: > { %v1820_v33 = vld [vmem:[%s2119_s30 + $0x74] ss:$8 sps:$4 sm:$0xff]   ;;  %v1824_v35 = vld [vmem:[%s2119_s30 + $0x70] ss:$8 sps:$4 sm:$0xff]   ;;  %v1826_v37 = vld [vmem:[%s2119_s30 + $0x64] ss:$8 sps:$4 sm:$0xff]  }
  0x40   : > { %v1822_v34 = vld [vmem:[%s2119_s30 + $0x174] ss:$8 sps:$4 sm:$0xff]   ;;  %881 = vmatprep.subr.bf16.mxu0 %v1820_v33  ;;  %v1825_v36 = vld [vmem:[%s2119_s30 + $0x170] ss:$8 sps:$4 sm:$0xff]   ;;  %v1828_v38 = vld [vmem:[%s2119_s30 + $0x164] ss:$8 sps:$4 sm:$0xff]  }
  0x41   : > { %994 = vmatprep.subr.bf16.mxu1 %v1822_v34  ;;  %882 = vmatpush1.bf16.msra.mxu0 %v1824_v35  ;;  %v1830_v39 = vld [vmem:[%s2119_s30 + $0x60] ss:$8 sps:$4 sm:$0xff]   ;;  %v1832_v41 = vld [vmem:[%s2119_s30 + $0x54] ss:$8 sps:$4 sm:$0xff]   ;;  %v1836_v43 = vld [vmem:[%s2119_s30 + $0x50] ss:$8 sps:$4 sm:$0xff]  }
  0x42   : > { %995 = vmatpush1.bf16.msra.mxu1 %v1825_v36  ;;  %883 = vmatprep.subr.bf16.mxu0 %v1826_v37  ;;  %v1831_v40 = vld [vmem:[%s2119_s30 + $0x160] ss:$8 sps:$4 sm:$0xff]   ;;  %v1834_v42 = vld [vmem:[%s2119_s30 + $0x154] ss:$8 sps:$4 sm:$0xff]   ;;  %v1837_v44 = vld [vmem:[%s2119_s30 + $0x150] ss:$8 sps:$4 sm:$0xff]  }
  0x43   : > { %996 = vmatprep.subr.bf16.mxu1 %v1828_v38  ;;  %v1838_v45 = vld [vmem:[%s2119_s30 + $0x44] ss:$8 sps:$4 sm:$0xff]   ;;  %v1842_v47 = vld [vmem:[%s2119_s30 + $0x40] ss:$8 sps:$4 sm:$0xff]   ;;  %v1844_v49 = vld [vmem:[%s2119_s30 + $0x34] ss:$8 sps:$4 sm:$0xff]  }
  0x44   : > { %v1840_v46 = vld [vmem:[%s2119_s30 + $0x144] ss:$8 sps:$4 sm:$0xff]   ;;  %v1843_v48 = vld [vmem:[%s2119_s30 + $0x140] ss:$8 sps:$4 sm:$0xff]   ;;  %v1846_v50 = vld [vmem:[%s2119_s30 + $0x134] ss:$8 sps:$4 sm:$0xff]  }
  0x45   : > { %884 = vmatpush1.bf16.msra.mxu0 %v1830_v39  ;;  %v1848_v51 = vld [vmem:[%s2119_s30 + $0x30] ss:$8 sps:$4 sm:$0xff]   ;;  %v1850_v53 = vld [vmem:[%s2119_s30 + $0x24] ss:$8 sps:$4 sm:$0xff]   ;;  %v1854_v55 = vld [vmem:[%s2119_s30 + $0x20] ss:$8 sps:$4 sm:$0xff]  }
  0x46   : > { %997 = vmatpush1.bf16.msra.mxu1 %v1831_v40  ;;  %885 = vmatprep.subr.bf16.mxu0 %v1832_v41  ;;  %v1849_v52 = vld [vmem:[%s2119_s30 + $0x130] ss:$8 sps:$4 sm:$0xff]   ;;  %v1852_v54 = vld [vmem:[%s2119_s30 + $0x124] ss:$8 sps:$4 sm:$0xff]   ;;  %v1855_v56 = vld [vmem:[%s2119_s30 + $0x120] ss:$8 sps:$4 sm:$0xff]  }
  0x47   : > { %998 = vmatprep.subr.bf16.mxu1 %v1834_v42  ;;  %v1856_v57 = vld [vmem:[%s2119_s30 + $0x14] ss:$8 sps:$4 sm:$0xff]   ;;  %v1860_v59 = vld [vmem:[%s2119_s30 + $0x10] ss:$8 sps:$4 sm:$0xff]   ;;  %v1862_v61 = vld [vmem:[%s2119_s30 + $0x4] ss:$8 sps:$4 sm:$0xff]  }
  0x48   : > { %v1858_v58 = vld [vmem:[%s2119_s30 + $0x114] ss:$8 sps:$4 sm:$0xff]   ;;  %v1861_v60 = vld [vmem:[%s2119_s30 + $0x110] ss:$8 sps:$4 sm:$0xff]   ;;  %v1864_v62 = vld [vmem:[%s2119_s30 + $0x104] ss:$8 sps:$4 sm:$0xff]  }
  0x49   : > { %886 = vmatpush1.bf16.msra.mxu0 %v1836_v43  ;;  %v1866_v63 = vld [vmem:[%s2119_s30] ss:$8 sps:$4 sm:$0xff]   ;;  %v1868_v1 = vld [vmem:[%s2119_s30 + $0xf4] ss:$8 sps:$4 sm:$0xff]   ;;  %v1872_v3 = vld [vmem:[%s2119_s30 + $0xf0] ss:$8 sps:$4 sm:$0xff]  }
  0x4a   : > { %999 = vmatpush1.bf16.msra.mxu1 %v1837_v44  ;;  %887 = vmatprep.subr.bf16.mxu0 %v1838_v45  ;;  %v1867_v0 = vld [vmem:[%s2119_s30 + $0x100] ss:$8 sps:$4 sm:$0xff]   ;;  %v1870_v2 = vld [vmem:[%s2119_s30 + $0x1f4] ss:$8 sps:$4 sm:$0xff]   ;;  %v1873_v4 = vld [vmem:[%s2119_s30 + $0x1f0] ss:$8 sps:$4 sm:$0xff]  }
  0x4b   : > { %1000 = vmatprep.subr.bf16.mxu1 %v1840_v46  ;;  %v1874_v5 = vld [vmem:[%s2119_s30 + $0xe4] ss:$8 sps:$4 sm:$0xff]   ;;  %v1878_v7 = vld [vmem:[%s2119_s30 + $0xe0] ss:$8 sps:$4 sm:$0xff]   ;;  %v1880_v9 = vld [vmem:[%s2119_s30 + $0xd4] ss:$8 sps:$4 sm:$0xff]  }
  0x4c   : > { %v1876_v6 = vld [vmem:[%s2119_s30 + $0x1e4] ss:$8 sps:$4 sm:$0xff]   ;;  %v1879_v8 = vld [vmem:[%s2119_s30 + $0x1e0] ss:$8 sps:$4 sm:$0xff]   ;;  %v1882_v10 = vld [vmem:[%s2119_s30 + $0x1d4] ss:$8 sps:$4 sm:$0xff]  }
  0x4d   : > { %888 = vmatpush1.bf16.msra.mxu0 %v1842_v47  ;;  %v1884_v11 = vld [vmem:[%s2119_s30 + $0xd0] ss:$8 sps:$4 sm:$0xff]   ;;  %v1886_v13 = vld [vmem:[%s2119_s30 + $0xc4] ss:$8 sps:$4 sm:$0xff]   ;;  %v1890_v15 = vld [vmem:[%s2119_s30 + $0xc0] ss:$8 sps:$4 sm:$0xff]  }
  0x4e   : > { %1001 = vmatpush1.bf16.msra.mxu1 %v1843_v48  ;;  %889 = vmatprep.subr.bf16.mxu0 %v1844_v49  ;;  %v1885_v12 = vld [vmem:[%s2119_s30 + $0x1d0] ss:$8 sps:$4 sm:$0xff]   ;;  %v1888_v14 = vld [vmem:[%s2119_s30 + $0x1c4] ss:$8 sps:$4 sm:$0xff]   ;;  %v1891_v16 = vld [vmem:[%s2119_s30 + $0x1c0] ss:$8 sps:$4 sm:$0xff]  }
  0x4f   : > { %1002 = vmatprep.subr.bf16.mxu1 %v1846_v50  ;;  %v1892_v17 = vld [vmem:[%s2119_s30 + $0xb4] ss:$8 sps:$4 sm:$0xff]   ;;  %v1896_v21 = vld [vmem:[%s2119_s30 + $0xb0] ss:$8 sps:$4 sm:$0xff]   ;;  %v1898_v23 = vld [vmem:[%s2119_s30 + $0xa4] ss:$8 sps:$4 sm:$0xff]  }
  0x50   : > { %v1918_v18 = vld [vmem:[%s2121_s3 + $0x4] ss:$16 sps:$4 sm:$0xff]   ;;  %v1921_v20 = vld [vmem:[%s2121_s3 + $0xc] ss:$16 sps:$4 sm:$0xff]   ;;  %v1897_v22 = vld [vmem:[%s2119_s30 + $0x1b0] ss:$8 sps:$4 sm:$0xff]  }
  0x51   : > { %890 = vmatpush1.bf16.msra.mxu0 %v1848_v51  ;;  %v1894_v19 = vld [vmem:[%s2119_s30 + $0x1b4] ss:$8 sps:$4 sm:$0xff]   ;;  %913 = vmatprep.mubr.bf16.mxu0 %v1918_v18  ;;  %v1900_v24 = vld [vmem:[%s2119_s30 + $0x1a4] ss:$8 sps:$4 sm:$0xff]   ;;  %v1902_v25 = vld [vmem:[%s2119_s30 + $0xa0] ss:$8 sps:$4 sm:$0xff]  }
  0x52   : > { %1003 = vmatpush1.bf16.msra.mxu1 %v1849_v52  ;;  %891 = vmatprep.subr.bf16.mxu0 %v1850_v53  ;;  %v1903_v26 = vld [vmem:[%s2119_s30 + $0x1a0] ss:$8 sps:$4 sm:$0xff]   ;;  %v1904_v27 = vld [vmem:[%s2119_s30 + $0x94] ss:$8 sps:$4 sm:$0xff]   ;;  %v1908_v29 = vld [vmem:[%s2119_s30 + $0x90] ss:$8 sps:$4 sm:$0xff]  }
  0x53   : > { %1004 = vmatprep.subr.bf16.mxu1 %v1852_v54  ;;  %1026 = vmatprep.mubr.bf16.mxu1 %v1921_v20  ;;  %v1906_v28 = vld [vmem:[%s2119_s30 + $0x194] ss:$8 sps:$4 sm:$0xff]   ;;  %v1909_v30 = vld [vmem:[%s2119_s30 + $0x190] ss:$8 sps:$4 sm:$0xff]   ;;  %v1910_v31 = vld [vmem:[%s2119_s30 + $0x84] ss:$8 sps:$4 sm:$0xff]  }
  0x54   : > { %v1912_v32 = vld [vmem:[%s2119_s30 + $0x184] ss:$8 sps:$4 sm:$0xff]   ;;  %v1914_v33 = vld [vmem:[%s2119_s30 + $0x80] ss:$8 sps:$4 sm:$0xff]   ;;  %p1758_p10 = scmp.ne.s32.totalorder %s2024_s12, 3 }
  0x55   : > { %892 = vmatpush1.bf16.msra.mxu0 %v1854_v55  ;;  %v1915_v34 = vld [vmem:[%s2119_s30 + $0x180] ss:$8 sps:$4 sm:$0xff]   ;;  %v1922_v37 = vld [vmem:[%s2121_s3 + $0x24] ss:$16 sps:$4 sm:$0xff]   ;;  %v1924_v38 = vld [vmem:[%s2121_s3 + $0x2c] ss:$16 sps:$4 sm:$0xff]  }
  0x56   : > { %1005 = vmatpush1.bf16.msra.mxu1 %v1855_v56  ;;  %893 = vmatprep.subr.bf16.mxu0 %v1856_v57  ;;  %v1916_v35 = vld [vmem:[%s2121_s3] ss:$16 sps:$4 sm:$0xff]   ;;  %v1919_v36 = vld [vmem:[%s2121_s3 + $0x8] ss:$16 sps:$4 sm:$0xff]   ;;  %v1928_v41 = vld [vmem:[%s2121_s3 + $0x44] ss:$16 sps:$4 sm:$0xff]  }
  0x57   : > { %1006 = vmatprep.subr.bf16.mxu1 %v1858_v58  ;;  %v1926_v39 = vld [vmem:[%s2121_s3 + $0x20] ss:$16 sps:$4 sm:$0xff]   ;;  %v1927_v40 = vld [vmem:[%s2121_s3 + $0x28] ss:$16 sps:$4 sm:$0xff]   ;;  %v1930_v42 = vld [vmem:[%s2121_s3 + $0x4c] ss:$16 sps:$4 sm:$0xff]  }
  0x58   : > { %v1932_v43 = vld [vmem:[%s2121_s3 + $0x40] ss:$16 sps:$4 sm:$0xff]   ;;  %v1933_v44 = vld [vmem:[%s2121_s3 + $0x48] ss:$16 sps:$4 sm:$0xff]   ;;  %v1934_v45 = vld [vmem:[%s2121_s3 + $0x64] ss:$16 sps:$4 sm:$0xff]  }
  0x59   : > { %894 = vmatpush1.bf16.msra.mxu0 %v1860_v59  ;;  %v1936_v46 = vld [vmem:[%s2121_s3 + $0x6c] ss:$16 sps:$4 sm:$0xff]   ;;  %v1938_v47 = vld [vmem:[%s2121_s3 + $0x60] ss:$16 sps:$4 sm:$0xff]   ;;  %v1939_v48 = vld [vmem:[%s2121_s3 + $0x68] ss:$16 sps:$4 sm:$0xff]  }
  0x5a   : > { %1007 = vmatpush1.bf16.msra.mxu1 %v1861_v60  ;;  %895 = vmatprep.subr.bf16.mxu0 %v1862_v61  ;;  %v1940_v49 = vld [vmem:[%s2121_s3 + $0x84] ss:$16 sps:$4 sm:$0xff]   ;;  %v1942_v50 = vld [vmem:[%s2121_s3 + $0x8c] ss:$16 sps:$4 sm:$0xff]   ;;  %v1944_v51 = vld [vmem:[%s2121_s3 + $0x80] ss:$16 sps:$4 sm:$0xff]  }
  0x5b   : > { %1008 = vmatprep.subr.bf16.mxu1 %v1864_v62  ;;  %v1945_v52 = vld [vmem:[%s2121_s3 + $0x88] ss:$16 sps:$4 sm:$0xff]   ;;  %v1946_v53 = vld [vmem:[%s2121_s3 + $0xa4] ss:$16 sps:$4 sm:$0xff]   ;;  %v1948_v54 = vld [vmem:[%s2121_s3 + $0xac] ss:$16 sps:$4 sm:$0xff]  }
  0x5c   : > { %v1950_v55 = vld [vmem:[%s2121_s3 + $0xa0] ss:$16 sps:$4 sm:$0xff]   ;;  %v1951_v56 = vld [vmem:[%s2121_s3 + $0xa8] ss:$16 sps:$4 sm:$0xff]   ;;  %v1952_v57 = vld [vmem:[%s2121_s3 + $0xc4] ss:$16 sps:$4 sm:$0xff]  }
  0x5d   : > { %896 = vmatpush1.bf16.msra.mxu0 %v1866_v63  ;;  %v1954_v58 = vld [vmem:[%s2121_s3 + $0xcc] ss:$16 sps:$4 sm:$0xff]   ;;  %v1956_v59 = vld [vmem:[%s2121_s3 + $0xc0] ss:$16 sps:$4 sm:$0xff]   ;;  %v1957_v60 = vld [vmem:[%s2121_s3 + $0xc8] ss:$16 sps:$4 sm:$0xff]  }
  0x5e   : > { %1009 = vmatpush1.bf16.msra.mxu1 %v1867_v0  ;;  %897 = vmatprep.subr.bf16.mxu0 %v1868_v1  ;;  %v1958_v61 = vld [vmem:[%s2121_s3 + $0xe4] ss:$16 sps:$4 sm:$0xff]   ;;  %v1960_v62 = vld [vmem:[%s2121_s3 + $0xec] ss:$16 sps:$4 sm:$0xff]   ;;  %v1962_v63 = vld [vmem:[%s2121_s3 + $0xe0] ss:$16 sps:$4 sm:$0xff]  }
  0x5f   : > { %1010 = vmatprep.subr.bf16.mxu1 %v1870_v2  ;;  %v1963_v0 = vld [vmem:[%s2121_s3 + $0xe8] ss:$16 sps:$4 sm:$0xff]   ;;  %v273_v2 = vld [vmem:[#allocation2 + $0xb0] sm:$0xff] }
  0x61   : > { %898 = vmatpush2.bf16.msra.mxu0 %v1872_v3 }
  0x62   : > { %1011 = vmatpush2.bf16.msra.mxu1 %v1873_v4  ;;  %899 = vmatprep.subr.bf16.mxu0 %v1874_v5 }
  0x63   : > { %1012 = vmatprep.subr.bf16.mxu1 %v1876_v6  ;;  %v274_v6 = vld [vmem:[#allocation2] sm:$0xff] }
  0x65   : > { %900 = vmatpush2.bf16.msra.mxu0 %v1878_v7 }
  0x66   : > { %1013 = vmatpush2.bf16.msra.mxu1 %v1879_v8  ;;  %901 = vmatprep.subr.bf16.mxu0 %v1880_v9 }
  0x67   : > { %1014 = vmatprep.subr.bf16.mxu1 %v1882_v10 }
  0x69   : > { %902 = vmatpush2.bf16.msra.mxu0 %v1884_v11  ;;  %v275_v11 = vld [vmem:[#allocation2 + $0xd8] sm:$0xff] }
  0x6a   : > { %1015 = vmatpush2.bf16.msra.mxu1 %v1885_v12  ;;  %903 = vmatprep.subr.bf16.mxu0 %v1886_v13 }
  0x6b   : > { %1016 = vmatprep.subr.bf16.mxu1 %v1888_v14 }
  0x6d   : > { %904 = vmatpush2.bf16.msra.mxu0 %v1890_v15 }
  0x6e   : > { %1017 = vmatpush2.bf16.msra.mxu1 %v1891_v16  ;;  %905 = vmatprep.subr.bf16.mxu0 %v1892_v17  ;;  %v276_v16 = vld [vmem:[#allocation2 + $0x18] sm:$0xff] }
  0x6f   : > { %1018 = vmatprep.subr.bf16.mxu1 %v1894_v19 }
  0x71   : > { %906 = vmatpush2.bf16.msra.mxu0 %v1896_v21  ;;  %v277_v21 = vld [vmem:[#allocation2 + $0x50] sm:$0xff] }
  0x72   : > { %1019 = vmatpush2.bf16.msra.mxu1 %v1897_v22  ;;  %907 = vmatprep.subr.bf16.mxu0 %v1898_v23 }
  0x73   : > { %1020 = vmatprep.subr.bf16.mxu1 %v1900_v24 }
  0x75   : > { %908 = vmatpush2.bf16.msra.mxu0 %v1902_v25 }
  0x76   : > { %1021 = vmatpush2.bf16.msra.mxu1 %v1903_v26  ;;  %909 = vmatprep.subr.bf16.mxu0 %v1904_v27  ;;  %v278_v26 = vld [vmem:[#allocation2 + $0x68] sm:$0xff] }
  0x77   : > { %1022 = vmatprep.subr.bf16.mxu1 %v1906_v28 }
  0x79   : > { %910 = vmatpush2.bf16.msra.mxu0 %v1908_v29 }
  0x7a   : > { %1023 = vmatpush2.bf16.msra.mxu1 %v1909_v30  ;;  %911 = vmatprep.subr.bf16.mxu0 %v1910_v31  ;;  %v279_v31 = vld [vmem:[#allocation2 + $0x30] sm:$0xff] }
  0x7b   : > { %1024 = vmatprep.subr.bf16.mxu1 %v1912_v32 }
  0x7d   : > { %912 = vmatpush2.bf16.msra.mxu0 %v1914_v33 }
  0x7e   : > { %1025 = vmatpush2.bf16.msra.mxu1 %v1915_v34 }
  0x80   : > { %914 = vmatmul.mubr.bf16.vlgmr.msra.gmra.mxu0 %v1916_v35 }
  0x81   : > { %1027 = vmatmul.mubr.bf16.vlgmr.msra.gmra.mxu1 %v1919_v36  ;;  %923 = vmatprep.mubr.bf16.mxu0 %v1922_v37  ;;  %v280_v36 = vld [vmem:[#allocation2 + $0x48] sm:$0xff] }
  0x82   : > { %1036 = vmatprep.mubr.bf16.mxu1 %v1924_v38 }
  0x88   : > { %924 = vmatmul.mubr.bf16.gmra.mxu0 %v1926_v39 }
  0x89   : > { %1037 = vmatmul.mubr.bf16.gmra.mxu1 %v1927_v40  ;;  %933 = vmatprep.mubr.bf16.mxu0 %v1928_v41  ;;  %v281_v41 = vld [vmem:[#allocation2 + $0x80] sm:$0xff] }
  0x8a   : > { %1046 = vmatprep.mubr.bf16.mxu1 %v1930_v42 }
  0x90   : > { %934 = vmatmul.mubr.bf16.gmra.mxu0 %v1932_v43 }
  0x91   : > { %1047 = vmatmul.mubr.bf16.gmra.mxu1 %v1933_v44  ;;  %943 = vmatprep.mubr.bf16.mxu0 %v1934_v45 }
  0x92   : > { %1056 = vmatprep.mubr.bf16.mxu1 %v1936_v46  ;;  %v282_v46 = vld [vmem:[#allocation2 + $0x88] sm:$0xff] }
  0x98   : > { %944 = vmatmul.mubr.bf16.gmra.mxu0 %v1938_v47 }
  0x99   : > { %1057 = vmatmul.mubr.bf16.gmra.mxu1 %v1939_v48  ;;  %953 = vmatprep.mubr.bf16.mxu0 %v1940_v49 }
  0x9a   : > { %1066 = vmatprep.mubr.bf16.mxu1 %v1942_v50 }
  0xa0   : > { %954 = vmatmul.mubr.bf16.gmra.mxu0 %v1944_v51  ;;  %v283_v51 = vld [vmem:[#allocation2 + $0xe8] sm:$0xff] }
  0xa1   : > { %1067 = vmatmul.mubr.bf16.gmra.mxu1 %v1945_v52  ;;  %963 = vmatprep.mubr.bf16.mxu0 %v1946_v53 }
  0xa2   : > { %1076 = vmatprep.mubr.bf16.mxu1 %v1948_v54 }
  0xa8   : > { %964 = vmatmul.mubr.bf16.gmra.mxu0 %v1950_v55 }
  0xa9   : > { %1077 = vmatmul.mubr.bf16.gmra.mxu1 %v1951_v56  ;;  %973 = vmatprep.mubr.bf16.mxu0 %v1952_v57  ;;  %v284_v56 = vld [vmem:[#allocation2 + $0xb8] sm:$0xff] }
  0xaa   : > { %1086 = vmatprep.mubr.bf16.mxu1 %v1954_v58 }
  0xb0   : > { %974 = vmatmul.mubr.bf16.gmra.mxu0 %v1956_v59 }
  0xb1   : > { %1087 = vmatmul.mubr.bf16.gmra.mxu1 %v1957_v60  ;;  %983 = vmatprep.mubr.bf16.mxu0 %v1958_v61  ;;  %v285_v61 = vld [vmem:[#allocation2 + $0x60] sm:$0xff] }
  0xb2   : > { %1096 = vmatprep.mubr.bf16.mxu1 %v1960_v62 }
  0xb8   : > { %984 = vmatmul.mubr.bf16.gmra.mxu0 %v1962_v63 }
  0xb9   : > { %1097 = vmatmul.mubr.bf16.gmra.mxu1 %v1963_v0 }
 0x140   : > { %v915_v1 = vpop.f32.mrf.mxu0 }
 0x141   : > { %v1028_v3 = vpop.f32.mrf.mxu1 }
 0x142   : > { %v1029_v4 = vadd.f32 %v1028_v3, %v915_v1  ;;  %v917_v5 = vpop.f32.mrf.mxu0 }
 0x143   : > { %v1030_v7 = vpop.f32.mrf.mxu1 }
 0x144   : > { %v1107_v8 = vadd.f32 %v1029_v4, %v273_v2  ;;  %v1031_v9 = vadd.f32 %v1030_v7, %v917_v5  ;;  %v919_v10 = vpop.f32.mrf.mxu0  ;;  %v286_v2 = vld [vmem:[#allocation2 + $0xf0] sm:$0xff]  ;;  %v287_v7 = vld [vmem:[#allocation2 + $0x8] sm:$0xff] }
 0x145   : > { %v1032_v12 = vpop.f32.mrf.mxu1 }
 0x146   : > { %1139 = vst [vmem:[#allocation2 + $0xb0] sm:$0xff] %v1107_v8  ;;  %v1108_v13 = vadd.f32 %v1031_v9, %v274_v6  ;;  %v1033_v14 = vadd.f32 %v1032_v12, %v919_v10  ;;  %v921_v15 = vpop.f32.mrf.mxu0  ;;  %v288_v12 = vld [vmem:[#allocation2 + $0x78] sm:$0xff] }
 0x147   : > { %v1034_v17 = vpop.f32.mrf.mxu1 }
 0x148   : > { %1140 = vst [vmem:[#allocation2] sm:$0xff] %v1108_v13  ;;  %v1109_v18 = vadd.f32 %v1033_v14, %v275_v11  ;;  %v1035_v19 = vadd.f32 %v1034_v17, %v921_v15  ;;  %v925_v20 = vpop.f32.mrf.mxu0  ;;  %v289_v17 = vld [vmem:[#allocation2 + $0x38] sm:$0xff] }
 0x149   : > { %v1038_v22 = vpop.f32.mrf.mxu1 }
 0x14a   : > { %1141 = vst [vmem:[#allocation2 + $0xd8] sm:$0xff] %v1109_v18  ;;  %v1110_v23 = vadd.f32 %v1035_v19, %v276_v16  ;;  %v1039_v24 = vadd.f32 %v1038_v22, %v925_v20  ;;  %v927_v25 = vpop.f32.mrf.mxu0  ;;  %v290_v22 = vld [vmem:[#allocation2 + $0x58] sm:$0xff] }
 0x14b   : > { %v1040_v27 = vpop.f32.mrf.mxu1 }
 0x14c   : > { %1142 = vst [vmem:[#allocation2 + $0x18] sm:$0xff] %v1110_v23  ;;  %v1111_v28 = vadd.f32 %v1039_v24, %v277_v21  ;;  %v1041_v29 = vadd.f32 %v1040_v27, %v927_v25  ;;  %v929_v30 = vpop.f32.mrf.mxu0  ;;  %v291_v27 = vld [vmem:[#allocation2 + $0x40] sm:$0xff] }
 0x14d   : > { %v1042_v32 = vpop.f32.mrf.mxu1 }
 0x14e   : > { %1143 = vst [vmem:[#allocation2 + $0x50] sm:$0xff] %v1111_v28  ;;  %v1112_v33 = vadd.f32 %v1041_v29, %v278_v26  ;;  %v1043_v34 = vadd.f32 %v1042_v32, %v929_v30  ;;  %v931_v35 = vpop.f32.mrf.mxu0  ;;  %v292_v32 = vld [vmem:[#allocation2 + $0xc8] sm:$0xff] }
 0x14f   : > { %v1044_v37 = vpop.f32.mrf.mxu1 }
 0x150   : > { %1144 = vst [vmem:[#allocation2 + $0x68] sm:$0xff] %v1112_v33  ;;  %v1113_v38 = vadd.f32 %v1043_v34, %v279_v31  ;;  %v1045_v39 = vadd.f32 %v1044_v37, %v931_v35  ;;  %v935_v40 = vpop.f32.mrf.mxu0  ;;  %v293_v37 = vld [vmem:[#allocation2 + $0xe0] sm:$0xff] }
 0x151   : > { %v1048_v42 = vpop.f32.mrf.mxu1 }
 0x152   : > { %1145 = vst [vmem:[#allocation2 + $0x30] sm:$0xff] %v1113_v38  ;;  %v1114_v43 = vadd.f32 %v1045_v39, %v280_v36  ;;  %v1049_v44 = vadd.f32 %v1048_v42, %v935_v40  ;;  %v937_v45 = vpop.f32.mrf.mxu0  ;;  %v294_v42 = vld [vmem:[#allocation2 + $0x90] sm:$0xff] }
 0x153   : > { %v1050_v47 = vpop.f32.mrf.mxu1 }
 0x154   : > { %1146 = vst [vmem:[#allocation2 + $0x48] sm:$0xff] %v1114_v43  ;;  %v1115_v48 = vadd.f32 %v1049_v44, %v281_v41  ;;  %v1051_v49 = vadd.f32 %v1050_v47, %v937_v45  ;;  %v939_v50 = vpop.f32.mrf.mxu0  ;;  %v295_v47 = vld [vmem:[#allocation2 + $0x70] sm:$0xff] }
 0x155   : > { %v1052_v52 = vpop.f32.mrf.mxu1 }
 0x156   : > { %1147 = vst [vmem:[#allocation2 + $0x80] sm:$0xff] %v1115_v48  ;;  %v1116_v53 = vadd.f32 %v1051_v49, %v282_v46  ;;  %v1053_v54 = vadd.f32 %v1052_v52, %v939_v50  ;;  %v941_v55 = vpop.f32.mrf.mxu0  ;;  %v296_v52 = vld [vmem:[#allocation2 + $0xc0] sm:$0xff] }
 0x157   : > { %v1054_v57 = vpop.f32.mrf.mxu1 }
 0x158   : > { %1148 = vst [vmem:[#allocation2 + $0x88] sm:$0xff] %v1116_v53  ;;  %v1117_v58 = vadd.f32 %v1053_v54, %v283_v51  ;;  %v1055_v59 = vadd.f32 %v1054_v57, %v941_v55  ;;  %v945_v60 = vpop.f32.mrf.mxu0  ;;  %v297_v57 = vld [vmem:[#allocation2 + $0xa8] sm:$0xff] }
 0x159   : > { %v1058_v62 = vpop.f32.mrf.mxu1 }
 0x15a   : > { %1149 = vst [vmem:[#allocation2 + $0xe8] sm:$0xff] %v1117_v58  ;;  %v1118_v63 = vadd.f32 %v1055_v59, %v284_v56  ;;  %v1059_v0 = vadd.f32 %v1058_v62, %v945_v60  ;;  %v947_v1 = vpop.f32.mrf.mxu0  ;;  %v298_v62 = vld [vmem:[#allocation2 + $0xd0] sm:$0xff] }
 0x15b   : > { %v1060_v3 = vpop.f32.mrf.mxu1 }
 0x15c   : > { %1150 = vst [vmem:[#allocation2 + $0xb8] sm:$0xff] %v1118_v63  ;;  %v1119_v4 = vadd.f32 %v1059_v0, %v285_v61  ;;  %v1061_v5 = vadd.f32 %v1060_v3, %v947_v1  ;;  %v949_v6 = vpop.f32.mrf.mxu0  ;;  %v299_v3 = vld [vmem:[#allocation2 + $0x10] sm:$0xff] }
 0x15d   : > { %v1062_v8 = vpop.f32.mrf.mxu1 }
 0x15e   : > { %1151 = vst [vmem:[#allocation2 + $0x60] sm:$0xff] %v1119_v4  ;;  %v1120_v9 = vadd.f32 %v1061_v5, %v286_v2  ;;  %v1063_v10 = vadd.f32 %v1062_v8, %v949_v6  ;;  %v951_v11 = vpop.f32.mrf.mxu0  ;;  %v300_v8 = vld [vmem:[#allocation2 + $0x28] sm:$0xff] }
 0x15f   : > { %v1064_v13 = vpop.f32.mrf.mxu1 }
 0x160   : > { %1152 = vst [vmem:[#allocation2 + $0xf0] sm:$0xff] %v1120_v9  ;;  %v1121_v14 = vadd.f32 %v1063_v10, %v287_v7  ;;  %v1065_v15 = vadd.f32 %v1064_v13, %v951_v11  ;;  %v955_v16 = vpop.f32.mrf.mxu0  ;;  %v301_v13 = vld [vmem:[#allocation2 + $0xa0] sm:$0xff] }
 0x161   : > { %v1068_v18 = vpop.f32.mrf.mxu1 }
 0x162   : > { %1153 = vst [vmem:[#allocation2 + $0x8] sm:$0xff] %v1121_v14  ;;  %v1122_v19 = vadd.f32 %v1065_v15, %v288_v12  ;;  %v1069_v20 = vadd.f32 %v1068_v18, %v955_v16  ;;  %v957_v21 = vpop.f32.mrf.mxu0  ;;  %v302_v18 = vld [vmem:[#allocation2 + $0xf8] sm:$0xff] }
 0x163   : > { %v1070_v23 = vpop.f32.mrf.mxu1 }
 0x164   : > { %1154 = vst [vmem:[#allocation2 + $0x78] sm:$0xff] %v1122_v19  ;;  %v1123_v24 = vadd.f32 %v1069_v20, %v289_v17  ;;  %v1071_v25 = vadd.f32 %v1070_v23, %v957_v21  ;;  %v959_v26 = vpop.f32.mrf.mxu0  ;;  %v303_v23 = vld [vmem:[#allocation2 + $0x20] sm:$0xff] }
 0x165   : > { %v1072_v28 = vpop.f32.mrf.mxu1 }
 0x166   : > { %1155 = vst [vmem:[#allocation2 + $0x38] sm:$0xff] %v1123_v24  ;;  %v1124_v29 = vadd.f32 %v1071_v25, %v290_v22  ;;  %v1073_v30 = vadd.f32 %v1072_v28, %v959_v26  ;;  %v961_v31 = vpop.f32.mrf.mxu0  ;;  %v304_v28 = vld [vmem:[#allocation2 + $0x98] sm:$0xff] }
 0x167   : > { %v1074_v33 = vpop.f32.mrf.mxu1 }
 0x168   : > { %1156 = vst [vmem:[#allocation2 + $0x58] sm:$0xff] %v1124_v29  ;;  %v1125_v34 = vadd.f32 %v1073_v30, %v291_v27  ;;  %v1075_v35 = vadd.f32 %v1074_v33, %v961_v31  ;;  %v965_v36 = vpop.f32.mrf.mxu0 }
 0x169   : > { %v1078_v38 = vpop.f32.mrf.mxu1 }
 0x16a   : > { %1157 = vst [vmem:[#allocation2 + $0x40] sm:$0xff] %v1125_v34  ;;  %v1126_v39 = vadd.f32 %v1075_v35, %v292_v32  ;;  %v1079_v40 = vadd.f32 %v1078_v38, %v965_v36  ;;  %v967_v41 = vpop.f32.mrf.mxu0 }
 0x16b   : > { %v1080_v43 = vpop.f32.mrf.mxu1 }
 0x16c   : > { %1158 = vst [vmem:[#allocation2 + $0xc8] sm:$0xff] %v1126_v39  ;;  %v1127_v44 = vadd.f32 %v1079_v40, %v293_v37  ;;  %v1081_v45 = vadd.f32 %v1080_v43, %v967_v41  ;;  %v969_v46 = vpop.f32.mrf.mxu0 }
 0x16d   : > { %v1082_v48 = vpop.f32.mrf.mxu1 }
 0x16e   : > { %1159 = vst [vmem:[#allocation2 + $0xe0] sm:$0xff] %v1127_v44  ;;  %v1128_v49 = vadd.f32 %v1081_v45, %v294_v42  ;;  %v1083_v50 = vadd.f32 %v1082_v48, %v969_v46  ;;  %v971_v51 = vpop.f32.mrf.mxu0 }
 0x16f   : > { %v1084_v53 = vpop.f32.mrf.mxu1 }
 0x170   : > { %1160 = vst [vmem:[#allocation2 + $0x90] sm:$0xff] %v1128_v49  ;;  %v1129_v54 = vadd.f32 %v1083_v50, %v295_v47  ;;  %v1085_v55 = vadd.f32 %v1084_v53, %v971_v51  ;;  %v975_v56 = vpop.f32.mrf.mxu0 }
 0x171   : > { %v1088_v58 = vpop.f32.mrf.mxu1 }
 0x172   : > { %1161 = vst [vmem:[#allocation2 + $0x70] sm:$0xff] %v1129_v54  ;;  %v1130_v59 = vadd.f32 %v1085_v55, %v296_v52  ;;  %v1089_v60 = vadd.f32 %v1088_v58, %v975_v56  ;;  %v977_v61 = vpop.f32.mrf.mxu0 }
 0x173   : > { %v1090_v63 = vpop.f32.mrf.mxu1 }
 0x174   : > { %1162 = vst [vmem:[#allocation2 + $0xc0] sm:$0xff] %v1130_v59  ;;  %v1131_v0 = vadd.f32 %v1089_v60, %v297_v57  ;;  %v1091_v1 = vadd.f32 %v1090_v63, %v977_v61  ;;  %v979_v2 = vpop.f32.mrf.mxu0 }
 0x175   : > { %v1092_v4 = vpop.f32.mrf.mxu1 }
 0x176   : > { %1163 = vst [vmem:[#allocation2 + $0xa8] sm:$0xff] %v1131_v0  ;;  %v1132_v5 = vadd.f32 %v1091_v1, %v298_v62  ;;  %v1093_v6 = vadd.f32 %v1092_v4, %v979_v2  ;;  %v981_v7 = vpop.f32.mrf.mxu0 }
 0x177   : > { %v1094_v9 = vpop.f32.mrf.mxu1 }
 0x178   : > { %1164 = vst [vmem:[#allocation2 + $0xd0] sm:$0xff] %v1132_v5  ;;  %v1133_v10 = vadd.f32 %v1093_v6, %v299_v3  ;;  %v1095_v11 = vadd.f32 %v1094_v9, %v981_v7  ;;  %v985_v12 = vpop.f32.mrf.mxu0 }
 0x179   : > { %v1098_v14 = vpop.f32.mrf.mxu1 }
 0x17a   : > { %1165 = vst [vmem:[#allocation2 + $0x10] sm:$0xff] %v1133_v10  ;;  %v1134_v15 = vadd.f32 %v1095_v11, %v300_v8  ;;  %v1099_v16 = vadd.f32 %v1098_v14, %v985_v12  ;;  %v987_v17 = vpop.f32.mrf.mxu0 }
 0x17b   : > { %v1100_v19 = vpop.f32.mrf.mxu1 }
 0x17c   : > { %1166 = vst [vmem:[#allocation2 + $0x28] sm:$0xff] %v1134_v15  ;;  %v1135_v20 = vadd.f32 %v1099_v16, %v301_v13  ;;  %v1101_v21 = vadd.f32 %v1100_v19, %v987_v17  ;;  %v989_v22 = vpop.f32.mrf.mxu0 }
 0x17d   : > { %v1102_v24 = vpop.f32.mrf.mxu1 }
 0x17e   : > { %1167 = vst [vmem:[#allocation2 + $0xa0] sm:$0xff] %v1135_v20  ;;  %v1136_v25 = vadd.f32 %v1101_v21, %v302_v18  ;;  %v1103_v26 = vadd.f32 %v1102_v24, %v989_v22  ;;  %v991_v27 = vpop.f32.mrf.mxu0 }
 0x17f   : > { %v1104_v29 = vpop.f32.mrf.mxu1 }
 0x180   : > { %1168 = vst [vmem:[#allocation2 + $0xf8] sm:$0xff] %v1136_v25  ;;  %v1137_v30 = vadd.f32 %v1103_v26, %v303_v23  ;;  %v1105_v31 = vadd.f32 %v1104_v29, %v991_v27  ;;  %1174 = sbr.rel (%p1758_p10) target bundleno = 540 (0x21c), region = 59 }
 0x182   : > { %1169 = vst [vmem:[#allocation2 + $0x20] sm:$0xff] %v1137_v30  ;;  %v1138_v32 = vadd.f32 %v1105_v31, %v304_v28 }
 0x184   : > { %1170 = vst [vmem:[#allocation2 + $0x98] sm:$0xff] %v1138_v32 }
 0x185   : > { %v2221_v33 = vld [vmem:[#allocation2 + $0xb0] sm:$0xff]  ;;  %v2223_v34 = vld [vmem:[#allocation2] sm:$0xff]  ;;  %v2225_v35 = vld [vmem:[#allocation2 + $0xd8] sm:$0xff] }
 0x186   : > { %v2227_v36 = vld [vmem:[#allocation2 + $0x18] sm:$0xff]  ;;  %v2229_v37 = vld [vmem:[#allocation2 + $0x50] sm:$0xff]  ;;  %v2231_v38 = vld [vmem:[#allocation2 + $0x68] sm:$0xff]  ;;  %v1207_v39 = vadd.f32 %v2225_v35, %v2221_v33 }
 0x187   : > { %v2235_v40 = vld [vmem:[#allocation2 + $0x30] sm:$0xff]  ;;  %v1228_v41 = vadd.f32 %v2227_v36, %v2223_v34  ;;  %v2239_v42 = vld [vmem:[#allocation2 + $0x48] sm:$0xff]  ;;  %v2242_v44 = vld [vmem:[#allocation2 + $0x80] sm:$0xff] }
 0x188   : > { %v1208_v43 = vadd.f32 %v1207_v39, %v2229_v37  ;;  %v2245_v46 = vld [vmem:[#allocation2 + $0x88] sm:$0xff]  ;;  %v2251_v50 = vld [vmem:[#allocation2 + $0xb8] sm:$0xff]  ;;  %v2254_v52 = vld [vmem:[#allocation2 + $0x60] sm:$0xff] }
 0x189   : > { %v1229_v45 = vadd.f32 %v1228_v41, %v2231_v38  ;;  %v2248_v48 = vld [vmem:[#allocation2 + $0xe8] sm:$0xff]  ;;  %v2257_v54 = vld [vmem:[#allocation2 + $0xf0] sm:$0xff]  ;;  %v2263_v58 = vld [vmem:[#allocation2 + $0x78] sm:$0xff] }
 0x18a   : > { %v1209_v47 = vadd.f32 %v1208_v43, %v2235_v40  ;;  %v2260_v56 = vld [vmem:[#allocation2 + $0x8] sm:$0xff]  ;;  %v2266_v60 = vld [vmem:[#allocation2 + $0x38] sm:$0xff]  ;;  %v2272_v0 = vld [vmem:[#allocation2 + $0x40] sm:$0xff] }
 0x18b   : > { %v1230_v49 = vadd.f32 %v1229_v45, %v2239_v42  ;;  %v2269_v62 = vld [vmem:[#allocation2 + $0x58] sm:$0xff]  ;;  %v2275_v2 = vld [vmem:[#allocation2 + $0xc8] sm:$0xff]  ;;  %v2278_v4 = vld [vmem:[#allocation2 + $0xe0] sm:$0xff] }
 0x18c   : > { %v1210_v51 = vadd.f32 %v1209_v47, %v2242_v44  ;;  %v2281_v6 = vld [vmem:[#allocation2 + $0x90] sm:$0xff]  ;;  %v2287_v10 = vld [vmem:[#allocation2 + $0xc0] sm:$0xff]  ;;  %v2290_v12 = vld [vmem:[#allocation2 + $0xa8] sm:$0xff] }
 0x18d   : > { %v1231_v53 = vadd.f32 %v1230_v49, %v2245_v46  ;;  %v2284_v8 = vld [vmem:[#allocation2 + $0x70] sm:$0xff]  ;;  %v2299_v18 = vld [vmem:[#allocation2 + $0x28] sm:$0xff]  ;;  %v2302_v20 = vld [vmem:[#allocation2 + $0xa0] sm:$0xff] }
 0x18e   : > { %v1211_v55 = vadd.f32 %v1210_v51, %v2248_v48  ;;  %v2293_v14 = vld [vmem:[#allocation2 + $0xd0] sm:$0xff]  ;;  %v2305_v22 = vld [vmem:[#allocation2 + $0xf8] sm:$0xff]  ;;  %v2308_v24 = vld [vmem:[#allocation2 + $0x20] sm:$0xff] }
 0x18f   : > { %v1232_v57 = vadd.f32 %v1231_v53, %v2251_v50  ;;  %v2296_v16 = vld [vmem:[#allocation2 + $0x10] sm:$0xff]  ;;  %v2311_v26 = vld [vmem:[#allocation2 + $0x98] sm:$0xff] }
 0x190   : > { %v1212_v59 = vadd.f32 %v1211_v55, %v2254_v52 }
 0x191   : > { %v1233_v61 = vadd.f32 %v1232_v57, %v2257_v54 }
 0x192   : > { %v1213_v63 = vadd.f32 %v1212_v59, %v2260_v56 }
 0x193   : > { %v1234_v1 = vadd.f32 %v1233_v61, %v2263_v58 }
 0x194   : > { %v1214_v3 = vadd.f32 %v1213_v63, %v2266_v60 }
 0x195   : > { %v1235_v5 = vadd.f32 %v1234_v1, %v2269_v62 }
 0x196   : > { %v1215_v7 = vadd.f32 %v1214_v3, %v2272_v0 }
 0x197   : > { %v1236_v9 = vadd.f32 %v1235_v5, %v2275_v2 }
 0x198   : > { %v1216_v11 = vadd.f32 %v1215_v7, %v2278_v4 }
 0x199   : > { %v1237_v13 = vadd.f32 %v1236_v9, %v2281_v6 }
 0x19a   : > { %v1217_v15 = vadd.f32 %v1216_v11, %v2284_v8 }
 0x19b   : > { %v1238_v17 = vadd.f32 %v1237_v13, %v2287_v10 }
 0x19c   : > { %v1218_v19 = vadd.f32 %v1217_v15, %v2290_v12 }
 0x19d   : > { %v1239_v21 = vadd.f32 %v1238_v17, %v2293_v14 }
 0x19e   : > { %v1219_v23 = vadd.f32 %v1218_v19, %v2296_v16 }
 0x19f   : > { %v1240_v25 = vadd.f32 %v1239_v21, %v2299_v18 }
 0x1a0   : > { %v1220_v27 = vadd.f32 %v1219_v23, %v2302_v20 }
 0x1a1   : > { %v1241_v28 = vadd.f32 %v1240_v25, %v2305_v22 }
 0x1a2   : > { %v1221_v29 = vadd.f32 %v1220_v27, %v2308_v24 }
 0x1a3   : > { %v1242_v30 = vadd.f32 %v1241_v28, %v2311_v26 }
 0x1a4   : > { %v1222_v31 = vrot.slane %v1221_v29, 4 }
 0x1a5   : > { %v1243_v32 = vrot.slane %v1242_v30, 4 }
 0x1a6   : > { %v1223_v39 = vadd.f32 %v1222_v31, %v1221_v29 }
 0x1a7   : > { %v1244_v41 = vadd.f32 %v1243_v32, %v1242_v30 }
 0x1a8   : > { %v1224_v43 = vrot.slane %v1223_v39, 2 }
 0x1a9   : > { %v1245_v45 = vrot.slane %v1244_v41, 2 }
 0x1aa   : > { %v1225_v47 = vadd.f32 %v1224_v43, %v1223_v39 }
 0x1ab   : > { %v1246_v49 = vadd.f32 %v1245_v45, %v1244_v41 }
 0x1ac   : > { %v1226_v51 = vrot.slane %v1225_v47, 1 }
 0x1ad   : > { %v1247_v53 = vrot.slane %v1246_v49, 1 }
 0x1ae   : > { %v1227_v55 = vadd.f32 %v1226_v51, %v1225_v47 }
 0x1af   : > { %v1248_v57 = vadd.f32 %v1247_v53, %v1246_v49 }
 0x1b0   : > { %v2317_v59 = vmul.f32 0.0078125, %v1227_v55 }
 0x1b1   : > { %v2319_v61 = vmul.f32 0.0078125, %v1248_v57 }
 0x1b2   : > { %v2323_v63 = vsub.f32 %v2221_v33, %v2317_v59  ;;  %v2331_v3 = vsub.f32 %v2225_v35, %v2317_v59  ;;  %v2339_v7 = vsub.f32 %v2229_v37, %v2317_v59  ;;  %v2375_v15 = vsub.f32 %v2248_v48, %v2317_v59 }
 0x1b3   : > { %v2327_v1 = vsub.f32 %v2223_v34, %v2319_v61  ;;  %v2335_v5 = vsub.f32 %v2227_v36, %v2319_v61  ;;  %v2343_v33 = vsub.f32 %v2231_v38, %v2319_v61  ;;  %v2347_v34 = vsub.f32 %v2235_v40, %v2317_v59 }
 0x1b4   : > { %v2351_v35 = vsub.f32 %v2239_v42, %v2319_v61  ;;  %v1284_v36 = vmul.f32 %v2323_v63, %v2323_v63  ;;  %v1286_v37 = vmul.f32 %v2331_v3, %v2331_v3  ;;  %v2363_v40 = vsub.f32 %v2242_v44, %v2317_v59 }
 0x1b5   : > { %v1285_v9 = vmul.f32 %v2327_v1, %v2327_v1  ;;  %v1287_v38 = vmul.f32 %v2335_v5, %v2335_v5  ;;  %v2367_v42 = vsub.f32 %v2245_v46, %v2319_v61  ;;  %v1288_v11 = vmul.f32 %v2339_v7, %v2339_v7 }
 0x1b6   : > { %v1289_v13 = vmul.f32 %v2343_v33, %v2343_v33  ;;  %v2379_v17 = vsub.f32 %v2251_v50, %v2319_v61  ;;  %v1290_v44 = vmul.f32 %v2347_v34, %v2347_v34  ;;  %v1291_v46 = vmul.f32 %v2351_v35, %v2351_v35 }
 0x1b7   : > { %v1316_v19 = vadd.f32 %v1286_v37, %v1284_v36  ;;  %v1337_v21 = vadd.f32 %v1287_v38, %v1285_v9  ;;  %v2387_v23 = vsub.f32 %v2254_v52, %v2317_v59  ;;  %v2391_v48 = vsub.f32 %v2257_v54, %v2319_v61 }
 0x1b8   : > { %v1292_v50 = vmul.f32 %v2363_v40, %v2363_v40  ;;  %v1293_v25 = vmul.f32 %v2367_v42, %v2367_v42  ;;  %v2399_v29 = vsub.f32 %v2260_v56, %v2317_v59  ;;  %v2403_v52 = vsub.f32 %v2263_v58, %v2319_v61 }
 0x1b9   : > { %v1317_v27 = vadd.f32 %v1316_v19, %v1288_v11  ;;  %v1338_v28 = vadd.f32 %v1337_v21, %v1289_v13  ;;  %v1294_v54 = vmul.f32 %v2375_v15, %v2375_v15  ;;  %v1295_v30 = vmul.f32 %v2379_v17, %v2379_v17 }
 0x1ba   : > { %v2411_v39 = vsub.f32 %v2266_v60, %v2317_v59  ;;  %v2415_v56 = vsub.f32 %v2269_v62, %v2319_v61  ;;  %v1296_v58 = vmul.f32 %v2387_v23, %v2387_v23  ;;  %v1297_v41 = vmul.f32 %v2391_v48, %v2391_v48 }
 0x1bb   : > { %v1318_v31 = vadd.f32 %v1317_v27, %v1290_v44  ;;  %v1339_v32 = vadd.f32 %v1338_v28, %v1291_v46  ;;  %v2423_v47 = vsub.f32 %v2272_v0, %v2317_v59  ;;  %v2427_v60 = vsub.f32 %v2275_v2, %v2319_v61 }
 0x1bc   : > { %v1298_v62 = vmul.f32 %v2399_v29, %v2399_v29  ;;  %v1299_v49 = vmul.f32 %v2403_v52, %v2403_v52  ;;  %v2435_v55 = vsub.f32 %v2278_v4, %v2317_v59  ;;  %v2439_v0 = vsub.f32 %v2281_v6, %v2319_v61 }
 0x1bd   : > { %v1319_v43 = vadd.f32 %v1318_v31, %v1292_v50  ;;  %v1340_v45 = vadd.f32 %v1339_v32, %v1293_v25  ;;  %v1300_v2 = vmul.f32 %v2411_v39, %v2411_v39  ;;  %v1301_v57 = vmul.f32 %v2415_v56, %v2415_v56 }
 0x1be   : > { %v2447_v37 = vsub.f32 %v2284_v8, %v2317_v59  ;;  %v2451_v4 = vsub.f32 %v2287_v10, %v2319_v61  ;;  %v1302_v6 = vmul.f32 %v2423_v47, %v2423_v47  ;;  %v1303_v38 = vmul.f32 %v2427_v60, %v2427_v60 }
 0x1bf   : > { %v1320_v51 = vadd.f32 %v1319_v43, %v1294_v54  ;;  %v1341_v53 = vadd.f32 %v1340_v45, %v1295_v30  ;;  %v2459_v44 = vsub.f32 %v2290_v12, %v2317_v59  ;;  %v2463_v8 = vsub.f32 %v2293_v14, %v2319_v61 }
 0x1c0   : > { %v1304_v10 = vmul.f32 %v2435_v55, %v2435_v55  ;;  %v1305_v46 = vmul.f32 %v2439_v0, %v2439_v0  ;;  %v2471_v50 = vsub.f32 %v2296_v16, %v2317_v59  ;;  %v2475_v12 = vsub.f32 %v2299_v18, %v2319_v61 }
 0x1c1   : > { %v1321_v36 = vadd.f32 %v1320_v51, %v1296_v58  ;;  %v1342_v9 = vadd.f32 %v1341_v53, %v1297_v41  ;;  %v1306_v14 = vmul.f32 %v2447_v37, %v2447_v37  ;;  %v1307_v25 = vmul.f32 %v2451_v4, %v2451_v4 }
 0x1c2   : > { %v2483_v54 = vsub.f32 %v2302_v20, %v2317_v59  ;;  %v2487_v16 = vsub.f32 %v2305_v22, %v2319_v61  ;;  %v1308_v18 = vmul.f32 %v2459_v44, %v2459_v44  ;;  %v1309_v30 = vmul.f32 %v2463_v8, %v2463_v8 }
 0x1c3   : > { %v1322_v11 = vadd.f32 %v1321_v36, %v1298_v62  ;;  %v1343_v13 = vadd.f32 %v1342_v9, %v1299_v49  ;;  %v2495_v58 = vsub.f32 %v2308_v24, %v2317_v59  ;;  %v2499_v20 = vsub.f32 %v2311_v26, %v2319_v61 }
 0x1c4   : > { %v1310_v22 = vmul.f32 %v2471_v50, %v2471_v50  ;;  %v1311_v41 = vmul.f32 %v2475_v12, %v2475_v12  ;;  %v1312_v62 = vmul.f32 %v2483_v54, %v2483_v54  ;;  %v1313_v49 = vmul.f32 %v2487_v16, %v2487_v16 }
 0x1c5   : > { %v1323_v19 = vadd.f32 %v1322_v11, %v1300_v2  ;;  %v1344_v21 = vadd.f32 %v1343_v13, %v1301_v57  ;;  %v1314_v26 = vmul.f32 %v2495_v58, %v2495_v58  ;;  %v1315_v61 = vmul.f32 %v2499_v20, %v2499_v20 }
 0x1c7   : > { %v1324_v27 = vadd.f32 %v1323_v19, %v1302_v6  ;;  %v1345_v28 = vadd.f32 %v1344_v21, %v1303_v38 }
 0x1c9   : > { %v1325_v31 = vadd.f32 %v1324_v27, %v1304_v10  ;;  %v1346_v32 = vadd.f32 %v1345_v28, %v1305_v46 }
 0x1cb   : > { %v1326_v43 = vadd.f32 %v1325_v31, %v1306_v14  ;;  %v1347_v45 = vadd.f32 %v1346_v32, %v1307_v25 }
 0x1cd   : > { %v1327_v24 = vadd.f32 %v1326_v43, %v1308_v18  ;;  %v1348_v59 = vadd.f32 %v1347_v45, %v1309_v30 }
 0x1cf   : > { %v1328_v51 = vadd.f32 %v1327_v24, %v1310_v22  ;;  %v1349_v53 = vadd.f32 %v1348_v59, %v1311_v41 }
 0x1d1   : > { %v1329_v2 = vadd.f32 %v1328_v51, %v1312_v62  ;;  %v1350_v57 = vadd.f32 %v1349_v53, %v1313_v49 }
 0x1d3   : > { %v1330_v36 = vadd.f32 %v1329_v2, %v1314_v26  ;;  %v1351_v9 = vadd.f32 %v1350_v57, %v1315_v61 }
 0x1d5   : > { %v1331_v6 = vrot.slane %v1330_v36, 4  ;;  %v1352_v38 = vrot.slane %v1351_v9, 4 }
 0x1d7   : > { %v1332_v11 = vadd.f32 %v1331_v6, %v1330_v36  ;;  %v1353_v13 = vadd.f32 %v1352_v38, %v1351_v9 }
 0x1d9   : > { %v1333_v10 = vrot.slane %v1332_v11, 2  ;;  %v1354_v46 = vrot.slane %v1353_v13, 2 }
 0x1db   : > { %v1334_v19 = vadd.f32 %v1333_v10, %v1332_v11  ;;  %v1355_v21 = vadd.f32 %v1354_v46, %v1353_v13 }
 0x1dd   : > { %v1335_v14 = vrot.slane %v1334_v19, 1  ;;  %v1356_v25 = vrot.slane %v1355_v21, 1 }
 0x1df   : > { %v1336_v27 = vadd.f32 %v1335_v14, %v1334_v19  ;;  %v1357_v28 = vadd.f32 %v1356_v25, %v1355_v21 }
 0x1e1   : > { %v1358_v18 = vmul.f32 0.0078125, %v1336_v27  ;;  %v1359_v30 = vmul.f32 0.0078125, %v1357_v28 }
 0x1e3   : > { %v1360_v31 = vadd.f32 1e-05, %v1358_v18  ;;  %v1361_v32 = vadd.f32 1e-05, %v1359_v30 }
 0x1e5   : > { %1964 = vrsqrt.f32 %v1360_v31 }
 0x1e6   : > { %1966 = vrsqrt.f32 %v1361_v32 }
 0x1f2   : > { %v2513_v22 = vpop.eup %1964 }
 0x1f3   : > { %v2515_v41 = vpop.eup %1966  ;;  %v1364_v43 = vmul.f32 %v2513_v22, %v2323_v63  ;;  %v1366_v45 = vmul.f32 %v2513_v22, %v2331_v3  ;;  %v1368_v62 = vmul.f32 %v2513_v22, %v2339_v7  ;;  %v1370_v49 = vmul.f32 %v2513_v22, %v2347_v34 }
 0x1f4   : > { %v1365_v24 = vmul.f32 %v2515_v41, %v2327_v1  ;;  %v1367_v59 = vmul.f32 %v2515_v41, %v2335_v5  ;;  %v1369_v26 = vmul.f32 %v2515_v41, %v2343_v33  ;;  %v1371_v63 = vmul.f32 %v2515_v41, %v2351_v35 }
 0x1f5   : > { %vm1396_vm0 = vcmp.gt.f32.partialorder %v1364_v43, 0.0  ;;  %v1428_v3 = vmul.f32 0.2, %v1364_v43  ;;  %vm1398_vm1 = vcmp.gt.f32.partialorder %v1366_v45, 0.0  ;;  %v1430_v61 = vmul.f32 0.2, %v1366_v45 }
 0x1f6   : > { %vm1397_vm2 = vcmp.gt.f32.partialorder %v1365_v24, 0.0  ;;  %v1429_v7 = vmul.f32 0.2, %v1365_v24  ;;  %vm1399_vm3 = vcmp.gt.f32.partialorder %v1367_v59, 0.0  ;;  %v1431_v34 = vmul.f32 0.2, %v1367_v59 }
 0x1f7   : > { %v1460_v51 = vsel %vm1396_vm0, %v1364_v43, %v1428_v3  ;;  %v1462_v53 = vsel %vm1398_vm1, %v1366_v45, %v1430_v61  ;;  %vm1400_vm4 = vcmp.gt.f32.partialorder %v1368_v62, 0.0  ;;  %vm1401_vm5 = vcmp.gt.f32.partialorder %v1369_v26, 0.0 }
 0x1f8   : > { %v1461_v1 = vsel %vm1397_vm2, %v1365_v24, %v1429_v7  ;;  %v1463_v5 = vsel %vm1399_vm3, %v1367_v59, %v1431_v34  ;;  %v1432_v2 = vmul.f32 0.2, %v1368_v62  ;;  %v1433_v57 = vmul.f32 0.2, %v1369_v26 }
 0x1f9   : > { %v1779_v33 = vpack.c.bf16 %v1461_v1, %v1460_v51  ;;  %v1780_v36 = vpack.c.bf16 %v1463_v5, %v1462_v53  ;;  %vm1402_vm6 = vcmp.gt.f32.partialorder %v1370_v49, 0.0  ;;  %vm1403_vm7 = vcmp.gt.f32.partialorder %v1371_v63, 0.0 }
 0x1fa   : > { %v1464_v35 = vsel %vm1400_vm4, %v1368_v62, %v1432_v2  ;;  %v1465_v9 = vsel %vm1401_vm5, %v1369_v26, %v1433_v57  ;;  %v1434_v6 = vmul.f32 0.2, %v1370_v49  ;;  %v1435_v38 = vmul.f32 0.2, %v1371_v63 }
 0x1fb   : > { %1588 = vst [vmem:[%s2641_s2] sm:$0xff] %v1779_v33  ;;  %1589 = vst [vmem:[%s2641_s2 + $0x8] sm:$0xff] %v1780_v36  ;;  %v1781_v11 = vpack.c.bf16 %v1465_v9, %v1464_v35  ;;  %v1372_v13 = vmul.f32 %v2513_v22, %v2363_v40  ;;  %v1373_v10 = vmul.f32 %v2515_v41, %v2367_v42 }
 0x1fc   : > { %v1374_v46 = vmul.f32 %v2513_v22, %v2375_v15  ;;  %v1466_v19 = vsel %vm1402_vm6, %v1370_v49, %v1434_v6  ;;  %v1467_v21 = vsel %vm1403_vm7, %v1371_v63, %v1435_v38  ;;  %v1375_v14 = vmul.f32 %v2515_v41, %v2379_v17 }
 0x1fd   : > { %v1376_v25 = vmul.f32 %v2513_v22, %v2387_v23  ;;  %1590 = vst [vmem:[%s2641_s2 + $0x10] sm:$0xff] %v1781_v11  ;;  %v1782_v27 = vpack.c.bf16 %v1467_v21, %v1466_v19  ;;  %vm1404_vm8 = vcmp.gt.f32.partialorder %v1372_v13, 0.0  ;;  %vm1405_vm9 = vcmp.gt.f32.partialorder %v1373_v10, 0.0 }
 0x1fe   : > { %v1436_v40 = vmul.f32 0.2, %v1372_v13  ;;  %v1437_v42 = vmul.f32 0.2, %v1373_v10  ;;  %vm1406_vm10 = vcmp.gt.f32.partialorder %v1374_v46, 0.0  ;;  %vm1407_vm11 = vcmp.gt.f32.partialorder %v1375_v14, 0.0 }
 0x1ff   : > { %v1438_v15 = vmul.f32 0.2, %v1374_v46  ;;  %1591 = vst [vmem:[%s2641_s2 + $0x18] sm:$0xff] %v1782_v27  ;;  %v1439_v28 = vmul.f32 0.2, %v1375_v14  ;;  %v1377_v23 = vmul.f32 %v2515_v41, %v2391_v48  ;;  %vm1408_vm12 = vcmp.gt.f32.partialorder %v1376_v25, 0.0 }
 0x200   : > { %v1468_v17 = vsel %vm1404_vm8, %v1372_v13, %v1436_v40  ;;  %v1469_v18 = vsel %vm1405_vm9, %v1373_v10, %v1437_v42  ;;  %v1440_v31 = vmul.f32 0.2, %v1376_v25  ;;  %v1378_v32 = vmul.f32 %v2513_v22, %v2399_v29 }
 0x201   : > { %v1470_v30 = vsel %vm1406_vm10, %v1374_v46, %v1438_v15  ;;  %v1783_v43 = vpack.c.bf16 %v1469_v18, %v1468_v17  ;;  %v1471_v45 = vsel %vm1407_vm11, %v1375_v14, %v1439_v28  ;;  %vm1409_vm13 = vcmp.gt.f32.partialorder %v1377_v23, 0.0 }
 0x202   : > { %v1441_v62 = vmul.f32 0.2, %v1377_v23  ;;  %v1784_v49 = vpack.c.bf16 %v1471_v45, %v1470_v30  ;;  %v1472_v24 = vsel %vm1408_vm12, %v1376_v25, %v1440_v31  ;;  %v1379_v59 = vmul.f32 %v2515_v41, %v2403_v52 }
 0x203   : > { %vm1410_vm14 = vcmp.gt.f32.partialorder %v1378_v32, 0.0  ;;  %1592 = vst [vmem:[%s2641_s2 + $0x20] sm:$0xff] %v1783_v43  ;;  %v1442_v26 = vmul.f32 0.2, %v1378_v32  ;;  %v1380_v63 = vmul.f32 %v2513_v22, %v2411_v39  ;;  %v1381_v29 = vmul.f32 %v2515_v41, %v2415_v56 }
 0x204   : > { %v1473_v48 = vsel %vm1409_vm13, %v1377_v23, %v1441_v62  ;;  %1593 = vst [vmem:[%s2641_s2 + $0x28] sm:$0xff] %v1784_v49  ;;  %vm1411_vm15 = vcmp.gt.f32.partialorder %v1379_v59, 0.0  ;;  %v1443_v52 = vmul.f32 0.2, %v1379_v59  ;;  %v1382_v61 = vmul.f32 %v2513_v22, %v2423_v47 }
 0x205   : > { %v1785_v3 = vpack.c.bf16 %v1473_v48, %v1472_v24  ;;  %v1474_v7 = vsel %vm1410_vm14, %v1378_v32, %v1442_v26  ;;  %vm1412_vm0 = vcmp.gt.f32.partialorder %v1380_v63, 0.0  ;;  %vm1413_vm1 = vcmp.gt.f32.partialorder %v1381_v29, 0.0 }
 0x206   : > { %v1444_v34 = vmul.f32 0.2, %v1380_v63  ;;  %v1475_v39 = vsel %vm1411_vm15, %v1379_v59, %v1443_v52  ;;  %v1445_v56 = vmul.f32 0.2, %v1381_v29  ;;  %v1383_v51 = vmul.f32 %v2515_v41, %v2427_v60 }
 0x207   : > { %1594 = vst [vmem:[%s2641_s2 + $0x30] sm:$0xff] %v1785_v3  ;;  %vm1414_vm2 = vcmp.gt.f32.partialorder %v1382_v61, 0.0  ;;  %v1786_v53 = vpack.c.bf16 %v1475_v39, %v1474_v7  ;;  %v1446_v5 = vmul.f32 0.2, %v1382_v61  ;;  %v1384_v47 = vmul.f32 %v2513_v22, %v2435_v55 }
 0x208   : > { %v1476_v1 = vsel %vm1412_vm0, %v1380_v63, %v1444_v34  ;;  %v1477_v2 = vsel %vm1413_vm1, %v1381_v29, %v1445_v56  ;;  %vm1415_vm3 = vcmp.gt.f32.partialorder %v1383_v51, 0.0  ;;  %v1447_v57 = vmul.f32 0.2, %v1383_v51 }
 0x209   : > { %v1385_v33 = vmul.f32 %v2515_v41, %v2439_v0  ;;  %1595 = vst [vmem:[%s2641_s2 + $0x38] sm:$0xff] %v1786_v53  ;;  %v1787_v36 = vpack.c.bf16 %v1477_v2, %v1476_v1  ;;  %v1478_v35 = vsel %vm1414_vm2, %v1382_v61, %v1446_v5  ;;  %vm1416_vm4 = vcmp.gt.f32.partialorder %v1384_v47, 0.0 }
 0x20a   : > { %v1448_v60 = vmul.f32 0.2, %v1384_v47  ;;  %v1479_v9 = vsel %vm1415_vm3, %v1383_v51, %v1447_v57  ;;  %v1386_v55 = vmul.f32 %v2513_v22, %v2447_v37  ;;  %v1387_v11 = vmul.f32 %v2515_v41, %v2451_v4 }
 0x20b   : > { %vm1417_vm5 = vcmp.gt.f32.partialorder %v1385_v33, 0.0  ;;  %v1449_v6 = vmul.f32 0.2, %v1385_v33  ;;  %1596 = vst [vmem:[%s2641_s2 + $0x40] sm:$0xff] %v1787_v36  ;;  %v1788_v38 = vpack.c.bf16 %v1479_v9, %v1478_v35  ;;  %v1388_v13 = vmul.f32 %v2513_v22, %v2459_v44 }
 0x20c   : > { %v1480_v0 = vsel %vm1416_vm4, %v1384_v47, %v1448_v60  ;;  %vm1418_vm6 = vcmp.gt.f32.partialorder %v1386_v55, 0.0  ;;  %v1450_v46 = vmul.f32 0.2, %v1386_v55  ;;  %v1389_v19 = vmul.f32 %v2515_v41, %v2463_v8 }
 0x20d   : > { %v1481_v10 = vsel %vm1417_vm5, %v1385_v33, %v1449_v6  ;;  %1597 = vst [vmem:[%s2641_s2 + $0x48] sm:$0xff] %v1788_v38  ;;  %vm1419_vm7 = vcmp.gt.f32.partialorder %v1387_v11, 0.0  ;;  %v1451_v21 = vmul.f32 0.2, %v1387_v11  ;;  %vm1420_vm8 = vcmp.gt.f32.partialorder %v1388_v13, 0.0 }
 0x20e   : > { %v1789_v37 = vpack.c.bf16 %v1481_v10, %v1480_v0  ;;  %v1482_v14 = vsel %vm1418_vm6, %v1386_v55, %v1450_v46  ;;  %vm1421_vm9 = vcmp.gt.f32.partialorder %v1389_v19, 0.0  ;;  %v1452_v4 = vmul.f32 0.2, %v1388_v13 }
 0x20f   : > { %v1453_v25 = vmul.f32 0.2, %v1389_v19  ;;  %v1483_v44 = vsel %vm1419_vm7, %v1387_v11, %v1451_v21  ;;  %v1390_v8 = vmul.f32 %v2513_v22, %v2471_v50  ;;  %v1391_v27 = vmul.f32 %v2515_v41, %v2475_v12 }
 0x210   : > { %1598 = vst [vmem:[%s2641_s2 + $0x50] sm:$0xff] %v1789_v37  ;;  %v1392_v40 = vmul.f32 %v2513_v22, %v2483_v54  ;;  %v1790_v42 = vpack.c.bf16 %v1483_v44, %v1482_v14  ;;  %v1484_v15 = vsel %vm1420_vm8, %v1388_v13, %v1452_v4  ;;  %v1393_v28 = vmul.f32 %v2515_v41, %v2487_v16 }
 0x211   : > { %v1485_v17 = vsel %vm1421_vm9, %v1389_v19, %v1453_v25  ;;  %vm1422_vm10 = vcmp.gt.f32.partialorder %v1390_v8, 0.0  ;;  %vm1423_vm11 = vcmp.gt.f32.partialorder %v1391_v27, 0.0  ;;  %v1454_v18 = vmul.f32 0.2, %v1390_v8 }
 0x212   : > { %v1791_v23 = vpack.c.bf16 %v1485_v17, %v1484_v15  ;;  %1599 = vst [vmem:[%s2641_s2 + $0x58] sm:$0xff] %v1790_v42  ;;  %v1455_v50 = vmul.f32 0.2, %v1391_v27  ;;  %vm1424_vm12 = vcmp.gt.f32.partialorder %v1392_v40, 0.0  ;;  %vm1425_vm13 = vcmp.gt.f32.partialorder %v1393_v28, 0.0 }
 0x213   : > { %v1456_v12 = vmul.f32 0.2, %v1392_v40  ;;  %v1486_v54 = vsel %vm1422_vm10, %v1390_v8, %v1454_v18  ;;  %v1457_v30 = vmul.f32 0.2, %v1393_v28  ;;  %v1394_v16 = vmul.f32 %v2513_v22, %v2495_v58 }
 0x214   : > { %1600 = vst [vmem:[%s2641_s2 + $0x60] sm:$0xff] %v1791_v23  ;;  %v1395_v31 = vmul.f32 %v2515_v41, %v2499_v20  ;;  %v1487_v32 = vsel %vm1423_vm11, %v1391_v27, %v1455_v50 }
 0x215   : > { %v1488_v43 = vsel %vm1424_vm12, %v1392_v40, %v1456_v12  ;;  %v1792_v45 = vpack.c.bf16 %v1487_v32, %v1486_v54  ;;  %v1489_v62 = vsel %vm1425_vm13, %v1393_v28, %v1457_v30  ;;  %vm1426_vm14 = vcmp.gt.f32.partialorder %v1394_v16, 0.0 }
 0x216   : > { %vm1427_vm15 = vcmp.gt.f32.partialorder %v1395_v31, 0.0  ;;  %v1793_v49 = vpack.c.bf16 %v1489_v62, %v1488_v43  ;;  %v1458_v24 = vmul.f32 0.2, %v1394_v16  ;;  %v1459_v59 = vmul.f32 0.2, %v1395_v31 }
 0x217   : > { %1601 = vst [vmem:[%s2641_s2 + $0x68] sm:$0xff] %v1792_v45 }
 0x218   : > { %1602 = vst [vmem:[%s2641_s2 + $0x70] sm:$0xff] %v1793_v49  ;;  %v1490_v58 = vsel %vm1426_vm14, %v1394_v16, %v1458_v24  ;;  %v1491_v22 = vsel %vm1427_vm15, %v1395_v31, %v1459_v59 }
 0x219   : > { %v1794_v20 = vpack.c.bf16 %v1491_v22, %v1490_v58 }
 0x21b   : > { %1603 = vst [vmem:[%s2641_s2 + $0x78] sm:$0xff] %v1794_v20 }
 0x21c PF: > { %p9_p11 = scmp.ge.s32.totalorder %s2027_s13, 6   ;;  %s2642_s9 = smov %s1986_s10 }
 0x21d   : > { %s2643_s10 = smov %s2036_s16  ;;  %s2644_s11 = smov %s2027_s13 }
 0x21e   :  { %11 = sbr.rel (!%p9_p11) target bundleno = 2 (0x2), region = 93 }

// kernel: discriminator_forward.7
= control target key start
LH: loop header
LB: loop body
LE: loop exit
PB: predicated region body
PF: predicated region fallthrough
CT: control target
= control target key end

     0   :  { %s3596_s15 = smov 0   ;;  %s3598_s16 = smov 0   ;;  %s4190_s0 = inlined_call_operand.vmem [shape: bf16[32,4096], index: 0, kind: input, shape index: {}]   ;;  %s4191_s1 = inlined_call_operand.vmem [shape: bf16[4096,512], index: 1, kind: input, shape index: {}]   ;;  %s4192_s2 = inlined_call_operand.vmem [shape: f32[32,512], index: 2, kind: input, shape index: {}]   ;;  %s4193_s3 = inlined_call_operand.vmem [shape: f32[2,32], index: 3, kind: input, shape index: {}]   ;;  %s4194_s4 = inlined_call_operand.vmem [shape: f32[2,1], index: 4, kind: output, shape index: {}]  }
   0x1   :  { %s3600_s17 = smov 0  }
   0x2 LB: > { %s3612_s18 = sadd.s32 4294967295, %s3567_s17   ;;  %s3615_s19 = sadd.s32 1, %s3567_s17   ;;  %s3567_s17 = sphi %s3600_s17, %s4197_s17   ;;  %s3563_s16 = sphi %s3598_s16, %s4196_s16   ;;  %s3559_s15 = sphi %s3596_s15, %s4195_s15  }
   0x3   : > { %s18_s20 = ssub.s32 %s3567_s17, %s3615_s19  ;;  %s21_s21 = sadd.s32 1, %s3563_s16 }
   0x4   : > { %p19_p0 = scmp.eq.s32.totalorder %s18_s20, 0  ;;  %p28_p1 = scmp.ne.s32.totalorder %s3563_s16, %s3559_s15 }
   0x5   : > { %p29_p2 = scmp.eq.s32.totalorder %s3567_s17, 0  ;;  %p2833_p4 = scmp.ge.s32.totalorder %s3567_s17, 4 }
   0x6   : > { %s3624_s22 = scalar_select %p19_p0, %s3563_s16, %s21_s21  }
   0x7   : > { %p30_p3 = por %p29_p2, %p28_p1  ;;  %149 = sbr.rel (%p2833_p4) target bundleno = 24 (0x18), region = 24 }
   0xc   : > { %152 = sbr.rel (!%p30_p3) target bundleno = 24 (0x18), region = 28  ;;  %s154_s23 = sand.u32 (%p30_p3), 1, %s3563_s16  }
   0xd   : > { %s3121_s24 = sshll.u32 (%p30_p3), %s3567_s17, 5  ;;  %s2834_s25 = sshll.u32 (%p30_p3), %s154_s23, 7 }
   0xe   : > { %s3632_s28 = scalar_lea.vmem (%p30_p3), %s4190_s0, %s3121_s24  ;;  %s156_s29 = scalar_lea.vmem (%p30_p3), [#allocation3], %s2834_s25 }
   0xf   : > { %v172_v0 = vld [vmem:[%s3632_s28] sm:$0xff] (%p30_p3)  ;;  %v174_v1 = vld [vmem:[%s3632_s28 + $0x8] sm:$0xff] (%p30_p3)  ;;  %v176_v2 = vld [vmem:[%s3632_s28 + $0x10] sm:$0xff] (%p30_p3) }
  0x10   : > { %173 = vst [vmem:[%s156_s29] sm:$0xff] (%p30_p3), %v172_v0  ;;  %175 = vst [vmem:[%s156_s29 + $0x8] sm:$0xff] (%p30_p3), %v174_v1  ;;  %v178_v3 = vld [vmem:[%s3632_s28 + $0x18] sm:$0xff] (%p30_p3)  ;;  %v180_v4 = vld [vmem:[%s3632_s28 + $0x80] sm:$0xff] (%p30_p3) }
  0x11   : > { %177 = vst [vmem:[%s156_s29 + $0x10] sm:$0xff] %v176_v2  ;;  %v182_v5 = vld [vmem:[%s3632_s28 + $0x88] sm:$0xff]  ;;  %179 = vst [vmem:[%s156_s29 + $0x18] sm:$0xff] %v178_v3  ;;  %v184_v6 = vld [vmem:[%s3632_s28 + $0x90] sm:$0xff] }
  0x12   : > { %181 = vst [vmem:[%s156_s29 + $0x20] sm:$0xff] %v180_v4  ;;  %183 = vst [vmem:[%s156_s29 + $0x28] sm:$0xff] %v182_v5  ;;  %v186_v7 = vld [vmem:[%s3632_s28 + $0x98] sm:$0xff]  ;;  %v188_v8 = vld [vmem:[%s3632_s28 + $0x100] sm:$0xff] }
  0x13   : > { %185 = vst [vmem:[%s156_s29 + $0x30] sm:$0xff] %v184_v6  ;;  %187 = vst [vmem:[%s156_s29 + $0x38] sm:$0xff] %v186_v7  ;;  %v190_v9 = vld [vmem:[%s3632_s28 + $0x108] sm:$0xff]  ;;  %v192_v10 = vld [vmem:[%s3632_s28 + $0x110] sm:$0xff] }
  0x14   : > { %189 = vst [vmem:[%s156_s29 + $0x40] sm:$0xff] %v188_v8  ;;  %v194_v11 = vld [vmem:[%s3632_s28 + $0x118] sm:$0xff]  ;;  %191 = vst [vmem:[%s156_s29 + $0x48] sm:$0xff] %v190_v9  ;;  %v196_v12 = vld [vmem:[%s3632_s28 + $0x180] sm:$0xff] }
  0x15   : > { %193 = vst [vmem:[%s156_s29 + $0x50] sm:$0xff] %v192_v10  ;;  %195 = vst [vmem:[%s156_s29 + $0x58] sm:$0xff] %v194_v11  ;;  %v198_v13 = vld [vmem:[%s3632_s28 + $0x188] sm:$0xff]  ;;  %v200_v14 = vld [vmem:[%s3632_s28 + $0x190] sm:$0xff] }
  0x16   : > { %197 = vst [vmem:[%s156_s29 + $0x60] sm:$0xff] %v196_v12  ;;  %199 = vst [vmem:[%s156_s29 + $0x68] sm:$0xff] %v198_v13  ;;  %v202_v15 = vld [vmem:[%s3632_s28 + $0x198] sm:$0xff] }
  0x17   : > { %201 = vst [vmem:[%s156_s29 + $0x70] sm:$0xff] %v200_v14  ;;  %203 = vst [vmem:[%s156_s29 + $0x78] sm:$0xff] %v202_v15 }
  0x18 PF: > { %p2837_p5 = scmp.ge.s32.totalorder %s3567_s17, 1  ;;  %p218_p6 = scmp.lt.s32.totalorder %s3567_s17, 5 }
  0x1a   : > { %p219_p7 = pnand %p2837_p5, %p218_p6 }
  0x1b   : > { %s225_s30 = sand.u32 (!%p219_p7), 1, %s3559_s15   ;;  %s2839_s5 = sshll.u32 (!%p219_p7), %s3612_s18, 7 }
  0x1c   : > { %222 = sbr.rel (%p219_p7) target bundleno = 975 (0x3cf), region = 55  ;;  %s2838_s6 = sshll.u32 (!%p219_p7), %s225_s30, 7 }
  0x1d   : > { %p253_p8 = scmp.lt.s32.totalorder (!%p219_p7), %s2839_s5, 511  ;;  %s3659_s11 = scalar_lea.vmem (!%p219_p7), [#allocation3], %s2838_s6 }
  0x1e   : > { %p2842_p9 = scmp.ne.s32.totalorder (!%p219_p7), %s3612_s18, 0 }
  0x21   : > { %s4199_s5 = smov (!%p253_p8, %s2839_s5), 511  ;;  %262 = sbr.rel (%p2842_p9) target bundleno = 47 (0x2f), region = 63 }
  0x22   : > { %s3122_s7 = sshll.u32 %s4199_s5, 4 }
  0x23   : > { %s3657_s10 = scalar_lea.vmem %s4191_s1, %s3122_s7 }
  0x26   : > { %v3569_v16 = vmov 0.0  }
  0x27   : > { %263 = vst [vmem:[#allocation2 + $0x30] sm:$0xff] %v3569_v16  ;;  %264 = vst [vmem:[#allocation2] sm:$0xff] %v3569_v16 }
  0x28   : > { %265 = vst [vmem:[#allocation2 + $0x58] sm:$0xff] %v3569_v16  ;;  %266 = vst [vmem:[#allocation2 + $0x18] sm:$0xff] %v3569_v16 }
  0x29   : > { %267 = vst [vmem:[#allocation2 + $0x50] sm:$0xff] %v3569_v16  ;;  %268 = vst [vmem:[#allocation2 + $0x68] sm:$0xff] %v3569_v16 }
  0x2a   : > { %269 = vst [vmem:[#allocation2 + $0x8] sm:$0xff] %v3569_v16  ;;  %270 = vst [vmem:[#allocation2 + $0x48] sm:$0xff] %v3569_v16 }
  0x2b   : > { %271 = vst [vmem:[#allocation2 + $0x40] sm:$0xff] %v3569_v16  ;;  %272 = vst [vmem:[#allocation2 + $0x20] sm:$0xff] %v3569_v16 }
  0x2c   : > { %273 = vst [vmem:[#allocation2 + $0x10] sm:$0xff] %v3569_v16  ;;  %274 = vst [vmem:[#allocation2 + $0x38] sm:$0xff] %v3569_v16 }
  0x2d   : > { %275 = vst [vmem:[#allocation2 + $0x60] sm:$0xff] %v3569_v16  ;;  %276 = vst [vmem:[#allocation2 + $0x70] sm:$0xff] %v3569_v16 }
  0x2e   : > { %277 = vst [vmem:[#allocation2 + $0x78] sm:$0xff] %v3569_v16  ;;  %278 = vst [vmem:[#allocation2 + $0x28] sm:$0xff] %v3569_v16 }
  0x2f PF: > { %v3149_v17 = vld [vmem:[%s3657_s10 + $0xe4] ss:$16 sps:$4 sm:$0xff]   ;;  %v3153_v19 = vld [vmem:[%s3657_s10 + $0xe0] ss:$16 sps:$4 sm:$0xff]   ;;  %v296_v3 = vld [vmem:[%s3659_s11 + $0x8] sm:$0xff]  ;;  %p3115_p10 = scmp.ne.s32.totalorder %s3612_s18, 3 }
  0x30   : > { %v3151_v18 = vld [vmem:[%s3657_s10 + $0x2e4] ss:$16 sps:$4 sm:$0xff]   ;;  %1927 = vmatprep.subr.bf16.mxu0 %v3149_v17  ;;  %v3154_v20 = vld [vmem:[%s3657_s10 + $0x2e0] ss:$16 sps:$4 sm:$0xff]   ;;  %v300_v4 = vld [vmem:[%s3659_s11 + $0x28] sm:$0xff] }
  0x31   : > { %1980 = vmatprep.subr.bf16.mxu1 %v3151_v18  ;;  %v3155_v21 = vld [vmem:[%s3657_s10 + $0xc4] ss:$16 sps:$4 sm:$0xff]   ;;  %1928 = vmatpush1.bf16.msra.mxu0 %v3153_v19  ;;  %v3159_v23 = vld [vmem:[%s3657_s10 + $0xc0] ss:$16 sps:$4 sm:$0xff]   ;;  %v3718_v8 = vcombine.high %v296_v3, %v300_v4 }
  0x32   : > { %1981 = vmatpush1.bf16.msra.mxu1 %v3154_v20  ;;  %v3157_v22 = vld [vmem:[%s3657_s10 + $0x2c4] ss:$16 sps:$4 sm:$0xff]   ;;  %1929 = vmatprep.subr.bf16.mxu0 %v3155_v21  ;;  %v3160_v24 = vld [vmem:[%s3657_s10 + $0x2c0] ss:$16 sps:$4 sm:$0xff]  }
  0x33   : > { %1982 = vmatprep.subr.bf16.mxu1 %v3157_v22  ;;  %v3161_v25 = vld [vmem:[%s3657_s10 + $0xa4] ss:$16 sps:$4 sm:$0xff]   ;;  %v3165_v27 = vld [vmem:[%s3657_s10 + $0xa0] ss:$16 sps:$4 sm:$0xff]   ;;  %2012 = vmatprep.mubr.bf16.mxu1 %v3718_v8 }
  0x34   : > { %v3163_v26 = vld [vmem:[%s3657_s10 + $0x2a4] ss:$16 sps:$4 sm:$0xff]   ;;  %v3166_v28 = vld [vmem:[%s3657_s10 + $0x2a0] ss:$16 sps:$4 sm:$0xff]  }
  0x35   : > { %1930 = vmatpush1.bf16.msra.mxu0 %v3159_v23  ;;  %v3167_v29 = vld [vmem:[%s3657_s10 + $0x84] ss:$16 sps:$4 sm:$0xff]   ;;  %v3171_v31 = vld [vmem:[%s3657_s10 + $0x80] ss:$16 sps:$4 sm:$0xff]  }
  0x36   : > { %1983 = vmatpush1.bf16.msra.mxu1 %v3160_v24  ;;  %1931 = vmatprep.subr.bf16.mxu0 %v3161_v25  ;;  %v3169_v30 = vld [vmem:[%s3657_s10 + $0x284] ss:$16 sps:$4 sm:$0xff]   ;;  %v3172_v32 = vld [vmem:[%s3657_s10 + $0x280] ss:$16 sps:$4 sm:$0xff]  }
  0x37   : > { %1984 = vmatprep.subr.bf16.mxu1 %v3163_v26  ;;  %v3173_v33 = vld [vmem:[%s3657_s10 + $0x64] ss:$16 sps:$4 sm:$0xff]   ;;  %v3177_v35 = vld [vmem:[%s3657_s10 + $0x60] ss:$16 sps:$4 sm:$0xff]   ;;  %v3740_v26 = vcombine.low %v296_v3, %v300_v4  ;;  %v3802_v3 = vld [vmem:[%s3659_s11 + $0x38] sm:$0xff] }
  0x38   : > { %v3175_v34 = vld [vmem:[%s3657_s10 + $0x264] ss:$16 sps:$4 sm:$0xff]   ;;  %v3178_v36 = vld [vmem:[%s3657_s10 + $0x260] ss:$16 sps:$4 sm:$0xff]  }
  0x39   : > { %1932 = vmatpush1.bf16.msra.mxu0 %v3165_v27  ;;  %v3179_v37 = vld [vmem:[%s3657_s10 + $0x44] ss:$16 sps:$4 sm:$0xff]   ;;  %v3183_v39 = vld [vmem:[%s3657_s10 + $0x40] ss:$16 sps:$4 sm:$0xff]  }
  0x3a   : > { %1985 = vmatpush1.bf16.msra.mxu1 %v3166_v28  ;;  %1933 = vmatprep.subr.bf16.mxu0 %v3167_v29  ;;  %v3181_v38 = vld [vmem:[%s3657_s10 + $0x244] ss:$16 sps:$4 sm:$0xff]   ;;  %v3184_v40 = vld [vmem:[%s3657_s10 + $0x240] ss:$16 sps:$4 sm:$0xff]  }
  0x3b   : > { %1986 = vmatprep.subr.bf16.mxu1 %v3169_v30  ;;  %v3185_v41 = vld [vmem:[%s3657_s10 + $0x24] ss:$16 sps:$4 sm:$0xff]   ;;  %v3189_v43 = vld [vmem:[%s3657_s10 + $0x20] ss:$16 sps:$4 sm:$0xff]  }
  0x3c   : > { %v3187_v42 = vld [vmem:[%s3657_s10 + $0x224] ss:$16 sps:$4 sm:$0xff]   ;;  %v3190_v44 = vld [vmem:[%s3657_s10 + $0x220] ss:$16 sps:$4 sm:$0xff]  }
  0x3d   : > { %1934 = vmatpush1.bf16.msra.mxu0 %v3171_v31  ;;  %v3191_v45 = vld [vmem:[%s3657_s10 + $0x4] ss:$16 sps:$4 sm:$0xff]   ;;  %v3195_v47 = vld [vmem:[%s3657_s10] ss:$16 sps:$4 sm:$0xff]  }
  0x3e   : > { %1987 = vmatpush1.bf16.msra.mxu1 %v3172_v32  ;;  %1935 = vmatprep.subr.bf16.mxu0 %v3173_v33  ;;  %v3193_v46 = vld [vmem:[%s3657_s10 + $0x204] ss:$16 sps:$4 sm:$0xff]   ;;  %v3196_v48 = vld [vmem:[%s3657_s10 + $0x200] ss:$16 sps:$4 sm:$0xff]  }
  0x3f   : > { %1988 = vmatprep.subr.bf16.mxu1 %v3175_v34  ;;  %v3197_v49 = vld [vmem:[%s3657_s10 + $0x1e4] ss:$16 sps:$4 sm:$0xff]   ;;  %v3201_v51 = vld [vmem:[%s3657_s10 + $0x1e0] ss:$16 sps:$4 sm:$0xff]  }
  0x40   : > { %v3199_v50 = vld [vmem:[%s3657_s10 + $0x3e4] ss:$16 sps:$4 sm:$0xff]   ;;  %v3202_v52 = vld [vmem:[%s3657_s10 + $0x3e0] ss:$16 sps:$4 sm:$0xff]  }
  0x41   : > { %1936 = vmatpush1.bf16.msra.mxu0 %v3177_v35  ;;  %v3203_v53 = vld [vmem:[%s3657_s10 + $0x1c4] ss:$16 sps:$4 sm:$0xff]   ;;  %v3207_v55 = vld [vmem:[%s3657_s10 + $0x1c0] ss:$16 sps:$4 sm:$0xff]  }
  0x42   : > { %1989 = vmatpush1.bf16.msra.mxu1 %v3178_v36  ;;  %1937 = vmatprep.subr.bf16.mxu0 %v3179_v37  ;;  %v3205_v54 = vld [vmem:[%s3657_s10 + $0x3c4] ss:$16 sps:$4 sm:$0xff]   ;;  %v3208_v56 = vld [vmem:[%s3657_s10 + $0x3c0] ss:$16 sps:$4 sm:$0xff]  }
  0x43   : > { %1990 = vmatprep.subr.bf16.mxu1 %v3181_v38  ;;  %v3209_v57 = vld [vmem:[%s3657_s10 + $0x1a4] ss:$16 sps:$4 sm:$0xff]   ;;  %v3213_v59 = vld [vmem:[%s3657_s10 + $0x1a0] ss:$16 sps:$4 sm:$0xff]  }
  0x44   : > { %v3211_v58 = vld [vmem:[%s3657_s10 + $0x3a4] ss:$16 sps:$4 sm:$0xff]   ;;  %v3214_v60 = vld [vmem:[%s3657_s10 + $0x3a0] ss:$16 sps:$4 sm:$0xff]  }
  0x45   : > { %1938 = vmatpush1.bf16.msra.mxu0 %v3183_v39  ;;  %v3215_v61 = vld [vmem:[%s3657_s10 + $0x184] ss:$16 sps:$4 sm:$0xff]   ;;  %v3219_v63 = vld [vmem:[%s3657_s10 + $0x180] ss:$16 sps:$4 sm:$0xff]  }
  0x46   : > { %1991 = vmatpush1.bf16.msra.mxu1 %v3184_v40  ;;  %1939 = vmatprep.subr.bf16.mxu0 %v3185_v41  ;;  %v3217_v62 = vld [vmem:[%s3657_s10 + $0x384] ss:$16 sps:$4 sm:$0xff]   ;;  %v3220_v0 = vld [vmem:[%s3657_s10 + $0x380] ss:$16 sps:$4 sm:$0xff]  }
  0x47   : > { %1992 = vmatprep.subr.bf16.mxu1 %v3187_v42  ;;  %v295_v1 = vld [vmem:[%s3659_s11] sm:$0xff] }
  0x48   : > { %v299_v2 = vld [vmem:[%s3659_s11 + $0x20] sm:$0xff] }
  0x49   : > { %1940 = vmatpush1.bf16.msra.mxu0 %v3189_v43  ;;  %v3221_v5 = vld [vmem:[%s3657_s10 + $0x164] ss:$16 sps:$4 sm:$0xff]   ;;  %v3715_v6 = vcombine.high %v295_v1, %v299_v2  ;;  %v3225_v9 = vld [vmem:[%s3657_s10 + $0x160] ss:$16 sps:$4 sm:$0xff]   ;;  %v3738_v25 = vcombine.low %v295_v1, %v299_v2  ;;  %v3795_v1 = vld [vmem:[%s3659_s11 + $0x18] sm:$0xff] }
  0x4a   : > { %1993 = vmatpush1.bf16.msra.mxu1 %v3190_v44  ;;  %1941 = vmatprep.subr.bf16.mxu0 %v3191_v45  ;;  %v3223_v7 = vld [vmem:[%s3657_s10 + $0x364] ss:$16 sps:$4 sm:$0xff]   ;;  %v3226_v10 = vld [vmem:[%s3657_s10 + $0x360] ss:$16 sps:$4 sm:$0xff]   ;;  %v3806_v4 = vcombine.high %v3795_v1, %v3802_v3 }
  0x4b   : > { %1994 = vmatprep.subr.bf16.mxu1 %v3193_v46  ;;  %1959 = vmatprep.mubr.bf16.mxu0 %v3715_v6  ;;  %v3227_v11 = vld [vmem:[%s3657_s10 + $0x144] ss:$16 sps:$4 sm:$0xff]   ;;  %v3231_v13 = vld [vmem:[%s3657_s10 + $0x140] ss:$16 sps:$4 sm:$0xff]  }
  0x4c   : > { %v3229_v12 = vld [vmem:[%s3657_s10 + $0x344] ss:$16 sps:$4 sm:$0xff]   ;;  %v3232_v14 = vld [vmem:[%s3657_s10 + $0x340] ss:$16 sps:$4 sm:$0xff]  }
  0x4d   : > { %1942 = vmatpush1.bf16.msra.mxu0 %v3195_v47  ;;  %v3233_v15 = vld [vmem:[%s3657_s10 + $0x124] ss:$16 sps:$4 sm:$0xff]   ;;  %v3237_v17 = vld [vmem:[%s3657_s10 + $0x120] ss:$16 sps:$4 sm:$0xff]   ;;  %v304_v47 = vld [vmem:[%s3659_s11 + $0x48] sm:$0xff] }
  0x4e   : > { %1995 = vmatpush1.bf16.msra.mxu1 %v3196_v48  ;;  %1943 = vmatprep.subr.bf16.mxu0 %v3197_v49  ;;  %v3235_v16 = vld [vmem:[%s3657_s10 + $0x324] ss:$16 sps:$4 sm:$0xff]   ;;  %v3238_v18 = vld [vmem:[%s3657_s10 + $0x320] ss:$16 sps:$4 sm:$0xff]   ;;  %v308_v48 = vld [vmem:[%s3659_s11 + $0x68] sm:$0xff] }
  0x4f   : > { %1996 = vmatprep.subr.bf16.mxu1 %v3199_v50  ;;  %v3239_v19 = vld [vmem:[%s3657_s10 + $0x104] ss:$16 sps:$4 sm:$0xff]   ;;  %v3243_v21 = vld [vmem:[%s3657_s10 + $0x100] ss:$16 sps:$4 sm:$0xff]  }
  0x50   : > { %v3241_v20 = vld [vmem:[%s3657_s10 + $0x304] ss:$16 sps:$4 sm:$0xff]   ;;  %v3244_v22 = vld [vmem:[%s3657_s10 + $0x300] ss:$16 sps:$4 sm:$0xff]  }
  0x51   : > { %1944 = vmatpush2.bf16.msra.mxu0 %v3201_v51  ;;  %v3247_v23 = vld [vmem:[%s3657_s10 + $0x4e4] ss:$16 sps:$4 sm:$0xff]   ;;  %v3245_v27 = vld [vmem:[%s3657_s10 + $0x4e0] ss:$16 sps:$4 sm:$0xff]   ;;  %v3769_v51 = vcombine.high %v304_v47, %v308_v48 }
  0x52   : > { %1997 = vmatpush2.bf16.msra.mxu1 %v3202_v52  ;;  %1945 = vmatprep.subr.bf16.mxu0 %v3203_v53  ;;  %v3250_v24 = vld [vmem:[%s3657_s10 + $0x6e4] ss:$16 sps:$4 sm:$0xff]   ;;  %v3248_v28 = vld [vmem:[%s3657_s10 + $0x6e0] ss:$16 sps:$4 sm:$0xff]  }
  0x53   : > { %1998 = vmatprep.subr.bf16.mxu1 %v3205_v54  ;;  %v3253_v29 = vld [vmem:[%s3657_s10 + $0x4c4] ss:$16 sps:$4 sm:$0xff]   ;;  %v3251_v31 = vld [vmem:[%s3657_s10 + $0x4c0] ss:$16 sps:$4 sm:$0xff]   ;;  %v3774_v54 = vcombine.low %v304_v47, %v308_v48 }
  0x54   : > { %v3256_v30 = vld [vmem:[%s3657_s10 + $0x6c4] ss:$16 sps:$4 sm:$0xff]   ;;  %v3254_v32 = vld [vmem:[%s3657_s10 + $0x6c0] ss:$16 sps:$4 sm:$0xff]  }
  0x55   : > { %1946 = vmatpush2.bf16.msra.mxu0 %v3207_v55  ;;  %v3259_v33 = vld [vmem:[%s3657_s10 + $0x4a4] ss:$16 sps:$4 sm:$0xff]   ;;  %v3257_v35 = vld [vmem:[%s3657_s10 + $0x4a0] ss:$16 sps:$4 sm:$0xff]  }
  0x56   : > { %1999 = vmatpush2.bf16.msra.mxu1 %v3208_v56  ;;  %1947 = vmatprep.subr.bf16.mxu0 %v3209_v57  ;;  %v3262_v34 = vld [vmem:[%s3657_s10 + $0x6a4] ss:$16 sps:$4 sm:$0xff]   ;;  %v3260_v36 = vld [vmem:[%s3657_s10 + $0x6a0] ss:$16 sps:$4 sm:$0xff]  }
  0x57   : > { %2000 = vmatprep.subr.bf16.mxu1 %v3211_v58  ;;  %v3265_v37 = vld [vmem:[%s3657_s10 + $0x484] ss:$16 sps:$4 sm:$0xff]   ;;  %v3263_v39 = vld [vmem:[%s3657_s10 + $0x480] ss:$16 sps:$4 sm:$0xff]  }
  0x58   : > { %v3268_v38 = vld [vmem:[%s3657_s10 + $0x684] ss:$16 sps:$4 sm:$0xff]   ;;  %v3266_v40 = vld [vmem:[%s3657_s10 + $0x680] ss:$16 sps:$4 sm:$0xff]  }
  0x59   : > { %1948 = vmatpush2.bf16.msra.mxu0 %v3213_v59  ;;  %v3271_v41 = vld [vmem:[%s3657_s10 + $0x464] ss:$16 sps:$4 sm:$0xff]   ;;  %v3269_v43 = vld [vmem:[%s3657_s10 + $0x460] ss:$16 sps:$4 sm:$0xff]  }
  0x5a   : > { %2001 = vmatpush2.bf16.msra.mxu1 %v3214_v60  ;;  %1949 = vmatprep.subr.bf16.mxu0 %v3215_v61  ;;  %v3274_v42 = vld [vmem:[%s3657_s10 + $0x664] ss:$16 sps:$4 sm:$0xff]   ;;  %v3272_v44 = vld [vmem:[%s3657_s10 + $0x660] ss:$16 sps:$4 sm:$0xff]  }
  0x5b   : > { %2002 = vmatprep.subr.bf16.mxu1 %v3217_v62  ;;  %v303_v45 = vld [vmem:[%s3659_s11 + $0x40] sm:$0xff]  ;;  %v305_v47 = vld [vmem:[%s3659_s11 + $0x50] sm:$0xff] }
  0x5c   : > { %v307_v46 = vld [vmem:[%s3659_s11 + $0x60] sm:$0xff]  ;;  %v309_v48 = vld [vmem:[%s3659_s11 + $0x70] sm:$0xff] }
  0x5d   : > { %1950 = vmatpush2.bf16.msra.mxu0 %v3219_v63  ;;  %v3277_v49 = vld [vmem:[%s3657_s10 + $0x444] ss:$16 sps:$4 sm:$0xff]   ;;  %v3767_v50 = vcombine.high %v303_v45, %v307_v46  ;;  %v3771_v52 = vcombine.low %v303_v45, %v307_v46  ;;  %v3275_v55 = vld [vmem:[%s3657_s10 + $0x440] ss:$16 sps:$4 sm:$0xff]   ;;  %v3341_v45 = vld [vmem:[%s3657_s10 + $0xe8] ss:$16 sps:$4 sm:$0xff]  }
  0x5e   : > { %2003 = vmatpush2.bf16.msra.mxu1 %v3220_v0  ;;  %1951 = vmatprep.subr.bf16.mxu0 %v3221_v5  ;;  %v3280_v53 = vld [vmem:[%s3657_s10 + $0x644] ss:$16 sps:$4 sm:$0xff]   ;;  %v3278_v56 = vld [vmem:[%s3657_s10 + $0x640] ss:$16 sps:$4 sm:$0xff]   ;;  %v3344_v46 = vld [vmem:[%s3657_s10 + $0x2e8] ss:$16 sps:$4 sm:$0xff]  }
  0x5f   : > { %2004 = vmatprep.subr.bf16.mxu1 %v3223_v7  ;;  %v3283_v57 = vld [vmem:[%s3657_s10 + $0x424] ss:$16 sps:$4 sm:$0xff]   ;;  %v3281_v59 = vld [vmem:[%s3657_s10 + $0x420] ss:$16 sps:$4 sm:$0xff]  }
  0x60   : > { %v3286_v58 = vld [vmem:[%s3657_s10 + $0x624] ss:$16 sps:$4 sm:$0xff]   ;;  %v3284_v60 = vld [vmem:[%s3657_s10 + $0x620] ss:$16 sps:$4 sm:$0xff]  }
  0x61   : > { %1952 = vmatpush2.bf16.msra.mxu0 %v3225_v9  ;;  %v3289_v61 = vld [vmem:[%s3657_s10 + $0x404] ss:$16 sps:$4 sm:$0xff]   ;;  %v3287_v5 = vld [vmem:[%s3657_s10 + $0x400] ss:$16 sps:$4 sm:$0xff]  }
  0x62   : > { %2005 = vmatpush2.bf16.msra.mxu1 %v3226_v10  ;;  %1953 = vmatprep.subr.bf16.mxu0 %v3227_v11  ;;  %v3292_v62 = vld [vmem:[%s3657_s10 + $0x604] ss:$16 sps:$4 sm:$0xff]   ;;  %v3290_v7 = vld [vmem:[%s3657_s10 + $0x600] ss:$16 sps:$4 sm:$0xff]  }
  0x63   : > { %2006 = vmatprep.subr.bf16.mxu1 %v3229_v12  ;;  %v3789_v63 = vld [vmem:[%s3659_s11 + $0x10] sm:$0xff] }
  0x64   : > { %v3792_v0 = vld [vmem:[%s3659_s11 + $0x30] sm:$0xff] }
  0x65   : > { %1954 = vmatpush2.bf16.msra.mxu0 %v3231_v13  ;;  %v3799_v2 = vcombine.high %v3789_v63, %v3792_v0  ;;  %v3295_v9 = vld [vmem:[%s3657_s10 + $0x5e4] ss:$16 sps:$4 sm:$0xff]   ;;  %v3293_v11 = vld [vmem:[%s3657_s10 + $0x5e0] ss:$16 sps:$4 sm:$0xff]  }
  0x66   : > { %2007 = vmatpush2.bf16.msra.mxu1 %v3232_v14  ;;  %1955 = vmatprep.subr.bf16.mxu0 %v3233_v15  ;;  %v3298_v10 = vld [vmem:[%s3657_s10 + $0x7e4] ss:$16 sps:$4 sm:$0xff]   ;;  %v3296_v12 = vld [vmem:[%s3657_s10 + $0x7e0] ss:$16 sps:$4 sm:$0xff]  }
  0x67   : > { %2008 = vmatprep.subr.bf16.mxu1 %v3235_v16  ;;  %v3301_v13 = vld [vmem:[%s3657_s10 + $0x5c4] ss:$16 sps:$4 sm:$0xff]   ;;  %v3299_v15 = vld [vmem:[%s3657_s10 + $0x5c0] ss:$16 sps:$4 sm:$0xff]  }
  0x68   : > { %v3304_v14 = vld [vmem:[%s3657_s10 + $0x7c4] ss:$16 sps:$4 sm:$0xff]   ;;  %v3302_v16 = vld [vmem:[%s3657_s10 + $0x7c0] ss:$16 sps:$4 sm:$0xff]  }
  0x69   : > { %1956 = vmatpush2.bf16.msra.mxu0 %v3237_v17  ;;  %v3307_v17 = vld [vmem:[%s3657_s10 + $0x5a4] ss:$16 sps:$4 sm:$0xff]  }
  0x6a   : > { %2009 = vmatpush2.bf16.msra.mxu1 %v3238_v18  ;;  %1957 = vmatprep.subr.bf16.mxu0 %v3239_v19  ;;  %v3310_v18 = vld [vmem:[%s3657_s10 + $0x7a4] ss:$16 sps:$4 sm:$0xff]   ;;  %v3305_v19 = vld [vmem:[%s3657_s10 + $0x5a0] ss:$16 sps:$4 sm:$0xff]  }
  0x6b   : > { %2010 = vmatprep.subr.bf16.mxu1 %v3241_v20  ;;  %v3308_v20 = vld [vmem:[%s3657_s10 + $0x7a0] ss:$16 sps:$4 sm:$0xff]  }
  0x6d   : > { %1958 = vmatpush2.bf16.msra.mxu0 %v3243_v21  ;;  %v3313_v21 = vld [vmem:[%s3657_s10 + $0x584] ss:$16 sps:$4 sm:$0xff]  }
  0x6e   : > { %2011 = vmatpush2.bf16.msra.mxu1 %v3244_v22  ;;  %2033 = vmatprep.subr.bf16.mxu0 %v3247_v23  ;;  %v3316_v22 = vld [vmem:[%s3657_s10 + $0x784] ss:$16 sps:$4 sm:$0xff]   ;;  %v3311_v23 = vld [vmem:[%s3657_s10 + $0x580] ss:$16 sps:$4 sm:$0xff]  }
  0x6f   : > { %2086 = vmatprep.subr.bf16.mxu1 %v3250_v24  ;;  %v3314_v24 = vld [vmem:[%s3657_s10 + $0x780] ss:$16 sps:$4 sm:$0xff]  }
  0x70   : > { %1960 = vmatmul.mubr.bf16.vlgmr.msra.gmra.mxu0 %v3738_v25 }
  0x71   : > { %2013 = vmatmul.mubr.bf16.vlgmr.msra.gmra.mxu1 %v3740_v26  ;;  %2034 = vmatpush1.bf16.msra.mxu0 %v3245_v27  ;;  %v3319_v27 = vld [vmem:[%s3657_s10 + $0x564] ss:$16 sps:$4 sm:$0xff]  }
  0x72   : > { %2087 = vmatpush1.bf16.msra.mxu1 %v3248_v28  ;;  %2035 = vmatprep.subr.bf16.mxu0 %v3253_v29  ;;  %v3322_v28 = vld [vmem:[%s3657_s10 + $0x764] ss:$16 sps:$4 sm:$0xff]   ;;  %v3317_v29 = vld [vmem:[%s3657_s10 + $0x560] ss:$16 sps:$4 sm:$0xff]  }
  0x73   : > { %2088 = vmatprep.subr.bf16.mxu1 %v3256_v30  ;;  %1969 = vmatprep.mubr.bf16.mxu0 %v3767_v50  ;;  %v3320_v30 = vld [vmem:[%s3657_s10 + $0x760] ss:$16 sps:$4 sm:$0xff]  }
  0x74   : > { %2022 = vmatprep.mubr.bf16.mxu1 %v3769_v51 }
  0x75   : > { %2036 = vmatpush1.bf16.msra.mxu0 %v3251_v31  ;;  %v3325_v31 = vld [vmem:[%s3657_s10 + $0x544] ss:$16 sps:$4 sm:$0xff]  }
  0x76   : > { %2089 = vmatpush1.bf16.msra.mxu1 %v3254_v32  ;;  %2037 = vmatprep.subr.bf16.mxu0 %v3259_v33  ;;  %v3328_v32 = vld [vmem:[%s3657_s10 + $0x744] ss:$16 sps:$4 sm:$0xff]   ;;  %v3323_v33 = vld [vmem:[%s3657_s10 + $0x540] ss:$16 sps:$4 sm:$0xff]  }
  0x77   : > { %2090 = vmatprep.subr.bf16.mxu1 %v3262_v34  ;;  %v3326_v34 = vld [vmem:[%s3657_s10 + $0x740] ss:$16 sps:$4 sm:$0xff]  }
  0x78   : > { %1970 = vmatmul.mubr.bf16.gmra.mxu0 %v3771_v52 }
  0x79   : > { %2038 = vmatpush1.bf16.msra.mxu0 %v3257_v35  ;;  %2023 = vmatmul.mubr.bf16.gmra.mxu1 %v3774_v54  ;;  %v3331_v35 = vld [vmem:[%s3657_s10 + $0x524] ss:$16 sps:$4 sm:$0xff]  }
  0x7a   : > { %2091 = vmatpush1.bf16.msra.mxu1 %v3260_v36  ;;  %2039 = vmatprep.subr.bf16.mxu0 %v3265_v37  ;;  %v3334_v36 = vld [vmem:[%s3657_s10 + $0x724] ss:$16 sps:$4 sm:$0xff]   ;;  %v3329_v37 = vld [vmem:[%s3657_s10 + $0x520] ss:$16 sps:$4 sm:$0xff]  }
  0x7b   : > { %2092 = vmatprep.subr.bf16.mxu1 %v3268_v38  ;;  %2065 = vmatprep.mubr.bf16.mxu0 %v3799_v2  ;;  %v3332_v38 = vld [vmem:[%s3657_s10 + $0x720] ss:$16 sps:$4 sm:$0xff]  }
  0x7c   : > { %2118 = vmatprep.mubr.bf16.mxu1 %v3806_v4 }
  0x7d   : > { %2040 = vmatpush1.bf16.msra.mxu0 %v3263_v39  ;;  %v3337_v39 = vld [vmem:[%s3657_s10 + $0x504] ss:$16 sps:$4 sm:$0xff]  }
  0x7e   : > { %2093 = vmatpush1.bf16.msra.mxu1 %v3266_v40  ;;  %2041 = vmatprep.subr.bf16.mxu0 %v3271_v41  ;;  %v3340_v40 = vld [vmem:[%s3657_s10 + $0x704] ss:$16 sps:$4 sm:$0xff]   ;;  %v3335_v41 = vld [vmem:[%s3657_s10 + $0x500] ss:$16 sps:$4 sm:$0xff]  }
  0x7f   : > { %2094 = vmatprep.subr.bf16.mxu1 %v3274_v42  ;;  %v3338_v42 = vld [vmem:[%s3657_s10 + $0x700] ss:$16 sps:$4 sm:$0xff]  }
  0x81   : > { %2042 = vmatpush1.bf16.msra.mxu0 %v3269_v43  ;;  %v3343_v43 = vld [vmem:[%s3657_s10 + $0xec] ss:$16 sps:$4 sm:$0xff]  }
  0x82   : > { %2095 = vmatpush1.bf16.msra.mxu1 %v3272_v44  ;;  %2043 = vmatprep.subr.bf16.mxu0 %v3277_v49  ;;  %v3346_v44 = vld [vmem:[%s3657_s10 + $0x2ec] ss:$16 sps:$4 sm:$0xff]   ;;  %v3852_v49 = vcombine.low %v3789_v63, %v3792_v0 }
  0x83   : > { %2096 = vmatprep.subr.bf16.mxu1 %v3280_v53  ;;  %v3856_v53 = vcombine.low %v3795_v1, %v3802_v3  ;;  %v3355_v63 = vld [vmem:[%s3657_s10 + $0xac] ss:$16 sps:$4 sm:$0xff]   ;;  %v3874_v1 = vcombine.low %v305_v47, %v309_v48  ;;  %v3353_v3 = vld [vmem:[%s3657_s10 + $0xa8] ss:$16 sps:$4 sm:$0xff]  }
  0x84   : > { %v3358_v0 = vld [vmem:[%s3657_s10 + $0x2ac] ss:$16 sps:$4 sm:$0xff]  }
  0x85   : > { %2044 = vmatpush1.bf16.msra.mxu0 %v3275_v55  ;;  %v306_v55 = vld [vmem:[%s3659_s11 + $0x58] sm:$0xff] }
  0x86   : > { %2097 = vmatpush1.bf16.msra.mxu1 %v3278_v56  ;;  %2045 = vmatprep.subr.bf16.mxu0 %v3283_v57  ;;  %v310_v56 = vld [vmem:[%s3659_s11 + $0x78] sm:$0xff] }
  0x87   : > { %2098 = vmatprep.subr.bf16.mxu1 %v3286_v58  ;;  %v3349_v57 = vld [vmem:[%s3657_s10 + $0xcc] ss:$16 sps:$4 sm:$0xff]  }
  0x88   : > { %v3352_v58 = vld [vmem:[%s3657_s10 + $0x2cc] ss:$16 sps:$4 sm:$0xff]  }
  0x89   : > { %2046 = vmatpush1.bf16.msra.mxu0 %v3281_v59  ;;  %v3862_v59 = vcombine.high %v305_v47, %v309_v48  ;;  %v3413_v47 = vld [vmem:[%s3657_s10 + $0x168] ss:$16 sps:$4 sm:$0xff]  }
  0x8a   : > { %2099 = vmatpush1.bf16.msra.mxu1 %v3284_v60  ;;  %2047 = vmatprep.subr.bf16.mxu0 %v3289_v61  ;;  %v3864_v60 = vcombine.high %v306_v55, %v310_v56  ;;  %v3347_v61 = vld [vmem:[%s3657_s10 + $0xc8] ss:$16 sps:$4 sm:$0xff]  }
  0x8b   : > { %2100 = vmatprep.subr.bf16.mxu1 %v3292_v62  ;;  %v3350_v62 = vld [vmem:[%s3657_s10 + $0x2c8] ss:$16 sps:$4 sm:$0xff]  }
  0x8c   : > { %v3416_v48 = vld [vmem:[%s3657_s10 + $0x368] ss:$16 sps:$4 sm:$0xff]  }
  0x8d   : > { %2048 = vmatpush1.bf16.msra.mxu0 %v3287_v5  ;;  %v3356_v5 = vld [vmem:[%s3657_s10 + $0x2a8] ss:$16 sps:$4 sm:$0xff]  }
  0x8e   : > { %2101 = vmatpush1.bf16.msra.mxu1 %v3290_v7  ;;  %2049 = vmatprep.subr.bf16.mxu0 %v3295_v9  ;;  %v3878_v7 = vcombine.low %v306_v55, %v310_v56  ;;  %v3361_v9 = vld [vmem:[%s3657_s10 + $0x8c] ss:$16 sps:$4 sm:$0xff]  }
  0x8f   : > { %2102 = vmatprep.subr.bf16.mxu1 %v3298_v10  ;;  %v3364_v10 = vld [vmem:[%s3657_s10 + $0x28c] ss:$16 sps:$4 sm:$0xff]  }
  0x90   : > { %v3421_v55 = vld [vmem:[%s3657_s10 + $0x14c] ss:$16 sps:$4 sm:$0xff]  }
  0x91   : > { %2050 = vmatpush2.bf16.msra.mxu0 %v3293_v11  ;;  %v3359_v11 = vld [vmem:[%s3657_s10 + $0x88] ss:$16 sps:$4 sm:$0xff]   ;;  %v3424_v56 = vld [vmem:[%s3657_s10 + $0x34c] ss:$16 sps:$4 sm:$0xff]  }
  0x92   : > { %2103 = vmatpush2.bf16.msra.mxu1 %v3296_v12  ;;  %2051 = vmatprep.subr.bf16.mxu0 %v3301_v13  ;;  %v3362_v12 = vld [vmem:[%s3657_s10 + $0x288] ss:$16 sps:$4 sm:$0xff]   ;;  %v3367_v13 = vld [vmem:[%s3657_s10 + $0x6c] ss:$16 sps:$4 sm:$0xff]  }
  0x93   : > { %2104 = vmatprep.subr.bf16.mxu1 %v3304_v14  ;;  %v3370_v14 = vld [vmem:[%s3657_s10 + $0x26c] ss:$16 sps:$4 sm:$0xff]  }
  0x95   : > { %2052 = vmatpush2.bf16.msra.mxu0 %v3299_v15  ;;  %v3365_v15 = vld [vmem:[%s3657_s10 + $0x68] ss:$16 sps:$4 sm:$0xff]  }
  0x96   : > { %2105 = vmatpush2.bf16.msra.mxu1 %v3302_v16  ;;  %2053 = vmatprep.subr.bf16.mxu0 %v3307_v17  ;;  %v3368_v16 = vld [vmem:[%s3657_s10 + $0x268] ss:$16 sps:$4 sm:$0xff]   ;;  %v3373_v17 = vld [vmem:[%s3657_s10 + $0x4c] ss:$16 sps:$4 sm:$0xff]  }
  0x97   : > { %2106 = vmatprep.subr.bf16.mxu1 %v3310_v18  ;;  %v3376_v18 = vld [vmem:[%s3657_s10 + $0x24c] ss:$16 sps:$4 sm:$0xff]  }
  0x99   : > { %2054 = vmatpush2.bf16.msra.mxu0 %v3305_v19  ;;  %v3371_v19 = vld [vmem:[%s3657_s10 + $0x48] ss:$16 sps:$4 sm:$0xff]  }
  0x9a   : > { %2107 = vmatpush2.bf16.msra.mxu1 %v3308_v20  ;;  %2055 = vmatprep.subr.bf16.mxu0 %v3313_v21  ;;  %v3374_v20 = vld [vmem:[%s3657_s10 + $0x248] ss:$16 sps:$4 sm:$0xff]  }
  0x9b   : > { %2108 = vmatprep.subr.bf16.mxu1 %v3316_v22  ;;  %v3377_v21 = vld [vmem:[%s3657_s10 + $0x28] ss:$16 sps:$4 sm:$0xff]  }
  0x9c   : > { %v3380_v22 = vld [vmem:[%s3657_s10 + $0x228] ss:$16 sps:$4 sm:$0xff]  }
  0x9d   : > { %2056 = vmatpush2.bf16.msra.mxu0 %v3311_v23  ;;  %v3385_v23 = vld [vmem:[%s3657_s10 + $0xc] ss:$16 sps:$4 sm:$0xff]  }
  0x9e   : > { %2109 = vmatpush2.bf16.msra.mxu1 %v3314_v24  ;;  %2057 = vmatprep.subr.bf16.mxu0 %v3319_v27  ;;  %v3388_v24 = vld [vmem:[%s3657_s10 + $0x20c] ss:$16 sps:$4 sm:$0xff]   ;;  %v3383_v27 = vld [vmem:[%s3657_s10 + $0x8] ss:$16 sps:$4 sm:$0xff]  }
  0x9f   : > { %2110 = vmatprep.subr.bf16.mxu1 %v3322_v28  ;;  %v3386_v28 = vld [vmem:[%s3657_s10 + $0x208] ss:$16 sps:$4 sm:$0xff]  }
  0xa1   : > { %2058 = vmatpush2.bf16.msra.mxu0 %v3317_v29  ;;  %v3391_v29 = vld [vmem:[%s3657_s10 + $0x1ec] ss:$16 sps:$4 sm:$0xff]  }
  0xa2   : > { %2111 = vmatpush2.bf16.msra.mxu1 %v3320_v30  ;;  %2059 = vmatprep.subr.bf16.mxu0 %v3325_v31  ;;  %v3394_v30 = vld [vmem:[%s3657_s10 + $0x3ec] ss:$16 sps:$4 sm:$0xff]   ;;  %v3389_v31 = vld [vmem:[%s3657_s10 + $0x1e8] ss:$16 sps:$4 sm:$0xff]  }
  0xa3   : > { %2112 = vmatprep.subr.bf16.mxu1 %v3328_v32  ;;  %v3392_v32 = vld [vmem:[%s3657_s10 + $0x3e8] ss:$16 sps:$4 sm:$0xff]  }
  0xa5   : > { %2060 = vmatpush2.bf16.msra.mxu0 %v3323_v33  ;;  %v3397_v33 = vld [vmem:[%s3657_s10 + $0x1cc] ss:$16 sps:$4 sm:$0xff]  }
  0xa6   : > { %2113 = vmatpush2.bf16.msra.mxu1 %v3326_v34  ;;  %2061 = vmatprep.subr.bf16.mxu0 %v3331_v35  ;;  %v3400_v34 = vld [vmem:[%s3657_s10 + $0x3cc] ss:$16 sps:$4 sm:$0xff]   ;;  %v3395_v35 = vld [vmem:[%s3657_s10 + $0x1c8] ss:$16 sps:$4 sm:$0xff]  }
  0xa7   : > { %2114 = vmatprep.subr.bf16.mxu1 %v3334_v36  ;;  %v3398_v36 = vld [vmem:[%s3657_s10 + $0x3c8] ss:$16 sps:$4 sm:$0xff]  }
  0xa9   : > { %2062 = vmatpush2.bf16.msra.mxu0 %v3329_v37  ;;  %v3403_v37 = vld [vmem:[%s3657_s10 + $0x1ac] ss:$16 sps:$4 sm:$0xff]  }
  0xaa   : > { %2115 = vmatpush2.bf16.msra.mxu1 %v3332_v38  ;;  %2063 = vmatprep.subr.bf16.mxu0 %v3337_v39  ;;  %v3406_v38 = vld [vmem:[%s3657_s10 + $0x3ac] ss:$16 sps:$4 sm:$0xff]   ;;  %v3401_v39 = vld [vmem:[%s3657_s10 + $0x1a8] ss:$16 sps:$4 sm:$0xff]  }
  0xab   : > { %2116 = vmatprep.subr.bf16.mxu1 %v3340_v40  ;;  %v3404_v40 = vld [vmem:[%s3657_s10 + $0x3a8] ss:$16 sps:$4 sm:$0xff]  }
  0xad   : > { %2064 = vmatpush2.bf16.msra.mxu0 %v3335_v41  ;;  %v3409_v41 = vld [vmem:[%s3657_s10 + $0x18c] ss:$16 sps:$4 sm:$0xff]  }
  0xae   : > { %2117 = vmatpush2.bf16.msra.mxu1 %v3338_v42  ;;  %2139 = vmatprep.subr.bf16.mxu0 %v3343_v43  ;;  %v3412_v42 = vld [vmem:[%s3657_s10 + $0x38c] ss:$16 sps:$4 sm:$0xff]   ;;  %v3407_v43 = vld [vmem:[%s3657_s10 + $0x188] ss:$16 sps:$4 sm:$0xff]  }
  0xaf   : > { %2192 = vmatprep.subr.bf16.mxu1 %v3346_v44  ;;  %v3410_v44 = vld [vmem:[%s3657_s10 + $0x388] ss:$16 sps:$4 sm:$0xff]  }
  0xb0   : > { %2066 = vmatmul.mubr.bf16.vlgmr.msra.gmra.mxu0 %v3852_v49 }
  0xb1   : > { %2119 = vmatmul.mubr.bf16.vlgmr.msra.gmra.mxu1 %v3856_v53  ;;  %2140 = vmatpush1.bf16.msra.mxu0 %v3341_v45  ;;  %v3415_v45 = vld [vmem:[%s3657_s10 + $0x16c] ss:$16 sps:$4 sm:$0xff]  }
  0xb2   : > { %2193 = vmatpush1.bf16.msra.mxu1 %v3344_v46  ;;  %2141 = vmatprep.subr.bf16.mxu0 %v3349_v57  ;;  %v3418_v46 = vld [vmem:[%s3657_s10 + $0x36c] ss:$16 sps:$4 sm:$0xff]   ;;  %v3419_v57 = vld [vmem:[%s3657_s10 + $0x148] ss:$16 sps:$4 sm:$0xff]  }
  0xb3   : > { %2194 = vmatprep.subr.bf16.mxu1 %v3352_v58  ;;  %2075 = vmatprep.mubr.bf16.mxu0 %v3862_v59  ;;  %v3422_v58 = vld [vmem:[%s3657_s10 + $0x348] ss:$16 sps:$4 sm:$0xff]  }
  0xb4   : > { %2128 = vmatprep.mubr.bf16.mxu1 %v3864_v60 }
  0xb5   : > { %2142 = vmatpush1.bf16.msra.mxu0 %v3347_v61  ;;  %v3427_v61 = vld [vmem:[%s3657_s10 + $0x12c] ss:$16 sps:$4 sm:$0xff]  }
  0xb6   : > { %2195 = vmatpush1.bf16.msra.mxu1 %v3350_v62  ;;  %2143 = vmatprep.subr.bf16.mxu0 %v3355_v63  ;;  %v3430_v62 = vld [vmem:[%s3657_s10 + $0x32c] ss:$16 sps:$4 sm:$0xff]   ;;  %v3425_v63 = vld [vmem:[%s3657_s10 + $0x128] ss:$16 sps:$4 sm:$0xff]  }
  0xb7   : > { %2196 = vmatprep.subr.bf16.mxu1 %v3358_v0  ;;  %v3428_v0 = vld [vmem:[%s3657_s10 + $0x328] ss:$16 sps:$4 sm:$0xff]  }
  0xb8   : > { %2076 = vmatmul.mubr.bf16.gmra.mxu0 %v3874_v1 }
  0xb9   : > { %2129 = vmatmul.mubr.bf16.gmra.mxu1 %v3878_v7  ;;  %2144 = vmatpush1.bf16.msra.mxu0 %v3353_v3  ;;  %v3433_v3 = vld [vmem:[%s3657_s10 + $0x10c] ss:$16 sps:$4 sm:$0xff]  }
  0xba   : > { %2197 = vmatpush1.bf16.msra.mxu1 %v3356_v5  ;;  %2145 = vmatprep.subr.bf16.mxu0 %v3361_v9  ;;  %v3436_v5 = vld [vmem:[%s3657_s10 + $0x30c] ss:$16 sps:$4 sm:$0xff]   ;;  %v3431_v9 = vld [vmem:[%s3657_s10 + $0x108] ss:$16 sps:$4 sm:$0xff]  }
  0xbb   : > { %2198 = vmatprep.subr.bf16.mxu1 %v3364_v10  ;;  %2171 = vmatprep.mubr.bf16.mxu0 %v3715_v6  ;;  %v3379_v6 = vld [vmem:[%s3657_s10 + $0x2c] ss:$16 sps:$4 sm:$0xff]   ;;  %v3434_v10 = vld [vmem:[%s3657_s10 + $0x308] ss:$16 sps:$4 sm:$0xff]  }
  0xbc   : > { %2224 = vmatprep.mubr.bf16.mxu1 %v3718_v8  ;;  %v3382_v8 = vld [vmem:[%s3657_s10 + $0x22c] ss:$16 sps:$4 sm:$0xff]  }
  0xbd   : > { %2146 = vmatpush1.bf16.msra.mxu0 %v3359_v11  ;;  %v3439_v11 = vld [vmem:[%s3657_s10 + $0x4ec] ss:$16 sps:$4 sm:$0xff]  }
  0xbe   : > { %2199 = vmatpush1.bf16.msra.mxu1 %v3362_v12  ;;  %2147 = vmatprep.subr.bf16.mxu0 %v3367_v13  ;;  %v3442_v12 = vld [vmem:[%s3657_s10 + $0x6ec] ss:$16 sps:$4 sm:$0xff]   ;;  %v3437_v13 = vld [vmem:[%s3657_s10 + $0x4e8] ss:$16 sps:$4 sm:$0xff]  }
  0xbf   : > { %2200 = vmatprep.subr.bf16.mxu1 %v3370_v14  ;;  %v3440_v14 = vld [vmem:[%s3657_s10 + $0x6e8] ss:$16 sps:$4 sm:$0xff]  }
  0xc1   : > { %2148 = vmatpush1.bf16.msra.mxu0 %v3365_v15  ;;  %v3445_v15 = vld [vmem:[%s3657_s10 + $0x4cc] ss:$16 sps:$4 sm:$0xff]  }
  0xc2   : > { %2201 = vmatpush1.bf16.msra.mxu1 %v3368_v16  ;;  %2149 = vmatprep.subr.bf16.mxu0 %v3373_v17  ;;  %v3448_v16 = vld [vmem:[%s3657_s10 + $0x6cc] ss:$16 sps:$4 sm:$0xff]   ;;  %v3443_v17 = vld [vmem:[%s3657_s10 + $0x4c8] ss:$16 sps:$4 sm:$0xff]  }
  0xc3   : > { %2202 = vmatprep.subr.bf16.mxu1 %v3376_v18  ;;  %v3446_v18 = vld [vmem:[%s3657_s10 + $0x6c8] ss:$16 sps:$4 sm:$0xff]  }
  0xc5   : > { %2150 = vmatpush1.bf16.msra.mxu0 %v3371_v19  ;;  %v3451_v19 = vld [vmem:[%s3657_s10 + $0x4ac] ss:$16 sps:$4 sm:$0xff]  }
  0xc6   : > { %2203 = vmatpush1.bf16.msra.mxu1 %v3374_v20  ;;  %2151 = vmatprep.subr.bf16.mxu0 %v3379_v6  ;;  %v3454_v20 = vld [vmem:[%s3657_s10 + $0x6ac] ss:$16 sps:$4 sm:$0xff]  }
  0xc7   : > { %2204 = vmatprep.subr.bf16.mxu1 %v3382_v8  ;;  %v3457_v6 = vld [vmem:[%s3657_s10 + $0x48c] ss:$16 sps:$4 sm:$0xff]  }
  0xc8   : > { %v3460_v8 = vld [vmem:[%s3657_s10 + $0x68c] ss:$16 sps:$4 sm:$0xff]  }
  0xc9   : > { %2152 = vmatpush1.bf16.msra.mxu0 %v3377_v21  ;;  %v3463_v21 = vld [vmem:[%s3657_s10 + $0x46c] ss:$16 sps:$4 sm:$0xff]  }
  0xca   : > { %2205 = vmatpush1.bf16.msra.mxu1 %v3380_v22  ;;  %2153 = vmatprep.subr.bf16.mxu0 %v3385_v23  ;;  %v3466_v22 = vld [vmem:[%s3657_s10 + $0x66c] ss:$16 sps:$4 sm:$0xff]  }
  0xcb   : > { %2206 = vmatprep.subr.bf16.mxu1 %v3388_v24  ;;  %v3469_v23 = vld [vmem:[%s3657_s10 + $0x44c] ss:$16 sps:$4 sm:$0xff]  }
  0xcc   : > { %v3472_v24 = vld [vmem:[%s3657_s10 + $0x64c] ss:$16 sps:$4 sm:$0xff]  }
  0xcd   : > { %2154 = vmatpush1.bf16.msra.mxu0 %v3383_v27  ;;  %v3467_v27 = vld [vmem:[%s3657_s10 + $0x448] ss:$16 sps:$4 sm:$0xff]  }
  0xce   : > { %2207 = vmatpush1.bf16.msra.mxu1 %v3386_v28  ;;  %2155 = vmatprep.subr.bf16.mxu0 %v3391_v29  ;;  %v3478_v28 = vld [vmem:[%s3657_s10 + $0x62c] ss:$16 sps:$4 sm:$0xff]   ;;  %v3473_v29 = vld [vmem:[%s3657_s10 + $0x428] ss:$16 sps:$4 sm:$0xff]  }
  0xcf   : > { %2208 = vmatprep.subr.bf16.mxu1 %v3394_v30  ;;  %v3476_v30 = vld [vmem:[%s3657_s10 + $0x628] ss:$16 sps:$4 sm:$0xff]  }
  0xd1   : > { %2156 = vmatpush2.bf16.msra.mxu0 %v3389_v31  ;;  %v3481_v31 = vld [vmem:[%s3657_s10 + $0x40c] ss:$16 sps:$4 sm:$0xff]  }
  0xd2   : > { %2209 = vmatpush2.bf16.msra.mxu1 %v3392_v32  ;;  %2157 = vmatprep.subr.bf16.mxu0 %v3397_v33  ;;  %v3484_v32 = vld [vmem:[%s3657_s10 + $0x60c] ss:$16 sps:$4 sm:$0xff]   ;;  %v3479_v33 = vld [vmem:[%s3657_s10 + $0x408] ss:$16 sps:$4 sm:$0xff]  }
  0xd3   : > { %2210 = vmatprep.subr.bf16.mxu1 %v3400_v34  ;;  %v3482_v34 = vld [vmem:[%s3657_s10 + $0x608] ss:$16 sps:$4 sm:$0xff]  }
  0xd5   : > { %2158 = vmatpush2.bf16.msra.mxu0 %v3395_v35  ;;  %v3487_v35 = vld [vmem:[%s3657_s10 + $0x5ec] ss:$16 sps:$4 sm:$0xff]  }
  0xd6   : > { %2211 = vmatpush2.bf16.msra.mxu1 %v3398_v36  ;;  %2159 = vmatprep.subr.bf16.mxu0 %v3403_v37  ;;  %v3490_v36 = vld [vmem:[%s3657_s10 + $0x7ec] ss:$16 sps:$4 sm:$0xff]   ;;  %v3485_v37 = vld [vmem:[%s3657_s10 + $0x5e8] ss:$16 sps:$4 sm:$0xff]  }
  0xd7   : > { %2212 = vmatprep.subr.bf16.mxu1 %v3406_v38  ;;  %v3488_v38 = vld [vmem:[%s3657_s10 + $0x7e8] ss:$16 sps:$4 sm:$0xff]  }
  0xd9   : > { %2160 = vmatpush2.bf16.msra.mxu0 %v3401_v39  ;;  %v3493_v39 = vld [vmem:[%s3657_s10 + $0x5cc] ss:$16 sps:$4 sm:$0xff]  }
  0xda   : > { %2213 = vmatpush2.bf16.msra.mxu1 %v3404_v40  ;;  %2161 = vmatprep.subr.bf16.mxu0 %v3409_v41  ;;  %v3496_v40 = vld [vmem:[%s3657_s10 + $0x7cc] ss:$16 sps:$4 sm:$0xff]   ;;  %v3491_v41 = vld [vmem:[%s3657_s10 + $0x5c8] ss:$16 sps:$4 sm:$0xff]  }
  0xdb   : > { %2214 = vmatprep.subr.bf16.mxu1 %v3412_v42  ;;  %v3494_v42 = vld [vmem:[%s3657_s10 + $0x7c8] ss:$16 sps:$4 sm:$0xff]  }
  0xdd   : > { %2162 = vmatpush2.bf16.msra.mxu0 %v3407_v43  ;;  %v3499_v43 = vld [vmem:[%s3657_s10 + $0x5ac] ss:$16 sps:$4 sm:$0xff]  }
  0xde   : > { %2215 = vmatpush2.bf16.msra.mxu1 %v3410_v44  ;;  %2163 = vmatprep.subr.bf16.mxu0 %v3415_v45  ;;  %v3502_v44 = vld [vmem:[%s3657_s10 + $0x7ac] ss:$16 sps:$4 sm:$0xff]   ;;  %v3497_v45 = vld [vmem:[%s3657_s10 + $0x5a8] ss:$16 sps:$4 sm:$0xff]  }
  0xdf   : > { %2216 = vmatprep.subr.bf16.mxu1 %v3418_v46  ;;  %v3500_v46 = vld [vmem:[%s3657_s10 + $0x7a8] ss:$16 sps:$4 sm:$0xff]  }
  0xe1   : > { %2164 = vmatpush2.bf16.msra.mxu0 %v3413_v47  ;;  %v3505_v47 = vld [vmem:[%s3657_s10 + $0x58c] ss:$16 sps:$4 sm:$0xff]  }
  0xe2   : > { %2217 = vmatpush2.bf16.msra.mxu1 %v3416_v48  ;;  %2165 = vmatprep.subr.bf16.mxu0 %v3421_v55  ;;  %v3508_v48 = vld [vmem:[%s3657_s10 + $0x78c] ss:$16 sps:$4 sm:$0xff]   ;;  %v3503_v55 = vld [vmem:[%s3657_s10 + $0x588] ss:$16 sps:$4 sm:$0xff]  }
  0xe3   : > { %2218 = vmatprep.subr.bf16.mxu1 %v3424_v56  ;;  %v3506_v56 = vld [vmem:[%s3657_s10 + $0x788] ss:$16 sps:$4 sm:$0xff]  }
  0xe5   : > { %2166 = vmatpush2.bf16.msra.mxu0 %v3419_v57  ;;  %v3511_v57 = vld [vmem:[%s3657_s10 + $0x56c] ss:$16 sps:$4 sm:$0xff]  }
  0xe6   : > { %2219 = vmatpush2.bf16.msra.mxu1 %v3422_v58  ;;  %2167 = vmatprep.subr.bf16.mxu0 %v3427_v61  ;;  %v3514_v58 = vld [vmem:[%s3657_s10 + $0x76c] ss:$16 sps:$4 sm:$0xff]   ;;  %v3509_v61 = vld [vmem:[%s3657_s10 + $0x568] ss:$16 sps:$4 sm:$0xff]  }
  0xe7   : > { %2220 = vmatprep.subr.bf16.mxu1 %v3430_v62  ;;  %v3512_v62 = vld [vmem:[%s3657_s10 + $0x768] ss:$16 sps:$4 sm:$0xff]  }
  0xe9   : > { %2168 = vmatpush2.bf16.msra.mxu0 %v3425_v63  ;;  %v3517_v63 = vld [vmem:[%s3657_s10 + $0x54c] ss:$16 sps:$4 sm:$0xff]  }
  0xea   : > { %2221 = vmatpush2.bf16.msra.mxu1 %v3428_v0  ;;  %2169 = vmatprep.subr.bf16.mxu0 %v3433_v3  ;;  %v3520_v0 = vld [vmem:[%s3657_s10 + $0x74c] ss:$16 sps:$4 sm:$0xff]   ;;  %v3515_v3 = vld [vmem:[%s3657_s10 + $0x548] ss:$16 sps:$4 sm:$0xff]  }
  0xeb   : > { %2222 = vmatprep.subr.bf16.mxu1 %v3436_v5  ;;  %v3518_v5 = vld [vmem:[%s3657_s10 + $0x748] ss:$16 sps:$4 sm:$0xff]  }
  0xed   : > { %2170 = vmatpush2.bf16.msra.mxu0 %v3431_v9  ;;  %v3523_v9 = vld [vmem:[%s3657_s10 + $0x52c] ss:$16 sps:$4 sm:$0xff]  }
  0xee   : > { %2223 = vmatpush2.bf16.msra.mxu1 %v3434_v10  ;;  %2245 = vmatprep.subr.bf16.mxu0 %v3439_v11  ;;  %v3526_v10 = vld [vmem:[%s3657_s10 + $0x72c] ss:$16 sps:$4 sm:$0xff]   ;;  %v3521_v11 = vld [vmem:[%s3657_s10 + $0x528] ss:$16 sps:$4 sm:$0xff]  }
  0xef   : > { %2298 = vmatprep.subr.bf16.mxu1 %v3442_v12  ;;  %v3524_v12 = vld [vmem:[%s3657_s10 + $0x728] ss:$16 sps:$4 sm:$0xff]  }
  0xf0   : > { %2172 = vmatmul.mubr.bf16.vlgmr.msra.gmra.mxu0 %v3738_v25  ;;  %v3449_v25 = vld [vmem:[%s3657_s10 + $0x4a8] ss:$16 sps:$4 sm:$0xff]  }
  0xf1   : > { %2225 = vmatmul.mubr.bf16.vlgmr.msra.gmra.mxu1 %v3740_v26  ;;  %2246 = vmatpush1.bf16.msra.mxu0 %v3437_v13  ;;  %v3452_v26 = vld [vmem:[%s3657_s10 + $0x6a8] ss:$16 sps:$4 sm:$0xff]   ;;  %v3529_v13 = vld [vmem:[%s3657_s10 + $0x50c] ss:$16 sps:$4 sm:$0xff]  }
  0xf2   : > { %2299 = vmatpush1.bf16.msra.mxu1 %v3440_v14  ;;  %2247 = vmatprep.subr.bf16.mxu0 %v3445_v15  ;;  %v3532_v14 = vld [vmem:[%s3657_s10 + $0x70c] ss:$16 sps:$4 sm:$0xff]   ;;  %v3527_v15 = vld [vmem:[%s3657_s10 + $0x508] ss:$16 sps:$4 sm:$0xff]  }
  0xf3   : > { %2300 = vmatprep.subr.bf16.mxu1 %v3448_v16  ;;  %2181 = vmatprep.mubr.bf16.mxu0 %v3767_v50  ;;  %v3455_v50 = vld [vmem:[%s3657_s10 + $0x488] ss:$16 sps:$4 sm:$0xff]  }
  0xf4   : > { %2234 = vmatprep.mubr.bf16.mxu1 %v3769_v51  ;;  %v3458_v51 = vld [vmem:[%s3657_s10 + $0x688] ss:$16 sps:$4 sm:$0xff]  }
  0xf5   : > { %2248 = vmatpush1.bf16.msra.mxu0 %v3443_v17  ;;  %v3530_v16 = vld [vmem:[%s3657_s10 + $0x708] ss:$16 sps:$4 sm:$0xff]  }
  0xf6   : > { %2301 = vmatpush1.bf16.msra.mxu1 %v3446_v18  ;;  %2249 = vmatprep.subr.bf16.mxu0 %v3451_v19 }
  0xf7   : > { %2302 = vmatprep.subr.bf16.mxu1 %v3454_v20 }
  0xf8   : > { %2182 = vmatmul.mubr.bf16.gmra.mxu0 %v3771_v52  ;;  %v3461_v52 = vld [vmem:[%s3657_s10 + $0x468] ss:$16 sps:$4 sm:$0xff]  }
  0xf9   : > { %2235 = vmatmul.mubr.bf16.gmra.mxu1 %v3774_v54  ;;  %2250 = vmatpush1.bf16.msra.mxu0 %v3449_v25  ;;  %v3464_v54 = vld [vmem:[%s3657_s10 + $0x668] ss:$16 sps:$4 sm:$0xff]  }
  0xfa   : > { %2303 = vmatpush1.bf16.msra.mxu1 %v3452_v26  ;;  %2251 = vmatprep.subr.bf16.mxu0 %v3457_v6 }
  0xfb   : > { %2304 = vmatprep.subr.bf16.mxu1 %v3460_v8  ;;  %2277 = vmatprep.mubr.bf16.mxu0 %v3799_v2  ;;  %v3470_v2 = vld [vmem:[%s3657_s10 + $0x648] ss:$16 sps:$4 sm:$0xff]  }
  0xfc   : > { %2330 = vmatprep.mubr.bf16.mxu1 %v3806_v4  ;;  %v3475_v4 = vld [vmem:[%s3657_s10 + $0x42c] ss:$16 sps:$4 sm:$0xff]  }
  0xfd   : > { %2252 = vmatpush1.bf16.msra.mxu0 %v3455_v50 }
  0xfe   : > { %2305 = vmatpush1.bf16.msra.mxu1 %v3458_v51  ;;  %2253 = vmatprep.subr.bf16.mxu0 %v3463_v21 }
  0xff   : > { %2306 = vmatprep.subr.bf16.mxu1 %v3466_v22 }
 0x101   : > { %2254 = vmatpush1.bf16.msra.mxu0 %v3461_v52 }
 0x102   : > { %2307 = vmatpush1.bf16.msra.mxu1 %v3464_v54  ;;  %2255 = vmatprep.subr.bf16.mxu0 %v3469_v23 }
 0x103   : > { %2308 = vmatprep.subr.bf16.mxu1 %v3472_v24  ;;  %v279_v24 = vld [vmem:[#allocation2 + $0x30] sm:$0xff] }
 0x105   : > { %2256 = vmatpush1.bf16.msra.mxu0 %v3467_v27 }
 0x106   : > { %2309 = vmatpush1.bf16.msra.mxu1 %v3470_v2  ;;  %2257 = vmatprep.subr.bf16.mxu0 %v3475_v4 }
 0x107   : > { %2310 = vmatprep.subr.bf16.mxu1 %v3478_v28 }
 0x109   : > { %2258 = vmatpush1.bf16.msra.mxu0 %v3473_v29 }
 0x10a   : > { %2311 = vmatpush1.bf16.msra.mxu1 %v3476_v30  ;;  %2259 = vmatprep.subr.bf16.mxu0 %v3481_v31  ;;  %v280_v30 = vld [vmem:[#allocation2] sm:$0xff] }
 0x10b   : > { %2312 = vmatprep.subr.bf16.mxu1 %v3484_v32 }
 0x10d   : > { %2260 = vmatpush1.bf16.msra.mxu0 %v3479_v33 }
 0x10e   : > { %2313 = vmatpush1.bf16.msra.mxu1 %v3482_v34  ;;  %2261 = vmatprep.subr.bf16.mxu0 %v3487_v35 }
 0x10f   : > { %2314 = vmatprep.subr.bf16.mxu1 %v3490_v36 }
 0x111   : > { %2262 = vmatpush2.bf16.msra.mxu0 %v3485_v37  ;;  %v283_v37 = vld [vmem:[#allocation2 + $0x50] sm:$0xff] }
 0x112   : > { %2315 = vmatpush2.bf16.msra.mxu1 %v3488_v38  ;;  %2263 = vmatprep.subr.bf16.mxu0 %v3493_v39 }
 0x113   : > { %2316 = vmatprep.subr.bf16.mxu1 %v3496_v40 }
 0x115   : > { %2264 = vmatpush2.bf16.msra.mxu0 %v3491_v41 }
 0x116   : > { %2317 = vmatpush2.bf16.msra.mxu1 %v3494_v42  ;;  %2265 = vmatprep.subr.bf16.mxu0 %v3499_v43 }
 0x117   : > { %2318 = vmatprep.subr.bf16.mxu1 %v3502_v44  ;;  %v284_v44 = vld [vmem:[#allocation2 + $0x68] sm:$0xff] }
 0x119   : > { %2266 = vmatpush2.bf16.msra.mxu0 %v3497_v45 }
 0x11a   : > { %2319 = vmatpush2.bf16.msra.mxu1 %v3500_v46  ;;  %2267 = vmatprep.subr.bf16.mxu0 %v3505_v47 }
 0x11b   : > { %2320 = vmatprep.subr.bf16.mxu1 %v3508_v48 }
 0x11d   : > { %2268 = vmatpush2.bf16.msra.mxu0 %v3503_v55 }
 0x11e   : > { %2321 = vmatpush2.bf16.msra.mxu1 %v3506_v56  ;;  %2269 = vmatprep.subr.bf16.mxu0 %v3511_v57 }
 0x11f   : > { %2322 = vmatprep.subr.bf16.mxu1 %v3514_v58  ;;  %v287_v58 = vld [vmem:[#allocation2 + $0x40] sm:$0xff] }
 0x121   : > { %2270 = vmatpush2.bf16.msra.mxu0 %v3509_v61 }
 0x122   : > { %2323 = vmatpush2.bf16.msra.mxu1 %v3512_v62  ;;  %2271 = vmatprep.subr.bf16.mxu0 %v3517_v63 }
 0x123   : > { %2324 = vmatprep.subr.bf16.mxu1 %v3520_v0 }
 0x125   : > { %2272 = vmatpush2.bf16.msra.mxu0 %v3515_v3 }
 0x126   : > { %2325 = vmatpush2.bf16.msra.mxu1 %v3518_v5  ;;  %2273 = vmatprep.subr.bf16.mxu0 %v3523_v9  ;;  %v288_v9 = vld [vmem:[#allocation2 + $0x20] sm:$0xff] }
 0x127   : > { %2326 = vmatprep.subr.bf16.mxu1 %v3526_v10 }
 0x129   : > { %2274 = vmatpush2.bf16.msra.mxu0 %v3521_v11 }
 0x12a   : > { %2327 = vmatpush2.bf16.msra.mxu1 %v3524_v12  ;;  %2275 = vmatprep.subr.bf16.mxu0 %v3529_v13 }
 0x12b   : > { %2328 = vmatprep.subr.bf16.mxu1 %v3532_v14 }
 0x12d   : > { %2276 = vmatpush2.bf16.msra.mxu0 %v3527_v15 }
 0x12e   : > { %2329 = vmatpush2.bf16.msra.mxu1 %v3530_v16  ;;  %v291_v16 = vld [vmem:[#allocation2 + $0x60] sm:$0xff] }
 0x130   : > { %2278 = vmatmul.mubr.bf16.vlgmr.msra.gmra.mxu0 %v3852_v49  ;;  %v1961_v17 = vpop.f32.mrf.mxu0 }
 0x131   : > { %2331 = vmatmul.mubr.bf16.vlgmr.msra.gmra.mxu1 %v3856_v53  ;;  %2287 = vmatprep.mubr.bf16.mxu0 %v3862_v59  ;;  %v2014_v18 = vpop.f32.mrf.mxu1 }
 0x132   : > { %2340 = vmatprep.mubr.bf16.mxu1 %v3864_v60  ;;  %v1963_v19 = vpop.f32.mrf.mxu0  ;;  %v2015_v52 = vadd.f32 %v2014_v18, %v1961_v17 }
 0x133   : > { %v2016_v20 = vpop.f32.mrf.mxu1 }
 0x134   : > { %v1965_v25 = vpop.f32.mrf.mxu0 }
 0x135   : > { %v2018_v26 = vpop.f32.mrf.mxu1 }
 0x136   : > { %v1967_v6 = vpop.f32.mrf.mxu0  ;;  %v2019_v4 = vadd.f32 %v2018_v26, %v1965_v25  ;;  %v292_v25 = vld [vmem:[#allocation2 + $0x70] sm:$0xff] }
 0x137   : > { %v2020_v8 = vpop.f32.mrf.mxu1 }
 0x138   : > { %2288 = vmatmul.mubr.bf16.gmra.mxu0 %v3874_v1  ;;  %v1971_v50 = vpop.f32.mrf.mxu0  ;;  %v2021_v33 = vadd.f32 %v2020_v8, %v1967_v6 }
 0x139   : > { %2341 = vmatmul.mubr.bf16.gmra.mxu1 %v3878_v7  ;;  %v2024_v49 = vpop.f32.mrf.mxu1  ;;  %v2017_v7 = vadd.f32 %v2016_v20, %v1963_v19 }
 0x13a   : > { %v1973_v51 = vpop.f32.mrf.mxu0  ;;  %v2025_v40 = vadd.f32 %v2024_v49, %v1971_v50 }
 0x13b   : > { %v2026_v53 = vpop.f32.mrf.mxu1 }
 0x13c   : > { %v1975_v21 = vpop.f32.mrf.mxu0  ;;  %v2027_v47 = vadd.f32 %v2026_v53, %v1973_v51 }
 0x13d   : > { %v2028_v59 = vpop.f32.mrf.mxu1 }
 0x13e   : > { %v1977_v22 = vpop.f32.mrf.mxu0  ;;  %v2029_v62 = vadd.f32 %v2028_v59, %v1975_v21 }
 0x13f   : > { %v2030_v60 = vpop.f32.mrf.mxu1 }
 0x140   : > { %v2031_v11 = vadd.f32 %v2030_v60, %v1977_v22 }
 0x170   : > { %v2067_v1 = vpop.f32.mrf.mxu0 }
 0x171   : > { %v2120_v54 = vpop.f32.mrf.mxu1  ;;  %v2068_v23 = vadd.f32 %v2067_v1, %v2015_v52 }
 0x172   : > { %v2069_v27 = vpop.f32.mrf.mxu0 }
 0x173   : > { %v2122_v2 = vpop.f32.mrf.mxu1  ;;  %v2121_v28 = vadd.f32 %v2120_v54, %v2068_v23  ;;  %v2070_v29 = vadd.f32 %v2069_v27, %v2017_v7 }
 0x174   : > { %v2071_v31 = vpop.f32.mrf.mxu0 }
 0x175   : > { %v2124_v32 = vpop.f32.mrf.mxu1  ;;  %v2351_v34 = vadd.f32 %v2121_v28, %v279_v24  ;;  %v2123_v35 = vadd.f32 %v2122_v2, %v2070_v29  ;;  %v2072_v36 = vadd.f32 %v2071_v31, %v2019_v4 }
 0x176   : > { %v2073_v38 = vpop.f32.mrf.mxu0 }
 0x177   : > { %v2126_v39 = vpop.f32.mrf.mxu1  ;;  %2367 = vst [vmem:[#allocation2 + $0x30] sm:$0xff] %v2351_v34  ;;  %v2352_v41 = vadd.f32 %v2123_v35, %v280_v30  ;;  %v2125_v42 = vadd.f32 %v2124_v32, %v2072_v36  ;;  %v2074_v43 = vadd.f32 %v2073_v38, %v2021_v33  ;;  %v281_v32 = vld [vmem:[#allocation2 + $0x58] sm:$0xff] }
 0x178   : > { %v2077_v45 = vpop.f32.mrf.mxu0  ;;  %v282_v38 = vld [vmem:[#allocation2 + $0x18] sm:$0xff] }
 0x179   : > { %v2130_v46 = vpop.f32.mrf.mxu1  ;;  %2368 = vst [vmem:[#allocation2] sm:$0xff] %v2352_v41  ;;  %v2355_v48 = vadd.f32 %v2125_v42, %v283_v37  ;;  %v2127_v55 = vadd.f32 %v2126_v39, %v2074_v43  ;;  %v2078_v56 = vadd.f32 %v2077_v45, %v2025_v40  ;;  %v285_v45 = vld [vmem:[#allocation2 + $0x8] sm:$0xff] }
 0x17a   : > { %v2079_v57 = vpop.f32.mrf.mxu0 }
 0x17b   : > { %v2132_v61 = vpop.f32.mrf.mxu1  ;;  %2371 = vst [vmem:[#allocation2 + $0x50] sm:$0xff] %v2355_v48  ;;  %v2356_v63 = vadd.f32 %v2127_v55, %v284_v44  ;;  %v2080_v0 = vadd.f32 %v2079_v57, %v2027_v47  ;;  %v2131_v3 = vadd.f32 %v2130_v46, %v2078_v56 }
 0x17c   : > { %v2081_v5 = vpop.f32.mrf.mxu0 }
 0x17d   : > { %v2134_v10 = vpop.f32.mrf.mxu1  ;;  %2372 = vst [vmem:[#allocation2 + $0x68] sm:$0xff] %v2356_v63  ;;  %v2359_v12 = vadd.f32 %v2131_v3, %v287_v58  ;;  %v2082_v13 = vadd.f32 %v2081_v5, %v2029_v62  ;;  %v2133_v14 = vadd.f32 %v2132_v61, %v2080_v0  ;;  %v286_v58 = vld [vmem:[#allocation2 + $0x48] sm:$0xff] }
 0x17e   : > { %v2083_v15 = vpop.f32.mrf.mxu0 }
 0x17f   : > { %v2136_v17 = vpop.f32.mrf.mxu1  ;;  %2375 = vst [vmem:[#allocation2 + $0x40] sm:$0xff] %v2359_v12  ;;  %v2360_v18 = vadd.f32 %v2133_v14, %v288_v9  ;;  %v2084_v19 = vadd.f32 %v2083_v15, %v2031_v11  ;;  %v2135_v20 = vadd.f32 %v2134_v10, %v2082_v13  ;;  %v289_v9 = vld [vmem:[#allocation2 + $0x10] sm:$0xff] }
 0x181   : > { %2376 = vst [vmem:[#allocation2 + $0x20] sm:$0xff] %v2360_v18  ;;  %v2363_v26 = vadd.f32 %v2135_v20, %v291_v16  ;;  %v2137_v6 = vadd.f32 %v2136_v17, %v2084_v19  ;;  %v290_v16 = vld [vmem:[#allocation2 + $0x38] sm:$0xff] }
 0x183   : > { %2379 = vst [vmem:[#allocation2 + $0x60] sm:$0xff] %v2363_v26  ;;  %v2364_v8 = vadd.f32 %v2137_v6, %v292_v25  ;;  %v293_v6 = vld [vmem:[#allocation2 + $0x78] sm:$0xff] }
 0x185   : > { %2380 = vst [vmem:[#allocation2 + $0x70] sm:$0xff] %v2364_v8 }
 0x1b0   : > { %v2173_v50 = vpop.f32.mrf.mxu0 }
 0x1b1   : > { %v2226_v49 = vpop.f32.mrf.mxu1 }
 0x1b2   : > { %v2175_v51 = vpop.f32.mrf.mxu0  ;;  %v2227_v4 = vadd.f32 %v2226_v49, %v2173_v50 }
 0x1b3   : > { %v2228_v53 = vpop.f32.mrf.mxu1 }
 0x1b4   : > { %v2177_v21 = vpop.f32.mrf.mxu0  ;;  %v2229_v30 = vadd.f32 %v2228_v53, %v2175_v51  ;;  %v294_v53 = vld [vmem:[#allocation2 + $0x28] sm:$0xff] }
 0x1b5   : > { %v2230_v59 = vpop.f32.mrf.mxu1 }
 0x1b6   : > { %v2179_v22 = vpop.f32.mrf.mxu0  ;;  %v2231_v35 = vadd.f32 %v2230_v59, %v2177_v21 }
 0x1b7   : > { %v2232_v60 = vpop.f32.mrf.mxu1 }
 0x1b8   : > { %v2183_v52 = vpop.f32.mrf.mxu0  ;;  %v2233_v41 = vadd.f32 %v2232_v60, %v2179_v22 }
 0x1b9   : > { %v2236_v1 = vpop.f32.mrf.mxu1 }
 0x1ba   : > { %v2185_v54 = vpop.f32.mrf.mxu0  ;;  %v2237_v48 = vadd.f32 %v2236_v1, %v2183_v52 }
 0x1bb   : > { %v2238_v7 = vpop.f32.mrf.mxu1 }
 0x1bc   : > { %v2187_v23 = vpop.f32.mrf.mxu0  ;;  %v2239_v63 = vadd.f32 %v2238_v7, %v2185_v54 }
 0x1bd   : > { %v2240_v24 = vpop.f32.mrf.mxu1 }
 0x1be   : > { %v2189_v27 = vpop.f32.mrf.mxu0  ;;  %v2241_v12 = vadd.f32 %v2240_v24, %v2187_v23 }
 0x1bf   : > { %v2242_v2 = vpop.f32.mrf.mxu1 }
 0x1c0   : > { %v2243_v19 = vadd.f32 %v2242_v2, %v2189_v27 }
 0x1f0   : > { %v2279_v28 = vpop.f32.mrf.mxu0 }
 0x1f1   : > { %v2332_v29 = vpop.f32.mrf.mxu1  ;;  %v2280_v31 = vadd.f32 %v2279_v28, %v2227_v4 }
 0x1f2   : > { %v2281_v33 = vpop.f32.mrf.mxu0 }
 0x1f3   : > { %v2334_v34 = vpop.f32.mrf.mxu1  ;;  %v2333_v36 = vadd.f32 %v2332_v29, %v2280_v31  ;;  %v2282_v37 = vadd.f32 %v2281_v33, %v2229_v30 }
 0x1f4   : > { %v2283_v39 = vpop.f32.mrf.mxu0 }
 0x1f5   : > { %v2336_v40 = vpop.f32.mrf.mxu1  ;;  %v2353_v42 = vadd.f32 %v2333_v36, %v281_v32  ;;  %v2335_v43 = vadd.f32 %v2334_v34, %v2282_v37  ;;  %v2284_v44 = vadd.f32 %v2283_v39, %v2231_v35 }
 0x1f6   : > { %v2285_v46 = vpop.f32.mrf.mxu0 }
 0x1f7   : > { %v2338_v47 = vpop.f32.mrf.mxu1  ;;  %2369 = vst [vmem:[#allocation2 + $0x58] sm:$0xff] %v2353_v42  ;;  %v2354_v55 = vadd.f32 %v2335_v43, %v282_v38  ;;  %v2337_v56 = vadd.f32 %v2336_v40, %v2284_v44  ;;  %v2286_v57 = vadd.f32 %v2285_v46, %v2233_v41 }
 0x1f8   : > { %v2289_v61 = vpop.f32.mrf.mxu0 }
 0x1f9   : > { %v2342_v62 = vpop.f32.mrf.mxu1  ;;  %2370 = vst [vmem:[#allocation2 + $0x18] sm:$0xff] %v2354_v55  ;;  %v2357_v0 = vadd.f32 %v2337_v56, %v285_v45  ;;  %v2339_v3 = vadd.f32 %v2338_v47, %v2286_v57  ;;  %v2290_v5 = vadd.f32 %v2289_v61, %v2237_v48 }
 0x1fa   : > { %v2291_v10 = vpop.f32.mrf.mxu0 }
 0x1fb   : > { %v2344_v11 = vpop.f32.mrf.mxu1  ;;  %2373 = vst [vmem:[#allocation2 + $0x8] sm:$0xff] %v2357_v0  ;;  %v2358_v13 = vadd.f32 %v2339_v3, %v286_v58  ;;  %v2343_v14 = vadd.f32 %v2342_v62, %v2290_v5  ;;  %v2292_v15 = vadd.f32 %v2291_v10, %v2239_v63 }
 0x1fc   : > { %v2293_v17 = vpop.f32.mrf.mxu0 }
 0x1fd   : > { %v2346_v18 = vpop.f32.mrf.mxu1  ;;  %2374 = vst [vmem:[#allocation2 + $0x48] sm:$0xff] %v2358_v13  ;;  %v2361_v20 = vadd.f32 %v2343_v14, %v289_v9  ;;  %v2345_v25 = vadd.f32 %v2344_v11, %v2292_v15  ;;  %v2294_v26 = vadd.f32 %v2293_v17, %v2241_v12 }
 0x1fe   : > { %v2295_v8 = vpop.f32.mrf.mxu0 }
 0x1ff   : > { %2377 = vst [vmem:[#allocation2 + $0x10] sm:$0xff] %v2361_v20  ;;  %v2362_v50 = vadd.f32 %v2345_v25, %v290_v16  ;;  %v2347_v49 = vadd.f32 %v2346_v18, %v2294_v26  ;;  %v2296_v51 = vadd.f32 %v2295_v8, %v2243_v19  ;;  %v2348_v21 = vpop.f32.mrf.mxu1 }
 0x201   : > { %2378 = vst [vmem:[#allocation2 + $0x38] sm:$0xff] %v2362_v50  ;;  %v2365_v59 = vadd.f32 %v2347_v49, %v293_v6  ;;  %v2349_v22 = vadd.f32 %v2348_v21, %v2296_v51  ;;  %2386 = sbr.rel (%p3115_p10) target bundleno = 975 (0x3cf), region = 67 }
 0x203   : > { %2381 = vst [vmem:[#allocation2 + $0x78] sm:$0xff] %v2365_v59  ;;  %v2366_v60 = vadd.f32 %v2349_v22, %v294_v53 }
 0x205   : > { %2382 = vst [vmem:[#allocation2 + $0x28] sm:$0xff] %v2366_v60 }
 0x206   : > { %v2388_v52 = vld [vmem:[#allocation2] sm:$0xff]  ;;  %v2392_v1 = vld [vmem:[#allocation2 + $0x68] sm:$0xff]  ;;  %v2387_v23 = vld [vmem:[#allocation2 + $0x30] sm:$0xff]  ;;  %v3570_v24 = vmov 0.0  }
 0x207   : > { %v2396_v54 = vld [vmem:[#allocation2 + $0x20] sm:$0xff]  ;;  %v2412_v7 = vadd.f32 %v2392_v1, %v2388_v52  ;;  %2689 = vmatprep.mubr.f32.mxu0 %v3570_v24  ;;  %2760 = vmatprep.mubr.f32.mxu1 %v3570_v24  ;;  %v2400_v27 = vld [vmem:[#allocation2 + $0x70] sm:$0xff]  ;;  %v2390_v30 = vld [vmem:[#allocation2 + $0x18] sm:$0xff] }
 0x208   : > { %v2391_v2 = vld [vmem:[#allocation2 + $0x50] sm:$0xff]  ;;  %v2395_v4 = vld [vmem:[#allocation2 + $0x40] sm:$0xff]  ;;  %v2394_v32 = vld [vmem:[#allocation2 + $0x48] sm:$0xff] }
 0x209   : > { %v2413_v28 = vadd.f32 %v2412_v7, %v2396_v54  ;;  %v2403_v29 = vadd.f32 %v2391_v2, %v2387_v23  ;;  %v2399_v31 = vld [vmem:[#allocation2 + $0x60] sm:$0xff]  ;;  %v2398_v33 = vld [vmem:[#allocation2 + $0x38] sm:$0xff]  ;;  %v2430_v36 = vadd.f32 %v2394_v32, %v2390_v30  ;;  %v4017_v39 = vld [vmem:[#allocation2 + $0x8] sm:$0xff] }
 0x20a   : > { %v4015_v37 = vld [vmem:[#allocation2 + $0x58] sm:$0xff]  ;;  %v4019_v40 = vld [vmem:[#allocation2 + $0x10] sm:$0xff] }
 0x20b   : > { %v2414_v34 = vadd.f32 %v2413_v28, %v2400_v27  ;;  %v2404_v35 = vadd.f32 %v2403_v29, %v2395_v4  ;;  %v2431_v43 = vadd.f32 %v2430_v36, %v2398_v33  ;;  %v2421_v44 = vadd.f32 %v4017_v39, %v4015_v37  ;;  %v4023_v45 = vld [vmem:[#allocation2 + $0x78] sm:$0xff] }
 0x20c   : > { %v2402_v38 = vld [vmem:[#allocation2 + $0x28] sm:$0xff] }
 0x20d   : > { %v2415_v41 = vrot.slane %v2414_v34, 4  ;;  %v2405_v42 = vadd.f32 %v2404_v35, %v2399_v31  ;;  %v2432_v48 = vadd.f32 %v2431_v43, %v2402_v38  ;;  %v2422_v55 = vadd.f32 %v2421_v44, %v4019_v40 }
 0x20f   : > { %v2416_v46 = vadd.f32 %v2415_v41, %v2414_v34  ;;  %v2406_v47 = vrot.slane %v2405_v42, 4  ;;  %v2433_v58 = vrot.slane %v2432_v48, 4  ;;  %v2423_v61 = vadd.f32 %v2422_v55, %v4023_v45 }
 0x211   : > { %v2417_v56 = vrot.slane %v2416_v46, 2  ;;  %v2407_v57 = vadd.f32 %v2406_v47, %v2405_v42  ;;  %v2434_v0 = vadd.f32 %v2433_v58, %v2432_v48  ;;  %v2424_v3 = vrot.slane %v2423_v61, 4 }
 0x213   : > { %v2418_v62 = vadd.f32 %v2417_v56, %v2416_v46  ;;  %v2408_v63 = vrot.slane %v2407_v57, 2  ;;  %v2435_v10 = vrot.slane %v2434_v0, 2  ;;  %v2425_v11 = vadd.f32 %v2424_v3, %v2423_v61 }
 0x215   : > { %v2419_v5 = vrot.slane %v2418_v62, 1  ;;  %v2409_v9 = vadd.f32 %v2408_v63, %v2407_v57  ;;  %v2436_v14 = vadd.f32 %v2435_v10, %v2434_v0  ;;  %v2426_v15 = vrot.slane %v2425_v11, 2 }
 0x217   : > { %v2420_v12 = vadd.f32 %v2419_v5, %v2418_v62  ;;  %v2410_v13 = vrot.slane %v2409_v9, 1  ;;  %v2437_v18 = vrot.slane %v2436_v14, 1  ;;  %v2427_v19 = vadd.f32 %v2426_v15, %v2425_v11 }
 0x219   : > { %v2441_v16 = vmul.f32 0.03125, %v2420_v12  ;;  %v2411_v17 = vadd.f32 %v2410_v13, %v2409_v9  ;;  %v2438_v50 = vadd.f32 %v2437_v18, %v2436_v14  ;;  %v2428_v49 = vrot.slane %v2427_v19, 1 }
 0x21b   : > { %v4027_v20 = vsub.f32 %v2388_v52, %v2441_v16  ;;  %v4029_v25 = vsub.f32 %v2392_v1, %v2441_v16  ;;  %v4031_v26 = vsub.f32 %v2396_v54, %v2441_v16  ;;  %v4033_v6 = vsub.f32 %v2400_v27, %v2441_v16 }
 0x21c   : > { %v2440_v8 = vmul.f32 0.03125, %v2411_v17  ;;  %v2443_v7 = vmul.f32 0.03125, %v2438_v50  ;;  %v2429_v24 = vadd.f32 %v2428_v49, %v2427_v19 }
 0x21d   : > { %v2461_v51 = vmul.f32 %v4027_v20, %v4027_v20  ;;  %v2465_v53 = vmul.f32 %v4029_v25, %v4029_v25  ;;  %v2469_v21 = vmul.f32 %v4031_v26, %v4031_v26  ;;  %v2473_v1 = vmul.f32 %v4033_v6, %v4033_v6 }
 0x21e   : > { %v4041_v59 = vsub.f32 %v2387_v23, %v2440_v8  ;;  %v4043_v22 = vsub.f32 %v2391_v2, %v2440_v8  ;;  %v4045_v60 = vsub.f32 %v2395_v4, %v2440_v8  ;;  %v4047_v52 = vsub.f32 %v2399_v31, %v2440_v8 }
 0x21f   : > { %v2485_v54 = vadd.f32 %v2465_v53, %v2461_v51  ;;  %v4057_v4 = vsub.f32 %v2390_v30, %v2443_v7  ;;  %v4059_v29 = vsub.f32 %v2394_v32, %v2443_v7  ;;  %v4061_v31 = vsub.f32 %v2398_v33, %v2443_v7 }
 0x220   : > { %v2460_v27 = vmul.f32 %v4041_v59, %v4041_v59  ;;  %v2464_v28 = vmul.f32 %v4043_v22, %v4043_v22  ;;  %v2468_v23 = vmul.f32 %v4045_v60, %v4045_v60  ;;  %v2472_v34 = vmul.f32 %v4047_v52, %v4047_v52 }
 0x221   : > { %v2486_v2 = vadd.f32 %v2485_v54, %v2469_v21  ;;  %v4065_v36 = vsub.f32 %v2402_v38, %v2443_v7  ;;  %v2442_v41 = vmul.f32 0.03125, %v2429_v24  ;;  %v2463_v43 = vmul.f32 %v4057_v4, %v4057_v4 }
 0x222   : > { %v2476_v35 = vadd.f32 %v2464_v28, %v2460_v27  ;;  %v2467_v44 = vmul.f32 %v4059_v29, %v4059_v29  ;;  %v2471_v30 = vmul.f32 %v4061_v31, %v4061_v31 }
 0x223   : > { %v2487_v42 = vadd.f32 %v2486_v2, %v2473_v1  ;;  %v2475_v33 = vmul.f32 %v4065_v36, %v4065_v36  ;;  %v4076_v46 = vsub.f32 %v4015_v37, %v2442_v41  ;;  %v4079_v38 = vsub.f32 %v4017_v39, %v2442_v41 }
 0x224   : > { %v2477_v32 = vadd.f32 %v2476_v35, %v2468_v23  ;;  %v2503_v48 = vadd.f32 %v2467_v44, %v2463_v43  ;;  %v4082_v55 = vsub.f32 %v4019_v40, %v2442_v41  ;;  %v4085_v56 = vsub.f32 %v4023_v45, %v2442_v41 }
 0x225   : > { %v2488_v47 = vrot.slane %v2487_v42, 4  ;;  %v2462_v58 = vmul.f32 %v4076_v46, %v4076_v46  ;;  %v2466_v61 = vmul.f32 %v4079_v38, %v4079_v38 }
 0x226   : > { %v2478_v57 = vadd.f32 %v2477_v32, %v2472_v34  ;;  %v2504_v62 = vadd.f32 %v2503_v48, %v2471_v30  ;;  %v2470_v39 = vmul.f32 %v4082_v55, %v4082_v55  ;;  %v2474_v40 = vmul.f32 %v4085_v56, %v4085_v56  ;;  %v2597_v48 = vld [vmem:[%s4192_s2 + $0x48] sm:$0xff] }
 0x227   : > { %v2489_v37 = vadd.f32 %v2488_v47, %v2487_v42  ;;  %v2494_v0 = vadd.f32 %v2466_v61, %v2462_v58  ;;  %v2601_v47 = vld [vmem:[%s4192_s2 + $0x68] sm:$0xff] }
 0x228   : > { %v2479_v63 = vrot.slane %v2478_v57, 4  ;;  %v2505_v45 = vadd.f32 %v2504_v62, %v2475_v33  ;;  %v2593_v62 = vld [vmem:[%s4192_s2 + $0x28] sm:$0xff] }
 0x229   : > { %v2490_v3 = vrot.slane %v2489_v37, 2  ;;  %v2495_v9 = vadd.f32 %v2494_v0, %v2470_v39 }
 0x22a   : > { %v2480_v5 = vadd.f32 %v2479_v63, %v2478_v57  ;;  %v2506_v11 = vrot.slane %v2505_v45, 4 }
 0x22b   : > { %v2491_v10 = vadd.f32 %v2490_v3, %v2489_v37  ;;  %v2496_v13 = vadd.f32 %v2495_v9, %v2474_v40 }
 0x22c   : > { %v2481_v12 = vrot.slane %v2480_v5, 2  ;;  %v2507_v15 = vadd.f32 %v2506_v11, %v2505_v45 }
 0x22d   : > { %v2492_v14 = vrot.slane %v2491_v10, 1  ;;  %v2497_v17 = vrot.slane %v2496_v13, 4 }
 0x22e   : > { %v2482_v16 = vadd.f32 %v2481_v12, %v2480_v5  ;;  %v2508_v19 = vrot.slane %v2507_v15, 2  ;;  %v2596_v5 = vld [vmem:[%s4192_s2 + $0x40] sm:$0xff] }
 0x22f   : > { %v2493_v18 = vadd.f32 %v2492_v14, %v2491_v10  ;;  %v2498_v50 = vadd.f32 %v2497_v17, %v2496_v13 }
 0x230   : > { %v2483_v8 = vrot.slane %v2482_v16, 1  ;;  %v2509_v51 = vadd.f32 %v2508_v19, %v2507_v15  ;;  %v2599_v19 = vld [vmem:[%s4192_s2 + $0x58] sm:$0xff] }
 0x231   : > { %v2513_v49 = vmul.f32 0.03125, %v2493_v18  ;;  %v2499_v21 = vrot.slane %v2498_v50, 2 }
 0x232   : > { %v2484_v53 = vadd.f32 %v2483_v8, %v2482_v16  ;;  %v2510_v54 = vrot.slane %v2509_v51, 1 }
 0x233   : > { %v2517_v1 = vadd.f32 1e-05, %v2513_v49  ;;  %v2500_v24 = vadd.f32 %v2499_v21, %v2498_v50  ;;  %v2592_v50 = vld [vmem:[%s4192_s2 + $0x20] sm:$0xff]  ;;  %v2602_v21 = vld [vmem:[%s4192_s2 + $0x70] sm:$0xff] }
 0x234   : > { %v2512_v7 = vmul.f32 0.03125, %v2484_v53  ;;  %v2511_v27 = vadd.f32 %v2510_v54, %v2509_v51  ;;  %v2589_v54 = vld [vmem:[%s4192_s2 + $0x8] sm:$0xff] }
 0x235   : > { %3533 = vrsqrt.f32 %v2517_v1  ;;  %v2501_v23 = vrot.slane %v2500_v24, 1 }
 0x236   : > { %v2516_v28 = vadd.f32 1e-05, %v2512_v7  ;;  %v2515_v2 = vmul.f32 0.03125, %v2511_v27  ;;  %v2598_v27 = vld [vmem:[%s4192_s2 + $0x50] sm:$0xff] }
 0x237   : > { %v2502_v34 = vadd.f32 %v2501_v23, %v2500_v24 }
 0x238   : > { %3535 = vrsqrt.f32 %v2516_v28  ;;  %v2519_v35 = vadd.f32 1e-05, %v2515_v2 }
 0x239   : > { %v2514_v41 = vmul.f32 0.03125, %v2502_v34 }
 0x23a   : > { %3537 = vrsqrt.f32 %v2519_v35 }
 0x23b   : > { %v2518_v42 = vadd.f32 1e-05, %v2514_v41 }
 0x23d   : > { %3539 = vrsqrt.f32 %v2518_v42 }
 0x242   : > { %v3534_v43 = vpop.eup %3533 }
 0x243   : > { %v2537_v44 = vmul.f32 %v3534_v43, %v4033_v6  ;;  %v2533_v30 = vmul.f32 %v3534_v43, %v4031_v26  ;;  %v2529_v32 = vmul.f32 %v3534_v43, %v4029_v25  ;;  %v4099_v33 = vmul.f32 %v3534_v43, %v4027_v20 }
 0x245   : > { %v4107_v57 = vpop.eup %3535  ;;  %vm2553_vm0 = vcmp.gt.f32.partialorder %v2537_v44, 0.0  ;;  %v2569_v58 = vmul.f32 0.2, %v2537_v44  ;;  %vm2549_vm1 = vcmp.gt.f32.partialorder %v2533_v30, 0.0  ;;  %v2565_v6 = vmul.f32 0.2, %v2533_v30 }
 0x246   : > { %v2536_v25 = vmul.f32 %v4107_v57, %v4047_v52  ;;  %v2532_v20 = vmul.f32 %v4107_v57, %v4045_v60  ;;  %vm2545_vm2 = vcmp.gt.f32.partialorder %v2529_v32, 0.0  ;;  %v2561_v26 = vmul.f32 0.2, %v2529_v32  ;;  %v2600_v60 = vld [vmem:[%s4192_s2 + $0x60] sm:$0xff] }
 0x247   : > { %v2585_v61 = vsel %vm2553_vm0, %v2537_v44, %v2569_v58  ;;  %v2581_v37 = vsel %vm2549_vm1, %v2533_v30, %v2565_v6  ;;  %v2528_v39 = vmul.f32 %v4107_v57, %v4043_v22  ;;  %vm2541_vm3 = vcmp.gt.f32.partialorder %v4099_v33, 0.0  ;;  %v3538_v63 = vpop.eup %3537  ;;  %v2591_v6 = vld [vmem:[%s4192_s2 + $0x18] sm:$0xff] }
 0x248   : > { %v2617_v40 = vmul.f32 %v2601_v47, %v2585_v61  ;;  %vm2552_vm4 = vcmp.gt.f32.partialorder %v2536_v25, 0.0  ;;  %v2568_v52 = vmul.f32 0.2, %v2536_v25  ;;  %v2613_v0 = vmul.f32 %v2597_v48, %v2581_v37 }
 0x249   : > { %v2539_v3 = vmul.f32 %v3538_v63, %v4065_v36  ;;  %vm2548_vm5 = vcmp.gt.f32.partialorder %v2532_v20, 0.0  ;;  %v2564_v45 = vmul.f32 0.2, %v2532_v20  ;;  %v2577_v22 = vsel %vm2545_vm2, %v2529_v32, %v2561_v26  ;;  %v2603_v36 = vld [vmem:[%s4192_s2 + $0x78] sm:$0xff] }
 0x24a   : > { %2649 = vmatprep.subr.mxu0 %v2617_v40  ;;  %v2584_v9 = vsel %vm2552_vm4, %v2536_v25, %v2568_v52  ;;  %v2609_v10 = vmul.f32 %v2593_v62, %v2577_v22  ;;  %v2535_v11 = vmul.f32 %v3538_v63, %v4061_v31  ;;  %vm2544_vm6 = vcmp.gt.f32.partialorder %v2528_v39, 0.0  ;;  %v3540_v12 = vpop.eup %3539 }
 0x24b   : > { %v2616_v13 = vmul.f32 %v2600_v60, %v2584_v9  ;;  %vm2555_vm7 = vcmp.gt.f32.partialorder %v2539_v3, 0.0  ;;  %v2571_v14 = vmul.f32 0.2, %v2539_v3  ;;  %v2580_v15 = vsel %vm2548_vm5, %v2532_v20, %v2564_v45 }
 0x24c   : > { %v2612_v16 = vmul.f32 %v2596_v5, %v2580_v15  ;;  %v2538_v17 = vmul.f32 %v3540_v12, %v4085_v56  ;;  %vm2551_vm8 = vcmp.gt.f32.partialorder %v2535_v11, 0.0  ;;  %v2567_v18 = vmul.f32 0.2, %v2535_v11 }
 0x24d   : > { %2650 = vmatpush1.msra.mxu0 %v2616_v13  ;;  %v2587_v31 = vsel %vm2555_vm7, %v2539_v3, %v2571_v14  ;;  %v2560_v8 = vmul.f32 0.2, %v2528_v39  ;;  %v2534_v49 = vmul.f32 %v3540_v12, %v4082_v55  ;;  %v2557_v51 = vmul.f32 0.2, %v4099_v33 }
 0x24e   : > { %2651 = vmatprep.subr.mxu0 %v2613_v0  ;;  %v2619_v53 = vmul.f32 %v2603_v36, %v2587_v31  ;;  %vm2554_vm9 = vcmp.gt.f32.partialorder %v2538_v17, 0.0  ;;  %v2570_v56 = vmul.f32 0.2, %v2538_v17  ;;  %v2583_v1 = vsel %vm2551_vm8, %v2535_v11, %v2567_v18 }
 0x24f   : > { %2652 = vmatpush1.msra.mxu0 %v2612_v16  ;;  %v2615_v7 = vmul.f32 %v2599_v19, %v2583_v1  ;;  %v2576_v24 = vsel %vm2544_vm6, %v2528_v39, %v2560_v8  ;;  %vm2550_vm10 = vcmp.gt.f32.partialorder %v2534_v49, 0.0  ;;  %v2566_v55 = vmul.f32 0.2, %v2534_v49  ;;  %v2620_v39 = vld [vmem:[%s4193_s3] sm:$0x3] }
 0x250   : > { %2720 = vmatprep.subr.mxu1 %v2619_v53  ;;  %v2586_v28 = vsel %vm2554_vm9, %v2538_v17, %v2570_v56  ;;  %2653 = vmatprep.subr.mxu0 %v2609_v10  ;;  %v2608_v23 = vmul.f32 %v2592_v50, %v2576_v24  ;;  %v2573_v2 = vsel %vm2541_vm3, %v4099_v33, %v2557_v51  ;;  %v2595_v33 = vld [vmem:[%s4192_s2 + $0x38] sm:$0xff]  ;;  %vm2621_vm0 = vcmask 261120  }
 0x251   : > { %v2618_v34 = vmul.f32 %v2602_v21, %v2586_v28  ;;  %v2582_v35 = vsel %vm2550_vm10, %v2534_v49, %v2566_v55  ;;  %v2605_v41 = vmul.f32 %v2589_v54, %v2573_v2  ;;  %v2531_v42 = vmul.f32 %v3538_v63, %v4059_v29  ;;  %v2588_v29 = vld [vmem:[%s4192_s2] sm:$0xff] }
 0x252   : > { %2654 = vmatpush1.msra.mxu0 %v2608_v23  ;;  %v2614_v43 = vmul.f32 %v2598_v27, %v2582_v35  ;;  %v2524_v44 = vmul.f32 %v4107_v57, %v4041_v59  ;;  %v2530_v30 = vmul.f32 %v3540_v12, %v4079_v38  ;;  %v2527_v32 = vmul.f32 %v3538_v63, %v4057_v4  ;;  %v2594_v59 = vld [vmem:[%s4192_s2 + $0x30] sm:$0xff] }
 0x253   : > { %2721 = vmatpush1.msra.mxu1 %v2618_v34  ;;  %2655 = vmatprep.subr.mxu0 %v2605_v41  ;;  %vm2547_vm11 = vcmp.gt.f32.partialorder %v2531_v42, 0.0  ;;  %v2563_v47 = vmul.f32 0.2, %v2531_v42  ;;  %v2526_v38 = vmul.f32 %v3540_v12, %v4076_v46  ;;  %v2590_v46 = vld [vmem:[%s4192_s2 + $0x10] sm:$0xff]  ;;  %vm2767_vm1 = vcmask 1041408  }
 0x254   : > { %2722 = vmatprep.subr.mxu1 %v2615_v7  ;;  %vm2540_vm12 = vcmp.gt.f32.partialorder %v2524_v44, 0.0  ;;  %v2556_v4 = vmul.f32 0.2, %v2524_v44  ;;  %vm2546_vm13 = vcmp.gt.f32.partialorder %v2530_v30, 0.0  ;;  %v2562_v48 = vmul.f32 0.2, %v2530_v30 }
 0x255   : > { %2723 = vmatpush1.msra.mxu1 %v2614_v43  ;;  %v2579_v57 = vsel %vm2547_vm11, %v2531_v42, %v2563_v47  ;;  %vm2543_vm14 = vcmp.gt.f32.partialorder %v2527_v32, 0.0  ;;  %v2559_v58 = vmul.f32 0.2, %v2527_v32  ;;  %vm2542_vm15 = vcmp.gt.f32.partialorder %v2526_v38, 0.0 }
 0x256   : > { %v2611_v25 = vmul.f32 %v2595_v33, %v2579_v57  ;;  %v2572_v20 = vsel %vm2540_vm12, %v2524_v44, %v2556_v4  ;;  %v2578_v26 = vsel %vm2546_vm13, %v2530_v30, %v2562_v48  ;;  %v2558_v61 = vmul.f32 0.2, %v2526_v38 }
 0x257   : > { %v2604_v37 = vmul.f32 %v2588_v29, %v2572_v20  ;;  %v2610_v62 = vmul.f32 %v2594_v59, %v2578_v26  ;;  %v2575_v63 = vsel %vm2543_vm14, %v2527_v32, %v2559_v58  ;;  %vm2783_vm2 = vcmask 1024  }
 0x258   : > { %2724 = vmatprep.subr.mxu1 %v2611_v25  ;;  %v2607_v40 = vmul.f32 %v2591_v6, %v2575_v63  ;;  %v2574_v52 = vsel %vm2542_vm15, %v2526_v38, %v2558_v61 }
 0x259   : > { %2656 = vmatpush1.msra.mxu0 %v2604_v37  ;;  %2725 = vmatpush1.msra.mxu1 %v2610_v62  ;;  %v2606_v60 = vmul.f32 %v2590_v46, %v2574_v52 }
 0x25a   : > { %3116 = vmatmul.mubr.msk.f32.vlgmr.msra.gmra.mxu0 %vm2621_vm0, %v2620_v39  ;;  %2726 = vmatprep.subr.mxu1 %v2607_v40 }
 0x25b   : > { %2727 = vmatpush1.msra.mxu1 %v2606_v60 }
 0x25c   : > { %3117 = vmatmul.mubr.msk.f32.vlgmr.msra.gmra.mxu1 %vm2621_vm0, %v2620_v39 }
 0x31a   : > { %v2691_v0 = vpop.f32.mrf.mxu0 }
 0x31b   : > { %v2768_v5 = vsel %vm2767_vm1, %v2691_v0, 0.0 }
 0x31c   : > { %v2693_v3 = vpop.f32.mrf.mxu0  ;;  %v2762_v45 = vpop.f32.mrf.mxu1 }
 0x31d   : > { %v2769_v22 = vsel %vm2767_vm1, %v2693_v3, 0.0  ;;  %v2771_v9 = vsel %vm2767_vm1, %v2762_v45, 0.0 }
 0x31e   : > { %v2770_v10 = vadd.f32 %v2769_v22, %v2768_v5  ;;  %v2764_v11 = vpop.f32.mrf.mxu1 }
 0x31f   : > { %v2773_v13 = vsel %vm2767_vm1, %v2764_v11, 0.0 }
 0x320   : > { %v2772_v12 = vadd.f32 %v2771_v9, %v2770_v10 }
 0x322   : > { %v2774_v14 = vadd.f32 %v2773_v13, %v2772_v12 }
 0x324   : > { %2775 = vadd.xlane.f32.xlu0 %v2774_v14 }
 0x3ad   : > { %v2776_v36 = vpop.xlane.xlu0 %2775 }
 0x3ae   : > { %v3118_v15 = vmul.f32 -1.442695, %v2776_v36 }
 0x3b0   : > { %3541 = vpow2.f32 %v3118_v15 }
 0x3bd   : > { %v3542_v16 = vpop.eup %3541 }
 0x3be   : > { %v2780_v17 = vadd.f32 1.0, %v3542_v16 }
 0x3c0   : > { %3543 = vrcp.f32 %v2780_v17 }
 0x3cd   : > { %v3544_v18 = vpop.eup %3543 }
 0x3ce   : > { %2784 = vst.msk [vmem:[%s4194_s4] sm:$0x3] %vm2783_vm2, %v3544_v18 }
 0x3cf PF: > { %p11_p11 = scmp.ge.s32.totalorder %s3615_s19, 6   ;;  %s4195_s15 = smov %s3563_s16 }
 0x3d0   : > { %s4196_s16 = smov %s3624_s22  ;;  %s4197_s17 = smov %s3615_s19 }
 0x3d1   :  { %13 = sbr.rel (!%p11_p11) target bundleno = 2 (0x2), region = 101 }

</bundles_post_ra>
